<compile_context>
chip_gen: v6e
topology: v6e:2x2x1
jax: 0.10.0
libtpu: 0.0.40
codegen_flags: <defaults>
</compile_context>

<pallas_src>
import jax
import jax.numpy as jnp
from jax.experimental import pallas as pl
from jax.experimental.pallas import tpu as pltpu

# Geometry constants (32x32x3 LeNet input).
QBLK = 200          # rows per pool-quadrant block of conv1's output (196 valid)
N1 = 4 * QBLK       # conv1 output rows per image (4 quadrants)
K1 = 256            # conv1 im2col contraction (25 taps * 8 ch -> padded 256)
P1 = 14             # pool1 pitch: row = ph*14 + pw (14x14 image)
N2 = 136            # conv2 output rows per image (raster oh*14+ow, max 9*14+9)
CH = 128            # lane-padded channel width for every conv/fc output


def _lenet_kernel(x1_ref, w1_ref, b1_ref, w2_ref, b2_ref, w3_ref, b3_ref,
                  w4_ref, b4_ref, w5_ref, b5_ref,
                  out_ref,
                  a1_ref, p1_ref, a2_ref, p2_ref):
    f32 = jnp.float32
    bf16 = jnp.bfloat16

    # ---- conv1 + ReLU: ONE im2col matmul (K=256), single lane-dense store ----
    a1_ref[...] = jnp.maximum(
        jnp.dot(x1_ref[0], w1_ref[...], preferred_element_type=f32)
        + b1_ref[...], 0.0)

    # ---- maxpool1: elementwise max of the 4 aligned quadrant blocks --------
    # Row ph*14+pw of p1 = max over (i,j) of conv1 output at (2ph+i, 2pw+j).
    p1_ref[...] = jnp.maximum(
        jnp.maximum(a1_ref[pl.ds(0 * QBLK, QBLK), :],
                    a1_ref[pl.ds(1 * QBLK, QBLK), :]),
        jnp.maximum(a1_ref[pl.ds(2 * QBLK, QBLK), :],
                    a1_ref[pl.ds(3 * QBLK, QBLK), :]))

    # ---- conv2 + ReLU: 25 taps chained into an f32 register accumulator ----
    # Output row r = oh*14+ow reads input row r + di*14 + dj.
    acc = (jnp.dot(p1_ref[pl.ds(0, N2), :].astype(bf16), w2_ref[0],
                   preferred_element_type=f32) + b2_ref[...])
    for t in range(1, 25):
        di, dj = t // 5, t % 5
        lhs = p1_ref[pl.ds(di * P1 + dj, N2), :].astype(bf16)
        acc = acc + jnp.dot(lhs, w2_ref[t], preferred_element_type=f32)
    a2_ref[...] = jnp.maximum(acc, 0.0)

    # ---- maxpool2: 4 shifted-slab maxes, result kept at dilated rows --------
    # p2[(2qh)*14 + 2qw] = max over the 2x2 window of conv2 output (qh,qw).
    p2_ref[pl.ds(0, 121), :] = jnp.maximum(
        jnp.maximum(a2_ref[pl.ds(0, 121), :], a2_ref[pl.ds(1, 121), :]),
        jnp.maximum(a2_ref[pl.ds(P1, 121), :], a2_ref[pl.ds(P1 + 1, 121), :]))

    # ---- conv3 (1x1 spatial output) + ReLU: 25 single-row dots --------------
    acc3 = b3_ref[...]                                   # (1, 128) f32
    for t in range(25):
        di, dj = t // 5, t % 5
        row = p2_ref[pl.ds(2 * (di * P1 + dj), 1), :].astype(bf16)
        acc3 = acc3 + jnp.dot(row, w3_ref[t], preferred_element_type=f32)
    feat = jnp.maximum(acc3, 0.0)                        # 120 features (padded)

    # ---- fc4 + ReLU, fc5 -----------------------------------------------------
    h4 = jnp.maximum(
        jnp.dot(feat.astype(bf16), w4_ref[...], preferred_element_type=f32)
        + b4_ref[...], 0.0)
    logits = (jnp.dot(h4.astype(bf16), w5_ref[...], preferred_element_type=f32)
              + b5_ref[...])

    # Lane-dense, unmasked (8,128) store; row 0 holds the logits.
    out_ref[0] = jnp.broadcast_to(logits, (8, CH))


def prepare_params(params):
    """One-time host-side prep: tap-major channels-last weights, pad to 128, bf16."""
    f32 = jnp.float32

    def tap_major(w, cin_pad):                   # (O,C,5,5) -> (25, cin_pad, 128)
        o, c, kh, kw = w.shape
        wt = jnp.transpose(w, (2, 3, 1, 0)).reshape(kh * kw, c, o)
        return jnp.pad(wt, ((0, 0), (0, cin_pad - c), (0, CH - o))).astype(jnp.bfloat16)

    def fc_w(w):                                 # (out,in) -> (128, 128), y = x @ W.T
        out_f, in_f = w.shape
        return jnp.pad(w.T, ((0, CH - in_f), (0, CH - out_f))).astype(jnp.bfloat16)

    def bias(b):
        return jnp.pad(b, (0, CH - b.shape[0])).reshape(1, CH).astype(f32)

    # conv1: fold the 25 taps into the contraction axis -> (256, 128).
    w1 = jnp.transpose(params["conv1_w"], (2, 3, 1, 0)).reshape(25, 3, 6)
    w1 = jnp.pad(w1, ((0, 0), (0, 8 - 3), (0, CH - 6))).reshape(25 * 8, CH)
    w1 = jnp.pad(w1, ((0, K1 - 25 * 8), (0, 0))).astype(jnp.bfloat16)

    return {
        "w1": w1,                               "b1": bias(params["conv1_b"]),
        "w2": tap_major(params["conv2_w"], CH), "b2": bias(params["conv2_b"]),
        "w3": tap_major(params["conv3_w"], CH), "b3": bias(params["conv3_b"]),
        "w4": fc_w(params["fc4_w"]),            "b4": bias(params["fc4_b"]),
        "w5": fc_w(params["fc5_w"]),            "b5": bias(params["fc5_b"]),
    }


def lenet_forward(prep, x):
    """x: (B, 3, 32, 32) NCHW float32 -> logits (B, 10)."""
    B, C, H, W = x.shape
    assert (C, H, W) == (3, 32, 32)

    # conv1 im2col in the wrapper (review item 1): patch at output position
    # (h,w) holds x[:, c, h+di, w+dj] at column (di*5+dj)*8 + c.  Rows are
    # ordered by pool quadrant: row = (2*i+j)*200 + ph*14 + pw with
    # (h,w) = (2ph+i, 2pw+j), so maxpool1 becomes an aligned elementwise max.
    xhwc = jnp.transpose(x, (0, 2, 3, 1)).astype(jnp.float32)          # (B,32,32,3)
    taps = [xhwc[:, di:di + 28, dj:dj + 28, :]
            for di in range(5) for dj in range(5)]
    pat = jnp.stack(taps, axis=3)                                       # (B,28,28,25,3)
    pat = jnp.pad(pat, ((0, 0), (0, 0), (0, 0), (0, 0), (0, 8 - 3)))    # c: 3->8
    pat = pat.reshape(B, 28, 28, 200)
    pat = jnp.pad(pat, ((0, 0), (0, 0), (0, 0), (0, K1 - 200)))         # K: 200->256
    pat = pat.reshape(B, 14, 2, 14, 2, K1).transpose(0, 2, 4, 1, 3, 5)  # (B,i,j,ph,pw,K)
    pat = pat.reshape(B, 4, 196, K1)
    pat = jnp.pad(pat, ((0, 0), (0, 0), (0, QBLK - 196), (0, 0)))       # 196->200 rows
    x1 = pat.reshape(B, N1, K1).astype(jnp.bfloat16)

    const2 = lambda b: (0, 0)
    const3 = lambda b: (0, 0, 0)

    out = pl.pallas_call(
        _lenet_kernel,
        out_shape=jax.ShapeDtypeStruct((B, 8, CH), jnp.float32),
        grid=(B,),
        in_specs=[
            pl.BlockSpec((1, N1, K1), lambda b: (b, 0, 0)),   # im2col'd image
            pl.BlockSpec((K1, CH), const2), pl.BlockSpec((1, CH), const2),   # conv1
            pl.BlockSpec((25, CH, CH), const3), pl.BlockSpec((1, CH), const2),  # conv2
            pl.BlockSpec((25, CH, CH), const3), pl.BlockSpec((1, CH), const2),  # conv3
            pl.BlockSpec((CH, CH), const2), pl.BlockSpec((1, CH), const2),      # fc4
            pl.BlockSpec((CH, CH), const2), pl.BlockSpec((1, CH), const2),      # fc5
        ],
        out_specs=pl.BlockSpec((1, 8, CH), lambda b: (b, 0, 0)),
        scratch_shapes=[
            pltpu.VMEM((N1, CH), jnp.float32),    # a1: conv1 out (quadrant blocks)
            pltpu.VMEM((QBLK, CH), jnp.float32),  # p1: pool1 out (14x14, pitch 14)
            pltpu.VMEM((N2, CH), jnp.float32),    # a2: conv2 out (10x10, pitch 14)
            pltpu.VMEM((128, CH), jnp.float32),   # p2: pool2 out at dilated rows
        ],
        compiler_params=pltpu.CompilerParams(
            dimension_semantics=("parallel",),            # 2x on v7x megacore
            vmem_limit_bytes=32 * 1024 * 1024),
    )(x1, prep["w1"], prep["b1"], prep["w2"], prep["b2"], prep["w3"], prep["b3"],
      prep["w4"], prep["b4"], prep["w5"], prep["b5"])

    return out[:, 0, :10]


def init_params(key):
    """Deterministic synthetic parameters with PyTorch shapes (OIHW / (out,in))."""
    ks = jax.random.split(key, 10)

    def u(k, shape, fan_in):
        bound = 1.0 / jnp.sqrt(float(fan_in))
        return jax.random.uniform(k, shape, jnp.float32, -bound, bound)

    return {
        "conv1_w": u(ks[0], (6, 3, 5, 5), 3 * 5 * 5),
        "conv1_b": u(ks[1], (6,), 3 * 5 * 5),
        "conv2_w": u(ks[2], (16, 6, 5, 5), 6 * 5 * 5),
        "conv2_b": u(ks[3], (16,), 6 * 5 * 5),
        "conv3_w": u(ks[4], (120, 16, 5, 5), 16 * 5 * 5),
        "conv3_b": u(ks[5], (120,), 16 * 5 * 5),
        "fc4_w": u(ks[6], (84, 120), 120),
        "fc4_b": u(ks[7], (84,), 120),
        "fc5_w": u(ks[8], (10, 84), 84),
        "fc5_b": u(ks[9], (10,), 84),
    }


if __name__ == "__main__":
    key = jax.random.PRNGKey(0)
    pkey, xkey = jax.random.split(key)
    params = init_params(pkey)
    prep = prepare_params(params)     # one-time host-side layout / padding prep

    # LeNet's conv stack needs a 32x32 input so conv3 reduces to 1x1 (=120 feats).
    x = jax.random.normal(xkey, (2, 3, 32, 32), dtype=jnp.float32)

    fwd = jax.jit(lenet_forward)
    out = jax.block_until_ready(fwd(prep, x))
    assert out.shape == (2, 10), out.shape
    assert out.dtype == jnp.float32
    assert bool(jnp.all(jnp.isfinite(out)))
    print("KERNEL_OK")
</pallas_src>

<mosaic_0001>
module attributes {stable_mosaic.version = 11 : i64} {
  func.func @_lenet_kernel(%arg0: i32, %arg1: memref<1x800x256xbf16, #tpu.memory_space<vmem>>, %arg2: memref<256x128xbf16, #tpu.memory_space<vmem>>, %arg3: memref<1x128xf32, #tpu.memory_space<vmem>>, %arg4: memref<25x128x128xbf16, #tpu.memory_space<vmem>>, %arg5: memref<1x128xf32, #tpu.memory_space<vmem>>, %arg6: memref<25x128x128xbf16, #tpu.memory_space<vmem>>, %arg7: memref<1x128xf32, #tpu.memory_space<vmem>>, %arg8: memref<128x128xbf16, #tpu.memory_space<vmem>>, %arg9: memref<1x128xf32, #tpu.memory_space<vmem>>, %arg10: memref<128x128xbf16, #tpu.memory_space<vmem>>, %arg11: memref<1x128xf32, #tpu.memory_space<vmem>>, %arg12: memref<1x8x128xf32, #tpu.memory_space<vmem>>, %arg13: memref<800x128xf32, #tpu.memory_space<vmem>>, %arg14: memref<200x128xf32, #tpu.memory_space<vmem>>, %arg15: memref<136x128xf32, #tpu.memory_space<vmem>>, %arg16: memref<128x128xf32, #tpu.memory_space<vmem>>) attributes {dimension_semantics = [#tpu.dimension_semantics<parallel>], iteration_bounds = array<i64: 2>, scalar_prefetch = 0 : i64, scratch_operands = 4 : i64, tpu.core_type = #tpu.core_type<tc>, window_params = [{transform_indices = @transform_0, window_bounds = array<i64: 1, 800, 256>}, {pipeline_mode = #tpu.pipeline_mode<synchronous>, transform_indices = @transform_1, window_bounds = array<i64: 256, 128>}, {pipeline_mode = #tpu.pipeline_mode<synchronous>, transform_indices = @transform_2, window_bounds = array<i64: 1, 128>}, {pipeline_mode = #tpu.pipeline_mode<synchronous>, transform_indices = @transform_3, window_bounds = array<i64: 25, 128, 128>}, {pipeline_mode = #tpu.pipeline_mode<synchronous>, transform_indices = @transform_4, window_bounds = array<i64: 1, 128>}, {pipeline_mode = #tpu.pipeline_mode<synchronous>, transform_indices = @transform_5, window_bounds = array<i64: 25, 128, 128>}, {pipeline_mode = #tpu.pipeline_mode<synchronous>, transform_indices = @transform_6, window_bounds = array<i64: 1, 128>}, {pipeline_mode = #tpu.pipeline_mode<synchronous>, transform_indices = @transform_7, window_bounds = array<i64: 128, 128>}, {pipeline_mode = #tpu.pipeline_mode<synchronous>, transform_indices = @transform_8, window_bounds = array<i64: 1, 128>}, {pipeline_mode = #tpu.pipeline_mode<synchronous>, transform_indices = @transform_9, window_bounds = array<i64: 128, 128>}, {pipeline_mode = #tpu.pipeline_mode<synchronous>, transform_indices = @transform_10, window_bounds = array<i64: 1, 128>}, {transform_indices = @transform_11, window_bounds = array<i64: 1, 8, 128>}]} {
    %c0 = arith.constant 0 : index
    %c0_0 = arith.constant 0 : index
    %c0_1 = arith.constant 0 : index
    %0 = vector.load %arg1[%c0, %c0_0, %c0_1] : memref<1x800x256xbf16, #tpu.memory_space<vmem>>, vector<1x800x256xbf16>
    %1 = vector.shape_cast %0 : vector<1x800x256xbf16> to vector<800x256xbf16>
    %c0_2 = arith.constant 0 : index
    %c0_3 = arith.constant 0 : index
    %2 = vector.load %arg2[%c0_2, %c0_3] : memref<256x128xbf16, #tpu.memory_space<vmem>>, vector<256x128xbf16>
    %cst = arith.constant dense<0.000000e+00> : vector<800x128xf32>
    %3 = tpu.matmul %1, %2, %cst {dimension_numbers = #tpu.dot_dimension_numbers<[1], [0], [0], [1], [0, 0, 1, 1], [], []>} : vector<800x256xbf16>, vector<256x128xbf16>, vector<800x128xf32> -> vector<800x128xf32>
    %c0_4 = arith.constant 0 : index
    %c0_5 = arith.constant 0 : index
    %4 = vector.load %arg3[%c0_4, %c0_5] : memref<1x128xf32, #tpu.memory_space<vmem>>, vector<1x128xf32>
    %5 = vector.broadcast %4 : vector<1x128xf32> to vector<800x128xf32>
    %6 = arith.addf %3, %5 : vector<800x128xf32>
    %cst_6 = arith.constant 0.000000e+00 : f32
    %7 = vector.broadcast %cst_6 : f32 to vector<800x128xf32>
    %8 = arith.maximumf %6, %7 : vector<800x128xf32>
    %c0_7 = arith.constant 0 : index
    %c0_8 = arith.constant 0 : index
    %9 = vector.load %arg13[%c0_7, %c0_8] : memref<800x128xf32, #tpu.memory_space<vmem>>, vector<800x128xf32>
    tpu.vector_store %arg13[%c0_7, %c0_8], %8 {strides = array<i32>} : memref<800x128xf32, #tpu.memory_space<vmem>>, vector<800x128xf32>,
    %c0_9 = arith.constant 0 : index
    %c0_10 = arith.constant 0 : index
    %10 = vector.load %arg13[%c0_9, %c0_10] : memref<800x128xf32, #tpu.memory_space<vmem>>, vector<200x128xf32>
    %c200 = arith.constant 200 : index
    %c0_11 = arith.constant 0 : index
    %11 = vector.load %arg13[%c200, %c0_11] : memref<800x128xf32, #tpu.memory_space<vmem>>, vector<200x128xf32>
    %12 = arith.maximumf %10, %11 : vector<200x128xf32>
    %c400 = arith.constant 400 : index
    %c0_12 = arith.constant 0 : index
    %13 = vector.load %arg13[%c400, %c0_12] : memref<800x128xf32, #tpu.memory_space<vmem>>, vector<200x128xf32>
    %c600 = arith.constant 600 : index
    %c0_13 = arith.constant 0 : index
    %14 = vector.load %arg13[%c600, %c0_13] : memref<800x128xf32, #tpu.memory_space<vmem>>, vector<200x128xf32>
    %15 = arith.maximumf %13, %14 : vector<200x128xf32>
    %16 = arith.maximumf %12, %15 : vector<200x128xf32>
    %c0_14 = arith.constant 0 : index
    %c0_15 = arith.constant 0 : index
    %17 = vector.load %arg14[%c0_14, %c0_15] : memref<200x128xf32, #tpu.memory_space<vmem>>, vector<200x128xf32>
    tpu.vector_store %arg14[%c0_14, %c0_15], %16 {strides = array<i32>} : memref<200x128xf32, #tpu.memory_space<vmem>>, vector<200x128xf32>,
    %c0_16 = arith.constant 0 : index
    %c0_17 = arith.constant 0 : index
    %18 = vector.load %arg14[%c0_16, %c0_17] : memref<200x128xf32, #tpu.memory_space<vmem>>, vector<136x128xf32>
    %19 = arith.truncf %18 : vector<136x128xf32> to vector<136x128xbf16>
    %c0_18 = arith.constant 0 : index
    %c0_19 = arith.constant 0 : index
    %c0_20 = arith.constant 0 : index
    %20 = vector.load %arg4[%c0_18, %c0_19, %c0_20] : memref<25x128x128xbf16, #tpu.memory_space<vmem>>, vector<1x128x128xbf16>
    %21 = vector.shape_cast %20 : vector<1x128x128xbf16> to vector<128x128xbf16>
    %cst_21 = arith.constant dense<0.000000e+00> : vector<136x128xf32>
    %22 = tpu.matmul %19, %21, %cst_21 {dimension_numbers = #tpu.dot_dimension_numbers<[1], [0], [0], [1], [0, 0, 1, 1], [], []>} : vector<136x128xbf16>, vector<128x128xbf16>, vector<136x128xf32> -> vector<136x128xf32>
    %c0_22 = arith.constant 0 : index
    %c0_23 = arith.constant 0 : index
    %23 = vector.load %arg5[%c0_22, %c0_23] : memref<1x128xf32, #tpu.memory_space<vmem>>, vector<1x128xf32>
    %24 = vector.broadcast %23 : vector<1x128xf32> to vector<136x128xf32>
    %25 = arith.addf %22, %24 : vector<136x128xf32>
    %c1 = arith.constant 1 : index
    %c0_24 = arith.constant 0 : index
    %26 = vector.load %arg14[%c1, %c0_24] : memref<200x128xf32, #tpu.memory_space<vmem>>, vector<136x128xf32>
    %27 = arith.truncf %26 : vector<136x128xf32> to vector<136x128xbf16>
    %c1_25 = arith.constant 1 : index
    %c0_26 = arith.constant 0 : index
    %c0_27 = arith.constant 0 : index
    %28 = vector.load %arg4[%c1_25, %c0_26, %c0_27] : memref<25x128x128xbf16, #tpu.memory_space<vmem>>, vector<1x128x128xbf16>
    %29 = vector.shape_cast %28 : vector<1x128x128xbf16> to vector<128x128xbf16>
    %cst_28 = arith.constant dense<0.000000e+00> : vector<136x128xf32>
    %30 = tpu.matmul %27, %29, %cst_28 {dimension_numbers = #tpu.dot_dimension_numbers<[1], [0], [0], [1], [0, 0, 1, 1], [], []>} : vector<136x128xbf16>, vector<128x128xbf16>, vector<136x128xf32> -> vector<136x128xf32>
    %31 = arith.addf %25, %30 : vector<136x128xf32>
    %c2 = arith.constant 2 : index
    %c0_29 = arith.constant 0 : index
    %32 = vector.load %arg14[%c2, %c0_29] : memref<200x128xf32, #tpu.memory_space<vmem>>, vector<136x128xf32>
    %33 = arith.truncf %32 : vector<136x128xf32> to vector<136x128xbf16>
    %c2_30 = arith.constant 2 : index
    %c0_31 = arith.constant 0 : index
    %c0_32 = arith.constant 0 : index
    %34 = vector.load %arg4[%c2_30, %c0_31, %c0_32] : memref<25x128x128xbf16, #tpu.memory_space<vmem>>, vector<1x128x128xbf16>
    %35 = vector.shape_cast %34 : vector<1x128x128xbf16> to vector<128x128xbf16>
    %cst_33 = arith.constant dense<0.000000e+00> : vector<136x128xf32>
    %36 = tpu.matmul %33, %35, %cst_33 {dimension_numbers = #tpu.dot_dimension_numbers<[1], [0], [0], [1], [0, 0, 1, 1], [], []>} : vector<136x128xbf16>, vector<128x128xbf16>, vector<136x128xf32> -> vector<136x128xf32>
    %37 = arith.addf %31, %36 : vector<136x128xf32>
    %c3 = arith.constant 3 : index
    %c0_34 = arith.constant 0 : index
    %38 = vector.load %arg14[%c3, %c0_34] : memref<200x128xf32, #tpu.memory_space<vmem>>, vector<136x128xf32>
    %39 = arith.truncf %38 : vector<136x128xf32> to vector<136x128xbf16>
    %c3_35 = arith.constant 3 : index
    %c0_36 = arith.constant 0 : index
    %c0_37 = arith.constant 0 : index
    %40 = vector.load %arg4[%c3_35, %c0_36, %c0_37] : memref<25x128x128xbf16, #tpu.memory_space<vmem>>, vector<1x128x128xbf16>
    %41 = vector.shape_cast %40 : vector<1x128x128xbf16> to vector<128x128xbf16>
    %cst_38 = arith.constant dense<0.000000e+00> : vector<136x128xf32>
    %42 = tpu.matmul %39, %41, %cst_38 {dimension_numbers = #tpu.dot_dimension_numbers<[1], [0], [0], [1], [0, 0, 1, 1], [], []>} : vector<136x128xbf16>, vector<128x128xbf16>, vector<136x128xf32> -> vector<136x128xf32>
    %43 = arith.addf %37, %42 : vector<136x128xf32>
    %c4 = arith.constant 4 : index
    %c0_39 = arith.constant 0 : index
    %44 = vector.load %arg14[%c4, %c0_39] : memref<200x128xf32, #tpu.memory_space<vmem>>, vector<136x128xf32>
    %45 = arith.truncf %44 : vector<136x128xf32> to vector<136x128xbf16>
    %c4_40 = arith.constant 4 : index
    %c0_41 = arith.constant 0 : index
    %c0_42 = arith.constant 0 : index
    %46 = vector.load %arg4[%c4_40, %c0_41, %c0_42] : memref<25x128x128xbf16, #tpu.memory_space<vmem>>, vector<1x128x128xbf16>
    %47 = vector.shape_cast %46 : vector<1x128x128xbf16> to vector<128x128xbf16>
    %cst_43 = arith.constant dense<0.000000e+00> : vector<136x128xf32>
    %48 = tpu.matmul %45, %47, %cst_43 {dimension_numbers = #tpu.dot_dimension_numbers<[1], [0], [0], [1], [0, 0, 1, 1], [], []>} : vector<136x128xbf16>, vector<128x128xbf16>, vector<136x128xf32> -> vector<136x128xf32>
    %49 = arith.addf %43, %48 : vector<136x128xf32>
    %c14 = arith.constant 14 : index
    %c0_44 = arith.constant 0 : index
    %50 = vector.load %arg14[%c14, %c0_44] : memref<200x128xf32, #tpu.memory_space<vmem>>, vector<136x128xf32>
    %51 = arith.truncf %50 : vector<136x128xf32> to vector<136x128xbf16>
    %c5 = arith.constant 5 : index
    %c0_45 = arith.constant 0 : index
    %c0_46 = arith.constant 0 : index
    %52 = vector.load %arg4[%c5, %c0_45, %c0_46] : memref<25x128x128xbf16, #tpu.memory_space<vmem>>, vector<1x128x128xbf16>
    %53 = vector.shape_cast %52 : vector<1x128x128xbf16> to vector<128x128xbf16>
    %cst_47 = arith.constant dense<0.000000e+00> : vector<136x128xf32>
    %54 = tpu.matmul %51, %53, %cst_47 {dimension_numbers = #tpu.dot_dimension_numbers<[1], [0], [0], [1], [0, 0, 1, 1], [], []>} : vector<136x128xbf16>, vector<128x128xbf16>, vector<136x128xf32> -> vector<136x128xf32>
    %55 = arith.addf %49, %54 : vector<136x128xf32>
    %c15 = arith.constant 15 : index
    %c0_48 = arith.constant 0 : index
    %56 = vector.load %arg14[%c15, %c0_48] : memref<200x128xf32, #tpu.memory_space<vmem>>, vector<136x128xf32>
    %57 = arith.truncf %56 : vector<136x128xf32> to vector<136x128xbf16>
    %c6 = arith.constant 6 : index
    %c0_49 = arith.constant 0 : index
    %c0_50 = arith.constant 0 : index
    %58 = vector.load %arg4[%c6, %c0_49, %c0_50] : memref<25x128x128xbf16, #tpu.memory_space<vmem>>, vector<1x128x128xbf16>
    %59 = vector.shape_cast %58 : vector<1x128x128xbf16> to vector<128x128xbf16>
    %cst_51 = arith.constant dense<0.000000e+00> : vector<136x128xf32>
    %60 = tpu.matmul %57, %59, %cst_51 {dimension_numbers = #tpu.dot_dimension_numbers<[1], [0], [0], [1], [0, 0, 1, 1], [], []>} : vector<136x128xbf16>, vector<128x128xbf16>, vector<136x128xf32> -> vector<136x128xf32>
    %61 = arith.addf %55, %60 : vector<136x128xf32>
    %c16 = arith.constant 16 : index
    %c0_52 = arith.constant 0 : index
    %62 = vector.load %arg14[%c16, %c0_52] : memref<200x128xf32, #tpu.memory_space<vmem>>, vector<136x128xf32>
    %63 = arith.truncf %62 : vector<136x128xf32> to vector<136x128xbf16>
    %c7 = arith.constant 7 : index
    %c0_53 = arith.constant 0 : index
    %c0_54 = arith.constant 0 : index
    %64 = vector.load %arg4[%c7, %c0_53, %c0_54] : memref<25x128x128xbf16, #tpu.memory_space<vmem>>, vector<1x128x128xbf16>
    %65 = vector.shape_cast %64 : vector<1x128x128xbf16> to vector<128x128xbf16>
    %cst_55 = arith.constant dense<0.000000e+00> : vector<136x128xf32>
    %66 = tpu.matmul %63, %65, %cst_55 {dimension_numbers = #tpu.dot_dimension_numbers<[1], [0], [0], [1], [0, 0, 1, 1], [], []>} : vector<136x128xbf16>, vector<128x128xbf16>, vector<136x128xf32> -> vector<136x128xf32>
    %67 = arith.addf %61, %66 : vector<136x128xf32>
    %c17 = arith.constant 17 : index
    %c0_56 = arith.constant 0 : index
    %68 = vector.load %arg14[%c17, %c0_56] : memref<200x128xf32, #tpu.memory_space<vmem>>, vector<136x128xf32>
    %69 = arith.truncf %68 : vector<136x128xf32> to vector<136x128xbf16>
    %c8 = arith.constant 8 : index
    %c0_57 = arith.constant 0 : index
    %c0_58 = arith.constant 0 : index
    %70 = vector.load %arg4[%c8, %c0_57, %c0_58] : memref<25x128x128xbf16, #tpu.memory_space<vmem>>, vector<1x128x128xbf16>
    %71 = vector.shape_cast %70 : vector<1x128x128xbf16> to vector<128x128xbf16>
    %cst_59 = arith.constant dense<0.000000e+00> : vector<136x128xf32>
    %72 = tpu.matmul %69, %71, %cst_59 {dimension_numbers = #tpu.dot_dimension_numbers<[1], [0], [0], [1], [0, 0, 1, 1], [], []>} : vector<136x128xbf16>, vector<128x128xbf16>, vector<136x128xf32> -> vector<136x128xf32>
    %73 = arith.addf %67, %72 : vector<136x128xf32>
    %c18 = arith.constant 18 : index
    %c0_60 = arith.constant 0 : index
    %74 = vector.load %arg14[%c18, %c0_60] : memref<200x128xf32, #tpu.memory_space<vmem>>, vector<136x128xf32>
    %75 = arith.truncf %74 : vector<136x128xf32> to vector<136x128xbf16>
    %c9 = arith.constant 9 : index
    %c0_61 = arith.constant 0 : index
    %c0_62 = arith.constant 0 : index
    %76 = vector.load %arg4[%c9, %c0_61, %c0_62] : memref<25x128x128xbf16, #tpu.memory_space<vmem>>, vector<1x128x128xbf16>
    %77 = vector.shape_cast %76 : vector<1x128x128xbf16> to vector<128x128xbf16>
    %cst_63 = arith.constant dense<0.000000e+00> : vector<136x128xf32>
    %78 = tpu.matmul %75, %77, %cst_63 {dimension_numbers = #tpu.dot_dimension_numbers<[1], [0], [0], [1], [0, 0, 1, 1], [], []>} : vector<136x128xbf16>, vector<128x128xbf16>, vector<136x128xf32> -> vector<136x128xf32>
    %79 = arith.addf %73, %78 : vector<136x128xf32>
    %c28 = arith.constant 28 : index
    %c0_64 = arith.constant 0 : index
    %80 = vector.load %arg14[%c28, %c0_64] : memref<200x128xf32, #tpu.memory_space<vmem>>, vector<136x128xf32>
    %81 = arith.truncf %80 : vector<136x128xf32> to vector<136x128xbf16>
    %c10 = arith.constant 10 : index
    %c0_65 = arith.constant 0 : index
    %c0_66 = arith.constant 0 : index
    %82 = vector.load %arg4[%c10, %c0_65, %c0_66] : memref<25x128x128xbf16, #tpu.memory_space<vmem>>, vector<1x128x128xbf16>
    %83 = vector.shape_cast %82 : vector<1x128x128xbf16> to vector<128x128xbf16>
    %cst_67 = arith.constant dense<0.000000e+00> : vector<136x128xf32>
    %84 = tpu.matmul %81, %83, %cst_67 {dimension_numbers = #tpu.dot_dimension_numbers<[1], [0], [0], [1], [0, 0, 1, 1], [], []>} : vector<136x128xbf16>, vector<128x128xbf16>, vector<136x128xf32> -> vector<136x128xf32>
    %85 = arith.addf %79, %84 : vector<136x128xf32>
    %c29 = arith.constant 29 : index
    %c0_68 = arith.constant 0 : index
    %86 = vector.load %arg14[%c29, %c0_68] : memref<200x128xf32, #tpu.memory_space<vmem>>, vector<136x128xf32>
    %87 = arith.truncf %86 : vector<136x128xf32> to vector<136x128xbf16>
    %c11 = arith.constant 11 : index
    %c0_69 = arith.constant 0 : index
    %c0_70 = arith.constant 0 : index
    %88 = vector.load %arg4[%c11, %c0_69, %c0_70] : memref<25x128x128xbf16, #tpu.memory_space<vmem>>, vector<1x128x128xbf16>
    %89 = vector.shape_cast %88 : vector<1x128x128xbf16> to vector<128x128xbf16>
    %cst_71 = arith.constant dense<0.000000e+00> : vector<136x128xf32>
    %90 = tpu.matmul %87, %89, %cst_71 {dimension_numbers = #tpu.dot_dimension_numbers<[1], [0], [0], [1], [0, 0, 1, 1], [], []>} : vector<136x128xbf16>, vector<128x128xbf16>, vector<136x128xf32> -> vector<136x128xf32>
    %91 = arith.addf %85, %90 : vector<136x128xf32>
    %c30 = arith.constant 30 : index
    %c0_72 = arith.constant 0 : index
    %92 = vector.load %arg14[%c30, %c0_72] : memref<200x128xf32, #tpu.memory_space<vmem>>, vector<136x128xf32>
    %93 = arith.truncf %92 : vector<136x128xf32> to vector<136x128xbf16>
    %c12 = arith.constant 12 : index
    %c0_73 = arith.constant 0 : index
    %c0_74 = arith.constant 0 : index
    %94 = vector.load %arg4[%c12, %c0_73, %c0_74] : memref<25x128x128xbf16, #tpu.memory_space<vmem>>, vector<1x128x128xbf16>
    %95 = vector.shape_cast %94 : vector<1x128x128xbf16> to vector<128x128xbf16>
    %cst_75 = arith.constant dense<0.000000e+00> : vector<136x128xf32>
    %96 = tpu.matmul %93, %95, %cst_75 {dimension_numbers = #tpu.dot_dimension_numbers<[1], [0], [0], [1], [0, 0, 1, 1], [], []>} : vector<136x128xbf16>, vector<128x128xbf16>, vector<136x128xf32> -> vector<136x128xf32>
    %97 = arith.addf %91, %96 : vector<136x128xf32>
    %c31 = arith.constant 31 : index
    %c0_76 = arith.constant 0 : index
    %98 = vector.load %arg14[%c31, %c0_76] : memref<200x128xf32, #tpu.memory_space<vmem>>, vector<136x128xf32>
    %99 = arith.truncf %98 : vector<136x128xf32> to vector<136x128xbf16>
    %c13 = arith.constant 13 : index
    %c0_77 = arith.constant 0 : index
    %c0_78 = arith.constant 0 : index
    %100 = vector.load %arg4[%c13, %c0_77, %c0_78] : memref<25x128x128xbf16, #tpu.memory_space<vmem>>, vector<1x128x128xbf16>
    %101 = vector.shape_cast %100 : vector<1x128x128xbf16> to vector<128x128xbf16>
    %cst_79 = arith.constant dense<0.000000e+00> : vector<136x128xf32>
    %102 = tpu.matmul %99, %101, %cst_79 {dimension_numbers = #tpu.dot_dimension_numbers<[1], [0], [0], [1], [0, 0, 1, 1], [], []>} : vector<136x128xbf16>, vector<128x128xbf16>, vector<136x128xf32> -> vector<136x128xf32>
    %103 = arith.addf %97, %102 : vector<136x128xf32>
    %c32 = arith.constant 32 : index
    %c0_80 = arith.constant 0 : index
    %104 = vector.load %arg14[%c32, %c0_80] : memref<200x128xf32, #tpu.memory_space<vmem>>, vector<136x128xf32>
    %105 = arith.truncf %104 : vector<136x128xf32> to vector<136x128xbf16>
    %c14_81 = arith.constant 14 : index
    %c0_82 = arith.constant 0 : index
    %c0_83 = arith.constant 0 : index
    %106 = vector.load %arg4[%c14_81, %c0_82, %c0_83] : memref<25x128x128xbf16, #tpu.memory_space<vmem>>, vector<1x128x128xbf16>
    %107 = vector.shape_cast %106 : vector<1x128x128xbf16> to vector<128x128xbf16>
    %cst_84 = arith.constant dense<0.000000e+00> : vector<136x128xf32>
    %108 = tpu.matmul %105, %107, %cst_84 {dimension_numbers = #tpu.dot_dimension_numbers<[1], [0], [0], [1], [0, 0, 1, 1], [], []>} : vector<136x128xbf16>, vector<128x128xbf16>, vector<136x128xf32> -> vector<136x128xf32>
    %109 = arith.addf %103, %108 : vector<136x128xf32>
    %c42 = arith.constant 42 : index
    %c0_85 = arith.constant 0 : index
    %110 = vector.load %arg14[%c42, %c0_85] : memref<200x128xf32, #tpu.memory_space<vmem>>, vector<136x128xf32>
    %111 = arith.truncf %110 : vector<136x128xf32> to vector<136x128xbf16>
    %c15_86 = arith.constant 15 : index
    %c0_87 = arith.constant 0 : index
    %c0_88 = arith.constant 0 : index
    %112 = vector.load %arg4[%c15_86, %c0_87, %c0_88] : memref<25x128x128xbf16, #tpu.memory_space<vmem>>, vector<1x128x128xbf16>
    %113 = vector.shape_cast %112 : vector<1x128x128xbf16> to vector<128x128xbf16>
    %cst_89 = arith.constant dense<0.000000e+00> : vector<136x128xf32>
    %114 = tpu.matmul %111, %113, %cst_89 {dimension_numbers = #tpu.dot_dimension_numbers<[1], [0], [0], [1], [0, 0, 1, 1], [], []>} : vector<136x128xbf16>, vector<128x128xbf16>, vector<136x128xf32> -> vector<136x128xf32>
    %115 = arith.addf %109, %114 : vector<136x128xf32>
    %c43 = arith.constant 43 : index
    %c0_90 = arith.constant 0 : index
    %116 = vector.load %arg14[%c43, %c0_90] : memref<200x128xf32, #tpu.memory_space<vmem>>, vector<136x128xf32>
    %117 = arith.truncf %116 : vector<136x128xf32> to vector<136x128xbf16>
    %c16_91 = arith.constant 16 : index
    %c0_92 = arith.constant 0 : index
    %c0_93 = arith.constant 0 : index
    %118 = vector.load %arg4[%c16_91, %c0_92, %c0_93] : memref<25x128x128xbf16, #tpu.memory_space<vmem>>, vector<1x128x128xbf16>
    %119 = vector.shape_cast %118 : vector<1x128x128xbf16> to vector<128x128xbf16>
    %cst_94 = arith.constant dense<0.000000e+00> : vector<136x128xf32>
    %120 = tpu.matmul %117, %119, %cst_94 {dimension_numbers = #tpu.dot_dimension_numbers<[1], [0], [0], [1], [0, 0, 1, 1], [], []>} : vector<136x128xbf16>, vector<128x128xbf16>, vector<136x128xf32> -> vector<136x128xf32>
    %121 = arith.addf %115, %120 : vector<136x128xf32>
    %c44 = arith.constant 44 : index
    %c0_95 = arith.constant 0 : index
    %122 = vector.load %arg14[%c44, %c0_95] : memref<200x128xf32, #tpu.memory_space<vmem>>, vector<136x128xf32>
    %123 = arith.truncf %122 : vector<136x128xf32> to vector<136x128xbf16>
    %c17_96 = arith.constant 17 : index
    %c0_97 = arith.constant 0 : index
    %c0_98 = arith.constant 0 : index
    %124 = vector.load %arg4[%c17_96, %c0_97, %c0_98] : memref<25x128x128xbf16, #tpu.memory_space<vmem>>, vector<1x128x128xbf16>
    %125 = vector.shape_cast %124 : vector<1x128x128xbf16> to vector<128x128xbf16>
    %cst_99 = arith.constant dense<0.000000e+00> : vector<136x128xf32>
    %126 = tpu.matmul %123, %125, %cst_99 {dimension_numbers = #tpu.dot_dimension_numbers<[1], [0], [0], [1], [0, 0, 1, 1], [], []>} : vector<136x128xbf16>, vector<128x128xbf16>, vector<136x128xf32> -> vector<136x128xf32>
    %127 = arith.addf %121, %126 : vector<136x128xf32>
    %c45 = arith.constant 45 : index
    %c0_100 = arith.constant 0 : index
    %128 = vector.load %arg14[%c45, %c0_100] : memref<200x128xf32, #tpu.memory_space<vmem>>, vector<136x128xf32>
    %129 = arith.truncf %128 : vector<136x128xf32> to vector<136x128xbf16>
    %c18_101 = arith.constant 18 : index
    %c0_102 = arith.constant 0 : index
    %c0_103 = arith.constant 0 : index
    %130 = vector.load %arg4[%c18_101, %c0_102, %c0_103] : memref<25x128x128xbf16, #tpu.memory_space<vmem>>, vector<1x128x128xbf16>
    %131 = vector.shape_cast %130 : vector<1x128x128xbf16> to vector<128x128xbf16>
    %cst_104 = arith.constant dense<0.000000e+00> : vector<136x128xf32>
    %132 = tpu.matmul %129, %131, %cst_104 {dimension_numbers = #tpu.dot_dimension_numbers<[1], [0], [0], [1], [0, 0, 1, 1], [], []>} : vector<136x128xbf16>, vector<128x128xbf16>, vector<136x128xf32> -> vector<136x128xf32>
    %133 = arith.addf %127, %132 : vector<136x128xf32>
    %c46 = arith.constant 46 : index
    %c0_105 = arith.constant 0 : index
    %134 = vector.load %arg14[%c46, %c0_105] : memref<200x128xf32, #tpu.memory_space<vmem>>, vector<136x128xf32>
    %135 = arith.truncf %134 : vector<136x128xf32> to vector<136x128xbf16>
    %c19 = arith.constant 19 : index
    %c0_106 = arith.constant 0 : index
    %c0_107 = arith.constant 0 : index
    %136 = vector.load %arg4[%c19, %c0_106, %c0_107] : memref<25x128x128xbf16, #tpu.memory_space<vmem>>, vector<1x128x128xbf16>
    %137 = vector.shape_cast %136 : vector<1x128x128xbf16> to vector<128x128xbf16>
    %cst_108 = arith.constant dense<0.000000e+00> : vector<136x128xf32>
    %138 = tpu.matmul %135, %137, %cst_108 {dimension_numbers = #tpu.dot_dimension_numbers<[1], [0], [0], [1], [0, 0, 1, 1], [], []>} : vector<136x128xbf16>, vector<128x128xbf16>, vector<136x128xf32> -> vector<136x128xf32>
    %139 = arith.addf %133, %138 : vector<136x128xf32>
    %c56 = arith.constant 56 : index
    %c0_109 = arith.constant 0 : index
    %140 = vector.load %arg14[%c56, %c0_109] : memref<200x128xf32, #tpu.memory_space<vmem>>, vector<136x128xf32>
    %141 = arith.truncf %140 : vector<136x128xf32> to vector<136x128xbf16>
    %c20 = arith.constant 20 : index
    %c0_110 = arith.constant 0 : index
    %c0_111 = arith.constant 0 : index
    %142 = vector.load %arg4[%c20, %c0_110, %c0_111] : memref<25x128x128xbf16, #tpu.memory_space<vmem>>, vector<1x128x128xbf16>
    %143 = vector.shape_cast %142 : vector<1x128x128xbf16> to vector<128x128xbf16>
    %cst_112 = arith.constant dense<0.000000e+00> : vector<136x128xf32>
    %144 = tpu.matmul %141, %143, %cst_112 {dimension_numbers = #tpu.dot_dimension_numbers<[1], [0], [0], [1], [0, 0, 1, 1], [], []>} : vector<136x128xbf16>, vector<128x128xbf16>, vector<136x128xf32> -> vector<136x128xf32>
    %145 = arith.addf %139, %144 : vector<136x128xf32>
    %c57 = arith.constant 57 : index
    %c0_113 = arith.constant 0 : index
    %146 = vector.load %arg14[%c57, %c0_113] : memref<200x128xf32, #tpu.memory_space<vmem>>, vector<136x128xf32>
    %147 = arith.truncf %146 : vector<136x128xf32> to vector<136x128xbf16>
    %c21 = arith.constant 21 : index
    %c0_114 = arith.constant 0 : index
    %c0_115 = arith.constant 0 : index
    %148 = vector.load %arg4[%c21, %c0_114, %c0_115] : memref<25x128x128xbf16, #tpu.memory_space<vmem>>, vector<1x128x128xbf16>
    %149 = vector.shape_cast %148 : vector<1x128x128xbf16> to vector<128x128xbf16>
    %cst_116 = arith.constant dense<0.000000e+00> : vector<136x128xf32>
    %150 = tpu.matmul %147, %149, %cst_116 {dimension_numbers = #tpu.dot_dimension_numbers<[1], [0], [0], [1], [0, 0, 1, 1], [], []>} : vector<136x128xbf16>, vector<128x128xbf16>, vector<136x128xf32> -> vector<136x128xf32>
    %151 = arith.addf %145, %150 : vector<136x128xf32>
    %c58 = arith.constant 58 : index
    %c0_117 = arith.constant 0 : index
    %152 = vector.load %arg14[%c58, %c0_117] : memref<200x128xf32, #tpu.memory_space<vmem>>, vector<136x128xf32>
    %153 = arith.truncf %152 : vector<136x128xf32> to vector<136x128xbf16>
    %c22 = arith.constant 22 : index
    %c0_118 = arith.constant 0 : index
    %c0_119 = arith.constant 0 : index
    %154 = vector.load %arg4[%c22, %c0_118, %c0_119] : memref<25x128x128xbf16, #tpu.memory_space<vmem>>, vector<1x128x128xbf16>
    %155 = vector.shape_cast %154 : vector<1x128x128xbf16> to vector<128x128xbf16>
    %cst_120 = arith.constant dense<0.000000e+00> : vector<136x128xf32>
    %156 = tpu.matmul %153, %155, %cst_120 {dimension_numbers = #tpu.dot_dimension_numbers<[1], [0], [0], [1], [0, 0, 1, 1], [], []>} : vector<136x128xbf16>, vector<128x128xbf16>, vector<136x128xf32> -> vector<136x128xf32>
    %157 = arith.addf %151, %156 : vector<136x128xf32>
    %c59 = arith.constant 59 : index
    %c0_121 = arith.constant 0 : index
    %158 = vector.load %arg14[%c59, %c0_121] : memref<200x128xf32, #tpu.memory_space<vmem>>, vector<136x128xf32>
    %159 = arith.truncf %158 : vector<136x128xf32> to vector<136x128xbf16>
    %c23 = arith.constant 23 : index
    %c0_122 = arith.constant 0 : index
    %c0_123 = arith.constant 0 : index
    %160 = vector.load %arg4[%c23, %c0_122, %c0_123] : memref<25x128x128xbf16, #tpu.memory_space<vmem>>, vector<1x128x128xbf16>
    %161 = vector.shape_cast %160 : vector<1x128x128xbf16> to vector<128x128xbf16>
    %cst_124 = arith.constant dense<0.000000e+00> : vector<136x128xf32>
    %162 = tpu.matmul %159, %161, %cst_124 {dimension_numbers = #tpu.dot_dimension_numbers<[1], [0], [0], [1], [0, 0, 1, 1], [], []>} : vector<136x128xbf16>, vector<128x128xbf16>, vector<136x128xf32> -> vector<136x128xf32>
    %163 = arith.addf %157, %162 : vector<136x128xf32>
    %c60 = arith.constant 60 : index
    %c0_125 = arith.constant 0 : index
    %164 = vector.load %arg14[%c60, %c0_125] : memref<200x128xf32, #tpu.memory_space<vmem>>, vector<136x128xf32>
    %165 = arith.truncf %164 : vector<136x128xf32> to vector<136x128xbf16>
    %c24 = arith.constant 24 : index
    %c0_126 = arith.constant 0 : index
    %c0_127 = arith.constant 0 : index
    %166 = vector.load %arg4[%c24, %c0_126, %c0_127] : memref<25x128x128xbf16, #tpu.memory_space<vmem>>, vector<1x128x128xbf16>
    %167 = vector.shape_cast %166 : vector<1x128x128xbf16> to vector<128x128xbf16>
    %cst_128 = arith.constant dense<0.000000e+00> : vector<136x128xf32>
    %168 = tpu.matmul %165, %167, %cst_128 {dimension_numbers = #tpu.dot_dimension_numbers<[1], [0], [0], [1], [0, 0, 1, 1], [], []>} : vector<136x128xbf16>, vector<128x128xbf16>, vector<136x128xf32> -> vector<136x128xf32>
    %169 = arith.addf %163, %168 : vector<136x128xf32>
    %cst_129 = arith.constant 0.000000e+00 : f32
    %170 = vector.broadcast %cst_129 : f32 to vector<136x128xf32>
    %171 = arith.maximumf %169, %170 : vector<136x128xf32>
    %c0_130 = arith.constant 0 : index
    %c0_131 = arith.constant 0 : index
    %172 = vector.load %arg15[%c0_130, %c0_131] : memref<136x128xf32, #tpu.memory_space<vmem>>, vector<136x128xf32>
    tpu.vector_store %arg15[%c0_130, %c0_131], %171 {strides = array<i32>} : memref<136x128xf32, #tpu.memory_space<vmem>>, vector<136x128xf32>,
    %c0_132 = arith.constant 0 : index
    %c0_133 = arith.constant 0 : index
    %173 = vector.load %arg15[%c0_132, %c0_133] : memref<136x128xf32, #tpu.memory_space<vmem>>, vector<121x128xf32>
    %c1_134 = arith.constant 1 : index
    %c0_135 = arith.constant 0 : index
    %174 = vector.load %arg15[%c1_134, %c0_135] : memref<136x128xf32, #tpu.memory_space<vmem>>, vector<121x128xf32>
    %175 = arith.maximumf %173, %174 : vector<121x128xf32>
    %c14_136 = arith.constant 14 : index
    %c0_137 = arith.constant 0 : index
    %176 = vector.load %arg15[%c14_136, %c0_137] : memref<136x128xf32, #tpu.memory_space<vmem>>, vector<121x128xf32>
    %c15_138 = arith.constant 15 : index
    %c0_139 = arith.constant 0 : index
    %177 = vector.load %arg15[%c15_138, %c0_139] : memref<136x128xf32, #tpu.memory_space<vmem>>, vector<121x128xf32>
    %178 = arith.maximumf %176, %177 : vector<121x128xf32>
    %179 = arith.maximumf %175, %178 : vector<121x128xf32>
    %c0_140 = arith.constant 0 : index
    %c0_141 = arith.constant 0 : index
    %180 = vector.load %arg16[%c0_140, %c0_141] : memref<128x128xf32, #tpu.memory_space<vmem>>, vector<121x128xf32>
    tpu.vector_store %arg16[%c0_140, %c0_141], %179 {strides = array<i32>} : memref<128x128xf32, #tpu.memory_space<vmem>>, vector<121x128xf32>,
    %c0_142 = arith.constant 0 : index
    %c0_143 = arith.constant 0 : index
    %181 = vector.load %arg7[%c0_142, %c0_143] : memref<1x128xf32, #tpu.memory_space<vmem>>, vector<1x128xf32>
    %c0_144 = arith.constant 0 : index
    %c0_145 = arith.constant 0 : index
    %182 = vector.load %arg16[%c0_144, %c0_145] : memref<128x128xf32, #tpu.memory_space<vmem>>, vector<1x128xf32>
    %183 = arith.truncf %182 : vector<1x128xf32> to vector<1x128xbf16>
    %c0_146 = arith.constant 0 : index
    %c0_147 = arith.constant 0 : index
    %c0_148 = arith.constant 0 : index
    %184 = vector.load %arg6[%c0_146, %c0_147, %c0_148] : memref<25x128x128xbf16, #tpu.memory_space<vmem>>, vector<1x128x128xbf16>
    %185 = vector.shape_cast %184 : vector<1x128x128xbf16> to vector<128x128xbf16>
    %cst_149 = arith.constant dense<0.000000e+00> : vector<1x128xf32>
    %186 = tpu.matmul %183, %185, %cst_149 {dimension_numbers = #tpu.dot_dimension_numbers<[1], [0], [0], [1], [0, 0, 1, 1], [], []>} : vector<1x128xbf16>, vector<128x128xbf16>, vector<1x128xf32> -> vector<1x128xf32>
    %187 = arith.addf %181, %186 : vector<1x128xf32>
    %c2_150 = arith.constant 2 : index
    %c0_151 = arith.constant 0 : index
    %188 = vector.load %arg16[%c2_150, %c0_151] : memref<128x128xf32, #tpu.memory_space<vmem>>, vector<1x128xf32>
    %189 = arith.truncf %188 : vector<1x128xf32> to vector<1x128xbf16>
    %c1_152 = arith.constant 1 : index
    %c0_153 = arith.constant 0 : index
    %c0_154 = arith.constant 0 : index
    %190 = vector.load %arg6[%c1_152, %c0_153, %c0_154] : memref<25x128x128xbf16, #tpu.memory_space<vmem>>, vector<1x128x128xbf16>
    %191 = vector.shape_cast %190 : vector<1x128x128xbf16> to vector<128x128xbf16>
    %cst_155 = arith.constant dense<0.000000e+00> : vector<1x128xf32>
    %192 = tpu.matmul %189, %191, %cst_155 {dimension_numbers = #tpu.dot_dimension_numbers<[1], [0], [0], [1], [0, 0, 1, 1], [], []>} : vector<1x128xbf16>, vector<128x128xbf16>, vector<1x128xf32> -> vector<1x128xf32>
    %193 = arith.addf %187, %192 : vector<1x128xf32>
    %c4_156 = arith.constant 4 : index
    %c0_157 = arith.constant 0 : index
    %194 = vector.load %arg16[%c4_156, %c0_157] : memref<128x128xf32, #tpu.memory_space<vmem>>, vector<1x128xf32>
    %195 = arith.truncf %194 : vector<1x128xf32> to vector<1x128xbf16>
    %c2_158 = arith.constant 2 : index
    %c0_159 = arith.constant 0 : index
    %c0_160 = arith.constant 0 : index
    %196 = vector.load %arg6[%c2_158, %c0_159, %c0_160] : memref<25x128x128xbf16, #tpu.memory_space<vmem>>, vector<1x128x128xbf16>
    %197 = vector.shape_cast %196 : vector<1x128x128xbf16> to vector<128x128xbf16>
    %cst_161 = arith.constant dense<0.000000e+00> : vector<1x128xf32>
    %198 = tpu.matmul %195, %197, %cst_161 {dimension_numbers = #tpu.dot_dimension_numbers<[1], [0], [0], [1], [0, 0, 1, 1], [], []>} : vector<1x128xbf16>, vector<128x128xbf16>, vector<1x128xf32> -> vector<1x128xf32>
    %199 = arith.addf %193, %198 : vector<1x128xf32>
    %c6_162 = arith.constant 6 : index
    %c0_163 = arith.constant 0 : index
    %200 = vector.load %arg16[%c6_162, %c0_163] : memref<128x128xf32, #tpu.memory_space<vmem>>, vector<1x128xf32>
    %201 = arith.truncf %200 : vector<1x128xf32> to vector<1x128xbf16>
    %c3_164 = arith.constant 3 : index
    %c0_165 = arith.constant 0 : index
    %c0_166 = arith.constant 0 : index
    %202 = vector.load %arg6[%c3_164, %c0_165, %c0_166] : memref<25x128x128xbf16, #tpu.memory_space<vmem>>, vector<1x128x128xbf16>
    %203 = vector.shape_cast %202 : vector<1x128x128xbf16> to vector<128x128xbf16>
    %cst_167 = arith.constant dense<0.000000e+00> : vector<1x128xf32>
    %204 = tpu.matmul %201, %203, %cst_167 {dimension_numbers = #tpu.dot_dimension_numbers<[1], [0], [0], [1], [0, 0, 1, 1], [], []>} : vector<1x128xbf16>, vector<128x128xbf16>, vector<1x128xf32> -> vector<1x128xf32>
    %205 = arith.addf %199, %204 : vector<1x128xf32>
    %c8_168 = arith.constant 8 : index
    %c0_169 = arith.constant 0 : index
    %206 = vector.load %arg16[%c8_168, %c0_169] : memref<128x128xf32, #tpu.memory_space<vmem>>, vector<1x128xf32>
    %207 = arith.truncf %206 : vector<1x128xf32> to vector<1x128xbf16>
    %c4_170 = arith.constant 4 : index
    %c0_171 = arith.constant 0 : index
    %c0_172 = arith.constant 0 : index
    %208 = vector.load %arg6[%c4_170, %c0_171, %c0_172] : memref<25x128x128xbf16, #tpu.memory_space<vmem>>, vector<1x128x128xbf16>
    %209 = vector.shape_cast %208 : vector<1x128x128xbf16> to vector<128x128xbf16>
    %cst_173 = arith.constant dense<0.000000e+00> : vector<1x128xf32>
    %210 = tpu.matmul %207, %209, %cst_173 {dimension_numbers = #tpu.dot_dimension_numbers<[1], [0], [0], [1], [0, 0, 1, 1], [], []>} : vector<1x128xbf16>, vector<128x128xbf16>, vector<1x128xf32> -> vector<1x128xf32>
    %211 = arith.addf %205, %210 : vector<1x128xf32>
    %c28_174 = arith.constant 28 : index
    %c0_175 = arith.constant 0 : index
    %212 = vector.load %arg16[%c28_174, %c0_175] : memref<128x128xf32, #tpu.memory_space<vmem>>, vector<1x128xf32>
    %213 = arith.truncf %212 : vector<1x128xf32> to vector<1x128xbf16>
    %c5_176 = arith.constant 5 : index
    %c0_177 = arith.constant 0 : index
    %c0_178 = arith.constant 0 : index
    %214 = vector.load %arg6[%c5_176, %c0_177, %c0_178] : memref<25x128x128xbf16, #tpu.memory_space<vmem>>, vector<1x128x128xbf16>
    %215 = vector.shape_cast %214 : vector<1x128x128xbf16> to vector<128x128xbf16>
    %cst_179 = arith.constant dense<0.000000e+00> : vector<1x128xf32>
    %216 = tpu.matmul %213, %215, %cst_179 {dimension_numbers = #tpu.dot_dimension_numbers<[1], [0], [0], [1], [0, 0, 1, 1], [], []>} : vector<1x128xbf16>, vector<128x128xbf16>, vector<1x128xf32> -> vector<1x128xf32>
    %217 = arith.addf %211, %216 : vector<1x128xf32>
    %c30_180 = arith.constant 30 : index
    %c0_181 = arith.constant 0 : index
    %218 = vector.load %arg16[%c30_180, %c0_181] : memref<128x128xf32, #tpu.memory_space<vmem>>, vector<1x128xf32>
    %219 = arith.truncf %218 : vector<1x128xf32> to vector<1x128xbf16>
    %c6_182 = arith.constant 6 : index
    %c0_183 = arith.constant 0 : index
    %c0_184 = arith.constant 0 : index
    %220 = vector.load %arg6[%c6_182, %c0_183, %c0_184] : memref<25x128x128xbf16, #tpu.memory_space<vmem>>, vector<1x128x128xbf16>
    %221 = vector.shape_cast %220 : vector<1x128x128xbf16> to vector<128x128xbf16>
    %cst_185 = arith.constant dense<0.000000e+00> : vector<1x128xf32>
    %222 = tpu.matmul %219, %221, %cst_185 {dimension_numbers = #tpu.dot_dimension_numbers<[1], [0], [0], [1], [0, 0, 1, 1], [], []>} : vector<1x128xbf16>, vector<128x128xbf16>, vector<1x128xf32> -> vector<1x128xf32>
    %223 = arith.addf %217, %222 : vector<1x128xf32>
    %c32_186 = arith.constant 32 : index
    %c0_187 = arith.constant 0 : index
    %224 = vector.load %arg16[%c32_186, %c0_187] : memref<128x128xf32, #tpu.memory_space<vmem>>, vector<1x128xf32>
    %225 = arith.truncf %224 : vector<1x128xf32> to vector<1x128xbf16>
    %c7_188 = arith.constant 7 : index
    %c0_189 = arith.constant 0 : index
    %c0_190 = arith.constant 0 : index
    %226 = vector.load %arg6[%c7_188, %c0_189, %c0_190] : memref<25x128x128xbf16, #tpu.memory_space<vmem>>, vector<1x128x128xbf16>
    %227 = vector.shape_cast %226 : vector<1x128x128xbf16> to vector<128x128xbf16>
    %cst_191 = arith.constant dense<0.000000e+00> : vector<1x128xf32>
    %228 = tpu.matmul %225, %227, %cst_191 {dimension_numbers = #tpu.dot_dimension_numbers<[1], [0], [0], [1], [0, 0, 1, 1], [], []>} : vector<1x128xbf16>, vector<128x128xbf16>, vector<1x128xf32> -> vector<1x128xf32>
    %229 = arith.addf %223, %228 : vector<1x128xf32>
    %c34 = arith.constant 34 : index
    %c0_192 = arith.constant 0 : index
    %230 = vector.load %arg16[%c34, %c0_192] : memref<128x128xf32, #tpu.memory_space<vmem>>, vector<1x128xf32>
    %231 = arith.truncf %230 : vector<1x128xf32> to vector<1x128xbf16>
    %c8_193 = arith.constant 8 : index
    %c0_194 = arith.constant 0 : index
    %c0_195 = arith.constant 0 : index
    %232 = vector.load %arg6[%c8_193, %c0_194, %c0_195] : memref<25x128x128xbf16, #tpu.memory_space<vmem>>, vector<1x128x128xbf16>
    %233 = vector.shape_cast %232 : vector<1x128x128xbf16> to vector<128x128xbf16>
    %cst_196 = arith.constant dense<0.000000e+00> : vector<1x128xf32>
    %234 = tpu.matmul %231, %233, %cst_196 {dimension_numbers = #tpu.dot_dimension_numbers<[1], [0], [0], [1], [0, 0, 1, 1], [], []>} : vector<1x128xbf16>, vector<128x128xbf16>, vector<1x128xf32> -> vector<1x128xf32>
    %235 = arith.addf %229, %234 : vector<1x128xf32>
    %c36 = arith.constant 36 : index
    %c0_197 = arith.constant 0 : index
    %236 = vector.load %arg16[%c36, %c0_197] : memref<128x128xf32, #tpu.memory_space<vmem>>, vector<1x128xf32>
    %237 = arith.truncf %236 : vector<1x128xf32> to vector<1x128xbf16>
    %c9_198 = arith.constant 9 : index
    %c0_199 = arith.constant 0 : index
    %c0_200 = arith.constant 0 : index
    %238 = vector.load %arg6[%c9_198, %c0_199, %c0_200] : memref<25x128x128xbf16, #tpu.memory_space<vmem>>, vector<1x128x128xbf16>
    %239 = vector.shape_cast %238 : vector<1x128x128xbf16> to vector<128x128xbf16>
    %cst_201 = arith.constant dense<0.000000e+00> : vector<1x128xf32>
    %240 = tpu.matmul %237, %239, %cst_201 {dimension_numbers = #tpu.dot_dimension_numbers<[1], [0], [0], [1], [0, 0, 1, 1], [], []>} : vector<1x128xbf16>, vector<128x128xbf16>, vector<1x128xf32> -> vector<1x128xf32>
    %241 = arith.addf %235, %240 : vector<1x128xf32>
    %c56_202 = arith.constant 56 : index
    %c0_203 = arith.constant 0 : index
    %242 = vector.load %arg16[%c56_202, %c0_203] : memref<128x128xf32, #tpu.memory_space<vmem>>, vector<1x128xf32>
    %243 = arith.truncf %242 : vector<1x128xf32> to vector<1x128xbf16>
    %c10_204 = arith.constant 10 : index
    %c0_205 = arith.constant 0 : index
    %c0_206 = arith.constant 0 : index
    %244 = vector.load %arg6[%c10_204, %c0_205, %c0_206] : memref<25x128x128xbf16, #tpu.memory_space<vmem>>, vector<1x128x128xbf16>
    %245 = vector.shape_cast %244 : vector<1x128x128xbf16> to vector<128x128xbf16>
    %cst_207 = arith.constant dense<0.000000e+00> : vector<1x128xf32>
    %246 = tpu.matmul %243, %245, %cst_207 {dimension_numbers = #tpu.dot_dimension_numbers<[1], [0], [0], [1], [0, 0, 1, 1], [], []>} : vector<1x128xbf16>, vector<128x128xbf16>, vector<1x128xf32> -> vector<1x128xf32>
    %247 = arith.addf %241, %246 : vector<1x128xf32>
    %c58_208 = arith.constant 58 : index
    %c0_209 = arith.constant 0 : index
    %248 = vector.load %arg16[%c58_208, %c0_209] : memref<128x128xf32, #tpu.memory_space<vmem>>, vector<1x128xf32>
    %249 = arith.truncf %248 : vector<1x128xf32> to vector<1x128xbf16>
    %c11_210 = arith.constant 11 : index
    %c0_211 = arith.constant 0 : index
    %c0_212 = arith.constant 0 : index
    %250 = vector.load %arg6[%c11_210, %c0_211, %c0_212] : memref<25x128x128xbf16, #tpu.memory_space<vmem>>, vector<1x128x128xbf16>
    %251 = vector.shape_cast %250 : vector<1x128x128xbf16> to vector<128x128xbf16>
    %cst_213 = arith.constant dense<0.000000e+00> : vector<1x128xf32>
    %252 = tpu.matmul %249, %251, %cst_213 {dimension_numbers = #tpu.dot_dimension_numbers<[1], [0], [0], [1], [0, 0, 1, 1], [], []>} : vector<1x128xbf16>, vector<128x128xbf16>, vector<1x128xf32> -> vector<1x128xf32>
    %253 = arith.addf %247, %252 : vector<1x128xf32>
    %c60_214 = arith.constant 60 : index
    %c0_215 = arith.constant 0 : index
    %254 = vector.load %arg16[%c60_214, %c0_215] : memref<128x128xf32, #tpu.memory_space<vmem>>, vector<1x128xf32>
    %255 = arith.truncf %254 : vector<1x128xf32> to vector<1x128xbf16>
    %c12_216 = arith.constant 12 : index
    %c0_217 = arith.constant 0 : index
    %c0_218 = arith.constant 0 : index
    %256 = vector.load %arg6[%c12_216, %c0_217, %c0_218] : memref<25x128x128xbf16, #tpu.memory_space<vmem>>, vector<1x128x128xbf16>
    %257 = vector.shape_cast %256 : vector<1x128x128xbf16> to vector<128x128xbf16>
    %cst_219 = arith.constant dense<0.000000e+00> : vector<1x128xf32>
    %258 = tpu.matmul %255, %257, %cst_219 {dimension_numbers = #tpu.dot_dimension_numbers<[1], [0], [0], [1], [0, 0, 1, 1], [], []>} : vector<1x128xbf16>, vector<128x128xbf16>, vector<1x128xf32> -> vector<1x128xf32>
    %259 = arith.addf %253, %258 : vector<1x128xf32>
    %c62 = arith.constant 62 : index
    %c0_220 = arith.constant 0 : index
    %260 = vector.load %arg16[%c62, %c0_220] : memref<128x128xf32, #tpu.memory_space<vmem>>, vector<1x128xf32>
    %261 = arith.truncf %260 : vector<1x128xf32> to vector<1x128xbf16>
    %c13_221 = arith.constant 13 : index
    %c0_222 = arith.constant 0 : index
    %c0_223 = arith.constant 0 : index
    %262 = vector.load %arg6[%c13_221, %c0_222, %c0_223] : memref<25x128x128xbf16, #tpu.memory_space<vmem>>, vector<1x128x128xbf16>
    %263 = vector.shape_cast %262 : vector<1x128x128xbf16> to vector<128x128xbf16>
    %cst_224 = arith.constant dense<0.000000e+00> : vector<1x128xf32>
    %264 = tpu.matmul %261, %263, %cst_224 {dimension_numbers = #tpu.dot_dimension_numbers<[1], [0], [0], [1], [0, 0, 1, 1], [], []>} : vector<1x128xbf16>, vector<128x128xbf16>, vector<1x128xf32> -> vector<1x128xf32>
    %265 = arith.addf %259, %264 : vector<1x128xf32>
    %c64 = arith.constant 64 : index
    %c0_225 = arith.constant 0 : index
    %266 = vector.load %arg16[%c64, %c0_225] : memref<128x128xf32, #tpu.memory_space<vmem>>, vector<1x128xf32>
    %267 = arith.truncf %266 : vector<1x128xf32> to vector<1x128xbf16>
    %c14_226 = arith.constant 14 : index
    %c0_227 = arith.constant 0 : index
    %c0_228 = arith.constant 0 : index
    %268 = vector.load %arg6[%c14_226, %c0_227, %c0_228] : memref<25x128x128xbf16, #tpu.memory_space<vmem>>, vector<1x128x128xbf16>
    %269 = vector.shape_cast %268 : vector<1x128x128xbf16> to vector<128x128xbf16>
    %cst_229 = arith.constant dense<0.000000e+00> : vector<1x128xf32>
    %270 = tpu.matmul %267, %269, %cst_229 {dimension_numbers = #tpu.dot_dimension_numbers<[1], [0], [0], [1], [0, 0, 1, 1], [], []>} : vector<1x128xbf16>, vector<128x128xbf16>, vector<1x128xf32> -> vector<1x128xf32>
    %271 = arith.addf %265, %270 : vector<1x128xf32>
    %c84 = arith.constant 84 : index
    %c0_230 = arith.constant 0 : index
    %272 = vector.load %arg16[%c84, %c0_230] : memref<128x128xf32, #tpu.memory_space<vmem>>, vector<1x128xf32>
    %273 = arith.truncf %272 : vector<1x128xf32> to vector<1x128xbf16>
    %c15_231 = arith.constant 15 : index
    %c0_232 = arith.constant 0 : index
    %c0_233 = arith.constant 0 : index
    %274 = vector.load %arg6[%c15_231, %c0_232, %c0_233] : memref<25x128x128xbf16, #tpu.memory_space<vmem>>, vector<1x128x128xbf16>
    %275 = vector.shape_cast %274 : vector<1x128x128xbf16> to vector<128x128xbf16>
    %cst_234 = arith.constant dense<0.000000e+00> : vector<1x128xf32>
    %276 = tpu.matmul %273, %275, %cst_234 {dimension_numbers = #tpu.dot_dimension_numbers<[1], [0], [0], [1], [0, 0, 1, 1], [], []>} : vector<1x128xbf16>, vector<128x128xbf16>, vector<1x128xf32> -> vector<1x128xf32>
    %277 = arith.addf %271, %276 : vector<1x128xf32>
    %c86 = arith.constant 86 : index
    %c0_235 = arith.constant 0 : index
    %278 = vector.load %arg16[%c86, %c0_235] : memref<128x128xf32, #tpu.memory_space<vmem>>, vector<1x128xf32>
    %279 = arith.truncf %278 : vector<1x128xf32> to vector<1x128xbf16>
    %c16_236 = arith.constant 16 : index
    %c0_237 = arith.constant 0 : index
    %c0_238 = arith.constant 0 : index
    %280 = vector.load %arg6[%c16_236, %c0_237, %c0_238] : memref<25x128x128xbf16, #tpu.memory_space<vmem>>, vector<1x128x128xbf16>
    %281 = vector.shape_cast %280 : vector<1x128x128xbf16> to vector<128x128xbf16>
    %cst_239 = arith.constant dense<0.000000e+00> : vector<1x128xf32>
    %282 = tpu.matmul %279, %281, %cst_239 {dimension_numbers = #tpu.dot_dimension_numbers<[1], [0], [0], [1], [0, 0, 1, 1], [], []>} : vector<1x128xbf16>, vector<128x128xbf16>, vector<1x128xf32> -> vector<1x128xf32>
    %283 = arith.addf %277, %282 : vector<1x128xf32>
    %c88 = arith.constant 88 : index
    %c0_240 = arith.constant 0 : index
    %284 = vector.load %arg16[%c88, %c0_240] : memref<128x128xf32, #tpu.memory_space<vmem>>, vector<1x128xf32>
    %285 = arith.truncf %284 : vector<1x128xf32> to vector<1x128xbf16>
    %c17_241 = arith.constant 17 : index
    %c0_242 = arith.constant 0 : index
    %c0_243 = arith.constant 0 : index
    %286 = vector.load %arg6[%c17_241, %c0_242, %c0_243] : memref<25x128x128xbf16, #tpu.memory_space<vmem>>, vector<1x128x128xbf16>
    %287 = vector.shape_cast %286 : vector<1x128x128xbf16> to vector<128x128xbf16>
    %cst_244 = arith.constant dense<0.000000e+00> : vector<1x128xf32>
    %288 = tpu.matmul %285, %287, %cst_244 {dimension_numbers = #tpu.dot_dimension_numbers<[1], [0], [0], [1], [0, 0, 1, 1], [], []>} : vector<1x128xbf16>, vector<128x128xbf16>, vector<1x128xf32> -> vector<1x128xf32>
    %289 = arith.addf %283, %288 : vector<1x128xf32>
    %c90 = arith.constant 90 : index
    %c0_245 = arith.constant 0 : index
    %290 = vector.load %arg16[%c90, %c0_245] : memref<128x128xf32, #tpu.memory_space<vmem>>, vector<1x128xf32>
    %291 = arith.truncf %290 : vector<1x128xf32> to vector<1x128xbf16>
    %c18_246 = arith.constant 18 : index
    %c0_247 = arith.constant 0 : index
    %c0_248 = arith.constant 0 : index
    %292 = vector.load %arg6[%c18_246, %c0_247, %c0_248] : memref<25x128x128xbf16, #tpu.memory_space<vmem>>, vector<1x128x128xbf16>
    %293 = vector.shape_cast %292 : vector<1x128x128xbf16> to vector<128x128xbf16>
    %cst_249 = arith.constant dense<0.000000e+00> : vector<1x128xf32>
    %294 = tpu.matmul %291, %293, %cst_249 {dimension_numbers = #tpu.dot_dimension_numbers<[1], [0], [0], [1], [0, 0, 1, 1], [], []>} : vector<1x128xbf16>, vector<128x128xbf16>, vector<1x128xf32> -> vector<1x128xf32>
    %295 = arith.addf %289, %294 : vector<1x128xf32>
    %c92 = arith.constant 92 : index
    %c0_250 = arith.constant 0 : index
    %296 = vector.load %arg16[%c92, %c0_250] : memref<128x128xf32, #tpu.memory_space<vmem>>, vector<1x128xf32>
    %297 = arith.truncf %296 : vector<1x128xf32> to vector<1x128xbf16>
    %c19_251 = arith.constant 19 : index
    %c0_252 = arith.constant 0 : index
    %c0_253 = arith.constant 0 : index
    %298 = vector.load %arg6[%c19_251, %c0_252, %c0_253] : memref<25x128x128xbf16, #tpu.memory_space<vmem>>, vector<1x128x128xbf16>
    %299 = vector.shape_cast %298 : vector<1x128x128xbf16> to vector<128x128xbf16>
    %cst_254 = arith.constant dense<0.000000e+00> : vector<1x128xf32>
    %300 = tpu.matmul %297, %299, %cst_254 {dimension_numbers = #tpu.dot_dimension_numbers<[1], [0], [0], [1], [0, 0, 1, 1], [], []>} : vector<1x128xbf16>, vector<128x128xbf16>, vector<1x128xf32> -> vector<1x128xf32>
    %301 = arith.addf %295, %300 : vector<1x128xf32>
    %c112 = arith.constant 112 : index
    %c0_255 = arith.constant 0 : index
    %302 = vector.load %arg16[%c112, %c0_255] : memref<128x128xf32, #tpu.memory_space<vmem>>, vector<1x128xf32>
    %303 = arith.truncf %302 : vector<1x128xf32> to vector<1x128xbf16>
    %c20_256 = arith.constant 20 : index
    %c0_257 = arith.constant 0 : index
    %c0_258 = arith.constant 0 : index
    %304 = vector.load %arg6[%c20_256, %c0_257, %c0_258] : memref<25x128x128xbf16, #tpu.memory_space<vmem>>, vector<1x128x128xbf16>
    %305 = vector.shape_cast %304 : vector<1x128x128xbf16> to vector<128x128xbf16>
    %cst_259 = arith.constant dense<0.000000e+00> : vector<1x128xf32>
    %306 = tpu.matmul %303, %305, %cst_259 {dimension_numbers = #tpu.dot_dimension_numbers<[1], [0], [0], [1], [0, 0, 1, 1], [], []>} : vector<1x128xbf16>, vector<128x128xbf16>, vector<1x128xf32> -> vector<1x128xf32>
    %307 = arith.addf %301, %306 : vector<1x128xf32>
    %c114 = arith.constant 114 : index
    %c0_260 = arith.constant 0 : index
    %308 = vector.load %arg16[%c114, %c0_260] : memref<128x128xf32, #tpu.memory_space<vmem>>, vector<1x128xf32>
    %309 = arith.truncf %308 : vector<1x128xf32> to vector<1x128xbf16>
    %c21_261 = arith.constant 21 : index
    %c0_262 = arith.constant 0 : index
    %c0_263 = arith.constant 0 : index
    %310 = vector.load %arg6[%c21_261, %c0_262, %c0_263] : memref<25x128x128xbf16, #tpu.memory_space<vmem>>, vector<1x128x128xbf16>
    %311 = vector.shape_cast %310 : vector<1x128x128xbf16> to vector<128x128xbf16>
    %cst_264 = arith.constant dense<0.000000e+00> : vector<1x128xf32>
    %312 = tpu.matmul %309, %311, %cst_264 {dimension_numbers = #tpu.dot_dimension_numbers<[1], [0], [0], [1], [0, 0, 1, 1], [], []>} : vector<1x128xbf16>, vector<128x128xbf16>, vector<1x128xf32> -> vector<1x128xf32>
    %313 = arith.addf %307, %312 : vector<1x128xf32>
    %c116 = arith.constant 116 : index
    %c0_265 = arith.constant 0 : index
    %314 = vector.load %arg16[%c116, %c0_265] : memref<128x128xf32, #tpu.memory_space<vmem>>, vector<1x128xf32>
    %315 = arith.truncf %314 : vector<1x128xf32> to vector<1x128xbf16>
    %c22_266 = arith.constant 22 : index
    %c0_267 = arith.constant 0 : index
    %c0_268 = arith.constant 0 : index
    %316 = vector.load %arg6[%c22_266, %c0_267, %c0_268] : memref<25x128x128xbf16, #tpu.memory_space<vmem>>, vector<1x128x128xbf16>
    %317 = vector.shape_cast %316 : vector<1x128x128xbf16> to vector<128x128xbf16>
    %cst_269 = arith.constant dense<0.000000e+00> : vector<1x128xf32>
    %318 = tpu.matmul %315, %317, %cst_269 {dimension_numbers = #tpu.dot_dimension_numbers<[1], [0], [0], [1], [0, 0, 1, 1], [], []>} : vector<1x128xbf16>, vector<128x128xbf16>, vector<1x128xf32> -> vector<1x128xf32>
    %319 = arith.addf %313, %318 : vector<1x128xf32>
    %c118 = arith.constant 118 : index
    %c0_270 = arith.constant 0 : index
    %320 = vector.load %arg16[%c118, %c0_270] : memref<128x128xf32, #tpu.memory_space<vmem>>, vector<1x128xf32>
    %321 = arith.truncf %320 : vector<1x128xf32> to vector<1x128xbf16>
    %c23_271 = arith.constant 23 : index
    %c0_272 = arith.constant 0 : index
    %c0_273 = arith.constant 0 : index
    %322 = vector.load %arg6[%c23_271, %c0_272, %c0_273] : memref<25x128x128xbf16, #tpu.memory_space<vmem>>, vector<1x128x128xbf16>
    %323 = vector.shape_cast %322 : vector<1x128x128xbf16> to vector<128x128xbf16>
    %cst_274 = arith.constant dense<0.000000e+00> : vector<1x128xf32>
    %324 = tpu.matmul %321, %323, %cst_274 {dimension_numbers = #tpu.dot_dimension_numbers<[1], [0], [0], [1], [0, 0, 1, 1], [], []>} : vector<1x128xbf16>, vector<128x128xbf16>, vector<1x128xf32> -> vector<1x128xf32>
    %325 = arith.addf %319, %324 : vector<1x128xf32>
    %c120 = arith.constant 120 : index
    %c0_275 = arith.constant 0 : index
    %326 = vector.load %arg16[%c120, %c0_275] : memref<128x128xf32, #tpu.memory_space<vmem>>, vector<1x128xf32>
    %327 = arith.truncf %326 : vector<1x128xf32> to vector<1x128xbf16>
    %c24_276 = arith.constant 24 : index
    %c0_277 = arith.constant 0 : index
    %c0_278 = arith.constant 0 : index
    %328 = vector.load %arg6[%c24_276, %c0_277, %c0_278] : memref<25x128x128xbf16, #tpu.memory_space<vmem>>, vector<1x128x128xbf16>
    %329 = vector.shape_cast %328 : vector<1x128x128xbf16> to vector<128x128xbf16>
    %cst_279 = arith.constant dense<0.000000e+00> : vector<1x128xf32>
    %330 = tpu.matmul %327, %329, %cst_279 {dimension_numbers = #tpu.dot_dimension_numbers<[1], [0], [0], [1], [0, 0, 1, 1], [], []>} : vector<1x128xbf16>, vector<128x128xbf16>, vector<1x128xf32> -> vector<1x128xf32>
    %331 = arith.addf %325, %330 : vector<1x128xf32>
    %cst_280 = arith.constant 0.000000e+00 : f32
    %332 = vector.broadcast %cst_280 : f32 to vector<1x128xf32>
    %333 = arith.maximumf %331, %332 : vector<1x128xf32>
    %334 = arith.truncf %333 : vector<1x128xf32> to vector<1x128xbf16>
    %c0_281 = arith.constant 0 : index
    %c0_282 = arith.constant 0 : index
    %335 = vector.load %arg8[%c0_281, %c0_282] : memref<128x128xbf16, #tpu.memory_space<vmem>>, vector<128x128xbf16>
    %cst_283 = arith.constant dense<0.000000e+00> : vector<1x128xf32>
    %336 = tpu.matmul %334, %335, %cst_283 {dimension_numbers = #tpu.dot_dimension_numbers<[1], [0], [0], [1], [0, 0, 1, 1], [], []>} : vector<1x128xbf16>, vector<128x128xbf16>, vector<1x128xf32> -> vector<1x128xf32>
    %c0_284 = arith.constant 0 : index
    %c0_285 = arith.constant 0 : index
    %337 = vector.load %arg9[%c0_284, %c0_285] : memref<1x128xf32, #tpu.memory_space<vmem>>, vector<1x128xf32>
    %338 = arith.addf %336, %337 : vector<1x128xf32>
    %cst_286 = arith.constant 0.000000e+00 : f32
    %339 = vector.broadcast %cst_286 : f32 to vector<1x128xf32>
    %340 = arith.maximumf %338, %339 : vector<1x128xf32>
    %341 = arith.truncf %340 : vector<1x128xf32> to vector<1x128xbf16>
    %c0_287 = arith.constant 0 : index
    %c0_288 = arith.constant 0 : index
    %342 = vector.load %arg10[%c0_287, %c0_288] : memref<128x128xbf16, #tpu.memory_space<vmem>>, vector<128x128xbf16>
    %cst_289 = arith.constant dense<0.000000e+00> : vector<1x128xf32>
    %343 = tpu.matmul %341, %342, %cst_289 {dimension_numbers = #tpu.dot_dimension_numbers<[1], [0], [0], [1], [0, 0, 1, 1], [], []>} : vector<1x128xbf16>, vector<128x128xbf16>, vector<1x128xf32> -> vector<1x128xf32>
    %c0_290 = arith.constant 0 : index
    %c0_291 = arith.constant 0 : index
    %344 = vector.load %arg11[%c0_290, %c0_291] : memref<1x128xf32, #tpu.memory_space<vmem>>, vector<1x128xf32>
    %345 = arith.addf %343, %344 : vector<1x128xf32>
    %346 = vector.shape_cast %345 : vector<1x128xf32> to vector<1x128xf32>
    %347 = vector.broadcast %346 : vector<1x128xf32> to vector<8x128xf32>
    %c0_292 = arith.constant 0 : index
    %c0_293 = arith.constant 0 : index
    %c0_294 = arith.constant 0 : index
    %348 = vector.load %arg12[%c0_292, %c0_293, %c0_294] : memref<1x8x128xf32, #tpu.memory_space<vmem>>, vector<1x8x128xf32>
    %349 = vector.shape_cast %348 : vector<1x8x128xf32> to vector<8x128xf32>
    %350 = vector.shape_cast %347 : vector<8x128xf32> to vector<1x8x128xf32>
    tpu.vector_store %arg12[%c0_292, %c0_293, %c0_294], %350 {strides = array<i32>} : memref<1x8x128xf32, #tpu.memory_space<vmem>>, vector<1x8x128xf32>,
    return
  }
  func.func @transform_0(%arg0: i32) -> (i32, i32, i32) {
    %c0_i32 = arith.constant 0 : i32
    %c0_i32_0 = arith.constant 0 : i32
    %c0_i32_1 = arith.constant 0 : i32
    return %arg0, %c0_i32, %c0_i32_0 : i32, i32, i32
  }
  func.func @transform_1(%arg0: i32) -> (i32, i32) {
    %c0_i32 = arith.constant 0 : i32
    %c0_i32_0 = arith.constant 0 : i32
    %c0_i32_1 = arith.constant 0 : i32
    return %c0_i32, %c0_i32_0 : i32, i32
  }
  func.func @transform_2(%arg0: i32) -> (i32, i32) {
    %c0_i32 = arith.constant 0 : i32
    %c0_i32_0 = arith.constant 0 : i32
    %c0_i32_1 = arith.constant 0 : i32
    return %c0_i32, %c0_i32_0 : i32, i32
  }
  func.func @transform_3(%arg0: i32) -> (i32, i32, i32) {
    %c0_i32 = arith.constant 0 : i32
    %c0_i32_0 = arith.constant 0 : i32
    %c0_i32_1 = arith.constant 0 : i32
    %c0_i32_2 = arith.constant 0 : i32
    return %c0_i32, %c0_i32_0, %c0_i32_1 : i32, i32, i32
  }
  func.func @transform_4(%arg0: i32) -> (i32, i32) {
    %c0_i32 = arith.constant 0 : i32
    %c0_i32_0 = arith.constant 0 : i32
    %c0_i32_1 = arith.constant 0 : i32
    return %c0_i32, %c0_i32_0 : i32, i32
  }
  func.func @transform_5(%arg0: i32) -> (i32, i32, i32) {
    %c0_i32 = arith.constant 0 : i32
    %c0_i32_0 = arith.constant 0 : i32
    %c0_i32_1 = arith.constant 0 : i32
    %c0_i32_2 = arith.constant 0 : i32
    return %c0_i32, %c0_i32_0, %c0_i32_1 : i32, i32, i32
  }
  func.func @transform_6(%arg0: i32) -> (i32, i32) {
    %c0_i32 = arith.constant 0 : i32
    %c0_i32_0 = arith.constant 0 : i32
    %c0_i32_1 = arith.constant 0 : i32
    return %c0_i32, %c0_i32_0 : i32, i32
  }
  func.func @transform_7(%arg0: i32) -> (i32, i32) {
    %c0_i32 = arith.constant 0 : i32
    %c0_i32_0 = arith.constant 0 : i32
    %c0_i32_1 = arith.constant 0 : i32
    return %c0_i32, %c0_i32_0 : i32, i32
  }
  func.func @transform_8(%arg0: i32) -> (i32, i32) {
    %c0_i32 = arith.constant 0 : i32
    %c0_i32_0 = arith.constant 0 : i32
    %c0_i32_1 = arith.constant 0 : i32
    return %c0_i32, %c0_i32_0 : i32, i32
  }
  func.func @transform_9(%arg0: i32) -> (i32, i32) {
    %c0_i32 = arith.constant 0 : i32
    %c0_i32_0 = arith.constant 0 : i32
    %c0_i32_1 = arith.constant 0 : i32
    return %c0_i32, %c0_i32_0 : i32, i32
  }
  func.func @transform_10(%arg0: i32) -> (i32, i32) {
    %c0_i32 = arith.constant 0 : i32
    %c0_i32_0 = arith.constant 0 : i32
    %c0_i32_1 = arith.constant 0 : i32
    return %c0_i32, %c0_i32_0 : i32, i32
  }
  func.func @transform_11(%arg0: i32) -> (i32, i32, i32) {
    %c0_i32 = arith.constant 0 : i32
    %c0_i32_0 = arith.constant 0 : i32
    %c0_i32_1 = arith.constant 0 : i32
    return %arg0, %c0_i32, %c0_i32_0 : i32, i32, i32
  }
}

</mosaic_0001>

<bundles_post_ra>
// kernel: lenet_forward.1
= control target key start
LH: loop header
LB: loop body
LE: loop exit
PB: predicated region body
PF: predicated region fallthrough
CT: control target
= control target key end

     0   :  { %s14880_s17 = smov 0   ;;  %s19171_s0 = inlined_call_operand.vmem [shape: bf16[2,800,256], index: 0, kind: input, shape index: {}]   ;;  %s19172_s1 = inlined_call_operand.vmem [shape: bf16[256,128], index: 1, kind: input, shape index: {}]   ;;  %s19173_s2 = inlined_call_operand.vmem [shape: f32[1,128], index: 2, kind: input, shape index: {}]   ;;  %s19174_s3 = inlined_call_operand.vmem [shape: bf16[25,128,128], index: 3, kind: input, shape index: {}]   ;;  %s19175_s4 = inlined_call_operand.vmem [shape: f32[1,128], index: 4, kind: input, shape index: {}]   ;;  %s19176_s5 = inlined_call_operand.vmem [shape: bf16[25,128,128], index: 5, kind: input, shape index: {}]   ;;  %s19177_s6 = inlined_call_operand.vmem [shape: f32[1,128], index: 6, kind: input, shape index: {}]   ;;  %s19178_s7 = inlined_call_operand.vmem [shape: bf16[128,128], index: 7, kind: input, shape index: {}]   ;;  %s19179_s8 = inlined_call_operand.vmem [shape: f32[1,128], index: 8, kind: input, shape index: {}]   ;;  %s19180_s9 = inlined_call_operand.vmem [shape: bf16[128,128], index: 9, kind: input, shape index: {}]   ;;  %s19181_s10 = inlined_call_operand.vmem [shape: f32[1,128], index: 10, kind: input, shape index: {}]   ;;  %s19182_s11 = inlined_call_operand.vmem [shape: f32[2,8,128], index: 11, kind: output, shape index: {}]  }
   0x1 LB: > { %s10377_s18 = sadd.s32 4294967295, %s14815_s17   ;;  %p10381_p0 = scmp.ge.s32.totalorder %s14815_s17, 1  ;;  %s14815_s17 = sphi %s14880_s17, %s21_s17  }
   0x2   : > { %p337_p1 = scmp.lt.s32.totalorder %s14815_s17, 3 }
   0x4   : > { %p338_p2 = pnand %p10381_p0, %p337_p1 }
   0x6   : > { %341 = sbr.rel (%p338_p2) target bundleno = 2836 (0xb14), region = 64 }
   0xb   : > { %v14208_v0 = vld [vmem:[%s19172_s1 + $0x38] sm:$0xff]   ;;  %v14817_v1 = vmov 0   ;;  %v14209_v2 = vld [vmem:[%s19172_s1 + $0x30] sm:$0xff]   ;;  %p376_p3 = scmp.lt.s32.totalorder %s10377_s18, 1  ;;  %v14210_v3 = vld [vmem:[%s19172_s1 + $0x28] sm:$0xff]   ;;  %vm14819_vm0 = vmmov 0  }
   0xc   : > { %1121 = vmatprep.subr.bf16.mxu0 %v14817_v1  ;;  %v14211_v4 = vld [vmem:[%s19172_s1 + $0x20] sm:$0xff]   ;;  %v14212_v5 = vld [vmem:[%s19172_s1 + $0x18] sm:$0xff]   ;;  %v14213_v7 = vld [vmem:[%s19172_s1 + $0x10] sm:$0xff]  }
   0xd   : > { %1122 = vmatpush1.bf16.msra.mxu0 %v14208_v0  ;;  %s19472_s18 = smov (!%p376_p3, %s10377_s18), 1  ;;  %v14214_v8 = vld [vmem:[%s19172_s1 + $0x8] sm:$0xff]   ;;  %v14215_v9 = vld [vmem:[%s19172_s1] sm:$0xff]   ;;  %v14216_v10 = vld [vmem:[%s19172_s1 + $0x78] sm:$0xff]  }
   0xe   : > { %1123 = vmatprep.subr.bf16.mxu0 %v14817_v1  ;;  %s14196_s27 = smul.u32 800, %s19472_s18  ;;  %v14217_v11 = vld [vmem:[%s19172_s1 + $0x70] sm:$0xff]   ;;  %v14218_v12 = vld [vmem:[%s19172_s1 + $0x68] sm:$0xff]   ;;  %v14219_v13 = vld [vmem:[%s19172_s1 + $0x60] sm:$0xff]   ;;  %s10383_s16 = sshll.u32 %s19472_s18, 3 }
   0xf   : > { %v14220_v14 = vld [vmem:[%s19172_s1 + $0x58] sm:$0xff]   ;;  %v14221_v15 = vld [vmem:[%s19172_s1 + $0x50] sm:$0xff]   ;;  %v14222_v16 = vld [vmem:[%s19172_s1 + $0x48] sm:$0xff]   ;;  %s384_s21 = scalar_lea.vmem %s19182_s11, %s10383_s16 }
  0x10   : > { %s14909_s13 = scalar_lea.vmem %s19171_s0, %s14196_s27  ;;  %v14223_v17 = vld [vmem:[%s19172_s1 + $0x40] sm:$0xff]  }
  0x11   : > { %1124 = vmatpush1.bf16.msra.mxu0 %v14209_v2  ;;  %v14226_v6 = vld [vmem:[%s14909_s13 + $0x4] ss:$8 sps:$4 sm:$0xff]   ;;  %v14224_v18 = vld [vmem:[%s14909_s13] ss:$8 sps:$4 sm:$0xff]   ;;  %v14227_v19 = vld [vmem:[%s14909_s13 + $0x14] ss:$8 sps:$4 sm:$0xff]  }
  0x12   : > { %1125 = vmatprep.subr.bf16.mxu0 %v14817_v1  ;;  %1153 = vmatprep.mubr.bf16.mxu0 %v14226_v6  ;;  %v14229_v20 = vld [vmem:[%s14909_s13 + $0x10] ss:$8 sps:$4 sm:$0xff]   ;;  %v14230_v21 = vld [vmem:[%s14909_s13 + $0x24] ss:$8 sps:$4 sm:$0xff]   ;;  %v14232_v22 = vld [vmem:[%s14909_s13 + $0x20] ss:$8 sps:$4 sm:$0xff]  }
  0x13   : > { %v14233_v23 = vld [vmem:[%s14909_s13 + $0x34] ss:$8 sps:$4 sm:$0xff]   ;;  %v14235_v24 = vld [vmem:[%s14909_s13 + $0x30] ss:$8 sps:$4 sm:$0xff]   ;;  %v14236_v25 = vld [vmem:[%s14909_s13 + $0x44] ss:$8 sps:$4 sm:$0xff]  }
  0x14   : > { %v14238_v26 = vld [vmem:[%s14909_s13 + $0x40] ss:$8 sps:$4 sm:$0xff]   ;;  %v14239_v27 = vld [vmem:[%s14909_s13 + $0x54] ss:$8 sps:$4 sm:$0xff]   ;;  %v14241_v28 = vld [vmem:[%s14909_s13 + $0x50] ss:$8 sps:$4 sm:$0xff]  }
  0x15   : > { %1126 = vmatpush1.bf16.msra.mxu0 %v14210_v3  ;;  %v14242_v29 = vld [vmem:[%s14909_s13 + $0x64] ss:$8 sps:$4 sm:$0xff]   ;;  %v14244_v30 = vld [vmem:[%s14909_s13 + $0x60] ss:$8 sps:$4 sm:$0xff]   ;;  %v14245_v31 = vld [vmem:[%s14909_s13 + $0x74] ss:$8 sps:$4 sm:$0xff]  }
  0x16   : > { %1127 = vmatprep.subr.bf16.mxu0 %v14817_v1  ;;  %v14247_v32 = vld [vmem:[%s14909_s13 + $0x70] ss:$8 sps:$4 sm:$0xff]   ;;  %v14248_v33 = vld [vmem:[%s14909_s13 + $0x84] ss:$8 sps:$4 sm:$0xff]   ;;  %v14250_v34 = vld [vmem:[%s14909_s13 + $0x80] ss:$8 sps:$4 sm:$0xff]  }
  0x17   : > { %v14251_v35 = vld [vmem:[%s14909_s13 + $0x94] ss:$8 sps:$4 sm:$0xff]   ;;  %v14253_v36 = vld [vmem:[%s14909_s13 + $0x90] ss:$8 sps:$4 sm:$0xff]   ;;  %v14254_v37 = vld [vmem:[%s14909_s13 + $0xa4] ss:$8 sps:$4 sm:$0xff]  }
  0x18   : > { %v14256_v38 = vld [vmem:[%s14909_s13 + $0xa0] ss:$8 sps:$4 sm:$0xff]   ;;  %v14257_v39 = vld [vmem:[%s14909_s13 + $0xb4] ss:$8 sps:$4 sm:$0xff]   ;;  %v14259_v40 = vld [vmem:[%s14909_s13 + $0xb0] ss:$8 sps:$4 sm:$0xff]  }
  0x19   : > { %1128 = vmatpush1.bf16.msra.mxu0 %v14211_v4  ;;  %v14260_v41 = vld [vmem:[%s14909_s13 + $0xc4] ss:$8 sps:$4 sm:$0xff]   ;;  %v14262_v42 = vld [vmem:[%s14909_s13 + $0xc0] ss:$8 sps:$4 sm:$0xff]   ;;  %v14263_v43 = vld [vmem:[%s14909_s13 + $0xd4] ss:$8 sps:$4 sm:$0xff]  }
  0x1a   : > { %1129 = vmatprep.subr.bf16.mxu0 %v14817_v1  ;;  %v14265_v44 = vld [vmem:[%s14909_s13 + $0xd0] ss:$8 sps:$4 sm:$0xff]   ;;  %v14266_v45 = vld [vmem:[%s14909_s13 + $0xe4] ss:$8 sps:$4 sm:$0xff]   ;;  %v14268_v46 = vld [vmem:[%s14909_s13 + $0xe0] ss:$8 sps:$4 sm:$0xff]  }
  0x1b   : > { %v14269_v47 = vld [vmem:[%s14909_s13 + $0xf4] ss:$8 sps:$4 sm:$0xff]   ;;  %v14271_v48 = vld [vmem:[%s14909_s13 + $0xf0] ss:$8 sps:$4 sm:$0xff]   ;;  %v14272_v49 = vld [vmem:[%s14909_s13 + $0x104] ss:$8 sps:$4 sm:$0xff]  }
  0x1c   : > { %v14274_v50 = vld [vmem:[%s14909_s13 + $0x100] ss:$8 sps:$4 sm:$0xff]   ;;  %v14275_v51 = vld [vmem:[%s14909_s13 + $0x114] ss:$8 sps:$4 sm:$0xff]   ;;  %v14277_v52 = vld [vmem:[%s14909_s13 + $0x110] ss:$8 sps:$4 sm:$0xff]  }
  0x1d   : > { %1130 = vmatpush1.bf16.msra.mxu0 %v14212_v5  ;;  %v14278_v53 = vld [vmem:[%s14909_s13 + $0x124] ss:$8 sps:$4 sm:$0xff]   ;;  %v14280_v54 = vld [vmem:[%s14909_s13 + $0x120] ss:$8 sps:$4 sm:$0xff]   ;;  %v14281_v55 = vld [vmem:[%s14909_s13 + $0x134] ss:$8 sps:$4 sm:$0xff]  }
  0x1e   : > { %1131 = vmatprep.subr.bf16.mxu0 %v14817_v1  ;;  %v14283_v56 = vld [vmem:[%s14909_s13 + $0x130] ss:$8 sps:$4 sm:$0xff]   ;;  %v14284_v57 = vld [vmem:[%s14909_s13 + $0x144] ss:$8 sps:$4 sm:$0xff]   ;;  %v14286_v58 = vld [vmem:[%s14909_s13 + $0x140] ss:$8 sps:$4 sm:$0xff]  }
  0x1f   : > { %v14287_v59 = vld [vmem:[%s14909_s13 + $0x154] ss:$8 sps:$4 sm:$0xff]   ;;  %v14289_v60 = vld [vmem:[%s14909_s13 + $0x150] ss:$8 sps:$4 sm:$0xff]   ;;  %v14290_v61 = vld [vmem:[%s14909_s13 + $0x164] ss:$8 sps:$4 sm:$0xff]  }
  0x20   : > { %v14292_v62 = vld [vmem:[%s14909_s13 + $0x160] ss:$8 sps:$4 sm:$0xff]   ;;  %v14293_v63 = vld [vmem:[%s14909_s13 + $0x174] ss:$8 sps:$4 sm:$0xff]   ;;  %v14295_v0 = vld [vmem:[%s14909_s13 + $0x170] ss:$8 sps:$4 sm:$0xff]  }
  0x21   : > { %1132 = vmatpush1.bf16.msra.mxu0 %v14213_v7  ;;  %v14298_v2 = vld [vmem:[%s14909_s13 + $0x180] ss:$8 sps:$4 sm:$0xff]   ;;  %v14299_v3 = vld [vmem:[%s14909_s13 + $0x194] ss:$8 sps:$4 sm:$0xff]   ;;  %v14301_v6 = vld [vmem:[%s14909_s13 + $0x190] ss:$8 sps:$4 sm:$0xff]  }
  0x22   : > { %1133 = vmatprep.subr.bf16.mxu0 %v14817_v1 }
  0x25   : > { %1134 = vmatpush1.bf16.msra.mxu0 %v14214_v8  ;;  %v14302_v8 = vld [vmem:[%s14909_s13 + $0x1a4] ss:$8 sps:$4 sm:$0xff]  }
  0x26   : > { %1135 = vmatprep.subr.bf16.mxu0 %v14817_v1 }
  0x29   : > { %1136 = vmatpush1.bf16.msra.mxu0 %v14215_v9 }
  0x2a   : > { %1137 = vmatprep.subr.bf16.mxu0 %v14817_v1 }
  0x2d   : > { %1138 = vmatpush2.bf16.msra.mxu0 %v14216_v10 }
  0x2e   : > { %1139 = vmatprep.subr.bf16.mxu0 %v14817_v1 }
  0x31   : > { %1140 = vmatpush2.bf16.msra.mxu0 %v14217_v11 }
  0x32   : > { %1141 = vmatprep.subr.bf16.mxu0 %v14817_v1 }
  0x35   : > { %1142 = vmatpush2.bf16.msra.mxu0 %v14218_v12  ;;  %v14304_v12 = vld [vmem:[%s14909_s13 + $0x1a0] ss:$8 sps:$4 sm:$0xff]  }
  0x36   : > { %1143 = vmatprep.subr.bf16.mxu0 %v14817_v1 }
  0x39   : > { %1144 = vmatpush2.bf16.msra.mxu0 %v14219_v13 }
  0x3a   : > { %1145 = vmatprep.subr.bf16.mxu0 %v14817_v1 }
  0x3d   : > { %1146 = vmatpush2.bf16.msra.mxu0 %v14220_v14  ;;  %v14305_v14 = vld [vmem:[%s14909_s13 + $0x1b4] ss:$8 sps:$4 sm:$0xff]  }
  0x3e   : > { %1147 = vmatprep.subr.bf16.mxu0 %v14817_v1 }
  0x41   : > { %1148 = vmatpush2.bf16.msra.mxu0 %v14221_v15 }
  0x42   : > { %1149 = vmatprep.subr.bf16.mxu0 %v14817_v1 }
  0x45   : > { %1150 = vmatpush2.bf16.msra.mxu0 %v14222_v16 }
  0x46   : > { %1151 = vmatprep.subr.bf16.mxu0 %v14817_v1  ;;  %v14296_v1 = vld [vmem:[%s14909_s13 + $0x184] ss:$8 sps:$4 sm:$0xff]  }
  0x49   : > { %1152 = vmatpush2.bf16.msra.mxu0 %v14223_v17 }
  0x4c   : > { %1154 = vmatmul.mubr.bf16.vlgmr.msra.gmra.mxu0 %v14224_v18  ;;  %v14307_v18 = vld [vmem:[%s14909_s13 + $0x1b0] ss:$8 sps:$4 sm:$0xff]  }
  0x4d   : > { %1161 = vmatprep.mubr.bf16.mxu0 %v14227_v19 }
  0x54   : > { %1162 = vmatmul.mubr.bf16.gmra.mxu0 %v14229_v20  ;;  %v14310_v20 = vld [vmem:[%s14909_s13 + $0x1c4] ss:$8 sps:$4 sm:$0xff]  }
  0x55   : > { %1169 = vmatprep.mubr.bf16.mxu0 %v14230_v21 }
  0x5c   : > { %1170 = vmatmul.mubr.bf16.gmra.mxu0 %v14232_v22 }
  0x5d   : > { %1177 = vmatprep.mubr.bf16.mxu0 %v14233_v23 }
  0x64   : > { %1178 = vmatmul.mubr.bf16.gmra.mxu0 %v14235_v24  ;;  %v14308_v24 = vld [vmem:[%s14909_s13 + $0x1c0] ss:$8 sps:$4 sm:$0xff]  }
  0x65   : > { %1185 = vmatprep.mubr.bf16.mxu0 %v14236_v25 }
  0x6c   : > { %1186 = vmatmul.mubr.bf16.gmra.mxu0 %v14238_v26  ;;  %v14313_v26 = vld [vmem:[%s14909_s13 + $0x1d4] ss:$8 sps:$4 sm:$0xff]  }
  0x6d   : > { %1193 = vmatprep.mubr.bf16.mxu0 %v14239_v27 }
  0x74   : > { %1194 = vmatmul.mubr.bf16.gmra.mxu0 %v14241_v28 }
  0x75   : > { %1201 = vmatprep.mubr.bf16.mxu0 %v14242_v29 }
  0x7c   : > { %1202 = vmatmul.mubr.bf16.gmra.mxu0 %v14244_v30  ;;  %v14311_v30 = vld [vmem:[%s14909_s13 + $0x1d0] ss:$8 sps:$4 sm:$0xff]  }
  0x7d   : > { %1209 = vmatprep.mubr.bf16.mxu0 %v14245_v31 }
  0x84   : > { %1210 = vmatmul.mubr.bf16.gmra.mxu0 %v14247_v32  ;;  %v14316_v32 = vld [vmem:[%s14909_s13 + $0x1e4] ss:$8 sps:$4 sm:$0xff]  }
  0x85   : > { %1217 = vmatprep.mubr.bf16.mxu0 %v14248_v33 }
  0x8c   : > { %1218 = vmatmul.mubr.bf16.gmra.mxu0 %v14250_v34 }
  0x8d   : > { %1225 = vmatprep.mubr.bf16.mxu0 %v14251_v35 }
  0x94   : > { %1226 = vmatmul.mubr.bf16.gmra.mxu0 %v14253_v36  ;;  %v14314_v36 = vld [vmem:[%s14909_s13 + $0x1e0] ss:$8 sps:$4 sm:$0xff]  }
  0x95   : > { %1233 = vmatprep.mubr.bf16.mxu0 %v14254_v37 }
  0x9c   : > { %1234 = vmatmul.mubr.bf16.gmra.mxu0 %v14256_v38  ;;  %v14319_v38 = vld [vmem:[%s14909_s13 + $0x1f4] ss:$8 sps:$4 sm:$0xff]  }
  0x9d   : > { %1241 = vmatprep.mubr.bf16.mxu0 %v14257_v39 }
  0xa4   : > { %1242 = vmatmul.mubr.bf16.gmra.mxu0 %v14259_v40 }
  0xa5   : > { %1249 = vmatprep.mubr.bf16.mxu0 %v14260_v41 }
  0xac   : > { %1250 = vmatmul.mubr.bf16.gmra.mxu0 %v14262_v42  ;;  %v14317_v42 = vld [vmem:[%s14909_s13 + $0x1f0] ss:$8 sps:$4 sm:$0xff]  }
  0xad   : > { %1257 = vmatprep.mubr.bf16.mxu0 %v14263_v43 }
  0xb4   : > { %1258 = vmatmul.mubr.bf16.gmra.mxu0 %v14265_v44  ;;  %v14322_v44 = vld [vmem:[%s14909_s13 + $0x204] ss:$8 sps:$4 sm:$0xff]  }
  0xb5   : > { %1265 = vmatprep.mubr.bf16.mxu0 %v14266_v45 }
  0xbc   : > { %1266 = vmatmul.mubr.bf16.gmra.mxu0 %v14268_v46 }
  0xbd   : > { %1273 = vmatprep.mubr.bf16.mxu0 %v14269_v47 }
  0xc4   : > { %1274 = vmatmul.mubr.bf16.gmra.mxu0 %v14271_v48  ;;  %v14320_v48 = vld [vmem:[%s14909_s13 + $0x200] ss:$8 sps:$4 sm:$0xff]  }
  0xc5   : > { %1281 = vmatprep.mubr.bf16.mxu0 %v14272_v49 }
  0xcc   : > { %1282 = vmatmul.mubr.bf16.gmra.mxu0 %v14274_v50  ;;  %v14325_v50 = vld [vmem:[%s14909_s13 + $0x214] ss:$8 sps:$4 sm:$0xff]  }
  0xcd   : > { %1289 = vmatprep.mubr.bf16.mxu0 %v14275_v51 }
  0xd4   : > { %1290 = vmatmul.mubr.bf16.gmra.mxu0 %v14277_v52 }
  0xd5   : > { %1297 = vmatprep.mubr.bf16.mxu0 %v14278_v53 }
  0xdc   : > { %1298 = vmatmul.mubr.bf16.gmra.mxu0 %v14280_v54  ;;  %v14323_v54 = vld [vmem:[%s14909_s13 + $0x210] ss:$8 sps:$4 sm:$0xff]  }
  0xdd   : > { %1305 = vmatprep.mubr.bf16.mxu0 %v14281_v55 }
  0xe4   : > { %1306 = vmatmul.mubr.bf16.gmra.mxu0 %v14283_v56  ;;  %v14328_v56 = vld [vmem:[%s14909_s13 + $0x224] ss:$8 sps:$4 sm:$0xff]  }
  0xe5   : > { %1313 = vmatprep.mubr.bf16.mxu0 %v14284_v57 }
  0xec   : > { %1314 = vmatmul.mubr.bf16.gmra.mxu0 %v14286_v58 }
  0xed   : > { %1321 = vmatprep.mubr.bf16.mxu0 %v14287_v59 }
  0xf4   : > { %1322 = vmatmul.mubr.bf16.gmra.mxu0 %v14289_v60  ;;  %v14326_v60 = vld [vmem:[%s14909_s13 + $0x220] ss:$8 sps:$4 sm:$0xff]  }
  0xf5   : > { %1329 = vmatprep.mubr.bf16.mxu0 %v14290_v61  ;;  %v14331_v61 = vld [vmem:[%s14909_s13 + $0x234] ss:$8 sps:$4 sm:$0xff]  }
  0xfc   : > { %1330 = vmatmul.mubr.bf16.gmra.mxu0 %v14292_v62 }
  0xfd   : > { %1337 = vmatprep.mubr.bf16.mxu0 %v14293_v63 }
 0x104   : > { %1338 = vmatmul.mubr.bf16.gmra.mxu0 %v14295_v0 }
 0x105   : > { %1345 = vmatprep.mubr.bf16.mxu0 %v14296_v1 }
 0x10c   : > { %v14995_v4 = vpop.f32.mrf.mxu0  ;;  %1346 = vmatmul.mubr.bf16.gmra.mxu0 %v14298_v2  ;;  %v14329_v2 = vld [vmem:[%s14909_s13 + $0x230] ss:$8 sps:$4 sm:$0xff]  }
 0x10d   : > { %1353 = vmatprep.mubr.bf16.mxu0 %v14299_v3  ;;  %v14334_v3 = vld [vmem:[%s14909_s13 + $0x244] ss:$8 sps:$4 sm:$0xff]  }
 0x10e   : > { %v1157_v5 = vpop.f32.mrf.mxu0 }
 0x110   : > { %v14998_v7 = vpop.f32.mrf.mxu0 }
 0x112   : > { %v1160_v9 = vpop.f32.mrf.mxu0 }
 0x114   : > { %v15001_v10 = vpop.f32.mrf.mxu0  ;;  %1354 = vmatmul.mubr.bf16.gmra.mxu0 %v14301_v6 }
 0x115   : > { %1361 = vmatprep.mubr.bf16.mxu0 %v14302_v8 }
 0x116   : > { %v1165_v11 = vpop.f32.mrf.mxu0 }
 0x117   : > { %v14332_v11 = vld [vmem:[%s14909_s13 + $0x240] ss:$8 sps:$4 sm:$0xff]  }
 0x118   : > { %v15004_v13 = vpop.f32.mrf.mxu0 }
 0x11a   : > { %v1168_v15 = vpop.f32.mrf.mxu0 }
 0x11c   : > { %v15007_v16 = vpop.f32.mrf.mxu0  ;;  %1362 = vmatmul.mubr.bf16.gmra.mxu0 %v14304_v12  ;;  %v14337_v12 = vld [vmem:[%s14909_s13 + $0x254] ss:$8 sps:$4 sm:$0xff]  }
 0x11d   : > { %1369 = vmatprep.mubr.bf16.mxu0 %v14305_v14 }
 0x11e   : > { %v1173_v17 = vpop.f32.mrf.mxu0 }
 0x11f   : > { %v15070_v17 = vld [vmem:[%s19173_s2] ss:$0 sm:$0xff] }
 0x120   : > { %v15010_v19 = vpop.f32.mrf.mxu0 }
 0x122   : > { %v1176_v21 = vpop.f32.mrf.mxu0 }
 0x123   : > { %v14335_v21 = vld [vmem:[%s14909_s13 + $0x250] ss:$8 sps:$4 sm:$0xff]  }
 0x124   : > { %v15013_v22 = vpop.f32.mrf.mxu0  ;;  %1370 = vmatmul.mubr.bf16.gmra.mxu0 %v14307_v18 }
 0x125   : > { %1377 = vmatprep.mubr.bf16.mxu0 %v14310_v20 }
 0x126   : > { %v1181_v23 = vpop.f32.mrf.mxu0 }
 0x127   : > { %v1156_v23 = vadd.f32 %v15070_v17, %v14995_v4  ;;  %v14338_v4 = vld [vmem:[%s14909_s13 + $0x260] ss:$8 sps:$4 sm:$0xff]  }
 0x128   : > { %v15016_v25 = vpop.f32.mrf.mxu0 }
 0x12a   : > { %v1184_v27 = vpop.f32.mrf.mxu0 }
 0x12c   : > { %v15019_v28 = vpop.f32.mrf.mxu0  ;;  %1378 = vmatmul.mubr.bf16.gmra.mxu0 %v14308_v24  ;;  %v14340_v24 = vld [vmem:[%s14909_s13 + $0x264] ss:$8 sps:$4 sm:$0xff]  }
 0x12d   : > { %1385 = vmatprep.mubr.bf16.mxu0 %v14313_v26 }
 0x12e   : > { %v1189_v29 = vpop.f32.mrf.mxu0 }
 0x130   : > { %v15022_v31 = vpop.f32.mrf.mxu0 }
 0x132   : > { %v1192_v33 = vpop.f32.mrf.mxu0 }
 0x134   : > { %v15025_v34 = vpop.f32.mrf.mxu0  ;;  %1386 = vmatmul.mubr.bf16.gmra.mxu0 %v14311_v30  ;;  %v1554_v30 = vmax.f32 %v1156_v23, 0.0 }
 0x135   : > { %1393 = vmatprep.mubr.bf16.mxu0 %v14316_v32  ;;  %v1159_v32 = vadd.f32 %v15070_v17, %v14998_v7 }
 0x136   : > { %v1197_v35 = vpop.f32.mrf.mxu0 }
 0x138   : > { %v15028_v37 = vpop.f32.mrf.mxu0 }
 0x13a   : > { %v1200_v39 = vpop.f32.mrf.mxu0 }
 0x13c   : > { %v15031_v40 = vpop.f32.mrf.mxu0  ;;  %1394 = vmatmul.mubr.bf16.gmra.mxu0 %v14314_v36 }
 0x13d   : > { %1401 = vmatprep.mubr.bf16.mxu0 %v14319_v38 }
 0x13e   : > { %v1205_v41 = vpop.f32.mrf.mxu0 }
 0x13f   : > { %v1555_v41 = vmax.f32 %v1159_v32, 0.0 }
 0x140   : > { %v15034_v43 = vpop.f32.mrf.mxu0 }
 0x142   : > { %v1208_v45 = vpop.f32.mrf.mxu0 }
 0x143   : > { %v14343_v45 = vld [vmem:[%s14909_s13 + $0x274] ss:$8 sps:$4 sm:$0xff]  }
 0x144   : > { %v15037_v46 = vpop.f32.mrf.mxu0  ;;  %1402 = vmatmul.mubr.bf16.gmra.mxu0 %v14317_v42  ;;  %v1164_v42 = vadd.f32 %v15070_v17, %v15001_v10 }
 0x145   : > { %1409 = vmatprep.mubr.bf16.mxu0 %v14322_v44 }
 0x146   : > { %v1213_v47 = vpop.f32.mrf.mxu0 }
 0x148   : > { %v15040_v49 = vpop.f32.mrf.mxu0 }
 0x14a   : > { %v1216_v51 = vpop.f32.mrf.mxu0 }
 0x14b   : > { %v1556_v51 = vmax.f32 %v1164_v42, 0.0 }
 0x14c   : > { %v15043_v52 = vpop.f32.mrf.mxu0  ;;  %1410 = vmatmul.mubr.bf16.gmra.mxu0 %v14320_v48 }
 0x14d   : > { %1417 = vmatprep.mubr.bf16.mxu0 %v14325_v50 }
 0x14e   : > { %v1221_v53 = vpop.f32.mrf.mxu0 }
 0x14f   : > { %v1167_v53 = vadd.f32 %v15070_v17, %v15004_v13 }
 0x150   : > { %v15046_v55 = vpop.f32.mrf.mxu0 }
 0x152   : > { %v1224_v57 = vpop.f32.mrf.mxu0 }
 0x154   : > { %v15049_v58 = vpop.f32.mrf.mxu0  ;;  %1418 = vmatmul.mubr.bf16.gmra.mxu0 %v14323_v54 }
 0x155   : > { %1425 = vmatprep.mubr.bf16.mxu0 %v14328_v56 }
 0x156   : > { %v1229_v59 = vpop.f32.mrf.mxu0 }
 0x158   : > { %v15053_v62 = vpop.f32.mrf.mxu0 }
 0x15a   : > { %v1232_v63 = vpop.f32.mrf.mxu0 }
 0x15c   : > { %v15055_v0 = vpop.f32.mrf.mxu0  ;;  %1426 = vmatmul.mubr.bf16.gmra.mxu0 %v14326_v60  ;;  %v1557_v60 = vmax.f32 %v1167_v53, 0.0 }
 0x15d   : > { %1433 = vmatprep.mubr.bf16.mxu0 %v14331_v61  ;;  %v1172_v61 = vadd.f32 %v15070_v17, %v15007_v16 }
 0x15e   : > { %v1237_v1 = vpop.f32.mrf.mxu0 }
 0x160   : > { %v15059_v5 = vpop.f32.mrf.mxu0 }
 0x162   : > { %v1240_v6 = vpop.f32.mrf.mxu0 }
 0x163   : > { %v14346_v6 = vld [vmem:[%s14909_s13 + $0x284] ss:$8 sps:$4 sm:$0xff]  }
 0x164   : > { %v15061_v8 = vpop.f32.mrf.mxu0  ;;  %1434 = vmatmul.mubr.bf16.gmra.mxu0 %v14329_v2  ;;  %v14341_v2 = vld [vmem:[%s14909_s13 + $0x270] ss:$8 sps:$4 sm:$0xff]  }
 0x165   : > { %1441 = vmatprep.mubr.bf16.mxu0 %v14334_v3 }
 0x166   : > { %v1245_v9 = vpop.f32.mrf.mxu0 }
 0x168   : > { %v15065_v14 = vpop.f32.mrf.mxu0 }
 0x16a   : > { %v1248_v15 = vpop.f32.mrf.mxu0 }
 0x16c   : > { %v15072_v18 = vpop.f32.mrf.mxu0  ;;  %1442 = vmatmul.mubr.bf16.gmra.mxu0 %v14332_v11  ;;  %v1558_v11 = vmax.f32 %v1172_v61, 0.0 }
 0x16d   : > { %1449 = vmatprep.mubr.bf16.mxu0 %v14337_v12  ;;  %v1175_v12 = vadd.f32 %v15070_v17, %v15010_v19 }
 0x16e   : > { %v1253_v20 = vpop.f32.mrf.mxu0 }
 0x170   : > { %v1254_v26 = vpop.f32.mrf.mxu0 }
 0x171   : > { %v1255_v27 = vadd.f32 %v15070_v17, %v1254_v26  ;;  %v1180_v26 = vadd.f32 %v15070_v17, %v15013_v22 }
 0x172   : > { %v1256_v29 = vpop.f32.mrf.mxu0 }
 0x173   : > { %v1579_v33 = vmax.f32 %v1255_v27, 0.0 }
 0x174   : > { %v1259_v35 = vpop.f32.mrf.mxu0  ;;  %1450 = vmatmul.mubr.bf16.gmra.mxu0 %v14335_v21 }
 0x175   : > { %v15081_v36 = vmax.f32 %v1554_v30, %v1579_v33  ;;  %v1260_v38 = vadd.f32 %v15070_v17, %v1259_v35  ;;  %1457 = vmatprep.mubr.bf16.mxu0 %v14340_v24  ;;  %v1559_v24 = vmax.f32 %v1175_v12, 0.0  ;;  %v14344_v30 = vld [vmem:[%s14909_s13 + $0x280] ss:$8 sps:$4 sm:$0xff]   ;;  %v14349_v33 = vld [vmem:[%s14909_s13 + $0x294] ss:$8 sps:$4 sm:$0xff]  }
 0x176   : > { %v1261_v39 = vpop.f32.mrf.mxu0 }
 0x177   : > { %v1580_v44 = vmax.f32 %v1260_v38, 0.0  ;;  %v1560_v38 = vmax.f32 %v1180_v26, 0.0  ;;  %v1183_v39 = vadd.f32 %v15070_v17, %v15016_v25 }
 0x178   : > { %v1262_v47 = vpop.f32.mrf.mxu0 }
 0x179   : > { %v15088_v48 = vmax.f32 %v1555_v41, %v1580_v44  ;;  %v1263_v7 = vadd.f32 %v15070_v17, %v1262_v47  ;;  %v1188_v47 = vadd.f32 %v15070_v17, %v15019_v28 }
 0x17a   : > { %v1264_v50 = vpop.f32.mrf.mxu0 }
 0x17b   : > { %v1581_v54 = vmax.f32 %v1263_v7, 0.0 }
 0x17c   : > { %v1267_v56 = vpop.f32.mrf.mxu0  ;;  %1458 = vmatmul.mubr.bf16.gmra.mxu0 %v14338_v4 }
 0x17d   : > { %v15093_v57 = vmax.f32 %v1556_v51, %v1581_v54  ;;  %v1268_v10 = vadd.f32 %v15070_v17, %v1267_v56  ;;  %1465 = vmatprep.mubr.bf16.mxu0 %v14343_v45  ;;  %v1561_v45 = vmax.f32 %v1183_v39, 0.0  ;;  %v14347_v51 = vld [vmem:[%s14909_s13 + $0x290] ss:$8 sps:$4 sm:$0xff]   ;;  %v14352_v54 = vld [vmem:[%s14909_s13 + $0x2a4] ss:$8 sps:$4 sm:$0xff]  }
 0x17e   : > { %v1269_v59 = vpop.f32.mrf.mxu0 }
 0x17f   : > { %v1582_v63 = vmax.f32 %v1268_v10, 0.0  ;;  %v1562_v10 = vmax.f32 %v1188_v47, 0.0  ;;  %v1191_v59 = vadd.f32 %v15070_v17, %v15022_v31 }
 0x180   : > { %v1270_v1 = vpop.f32.mrf.mxu0 }
 0x181   : > { %v15099_v3 = vmax.f32 %v1557_v60, %v1582_v63  ;;  %v1271_v13 = vadd.f32 %v15070_v17, %v1270_v1 }
 0x182   : > { %v1272_v9 = vpop.f32.mrf.mxu0 }
 0x183   : > { %v1583_v15 = vmax.f32 %v1271_v13, 0.0  ;;  %v1196_v13 = vadd.f32 %v15070_v17, %v15025_v34 }
 0x184   : > { %v1275_v20 = vpop.f32.mrf.mxu0  ;;  %1466 = vmatmul.mubr.bf16.gmra.mxu0 %v14341_v2  ;;  %v1563_v2 = vmax.f32 %v1191_v59, 0.0  ;;  %v14356_v59 = vld [vmem:[%s14909_s13 + $0x2c0] ss:$8 sps:$4 sm:$0xff]  }
 0x185   : > { %v15105_v21 = vmax.f32 %v1558_v11, %v1583_v15  ;;  %v1276_v16 = vadd.f32 %v15070_v17, %v1275_v20  ;;  %1473 = vmatprep.mubr.bf16.mxu0 %v14346_v6  ;;  %v14350_v11 = vld [vmem:[%s14909_s13 + $0x2a0] ss:$8 sps:$4 sm:$0xff]   ;;  %v14355_v15 = vld [vmem:[%s14909_s13 + $0x2b4] ss:$8 sps:$4 sm:$0xff]  }
 0x186   : > { %v1277_v23 = vpop.f32.mrf.mxu0 }
 0x187   : > { %v1584_v27 = vmax.f32 %v1276_v16, 0.0  ;;  %v1564_v16 = vmax.f32 %v1196_v13, 0.0  ;;  %v1199_v23 = vadd.f32 %v15070_v17, %v15028_v37  ;;  %v1215_v13 = vadd.f32 %v15070_v17, %v15040_v49  ;;  %v14377_v49 = vld [vmem:[%s19174_s3 + $0x28] sm:$0xff]  }
 0x188   : > { %v1278_v29 = vpop.f32.mrf.mxu0 }
 0x189   : > { %v15111_v32 = vmax.f32 %v1559_v24, %v1584_v27  ;;  %v1279_v19 = vadd.f32 %v15070_v17, %v1278_v29 }
 0x18a   : > { %v1280_v35 = vpop.f32.mrf.mxu0 }
 0x18b   : > { %v1585_v4 = vmax.f32 %v1279_v19, 0.0  ;;  %v1204_v19 = vadd.f32 %v15070_v17, %v15031_v40 }
 0x18c   : > { %v1283_v41 = vpop.f32.mrf.mxu0  ;;  %1474 = vmatmul.mubr.bf16.gmra.mxu0 %v14344_v30  ;;  %v1565_v30 = vmax.f32 %v1199_v23, 0.0  ;;  %v1220_v23 = vadd.f32 %v15070_v17, %v15043_v52  ;;  %v1223_v52 = vadd.f32 %v15070_v17, %v15046_v55  ;;  %v1228_v55 = vadd.f32 %v15070_v17, %v15049_v58  ;;  %v14382_v58 = vld [vmem:[%s19174_s3 + $0x10] sm:$0xff]  }
 0x18d   : > { %v15117_v42 = vmax.f32 %v1560_v38, %v1585_v4  ;;  %v1284_v22 = vadd.f32 %v15070_v17, %v1283_v41  ;;  %1481 = vmatprep.mubr.bf16.mxu0 %v14349_v33  ;;  %v14353_v38 = vld [vmem:[%s14909_s13 + $0x2b0] ss:$8 sps:$4 sm:$0xff]   ;;  %v14358_v4 = vld [vmem:[%s14909_s13 + $0x2c4] ss:$8 sps:$4 sm:$0xff]  }
 0x18e   : > { %v1285_v44 = vpop.f32.mrf.mxu0 }
 0x18f   : > { %v1586_v7 = vmax.f32 %v1284_v22, 0.0  ;;  %v1566_v22 = vmax.f32 %v1204_v19, 0.0  ;;  %v1207_v44 = vadd.f32 %v15070_v17, %v15034_v43  ;;  %v14364_v19 = vld [vmem:[%s14909_s13 + $0x2e4] ss:$8 sps:$4 sm:$0xff]  }
 0x190   : > { %v1286_v50 = vpop.f32.mrf.mxu0 }
 0x191   : > { %v15123_v53 = vmax.f32 %v1561_v45, %v1586_v7  ;;  %v1287_v25 = vadd.f32 %v15070_v17, %v1286_v50 }
 0x192   : > { %v1288_v56 = vpop.f32.mrf.mxu0 }
 0x193   : > { %v1587_v60 = vmax.f32 %v1287_v25, 0.0  ;;  %v1567_v25 = vmax.f32 %v1207_v44, 0.0  ;;  %v19183_v56 = vmov 0.0  }
 0x194   : > { %v1291_v61 = vpop.f32.mrf.mxu0  ;;  %1482 = vmatmul.mubr.bf16.gmra.mxu0 %v14347_v51  ;;  %v14375_v51 = vld [vmem:[%s19174_s3 + $0x38] sm:$0xff]   ;;  %12668 = vmatprep.subr.bf16.mxu0 %v19183_v56 }
 0x195   : > { %v15129_v63 = vmax.f32 %v1562_v10, %v1587_v60  ;;  %v1292_v28 = vadd.f32 %v15070_v17, %v1291_v61  ;;  %1489 = vmatprep.mubr.bf16.mxu0 %v14352_v54  ;;  %v1212_v54 = vadd.f32 %v15070_v17, %v15037_v46  ;;  %12356 = vmatprep.subr.bf16.mxu1 %v19183_v56  ;;  %v14376_v46 = vld [vmem:[%s19174_s3 + $0x30] sm:$0xff]  }
 0x196   : > { %v1293_v1 = vpop.f32.mrf.mxu0  ;;  %12357 = vmatpush3.bf16.msra.mxu1 %v14375_v51  ;;  %v14362_v51 = vld [vmem:[%s14909_s13 + $0x2e0] ss:$8 sps:$4 sm:$0xff]   ;;  %12372 = vmatprep.mubr.msk.bf16.mxu1 %vm14819_vm0, %v19183_v56 }
 0x197   : > { %v1588_v6 = vmax.f32 %v1292_v28, 0.0  ;;  %v14361_v28 = vld [vmem:[%s14909_s13 + $0x2d4] ss:$8 sps:$4 sm:$0xff]   ;;  %12358 = vmatprep.subr.bf16.mxu1 %v19183_v56 }
 0x198   : > { %v1294_v9 = vpop.f32.mrf.mxu0 }
 0x199   : > { %v15135_v12 = vmax.f32 %v1563_v2, %v1588_v6  ;;  %v1295_v31 = vadd.f32 %v15070_v17, %v1294_v9  ;;  %v1568_v2 = vmax.f32 %v1212_v54, 0.0  ;;  %v14374_v9 = vld [vmem:[%s19174_s3 + $0x1b8] sm:$0xff]  }
 0x19a   : > { %v1296_v20 = vpop.f32.mrf.mxu0  ;;  %12359 = vmatpush3.bf16.msra.mxu1 %v14376_v46  ;;  %12669 = vmatpush3.bf16.msra.mxu0 %v14374_v9  ;;  %v14381_v9 = vld [vmem:[%s19174_s3 + $0x1a8] sm:$0xff]  }
 0x19b   : > { %v1589_v24 = vmax.f32 %v1295_v31, 0.0  ;;  %12360 = vmatprep.subr.bf16.mxu1 %v19183_v56  ;;  %12670 = vmatprep.subr.bf16.mxu0 %v19183_v56 }
 0x19c   : > { %v1299_v26 = vpop.f32.mrf.mxu0  ;;  %1490 = vmatmul.mubr.bf16.gmra.mxu0 %v14350_v11 }
 0x19d   : > { %v15141_v27 = vmax.f32 %v1564_v16, %v1589_v24  ;;  %v1300_v34 = vadd.f32 %v15070_v17, %v1299_v26  ;;  %1497 = vmatprep.mubr.bf16.mxu0 %v14355_v15  ;;  %v1569_v16 = vmax.f32 %v1215_v13, 0.0 }
 0x19e   : > { %v1301_v29 = vpop.f32.mrf.mxu0  ;;  %12361 = vmatpush3.bf16.msra.mxu1 %v14377_v49 }
 0x19f   : > { %v1590_v33 = vmax.f32 %v1300_v34, 0.0  ;;  %v14359_v34 = vld [vmem:[%s14909_s13 + $0x2d0] ss:$8 sps:$4 sm:$0xff]   ;;  %12362 = vmatprep.subr.bf16.mxu1 %v19183_v56 }
 0x1a0   : > { %v1302_v35 = vpop.f32.mrf.mxu0 }
 0x1a1   : > { %v15147_v39 = vmax.f32 %v1565_v30, %v1590_v33  ;;  %v1303_v37 = vadd.f32 %v15070_v17, %v1302_v35  ;;  %v14378_v35 = vld [vmem:[%s19174_s3 + $0x20] sm:$0xff]  }
 0x1a2   : > { %v1304_v41 = vpop.f32.mrf.mxu0  ;;  %12363 = vmatpush3.bf16.msra.mxu1 %v14378_v35 }
 0x1a3   : > { %v1591_v45 = vmax.f32 %v1303_v37, 0.0  ;;  %12364 = vmatprep.subr.bf16.mxu1 %v19183_v56 }
 0x1a4   : > { %v1307_v47 = vpop.f32.mrf.mxu0  ;;  %1498 = vmatmul.mubr.bf16.gmra.mxu0 %v14353_v38  ;;  %v1570_v38 = vmax.f32 %v1220_v23, 0.0 }
 0x1a5   : > { %v15153_v7 = vmax.f32 %v1566_v22, %v1591_v45  ;;  %v1308_v40 = vadd.f32 %v15070_v17, %v1307_v47  ;;  %1505 = vmatprep.mubr.bf16.mxu0 %v14358_v4  ;;  %v14380_v45 = vld [vmem:[%s19174_s3 + $0x18] sm:$0xff]   ;;  %v1571_v47 = vmax.f32 %v1223_v52, 0.0 }
 0x1a6   : > { %v1309_v50 = vpop.f32.mrf.mxu0  ;;  %12365 = vmatpush3.bf16.msra.mxu1 %v14380_v45 }
 0x1a7   : > { %v1592_v43 = vmax.f32 %v1308_v40, 0.0  ;;  %12366 = vmatprep.subr.bf16.mxu1 %v19183_v56 }
 0x1a8   : > { %v1310_v10 = vpop.f32.mrf.mxu0 }
 0x1a9   : > { %v15164_v60 = vmax.f32 %v1567_v25, %v1592_v43  ;;  %v1311_v61 = vadd.f32 %v15070_v17, %v1310_v10  ;;  %v14367_v43 = vld [vmem:[%s14909_s13 + $0x2f4] ss:$8 sps:$4 sm:$0xff]  }
 0x1aa   : > { %v1312_v1 = vpop.f32.mrf.mxu0  ;;  %12367 = vmatpush3.bf16.msra.mxu1 %v14382_v58 }
 0x1ab   : > { %v1593_v6 = vmax.f32 %v1311_v61, 0.0  ;;  %v1572_v61 = vmax.f32 %v1228_v55, 0.0  ;;  %12368 = vmatprep.subr.bf16.mxu1 %v19183_v56  ;;  %v14368_v55 = vld [vmem:[%s14909_s13 + $0x300] ss:$8 sps:$4 sm:$0xff]  }
 0x1ac   : > { %v1315_v11 = vpop.f32.mrf.mxu0  ;;  %1506 = vmatmul.mubr.bf16.gmra.mxu0 %v14356_v59  ;;  %v14379_v59 = vld [vmem:[%s19174_s3 + $0x1b0] sm:$0xff]  }
 0x1ad   : > { %v15177_v31 = vmax.f32 %v1568_v2, %v1593_v6  ;;  %v1316_v15 = vadd.f32 %v15070_v17, %v1315_v11  ;;  %1513 = vmatprep.mubr.bf16.mxu0 %v14361_v28  ;;  %v1231_v28 = vadd.f32 %v15070_v17, %v15053_v62  ;;  %12671 = vmatpush3.bf16.msra.mxu0 %v14379_v59  ;;  %v14384_v62 = vld [vmem:[%s19174_s3 + $0x8] sm:$0xff]  }
 0x1ae   : > { %v1317_v20 = vpop.f32.mrf.mxu0  ;;  %12672 = vmatprep.subr.bf16.mxu0 %v19183_v56  ;;  %12369 = vmatpush3.bf16.msra.mxu1 %v14384_v62  ;;  %v14371_v62 = vld [vmem:[%s14909_s13 + $0x310] ss:$8 sps:$4 sm:$0xff]  }
 0x1af   : > { %v1594_v24 = vmax.f32 %v1316_v15, 0.0  ;;  %v1573_v11 = vmax.f32 %v1231_v28, 0.0  ;;  %v1236_v15 = vadd.f32 %v15070_v17, %v15055_v0  ;;  %12370 = vmatprep.subr.bf16.mxu1 %v19183_v56  ;;  %v14386_v0 = vld [vmem:[%s19174_s3] sm:$0xff]  }
 0x1b0   : > { %v1318_v26 = vpop.f32.mrf.mxu0 }
 0x1b1   : > { %v15188_v29 = vmax.f32 %v1569_v16, %v1594_v24  ;;  %v1319_v30 = vadd.f32 %v15070_v17, %v1318_v26  ;;  %v14365_v16 = vld [vmem:[%s14909_s13 + $0x2f0] ss:$8 sps:$4 sm:$0xff]   ;;  %v14370_v26 = vld [vmem:[%s14909_s13 + $0x304] ss:$8 sps:$4 sm:$0xff]   ;;  %12673 = vmatpush3.bf16.msra.mxu0 %v14381_v9 }
 0x1b2   : > { %v1320_v33 = vpop.f32.mrf.mxu0  ;;  %12674 = vmatprep.subr.bf16.mxu0 %v19183_v56  ;;  %12371 = vmatpush3.bf16.msra.mxu1 %v14386_v0 }
 0x1b3   : > { %v1595_v37 = vmax.f32 %v1319_v30, 0.0  ;;  %v14383_v30 = vld [vmem:[%s19174_s3 + $0x1a0] sm:$0xff]   ;;  %v1239_v33 = vadd.f32 %v15070_v17, %v15059_v5  ;;  %12408 = vmatprep.subr.bf16.mxu1 %v19183_v56 }
 0x1b4   : > { %v1323_v4 = vpop.f32.mrf.mxu0  ;;  %1514 = vmatmul.mubr.bf16.gmra.mxu0 %v14359_v34 }
 0x1b5   : > { %v15198_v41 = vmax.f32 %v1570_v38, %v1595_v37  ;;  %v1324_v22 = vadd.f32 %v15070_v17, %v1323_v4  ;;  %1521 = vmatprep.mubr.bf16.mxu0 %v14364_v19  ;;  %v1574_v19 = vmax.f32 %v1236_v15, 0.0  ;;  %12675 = vmatpush3.bf16.msra.mxu0 %v14383_v30  ;;  %v1575_v5 = vmax.f32 %v1239_v33, 0.0 }
 0x1b6   : > { %v1325_v44 = vpop.f32.mrf.mxu0  ;;  %12676 = vmatprep.subr.bf16.mxu0 %v19183_v56 }
 0x1b7   : > { %v1596_v40 = vmax.f32 %v1324_v22, 0.0  ;;  %v14385_v22 = vld [vmem:[%s19174_s3 + $0x198] sm:$0xff]   ;;  %v1244_v44 = vadd.f32 %v15070_v17, %v15061_v8  ;;  %v1247_v8 = vadd.f32 %v15070_v17, %v15065_v14  ;;  %v1252_v14 = vadd.f32 %v15070_v17, %v15072_v18 }
 0x1b8   : > { %v1326_v50 = vpop.f32.mrf.mxu0 }
 0x1b9   : > { %v15208_v25 = vmax.f32 %v1571_v47, %v1596_v40  ;;  %v1327_v54 = vadd.f32 %v15070_v17, %v1326_v50  ;;  %12677 = vmatpush3.bf16.msra.mxu0 %v14385_v22 }
 0x1ba   : > { %v1328_v10 = vpop.f32.mrf.mxu0  ;;  %12678 = vmatprep.subr.bf16.mxu0 %v19183_v56 }
 0x1bb   : > { %v1597_v1 = vmax.f32 %v1327_v54, 0.0  ;;  %v1576_v10 = vmax.f32 %v1244_v44, 0.0 }
 0x1bc   : > { %v1331_v46 = vpop.f32.mrf.mxu0  ;;  %1522 = vmatmul.mubr.bf16.gmra.mxu0 %v14362_v51  ;;  %v14373_v51 = vld [vmem:[%s14909_s13 + $0x314] ss:$8 sps:$4 sm:$0xff]  }
 0x1bd   : > { %v15221_v2 = vmax.f32 %v1572_v61, %v1597_v1  ;;  %v1332_v13 = vadd.f32 %v15070_v17, %v1331_v46  ;;  %1529 = vmatprep.mubr.bf16.mxu0 %v14367_v43  ;;  %v14387_v43 = vld [vmem:[%s19174_s3 + $0x190] sm:$0xff]   ;;  %v14389_v46 = vld [vmem:[%s19174_s3 + $0x188] sm:$0xff]  }
 0x1be   : > { %v1333_v6 = vpop.f32.mrf.mxu0  ;;  %12679 = vmatpush3.bf16.msra.mxu0 %v14387_v43 }
 0x1bf   : > { %v1598_v20 = vmax.f32 %v1332_v13, 0.0  ;;  %12680 = vmatprep.subr.bf16.mxu0 %v19183_v56  ;;  %v1577_v13 = vmax.f32 %v1247_v8, 0.0 }
 0x1c0   : > { %v1334_v49 = vpop.f32.mrf.mxu0 }
 0x1c1   : > { %v15235_v23 = vmax.f32 %v1573_v11, %v1598_v20  ;;  %v1335_v24 = vadd.f32 %v15070_v17, %v1334_v49  ;;  %v14390_v49 = vld [vmem:[%s19174_s3 + $0x180] sm:$0xff]  }
 0x1c2   : > { %v1336_v34 = vpop.f32.mrf.mxu0  ;;  %12681 = vmatpush3.bf16.msra.mxu0 %v14389_v46 }
 0x1c3   : > { %v1599_v35 = vmax.f32 %v1335_v24, 0.0  ;;  %12682 = vmatprep.subr.bf16.mxu0 %v19183_v56 }
 0x1c4   : > { %v1339_v38 = vpop.f32.mrf.mxu0  ;;  %1530 = vmatmul.mubr.bf16.gmra.mxu0 %v14365_v16  ;;  %v1578_v16 = vmax.f32 %v1252_v14, 0.0 }
 0x1c5   : > { %v15249_v52 = vmax.f32 %v1574_v19, %v1599_v35  ;;  %v1340_v37 = vadd.f32 %v15070_v17, %v1339_v38  ;;  %1537 = vmatprep.mubr.bf16.mxu0 %v14370_v26 }
 0x1c6   : > { %v1341_v4 = vpop.f32.mrf.mxu0  ;;  %12683 = vmatpush3.bf16.msra.mxu0 %v14390_v49 }
 0x1c7   : > { %v1600_v45 = vmax.f32 %v1340_v37, 0.0  ;;  %12772 = vmatprep.subr.bf16.mxu0 %v19183_v56 }
 0x1c8   : > { %v1342_v47 = vpop.f32.mrf.mxu0 }
 0x1c9   : > { %v15262_v40 = vmax.f32 %v1575_v5, %v1600_v45  ;;  %v1343_v50 = vadd.f32 %v15070_v17, %v1342_v47 }
 0x1ca   : > { %v1344_v54 = vpop.f32.mrf.mxu0 }
 0x1cb   : > { %v1601_v59 = vmax.f32 %v1343_v50, 0.0 }
 0x1cc   : > { %v1347_v58 = vpop.f32.mrf.mxu0  ;;  %1538 = vmatmul.mubr.bf16.gmra.mxu0 %v14368_v55 }
 0x1cd   : > { %v15272_v61 = vmax.f32 %v1576_v10, %v1601_v59  ;;  %v1348_v28 = vadd.f32 %v15070_v17, %v1347_v58  ;;  %1545 = vmatprep.mubr.bf16.mxu0 %v14373_v51 }
 0x1ce   : > { %v1349_v1 = vpop.f32.mrf.mxu0 }
 0x1cf   : > { %19195 = vst [vmem:[#allocation6_spill] sm:$0xff] %v15272_v61  ;;  %v1602_v6 = vmax.f32 %v1348_v28, 0.0 }
 0x1d0   : > { %v1350_v9 = vpop.f32.mrf.mxu0 }
 0x1d1   : > { %v15282_v11 = vmax.f32 %v1577_v13, %v1602_v6  ;;  %v1351_v15 = vadd.f32 %v15070_v17, %v1350_v9 }
 0x1d2   : > { %v1352_v20 = vpop.f32.mrf.mxu0 }
 0x1d3   : > { %19196 = vst [vmem:[#allocation7_spill] sm:$0xff] %v15282_v11  ;;  %v1603_v24 = vmax.f32 %v1351_v15, 0.0 }
 0x1d4   : > { %v1355_v26 = vpop.f32.mrf.mxu0  ;;  %1546 = vmatmul.mubr.bf16.gmra.mxu0 %v14371_v62 }
 0x1d5   : > { %v15289_v18 = vmax.f32 %v1578_v16, %v1603_v24  ;;  %12684 = vmatprep.mubr.msk.bf16.mxu0 %vm14819_vm0, %v19183_v56 }
 0x1d6   : > { %v1357_v34 = vpop.f32.mrf.mxu0 }
 0x1d7   : > { %19197 = vst [vmem:[#allocation8_spill] sm:$0xff] %v15289_v18 }
 0x1d8   : > { %v1358_v30 = vpop.f32.mrf.mxu0 }
 0x1da   : > { %v1360_v0 = vpop.f32.mrf.mxu0 }
 0x1dc   : > { %v1363_v19 = vpop.f32.mrf.mxu0 }
 0x1de   : > { %v1365_v33 = vpop.f32.mrf.mxu0 }
 0x1e0   : > { %v15294_v35 = vpop.f32.mrf.mxu0 }
 0x1e2   : > { %v1368_v38 = vpop.f32.mrf.mxu0 }
 0x1e4   : > { %v15296_v37 = vpop.f32.mrf.mxu0 }
 0x1e6   : > { %v1373_v4 = vpop.f32.mrf.mxu0 }
 0x1e8   : > { %v15298_v22 = vpop.f32.mrf.mxu0 }
 0x1ea   : > { %v1376_v5 = vpop.f32.mrf.mxu0 }
 0x1ec   : > { %v15300_v44 = vpop.f32.mrf.mxu0 }
 0x1ee   : > { %v1381_v45 = vpop.f32.mrf.mxu0 }
 0x1f0   : > { %v15302_v47 = vpop.f32.mrf.mxu0 }
 0x1f2   : > { %v1384_v55 = vpop.f32.mrf.mxu0 }
 0x1f4   : > { %v15304_v50 = vpop.f32.mrf.mxu0 }
 0x1f6   : > { %v1389_v51 = vpop.f32.mrf.mxu0 }
 0x1f8   : > { %v15306_v54 = vpop.f32.mrf.mxu0 }
 0x1fa   : > { %v1392_v43 = vpop.f32.mrf.mxu0 }
 0x1fc   : > { %v15308_v10 = vpop.f32.mrf.mxu0 }
 0x1fe   : > { %v1397_v8 = vpop.f32.mrf.mxu0 }
 0x200   : > { %v15310_v59 = vpop.f32.mrf.mxu0 }
 0x202   : > { %v1400_v58 = vpop.f32.mrf.mxu0 }
 0x204   : > { %v15312_v28 = vpop.f32.mrf.mxu0 }
 0x206   : > { %v1405_v1 = vpop.f32.mrf.mxu0 }
 0x208   : > { %v15314_v46 = vpop.f32.mrf.mxu0 }
 0x20a   : > { %v1408_v13 = vpop.f32.mrf.mxu0 }
 0x20b   : > { %v1356_v13 = vadd.f32 %v15070_v17, %v1355_v26 }
 0x20c   : > { %v15316_v14 = vpop.f32.mrf.mxu0 }
 0x20e   : > { %v1413_v6 = vpop.f32.mrf.mxu0 }
 0x210   : > { %v15318_v9 = vpop.f32.mrf.mxu0 }
 0x212   : > { %v1416_v62 = vpop.f32.mrf.mxu0 }
 0x214   : > { %v15320_v15 = vpop.f32.mrf.mxu0 }
 0x216   : > { %v1421_v20 = vpop.f32.mrf.mxu0 }
 0x218   : > { %v15322_v49 = vpop.f32.mrf.mxu0 }
 0x21a   : > { %v1424_v16 = vpop.f32.mrf.mxu0 }
 0x21b   : > { %v1604_v16 = vmax.f32 %v1356_v13, 0.0 }
 0x21c   : > { %v15324_v24 = vpop.f32.mrf.mxu0 }
 0x21e   : > { %v1429_v34 = vpop.f32.mrf.mxu0 }
 0x21f   : > { %v1359_v34 = vadd.f32 %v15070_v17, %v1358_v30  ;;  %v1367_v30 = vadd.f32 %v15070_v17, %v15294_v35 }
 0x220   : > { %v15326_v0 = vpop.f32.mrf.mxu0 }
 0x221   : > { %v1605_v18 = vmax.f32 %v1359_v34, 0.0 }
 0x222   : > { %v1432_v33 = vpop.f32.mrf.mxu0 }
 0x224   : > { %v15328_v38 = vpop.f32.mrf.mxu0 }
 0x226   : > { %v1437_v4 = vpop.f32.mrf.mxu0 }
 0x228   : > { %v15330_v5 = vpop.f32.mrf.mxu0 }
 0x22a   : > { %v1440_v45 = vpop.f32.mrf.mxu0 }
 0x22c   : > { %v15332_v55 = vpop.f32.mrf.mxu0 }
 0x22e   : > { %v1445_v51 = vpop.f32.mrf.mxu0 }
 0x230   : > { %v15334_v43 = vpop.f32.mrf.mxu0 }
 0x232   : > { %v1448_v8 = vpop.f32.mrf.mxu0 }
 0x233   : > { %v1364_v8 = vadd.f32 %v15070_v17, %v1363_v19  ;;  %v14388_v19 = vld [vmem:[%s19174_s3 + $0x78] sm:$0xff]  }
 0x234   : > { %v15336_v58 = vpop.f32.mrf.mxu0 }
 0x236   : > { %v1453_v1 = vpop.f32.mrf.mxu0 }
 0x238   : > { %v1454_v6 = vpop.f32.mrf.mxu0 }
 0x239   : > { %v1455_v62 = vadd.f32 %v15070_v17, %v1454_v6 }
 0x23a   : > { %v1456_v20 = vpop.f32.mrf.mxu0 }
 0x23b   : > { %v1629_v33 = vmax.f32 %v1455_v62, 0.0  ;;  %v1606_v20 = vmax.f32 %v1364_v8, 0.0 }
 0x23c   : > { %v1459_v4 = vpop.f32.mrf.mxu0 }
 0x23d   : > { %v1879_v45 = vmax.f32 %v1604_v16, %v1629_v33  ;;  %v1460_v51 = vadd.f32 %v15070_v17, %v1459_v4  ;;  %v1607_v33 = vmax.f32 %v1367_v30, 0.0  ;;  %v1372_v4 = vadd.f32 %v15070_v17, %v15296_v37  ;;  %v14392_v30 = vld [vmem:[%s19174_s3 + $0x68] sm:$0xff]  }
 0x23e   : > { %v1461_v56 = vpop.f32.mrf.mxu0 }
 0x23f   : > { %v1904_v1 = vmax.f32 %v15081_v36, %v1879_v45  ;;  %v1630_v11 = vmax.f32 %v1460_v51, 0.0  ;;  %v14391_v51 = vld [vmem:[%s19174_s3 + $0x70] sm:$0xff]  }
 0x240   : > { %v1462_v26 = vpop.f32.mrf.mxu0 }
 0x241   : > { %1929 = vst [vmem:[#allocation3] sm:$0xff] %v1904_v1  ;;  %v1880_v61 = vmax.f32 %v1605_v18, %v1630_v11  ;;  %v1463_v6 = vadd.f32 %v15070_v17, %v1462_v26  ;;  %v1608_v26 = vmax.f32 %v1372_v4, 0.0 }
 0x242   : > { %v1464_v13 = vpop.f32.mrf.mxu0 }
 0x243   : > { %v1905_v62 = vmax.f32 %v15088_v48, %v1880_v61  ;;  %v1631_v16 = vmax.f32 %v1463_v6, 0.0  ;;  %v19198_v61 = vmov 0.0  }
 0x244   : > { %v1467_v56 = vpop.f32.mrf.mxu0 }
 0x245   : > { %1930 = vst [vmem:[#allocation3 + $0x8] sm:$0xff] %v1905_v62  ;;  %v1881_v36 = vmax.f32 %v1606_v20, %v1631_v16  ;;  %v1468_v34 = vadd.f32 %v15070_v17, %v1467_v56  ;;  %v1971_v11 = vpack.c.bf16 %v1905_v62, %v1904_v1 }
 0x246   : > { %v1469_v18 = vpop.f32.mrf.mxu0 }
 0x247   : > { %v1906_v35 = vmax.f32 %v15093_v57, %v1881_v36  ;;  %v1632_v45 = vmax.f32 %v1468_v34, 0.0  ;;  %12373 = vmatmul.mubr.bf16.vlgmr.msra.gmra.mxu1 %v1971_v11  ;;  %v1375_v57 = vadd.f32 %v15070_v17, %v15298_v22  ;;  %v1380_v22 = vadd.f32 %v15070_v17, %v15300_v44  ;;  %v14393_v18 = vld [vmem:[%s19174_s3 + $0x60] sm:$0xff]  }
 0x248   : > { %v1470_v48 = vpop.f32.mrf.mxu0  ;;  %12409 = vmatpush3.bf16.msra.mxu1 %v14388_v19  ;;  %12376 = vmatprep.mubr.msk.bf16.mxu1 %vm14819_vm0, %v19198_v61 }
 0x249   : > { %1931 = vst [vmem:[#allocation3 + $0x10] sm:$0xff] %v1906_v35  ;;  %v1882_v8 = vmax.f32 %v1607_v33, %v1632_v45  ;;  %v1471_v1 = vadd.f32 %v15070_v17, %v1470_v48  ;;  %12410 = vmatprep.subr.bf16.mxu1 %v19198_v61  ;;  %v1609_v36 = vmax.f32 %v1375_v57, 0.0 }
 0x24a   : > { %v1472_v37 = vpop.f32.mrf.mxu0 }
 0x24b   : > { %v1907_v6 = vmax.f32 %v15099_v3, %v1882_v8  ;;  %v1633_v13 = vmax.f32 %v1471_v1, 0.0 }
 0x24c   : > { %v1475_v20 = vpop.f32.mrf.mxu0  ;;  %12411 = vmatpush3.bf16.msra.mxu1 %v14391_v51 }
 0x24d   : > { %1932 = vst [vmem:[#allocation3 + $0x18] sm:$0xff] %v1907_v6  ;;  %v1883_v62 = vmax.f32 %v1608_v26, %v1633_v13  ;;  %v1476_v16 = vadd.f32 %v15070_v17, %v1475_v20  ;;  %v1972_v56 = vpack.c.bf16 %v1907_v6, %v1906_v35  ;;  %12412 = vmatprep.subr.bf16.mxu1 %v19198_v61  ;;  %v1610_v35 = vmax.f32 %v1380_v22, 0.0  ;;  %v14394_v13 = vld [vmem:[%s19174_s3 + $0x58] sm:$0xff]   ;;  %v14397_v22 = vld [vmem:[%s19174_s3 + $0x230] sm:$0xff]  }
 0x24e   : > { %v1477_v19 = vpop.f32.mrf.mxu0 }
 0x24f   : > { %v1908_v3 = vmax.f32 %v15105_v21, %v1883_v62  ;;  %v1634_v34 = vmax.f32 %v1476_v16, 0.0  ;;  %12377 = vmatmul.mubr.bf16.gmra.mxu1 %v1972_v56  ;;  %v1383_v21 = vadd.f32 %v15070_v17, %v15302_v47 }
 0x250   : > { %v1478_v11 = vpop.f32.mrf.mxu0  ;;  %12380 = vmatprep.mubr.msk.bf16.mxu1 %vm14819_vm0, %v19198_v61  ;;  %12413 = vmatpush3.bf16.msra.mxu1 %v14392_v30  ;;  %v3215_v8 = vld [vmem:[#allocation3 + $0xf] sm:$0xff]  ;;  %v1388_v30 = vadd.f32 %v15070_v17, %v15304_v50 }
 0x251   : > { %1933 = vst [vmem:[#allocation3 + $0x20] sm:$0xff] %v1908_v3  ;;  %v1884_v33 = vmax.f32 %v1609_v36, %v1634_v34  ;;  %v1479_v4 = vadd.f32 %v15070_v17, %v1478_v11  ;;  %12414 = vmatprep.subr.bf16.mxu1 %v19198_v61  ;;  %v1611_v20 = vmax.f32 %v1383_v21, 0.0  ;;  %v14395_v50 = vld [vmem:[%s19174_s3 + $0x50] sm:$0xff]   ;;  %v1391_v34 = vadd.f32 %v15070_v17, %v15306_v54 }
 0x252   : > { %v1480_v44 = vpop.f32.mrf.mxu0 }
 0x253   : > { %v1909_v45 = vmax.f32 %v15111_v32, %v1884_v33  ;;  %v1635_v48 = vmax.f32 %v1479_v4, 0.0  ;;  %v14396_v32 = vld [vmem:[%s19174_s3 + $0x238] sm:$0xff]   ;;  %v1613_v54 = vmax.f32 %v1391_v34, 0.0 }
 0x254   : > { %v1483_v51 = vpop.f32.mrf.mxu0  ;;  %v3216_v1 = vld [vmem:[#allocation3 + $0x17] sm:$0xff]  ;;  %12415 = vmatpush3.bf16.msra.mxu1 %v14393_v18 }
 0x255   : > { %1934 = vst [vmem:[#allocation3 + $0x28] sm:$0xff] %v1909_v45  ;;  %v1885_v37 = vmax.f32 %v1610_v35, %v1635_v48  ;;  %v1484_v26 = vadd.f32 %v15070_v17, %v1483_v51  ;;  %v3232_v57 = vpack.c.bf16 %v3216_v1, %v3215_v8  ;;  %v1973_v6 = vpack.c.bf16 %v1909_v45, %v1908_v3  ;;  %v14398_v51 = vld [vmem:[%s19174_s3 + $0x48] sm:$0xff]  }
 0x256   : > { %12416 = vmatprep.subr.bf16.mxu1 %v19198_v61  ;;  %v1485_v47 = vpop.f32.mrf.mxu0  ;;  %v1612_v3 = vmax.f32 %v1388_v30, 0.0  ;;  %v1396_v1 = vadd.f32 %v15070_v17, %v15308_v10 }
 0x257   : > { %v1910_v62 = vmax.f32 %v15117_v42, %v1885_v37  ;;  %v1636_v16 = vmax.f32 %v1484_v26, 0.0  ;;  %12685 = vmatmul.mubr.bf16.vlgmr.msra.gmra.mxu0 %v3232_v57  ;;  %12381 = vmatmul.mubr.bf16.gmra.mxu1 %v1973_v6 }
 0x258   : > { %v1486_v56 = vpop.f32.mrf.mxu0  ;;  %12688 = vmatprep.mubr.msk.bf16.mxu0 %vm14819_vm0, %v19198_v61  ;;  %12384 = vmatprep.mubr.msk.bf16.mxu1 %vm14819_vm0, %v19198_v61  ;;  %v3217_v4 = vld [vmem:[#allocation3 + $0x1f] sm:$0xff] }
 0x259   : > { %1935 = vst [vmem:[#allocation3 + $0x30] sm:$0xff] %v1910_v62  ;;  %v1886_v19 = vmax.f32 %v1611_v20, %v1636_v16  ;;  %v1487_v36 = vadd.f32 %v15070_v17, %v1486_v56  ;;  %12417 = vmatpush3.bf16.msra.mxu1 %v14394_v13  ;;  %12773 = vmatpush3.bf16.msra.mxu0 %v14396_v32  ;;  %v15428_v13 = vld [vmem:[%s19173_s2] ss:$0 sm:$0xff] }
 0x25a   : > { %v1488_v42 = vpop.f32.mrf.mxu0  ;;  %12418 = vmatprep.subr.bf16.mxu1 %v19198_v61  ;;  %12774 = vmatprep.subr.bf16.mxu0 %v19198_v61  ;;  %v14400_v20 = vld [vmem:[%s19174_s3 + $0x220] sm:$0xff]   ;;  %v1399_v16 = vadd.f32 %v15428_v13, %v15310_v59 }
 0x25b   : > { %v1911_v11 = vmax.f32 %v15123_v53, %v1886_v19  ;;  %v1637_v18 = vmax.f32 %v1487_v36, 0.0  ;;  %v14399_v53 = vld [vmem:[%s19174_s3 + $0x228] sm:$0xff]  }
 0x25c   : > { %v1491_v33 = vpop.f32.mrf.mxu0  ;;  %v3218_v44 = vld [vmem:[#allocation3 + $0x27] sm:$0xff] }
 0x25d   : > { %1936 = vst [vmem:[#allocation3 + $0x38] sm:$0xff] %v1911_v11  ;;  %v1887_v35 = vmax.f32 %v1612_v3, %v1637_v18  ;;  %v1492_v21 = vadd.f32 %v15070_v17, %v1491_v33  ;;  %v3233_v45 = vpack.c.bf16 %v3218_v44, %v3217_v4  ;;  %v1974_v48 = vpack.c.bf16 %v1911_v11, %v1910_v62  ;;  %v15435_v10 = vld [vmem:[#allocation3 + $0x24] sm:$0xff] }
 0x25e   : > { %12419 = vmatpush3.bf16.msra.mxu1 %v14395_v50  ;;  %v1493_v8 = vpop.f32.mrf.mxu0  ;;  %12775 = vmatpush3.bf16.msra.mxu0 %v14397_v22  ;;  %v1614_v62 = vmax.f32 %v1396_v1, 0.0  ;;  %v1615_v44 = vmax.f32 %v1399_v16, 0.0 }
 0x25f   : > { %12420 = vmatprep.subr.bf16.mxu1 %v19198_v61  ;;  %v1912_v37 = vmax.f32 %v15129_v63, %v1887_v35  ;;  %v1638_v26 = vmax.f32 %v1492_v21, 0.0  ;;  %12689 = vmatmul.mubr.bf16.gmra.mxu0 %v3233_v45  ;;  %v14401_v63 = vld [vmem:[%s19174_s3 + $0x40] sm:$0xff]   ;;  %v1404_v35 = vadd.f32 %v15428_v13, %v15312_v28 }
 0x260   : > { %12385 = vmatmul.mubr.bf16.gmra.mxu1 %v1974_v48  ;;  %v1494_v57 = vpop.f32.mrf.mxu0  ;;  %12692 = vmatprep.mubr.msk.bf16.mxu0 %vm14819_vm0, %v19198_v61  ;;  %v15437_v32 = vld [vmem:[#allocation3 + $0x2c] sm:$0xff] }
 0x261   : > { %12388 = vmatprep.mubr.msk.bf16.mxu1 %vm14819_vm0, %v19198_v61  ;;  %1937 = vst [vmem:[#allocation3 + $0x40] sm:$0xff] %v1912_v37  ;;  %v1888_v6 = vmax.f32 %v1613_v54, %v1638_v26  ;;  %v1495_v17 = vadd.f32 %v15428_v13, %v1494_v57  ;;  %12776 = vmatprep.subr.bf16.mxu0 %v19198_v61  ;;  %v3219_v50 = vld [vmem:[#allocation3 + $0x2f] sm:$0xff] }
 0x262   : > { %12421 = vmatpush3.bf16.msra.mxu1 %v14398_v51  ;;  %v1496_v47 = vpop.f32.mrf.mxu0  ;;  %12777 = vmatpush3.bf16.msra.mxu0 %v14399_v53  ;;  %v15450_v18 = vld [vmem:[#allocation3 + $0x2b] sm:$0xff]  ;;  %v1407_v26 = vadd.f32 %v15428_v13, %v15314_v46 }
 0x263   : > { %12422 = vmatprep.subr.bf16.mxu1 %v19198_v61  ;;  %v1913_v56 = vmax.f32 %v15135_v12, %v1888_v6  ;;  %v1639_v19 = vmax.f32 %v1495_v17, 0.0  ;;  %12778 = vmatprep.subr.bf16.mxu0 %v19198_v61  ;;  %v14402_v12 = vld [vmem:[%s19174_s3 + $0x218] sm:$0xff]   ;;  %v14403_v54 = vld [vmem:[%s19174_s3 + $0x210] sm:$0xff]  }
 0x264   : > { %v1499_v36 = vpop.f32.mrf.mxu0  ;;  %v3220_v42 = vld [vmem:[#allocation3 + $0x37] sm:$0xff] }
 0x265   : > { %1938 = vst [vmem:[#allocation3 + $0x48] sm:$0xff] %v1913_v56  ;;  %v1889_v22 = vmax.f32 %v1614_v62, %v1639_v19  ;;  %v1500_v3 = vadd.f32 %v15428_v13, %v1499_v36  ;;  %v3234_v34 = vpack.c.bf16 %v3220_v42, %v3219_v50  ;;  %v1975_v11 = vpack.c.bf16 %v1913_v56, %v1912_v37  ;;  %v15452_v33 = vld [vmem:[#allocation3 + $0x33] sm:$0xff] }
 0x266   : > { %12423 = vmatpush3.bf16.msra.mxu1 %v14401_v63  ;;  %v1501_v59 = vpop.f32.mrf.mxu0  ;;  %12779 = vmatpush3.bf16.msra.mxu0 %v14400_v20  ;;  %v15469_v53 = vld [vmem:[#allocation3 + $0x34] sm:$0xff]  ;;  %v1616_v37 = vmax.f32 %v1404_v35, 0.0  ;;  %v1617_v42 = vmax.f32 %v1407_v26, 0.0 }
 0x267   : > { %12460 = vmatprep.subr.bf16.mxu1 %v19198_v61  ;;  %v1914_v21 = vmax.f32 %v15141_v27, %v1889_v22  ;;  %v1640_v45 = vmax.f32 %v1500_v3, 0.0  ;;  %12693 = vmatmul.mubr.bf16.gmra.mxu0 %v3234_v34  ;;  %v1412_v22 = vadd.f32 %v15428_v13, %v15316_v14 }
 0x268   : > { %12389 = vmatmul.mubr.bf16.gmra.mxu1 %v1975_v11  ;;  %v1502_v48 = vpop.f32.mrf.mxu0  ;;  %12696 = vmatprep.mubr.msk.bf16.mxu0 %vm14819_vm0, %v19198_v61  ;;  %v15471_v28 = vld [vmem:[#allocation3 + $0x3c] sm:$0xff] }
 0x269   : > { %12392 = vmatprep.mubr.msk.bf16.mxu1 %vm14819_vm0, %v19198_v61  ;;  %1939 = vst [vmem:[#allocation3 + $0x50] sm:$0xff] %v1914_v21  ;;  %v1890_v51 = vmax.f32 %v1615_v44, %v1640_v45  ;;  %v1503_v8 = vadd.f32 %v15428_v13, %v1502_v48  ;;  %12780 = vmatprep.subr.bf16.mxu0 %v19198_v61  ;;  %v3221_v63 = vld [vmem:[#allocation3 + $0x3f] sm:$0xff] }
 0x26a   : > { %v1504_v27 = vpop.f32.mrf.mxu0  ;;  %12781 = vmatpush3.bf16.msra.mxu0 %v14402_v12  ;;  %v15483_v19 = vld [vmem:[#allocation3 + $0x3b] sm:$0xff] }
 0x26b   : > { %v1915_v57 = vmax.f32 %v15147_v39, %v1890_v51  ;;  %v1641_v6 = vmax.f32 %v1503_v8, 0.0  ;;  %12782 = vmatprep.subr.bf16.mxu0 %v19198_v61  ;;  %v14405_v39 = vld [vmem:[%s19174_s3 + $0x208] sm:$0xff]   ;;  %v15495_v11 = vld [vmem:[#allocation3 + $0x3a] sm:$0xff]  ;;  %v1618_v8 = vmax.f32 %v1412_v22, 0.0  ;;  %v1415_v27 = vadd.f32 %v15428_v13, %v15318_v9 }
 0x26c   : > { %v1507_v17 = vpop.f32.mrf.mxu0  ;;  %v3222_v47 = vld [vmem:[#allocation3 + $0x47] sm:$0xff]  ;;  %v14444_v51 = vld [vmem:[%s19174_s3 + $0x3b8] sm:$0xff]  }
 0x26d   : > { %1940 = vst [vmem:[#allocation3 + $0x58] sm:$0xff] %v1915_v57  ;;  %v1891_v20 = vmax.f32 %v1616_v37, %v1641_v6  ;;  %v1508_v62 = vadd.f32 %v15428_v13, %v1507_v17  ;;  %v3235_v16 = vpack.c.bf16 %v3222_v47, %v3221_v63  ;;  %v1976_v56 = vpack.c.bf16 %v1915_v57, %v1914_v21  ;;  %v15485_v36 = vld [vmem:[#allocation3 + $0x43] sm:$0xff] }
 0x26e   : > { %v1509_v50 = vpop.f32.mrf.mxu0  ;;  %12783 = vmatpush3.bf16.msra.mxu0 %v14403_v54  ;;  %v15497_v59 = vld [vmem:[#allocation3 + $0x42] sm:$0xff]  ;;  %v1619_v9 = vmax.f32 %v1415_v27, 0.0 }
 0x26f   : > { %v1916_v3 = vmax.f32 %v15153_v7, %v1891_v20  ;;  %v1642_v34 = vmax.f32 %v1508_v62, 0.0  ;;  %12697 = vmatmul.mubr.bf16.gmra.mxu0 %v3235_v16  ;;  %12784 = vmatprep.subr.bf16.mxu0 %v19198_v61  ;;  %v15507_v35 = vld [vmem:[#allocation3 + $0x44] sm:$0xff]  ;;  %v1420_v50 = vadd.f32 %v15428_v13, %v15320_v15 }
 0x270   : > { %12393 = vmatmul.mubr.bf16.gmra.mxu1 %v1976_v56  ;;  %v1510_v12 = vpop.f32.mrf.mxu0  ;;  %12700 = vmatprep.mubr.msk.bf16.mxu0 %vm14819_vm0, %v19198_v61  ;;  %v15509_v21 = vld [vmem:[#allocation3 + $0x4c] sm:$0xff]  ;;  %v14406_v48 = vld [vmem:[%s19174_s3 + $0x200] sm:$0xff]  }
 0x271   : > { %12396 = vmatprep.mubr.msk.bf16.mxu1 %vm14819_vm0, %v19198_v61  ;;  %1941 = vst [vmem:[#allocation3 + $0x60] sm:$0xff] %v1916_v3  ;;  %v1892_v14 = vmax.f32 %v1617_v42, %v1642_v34  ;;  %v1511_v7 = vadd.f32 %v15428_v13, %v1510_v12  ;;  %v3223_v57 = vld [vmem:[#allocation3 + $0x4f] sm:$0xff] }
 0x272   : > { %v1512_v45 = vpop.f32.mrf.mxu0  ;;  %12785 = vmatpush3.bf16.msra.mxu0 %v14405_v39  ;;  %v15521_v62 = vld [vmem:[#allocation3 + $0x4b] sm:$0xff] }
 0x273   : > { %v1917_v54 = vmax.f32 %v15164_v60, %v1892_v14  ;;  %v1643_v37 = vmax.f32 %v1511_v7, 0.0  ;;  %12786 = vmatprep.subr.bf16.mxu0 %v19198_v61  ;;  %v15530_v22 = vld [vmem:[#allocation3 + $0x4a] sm:$0xff]  ;;  %v1620_v7 = vmax.f32 %v1420_v50, 0.0  ;;  %v1423_v45 = vadd.f32 %v15428_v13, %v15322_v49 }
 0x274   : > { %v1515_v26 = vpop.f32.mrf.mxu0  ;;  %v3224_v6 = vld [vmem:[#allocation3 + $0x57] sm:$0xff]  ;;  %19199 = vst [vmem:[#allocation9_spill] sm:$0xff] %v15530_v22 }
 0x275   : > { %1942 = vst [vmem:[#allocation3 + $0x68] sm:$0xff] %v1917_v54  ;;  %v1893_v17 = vmax.f32 %v1618_v8, %v1643_v37  ;;  %v1516_v63 = vadd.f32 %v15428_v13, %v1515_v26  ;;  %v3236_v47 = vpack.c.bf16 %v3224_v6, %v3223_v57  ;;  %v1977_v20 = vpack.c.bf16 %v1917_v54, %v1916_v3  ;;  %v15523_v16 = vld [vmem:[#allocation3 + $0x53] sm:$0xff] }
 0x276   : > { %v1517_v56 = vpop.f32.mrf.mxu0  ;;  %12787 = vmatpush3.bf16.msra.mxu0 %v14406_v48  ;;  %v15532_v3 = vld [vmem:[#allocation3 + $0x52] sm:$0xff] }
 0x277   : > { %v1918_v39 = vmax.f32 %v15177_v31, %v1893_v17  ;;  %v1644_v42 = vmax.f32 %v1516_v63, 0.0  ;;  %12701 = vmatmul.mubr.bf16.gmra.mxu0 %v3236_v47  ;;  %19200 = vst [vmem:[#allocation10_spill] sm:$0xff] %v15532_v3  ;;  %12876 = vmatprep.subr.bf16.mxu0 %v19198_v61  ;;  %v1621_v56 = vmax.f32 %v1423_v45, 0.0 }
 0x278   : > { %12397 = vmatmul.mubr.bf16.gmra.mxu1 %v1977_v20  ;;  %v1518_v34 = vpop.f32.mrf.mxu0  ;;  %12704 = vmatprep.mubr.msk.bf16.mxu0 %vm14819_vm0, %v19198_v61  ;;  %v3225_v54 = vld [vmem:[#allocation3 + $0x5f] sm:$0xff] }
 0x279   : > { %12400 = vmatprep.mubr.msk.bf16.mxu1 %vm14819_vm0, %v19198_v61  ;;  %1943 = vst [vmem:[#allocation3 + $0x70] sm:$0xff] %v1918_v39  ;;  %v1894_v15 = vmax.f32 %v1619_v9, %v1644_v42  ;;  %v1519_v31 = vadd.f32 %v15428_v13, %v1518_v34  ;;  %v15546_v63 = vld [vmem:[#allocation3 + $0x5b] sm:$0xff] }
 0x27a   : > { %v1520_v14 = vpop.f32.mrf.mxu0  ;;  %v15555_v42 = vld [vmem:[#allocation3 + $0x5a] sm:$0xff] }
 0x27b   : > { %v1919_v48 = vmax.f32 %v15188_v29, %v1894_v15  ;;  %v1645_v8 = vmax.f32 %v1519_v31, 0.0  ;;  %v1428_v29 = vadd.f32 %v15428_v13, %v15324_v24  ;;  %19201 = vst [vmem:[#allocation11_spill] sm:$0xff] %v15555_v42 }
 0x27c   : > { %v1523_v27 = vpop.f32.mrf.mxu0  ;;  %v3226_v37 = vld [vmem:[#allocation3 + $0x67] sm:$0xff] }
 0x27d   : > { %1944 = vst [vmem:[#allocation3 + $0x78] sm:$0xff] %v1919_v48  ;;  %v1895_v26 = vmax.f32 %v1620_v7, %v1645_v8  ;;  %v1524_v57 = vadd.f32 %v15428_v13, %v1523_v27  ;;  %v3237_v6 = vpack.c.bf16 %v3226_v37, %v3225_v54  ;;  %v1978_v17 = vpack.c.bf16 %v1919_v48, %v1918_v39  ;;  %v15548_v47 = vld [vmem:[#allocation3 + $0x63] sm:$0xff] }
 0x27e   : > { %v1525_v20 = vpop.f32.mrf.mxu0  ;;  %v15557_v39 = vld [vmem:[#allocation3 + $0x62] sm:$0xff]  ;;  %v1622_v14 = vmax.f32 %v1428_v29, 0.0  ;;  %v1431_v7 = vadd.f32 %v15428_v13, %v15326_v0 }
 0x27f   : > { %v1920_v9 = vmax.f32 %v15198_v41, %v1895_v26  ;;  %v1646_v50 = vmax.f32 %v1524_v57, 0.0  ;;  %12705 = vmatmul.mubr.bf16.gmra.mxu0 %v3237_v6  ;;  %19202 = vst [vmem:[#allocation12_spill] sm:$0xff] %v15557_v39 }
 0x280   : > { %12401 = vmatmul.mubr.bf16.gmra.mxu1 %v1978_v17  ;;  %v1526_v34 = vpop.f32.mrf.mxu0  ;;  %12708 = vmatprep.mubr.msk.bf16.mxu0 %vm14819_vm0, %v19198_v61  ;;  %v3227_v27 = vld [vmem:[#allocation3 + $0x6f] sm:$0xff]  ;;  %v1623_v29 = vmax.f32 %v1431_v7, 0.0 }
 0x281   : > { %12404 = vmatprep.mubr.msk.bf16.mxu1 %vm14819_vm0, %v19198_v61  ;;  %1945 = vst [vmem:[#allocation3 + $0x80] sm:$0xff] %v1920_v9  ;;  %v1896_v24 = vmax.f32 %v1621_v56, %v1646_v50  ;;  %v1527_v41 = vadd.f32 %v15428_v13, %v1526_v34  ;;  %v1979_v6 = vpack.c.bf16 %v1920_v9, %v1920_v9  ;;  %v15570_v17 = vld [vmem:[#allocation3 + $0x6b] sm:$0xff] }
 0x282   : > { %v1528_v31 = vpop.f32.mrf.mxu0  ;;  %v2156_v7 = vld [vmem:[#allocation3 + $0x9] sm:$0xff] }
 0x283   : > { %v1921_v45 = vmax.f32 %v15208_v25, %v1896_v24  ;;  %v1647_v48 = vmax.f32 %v1527_v41, 0.0  ;;  %v1436_v25 = vadd.f32 %v15428_v13, %v15328_v38  ;;  %v15579_v24 = vld [vmem:[#allocation3 + $0x6a] sm:$0xff] }
 0x284   : > { %v1531_v8 = vpop.f32.mrf.mxu0  ;;  %v3228_v54 = vld [vmem:[#allocation3 + $0x77] sm:$0xff]  ;;  %19203 = vst [vmem:[#allocation13_spill] sm:$0xff] %v15579_v24  ;;  %v14796_v24 = vld [vmem:[#allocation3 + $0x63] sm:$0xff] }
 0x285   : > { %1946 = vst [vmem:[#allocation3 + $0x88] sm:$0xff] %v1921_v45  ;;  %v1897_v37 = vmax.f32 %v1622_v14, %v1647_v48  ;;  %v1532_v26 = vadd.f32 %v15428_v13, %v1531_v8  ;;  %v3238_v57 = vpack.c.bf16 %v3228_v54, %v3227_v27  ;;  %v15572_v20 = vld [vmem:[#allocation3 + $0x73] sm:$0xff]  ;;  %v1624_v45 = vmax.f32 %v1436_v25, 0.0 }
 0x286   : > { %v1533_v56 = vpop.f32.mrf.mxu0  ;;  %v15581_v9 = vld [vmem:[#allocation3 + $0x72] sm:$0xff]  ;;  %v1439_v48 = vadd.f32 %v15428_v13, %v15330_v5 }
 0x287   : > { %v1922_v50 = vmax.f32 %v15221_v2, %v1897_v37  ;;  %v1648_v34 = vmax.f32 %v1532_v26, 0.0  ;;  %12709 = vmatmul.mubr.bf16.gmra.mxu0 %v3238_v57  ;;  %19204 = vst [vmem:[#allocation14_spill] sm:$0xff] %v15581_v9  ;;  %v14404_v54 = vld [vmem:[%s19174_s3 + $0xb8] sm:$0xff]  }
 0x288   : > { %12405 = vmatmul.mubr.bf16.gmra.mxu1 %v1979_v6  ;;  %v1534_v41 = vpop.f32.mrf.mxu0  ;;  %12712 = vmatprep.mubr.msk.bf16.mxu0 %vm14819_vm0, %v19198_v61  ;;  %v3229_v26 = vld [vmem:[#allocation3 + $0x7f] sm:$0xff] }
 0x289   : > { %12424 = vmatprep.mubr.msk.bf16.mxu1 %vm14819_vm0, %v19198_v61  ;;  %1947 = vst [vmem:[#allocation3 + $0x90] sm:$0xff] %v1922_v50  ;;  %v1898_v38 = vmax.f32 %v1623_v29, %v1648_v34  ;;  %v1535_v2 = vadd.f32 %v15428_v13, %v1534_v41  ;;  %v2155_v6 = vld [vmem:[#allocation3 + $0x1] sm:$0xff]  ;;  %v1625_v41 = vmax.f32 %v1439_v48, 0.0  ;;  %v1447_v48 = vadd.f32 %v15428_v13, %v15334_v43 }
 0x28a   : > { %v1536_v14 = vpop.f32.mrf.mxu0  ;;  %v2172_v25 = vpack.c.bf16 %v2156_v7, %v2155_v6  ;;  %v14407_v7 = vld [vmem:[%s19174_s3 + $0xb0] sm:$0xff]  }
 0x28b   : > { %v1923_v8 = vmax.f32 %v15235_v23, %v1898_v38  ;;  %v1649_v27 = vmax.f32 %v1535_v2, 0.0  ;;  %v1444_v23 = vadd.f32 %v15428_v13, %v15332_v55  ;;  %v15602_v14 = vld [vmem:[#allocation3 + $0x7b] sm:$0xff] }
 0x28c   : > { %v1539_v37 = vpop.f32.mrf.mxu0  ;;  %v3230_v57 = vld [vmem:[#allocation3 + $0x87] sm:$0xff] }
 0x28d   : > { %1948 = vst [vmem:[#allocation3 + $0x98] sm:$0xff] %v1923_v8  ;;  %v1899_v56 = vmax.f32 %v1624_v45, %v1649_v27  ;;  %v1540_v29 = vadd.f32 %v15428_v13, %v1539_v37  ;;  %v3239_v50 = vpack.c.bf16 %v3230_v57, %v3229_v26  ;;  %v15597_v34 = vld [vmem:[#allocation3 + $0x83] sm:$0xff]  ;;  %v2158_v37 = vld [vmem:[#allocation3 + $0x19] sm:$0xff]  ;;  %v1626_v26 = vmax.f32 %v1444_v23, 0.0 }
 0x28e   : > { %v1541_v5 = vpop.f32.mrf.mxu0  ;;  %v1627_v23 = vmax.f32 %v1447_v48, 0.0 }
 0x28f   : > { %v1924_v38 = vmax.f32 %v15249_v52, %v1899_v56  ;;  %v1650_v2 = vmax.f32 %v1540_v29, 0.0  ;;  %12713 = vmatmul.mubr.bf16.gmra.mxu0 %v3239_v50  ;;  %v15618_v56 = vld [vmem:[#allocation3 + $0x7a] sm:$0xff]  ;;  %v15620_v29 = vld [vmem:[#allocation3 + $0x82] sm:$0xff] }
 0x290   : > { %12425 = vmatmul.mubr.bf16.vlgmr.msra.gmra.mxu1 %v2172_v25  ;;  %v1542_v8 = vpop.f32.mrf.mxu0  ;;  %12716 = vmatprep.mubr.msk.bf16.mxu0 %vm14819_vm0, %v19198_v61  ;;  %19205 = vst [vmem:[#allocation15_spill] sm:$0xff] %v15618_v56  ;;  %19206 = vst [vmem:[#allocation16_spill] sm:$0xff] %v15620_v29  ;;  %v2157_v25 = vld [vmem:[#allocation3 + $0x11] sm:$0xff]  ;;  %v4495_v56 = vld [vmem:[#allocation3 + $0x5e] sm:$0xff] }
 0x291   : > { %12461 = vmatpush3.bf16.msra.mxu1 %v14404_v54  ;;  %1949 = vst [vmem:[#allocation3 + $0xa0] sm:$0xff] %v1924_v38  ;;  %v1900_v55 = vmax.f32 %v1625_v41, %v1650_v2  ;;  %v1543_v52 = vadd.f32 %v15428_v13, %v1542_v8  ;;  %12428 = vmatprep.mubr.msk.bf16.mxu1 %vm14819_vm0, %v19198_v61  ;;  %v3231_v54 = vld [vmem:[#allocation3 + $0x8f] sm:$0xff] }
 0x292   : > { %12462 = vmatprep.subr.bf16.mxu1 %v19198_v61  ;;  %v1544_v27 = vpop.f32.mrf.mxu0  ;;  %v3240_v38 = vpack.c.bf16 %v3231_v54, %v3231_v54  ;;  %v2173_v2 = vpack.c.bf16 %v2158_v37, %v2157_v25 }
 0x293   : > { %v1925_v57 = vmax.f32 %v15262_v40, %v1900_v55  ;;  %v1651_v6 = vmax.f32 %v1543_v52, 0.0  ;;  %v14408_v40 = vld [vmem:[%s19174_s3 + $0xa8] sm:$0xff]   ;;  %v1452_v52 = vadd.f32 %v15428_v13, %v15336_v58  ;;  %v19209_v27 = vld [vmem:[#allocation6_spill] sm:$0xff]  ;;  %v14409_v58 = vld [vmem:[%s19174_s3 + $0xa0] sm:$0xff]  }
 0x294   : > { %v1547_v50 = vpop.f32.mrf.mxu0  ;;  %v15629_v55 = vld [vmem:[#allocation3 + $0x8a] sm:$0xff] }
 0x295   : > { %12463 = vmatpush3.bf16.msra.mxu1 %v14407_v7  ;;  %1950 = vst [vmem:[#allocation3 + $0xa8] sm:$0xff] %v1925_v57  ;;  %v1901_v41 = vmax.f32 %v1626_v26, %v1651_v6  ;;  %v1548_v43 = vadd.f32 %v15428_v13, %v1547_v50  ;;  %19207 = vst [vmem:[#allocation17_spill] sm:$0xff] %v15629_v55  ;;  %v15631_v7 = vld [vmem:[#allocation3 + $0x92] sm:$0xff]  ;;  %v2160_v50 = vld [vmem:[#allocation3 + $0x29] sm:$0xff] }
 0x296   : > { %12464 = vmatprep.subr.bf16.mxu1 %v19198_v61  ;;  %v1549_v8 = vpop.f32.mrf.mxu0  ;;  %19208 = vst [vmem:[#allocation18_spill] sm:$0xff] %v15631_v7  ;;  %v14450_v55 = vld [vmem:[%s19174_s3 + $0x398] sm:$0xff]  }
 0x297   : > { %v1926_v26 = vmax.f32 %v19209_v27, %v1901_v41  ;;  %v1652_v57 = vmax.f32 %v1548_v43, 0.0  ;;  %12717 = vmatmul.mubr.bf16.gmra.mxu0 %v3240_v38  ;;  %v1628_v41 = vmax.f32 %v1452_v52, 0.0  ;;  %v19210_v43 = vld [vmem:[#allocation7_spill] sm:$0xff]  ;;  %v2159_v27 = vld [vmem:[#allocation3 + $0x21] sm:$0xff] }
 0x298   : > { %12429 = vmatmul.mubr.bf16.gmra.mxu1 %v2173_v2  ;;  %v1550_v37 = vpop.f32.mrf.mxu0  ;;  %12788 = vmatprep.mubr.msk.bf16.mxu0 %vm14819_vm0, %v19198_v61 }
 0x299   : > { %12432 = vmatprep.mubr.msk.bf16.mxu1 %vm14819_vm0, %v19198_v61  ;;  %1951 = vst [vmem:[#allocation3 + $0xb0] sm:$0xff] %v1926_v26  ;;  %v1902_v48 = vmax.f32 %v1627_v23, %v1652_v57  ;;  %v1551_v6 = vadd.f32 %v15428_v13, %v1550_v37  ;;  %12465 = vmatpush3.bf16.msra.mxu1 %v14408_v40  ;;  %v14410_v13 = vld [vmem:[%s19174_s3 + $0x98] sm:$0xff]   ;;  %v19211_v23 = vld [vmem:[#allocation8_spill] sm:$0xff]  ;;  %v14411_v57 = vld [vmem:[%s19174_s3 + $0x90] sm:$0xff]  }
 0x29a   : > { %12466 = vmatprep.subr.bf16.mxu1 %v19198_v61  ;;  %v1552_v25 = vpop.f32.mrf.mxu0  ;;  %v2174_v26 = vpack.c.bf16 %v2160_v50, %v2159_v27  ;;  %v14412_v40 = vld [vmem:[%s19174_s3 + $0x2b8] sm:$0xff]   ;;  %v14413_v37 = vld [vmem:[%s19174_s3 + $0x2b0] sm:$0xff]   ;;  %v14416_v50 = vld [vmem:[%s19174_s3 + $0x2a0] sm:$0xff]  }
 0x29b   : > { %v1927_v38 = vmax.f32 %v19210_v43, %v1902_v48  ;;  %v1653_v8 = vmax.f32 %v1551_v6, 0.0  ;;  %v14414_v6 = vld [vmem:[%s19174_s3 + $0x88] sm:$0xff]   ;;  %v14417_v25 = vld [vmem:[%s19174_s3 + $0x80] sm:$0xff]   ;;  %v14419_v27 = vld [vmem:[%s19174_s3 + $0x290] sm:$0xff]  }
 0x29c   : > { %v2163_v43 = vld [vmem:[#allocation3 + $0x41] sm:$0xff] }
 0x29d   : > { %1952 = vst [vmem:[#allocation3 + $0xb8] sm:$0xff] %v1927_v38  ;;  %v1903_v54 = vmax.f32 %v1628_v41, %v1653_v8  ;;  %12467 = vmatpush3.bf16.msra.mxu1 %v14409_v58  ;;  %v14415_v58 = vld [vmem:[%s19174_s3 + $0x2a8] sm:$0xff]   ;;  %v14418_v8 = vld [vmem:[%s19174_s3 + $0x298] sm:$0xff]  }
 0x29e   : > { %12468 = vmatprep.subr.bf16.mxu1 %v19198_v61  ;;  %v2164_v41 = vld [vmem:[#allocation3 + $0x49] sm:$0xff] }
 0x29f   : > { %v1928_v52 = vmax.f32 %v19211_v23, %v1903_v54  ;;  %12789 = vmatmul.mubr.bf16.vlgmr.msra.gmra.mxu0 %v2173_v2  ;;  %v2162_v54 = vld [vmem:[#allocation3 + $0x39] sm:$0xff]  ;;  %v2161_v2 = vld [vmem:[#allocation3 + $0x31] sm:$0xff]  ;;  %v2176_v38 = vpack.c.bf16 %v2164_v41, %v2163_v43  ;;  %v14421_v23 = vld [vmem:[%s19174_s3 + $0x288] sm:$0xff]  }
 0x2a0   : > { %12433 = vmatmul.mubr.bf16.gmra.mxu1 %v2174_v26  ;;  %12792 = vmatprep.mubr.msk.bf16.mxu0 %vm14819_vm0, %v19198_v61  ;;  %v2175_v48 = vpack.c.bf16 %v2162_v54, %v2161_v2  ;;  %v2170_v2 = vld [vmem:[#allocation3 + $0x79] sm:$0xff]  ;;  %v2368_v41 = vld [vmem:[#allocation3 + $0xa] sm:$0xff]  ;;  %v2367_v43 = vld [vmem:[#allocation3 + $0x2] sm:$0xff] }
 0x2a1   : > { %12436 = vmatprep.mubr.msk.bf16.mxu1 %vm14819_vm0, %v19198_v61  ;;  %1953 = vst [vmem:[#allocation3 + $0xc0] sm:$0xff] %v1928_v52  ;;  %12469 = vmatpush3.bf16.msra.mxu1 %v14410_v13  ;;  %v2165_v13 = vld [vmem:[#allocation3 + $0x51] sm:$0xff]  ;;  %v14422_v52 = vld [vmem:[%s19174_s3 + $0x280] sm:$0xff]  }
 0x2a2   : > { %12877 = vmatpush3.bf16.msra.mxu0 %v14412_v40  ;;  %12470 = vmatprep.subr.bf16.mxu1 %v19198_v61 }
 0x2a3   : > { %12878 = vmatprep.subr.bf16.mxu0 %v19198_v61 }
 0x2a5   : > { %12471 = vmatpush3.bf16.msra.mxu1 %v14411_v57  ;;  %v2168_v57 = vld [vmem:[#allocation3 + $0x69] sm:$0xff] }
 0x2a6   : > { %12879 = vmatpush3.bf16.msra.mxu0 %v14413_v37  ;;  %12472 = vmatprep.subr.bf16.mxu1 %v19198_v61  ;;  %v2167_v37 = vld [vmem:[#allocation3 + $0x61] sm:$0xff] }
 0x2a7   : > { %12880 = vmatprep.subr.bf16.mxu0 %v19198_v61  ;;  %12793 = vmatmul.mubr.bf16.gmra.mxu0 %v2174_v26  ;;  %v2166_v26 = vld [vmem:[#allocation3 + $0x59] sm:$0xff]  ;;  %v2178_v54 = vpack.c.bf16 %v2168_v57, %v2167_v37  ;;  %v14424_v37 = vld [vmem:[%s19174_s3 + $0xe8] sm:$0xff]  }
 0x2a8   : > { %12437 = vmatmul.mubr.bf16.gmra.mxu1 %v2175_v48  ;;  %12796 = vmatprep.mubr.msk.bf16.mxu0 %vm14819_vm0, %v19198_v61  ;;  %v2177_v40 = vpack.c.bf16 %v2166_v26, %v2165_v13  ;;  %v14423_v26 = vld [vmem:[%s19174_s3 + $0xf0] sm:$0xff]  }
 0x2a9   : > { %12440 = vmatprep.mubr.msk.bf16.mxu1 %vm14819_vm0, %v19198_v61  ;;  %12473 = vmatpush3.bf16.msra.mxu1 %v14414_v6  ;;  %v3655_v13 = vld [vmem:[#allocation3 + $0x91] sm:$0xff] }
 0x2aa   : > { %12881 = vmatpush3.bf16.msra.mxu0 %v14415_v58  ;;  %12474 = vmatprep.subr.bf16.mxu1 %v19198_v61  ;;  %v2171_v58 = vld [vmem:[#allocation3 + $0x81] sm:$0xff] }
 0x2ab   : > { %12882 = vmatprep.subr.bf16.mxu0 %v19198_v61 }
 0x2ad   : > { %12475 = vmatpush3.bf16.msra.mxu1 %v14417_v25  ;;  %v3654_v25 = vld [vmem:[#allocation3 + $0x89] sm:$0xff] }
 0x2ae   : > { %12883 = vmatpush3.bf16.msra.mxu0 %v14416_v50  ;;  %12512 = vmatprep.subr.bf16.mxu1 %v19198_v61  ;;  %v2180_v50 = vpack.c.bf16 %v2171_v58, %v2171_v58 }
 0x2af   : > { %12884 = vmatprep.subr.bf16.mxu0 %v19198_v61  ;;  %12797 = vmatmul.mubr.bf16.gmra.mxu0 %v2175_v48  ;;  %v2169_v48 = vld [vmem:[#allocation3 + $0x71] sm:$0xff] }
 0x2b0   : > { %12441 = vmatmul.mubr.bf16.gmra.mxu1 %v2176_v38  ;;  %12800 = vmatprep.mubr.msk.bf16.mxu0 %vm14819_vm0, %v19198_v61  ;;  %v2179_v6 = vpack.c.bf16 %v2170_v2, %v2169_v48  ;;  %v2372_v2 = vld [vmem:[#allocation3 + $0x2a] sm:$0xff]  ;;  %v15749_v48 = vld [vmem:[#allocation3 + $0x1c] sm:$0xff] }
 0x2b1   : > { %12444 = vmatprep.mubr.msk.bf16.mxu1 %vm14819_vm0, %v19198_v61 }
 0x2b2   : > { %12885 = vmatpush3.bf16.msra.mxu0 %v14418_v8  ;;  %v3663_v8 = vpack.c.bf16 %v3654_v25, %v2171_v58  ;;  %v4080_v58 = vpack.c.bf16 %v15435_v10, %v15749_v48  ;;  %v14426_v25 = vld [vmem:[%s19174_s3 + $0xd8] sm:$0xff]  }
 0x2b3   : > { %12886 = vmatprep.subr.bf16.mxu0 %v19198_v61 }
 0x2b6   : > { %12887 = vmatpush3.bf16.msra.mxu0 %v14419_v27  ;;  %v2384_v27 = vpack.c.bf16 %v2368_v41, %v2367_v43  ;;  %v14428_v41 = vld [vmem:[%s19174_s3 + $0x338] sm:$0xff]   ;;  %v14427_v43 = vld [vmem:[%s19174_s3 + $0xd0] sm:$0xff]  }
 0x2b7   : > { %12888 = vmatprep.subr.bf16.mxu0 %v19198_v61  ;;  %12801 = vmatmul.mubr.bf16.gmra.mxu0 %v2176_v38  ;;  %v14420_v38 = vld [vmem:[%s19174_s3 + $0xf8] sm:$0xff]  }
 0x2b8   : > { %12445 = vmatmul.mubr.bf16.gmra.mxu1 %v2177_v40  ;;  %12804 = vmatprep.mubr.msk.bf16.mxu0 %vm14819_vm0, %v19198_v61 }
 0x2b9   : > { %12448 = vmatprep.mubr.msk.bf16.mxu1 %vm14819_vm0, %v19198_v61 }
 0x2ba   : > { %12889 = vmatpush3.bf16.msra.mxu0 %v14421_v23  ;;  %v2369_v23 = vld [vmem:[#allocation3 + $0x12] sm:$0xff] }
 0x2bb   : > { %12890 = vmatprep.subr.bf16.mxu0 %v19198_v61 }
 0x2be   : > { %12891 = vmatpush3.bf16.msra.mxu0 %v14422_v52  ;;  %v3664_v52 = vpack.c.bf16 %v3655_v13, %v3655_v13 }
 0x2bf   : > { %12980 = vmatprep.subr.bf16.mxu0 %v19198_v61  ;;  %12805 = vmatmul.mubr.bf16.gmra.mxu0 %v2177_v40  ;;  %v2370_v40 = vld [vmem:[#allocation3 + $0x1a] sm:$0xff] }
 0x2c0   : > { %12449 = vmatmul.mubr.bf16.gmra.mxu1 %v2178_v54  ;;  %12808 = vmatprep.mubr.msk.bf16.mxu0 %vm14819_vm0, %v19198_v61  ;;  %v2385_v57 = vpack.c.bf16 %v2370_v40, %v2369_v23  ;;  %v14430_v40 = vld [vmem:[%s19174_s3 + $0xc8] sm:$0xff]  }
 0x2c1   : > { %12452 = vmatprep.mubr.msk.bf16.mxu1 %vm14819_vm0, %v19198_v61  ;;  %v14431_v23 = vld [vmem:[%s19174_s3 + $0x328] sm:$0xff]  }
 0x2c7   : > { %12809 = vmatmul.mubr.bf16.gmra.mxu0 %v2178_v54  ;;  %v14425_v54 = vld [vmem:[%s19174_s3 + $0xe0] sm:$0xff]  }
 0x2c8   : > { %12453 = vmatmul.mubr.bf16.gmra.mxu1 %v2179_v6  ;;  %12812 = vmatprep.mubr.msk.bf16.mxu0 %vm14819_vm0, %v19198_v61 }
 0x2c9   : > { %12456 = vmatprep.mubr.msk.bf16.mxu1 %vm14819_vm0, %v19198_v61 }
 0x2cf   : > { %12813 = vmatmul.mubr.bf16.gmra.mxu0 %v2179_v6  ;;  %v2371_v6 = vld [vmem:[#allocation3 + $0x22] sm:$0xff] }
 0x2d0   : > { %12457 = vmatmul.mubr.bf16.gmra.mxu1 %v2180_v50  ;;  %12816 = vmatprep.mubr.msk.bf16.mxu0 %vm14819_vm0, %v19198_v61  ;;  %v2386_v50 = vpack.c.bf16 %v2372_v2, %v2371_v6  ;;  %v4082_v2 = vpack.c.bf16 %v15507_v35, %v15471_v28 }
 0x2d1   : > { %12476 = vmatprep.mubr.msk.bf16.mxu1 %vm14819_vm0, %v19198_v61 }
 0x2d7   : > { %12817 = vmatmul.mubr.bf16.gmra.mxu0 %v3663_v8  ;;  %v2374_v8 = vld [vmem:[#allocation3 + $0x3a] sm:$0xff] }
 0x2d8   : > { %12477 = vmatmul.mubr.bf16.vlgmr.msra.gmra.mxu1 %v2384_v27  ;;  %12820 = vmatprep.mubr.msk.bf16.mxu0 %vm14819_vm0, %v19198_v61  ;;  %v2373_v27 = vld [vmem:[#allocation3 + $0x32] sm:$0xff] }
 0x2d9   : > { %12513 = vmatpush3.bf16.msra.mxu1 %v14420_v38  ;;  %12480 = vmatprep.mubr.msk.bf16.mxu1 %vm14819_vm0, %v19198_v61  ;;  %v14429_v38 = vld [vmem:[%s19174_s3 + $0x330] sm:$0xff]   ;;  %v2387_v13 = vpack.c.bf16 %v2374_v8, %v2373_v27  ;;  %v14437_v27 = vld [vmem:[%s19174_s3 + $0x308] sm:$0xff]  }
 0x2da   : > { %12514 = vmatprep.subr.bf16.mxu1 %v19198_v61 }
 0x2dd   : > { %12515 = vmatpush3.bf16.msra.mxu1 %v14423_v26  ;;  %v4081_v26 = vpack.c.bf16 %v15469_v53, %v15437_v32 }
 0x2de   : > { %12516 = vmatprep.subr.bf16.mxu1 %v19198_v61 }
 0x2df   : > { %12821 = vmatmul.mubr.bf16.gmra.mxu0 %v3664_v52  ;;  %v14432_v52 = vld [vmem:[%s19174_s3 + $0x320] sm:$0xff]  }
 0x2e0   : > { %12481 = vmatmul.mubr.bf16.gmra.mxu1 %v2385_v57  ;;  %12892 = vmatprep.mubr.msk.bf16.mxu0 %vm14819_vm0, %v19198_v61  ;;  %v14433_v57 = vld [vmem:[%s19174_s3 + $0xc0] sm:$0xff]  }
 0x2e1   : > { %12484 = vmatprep.mubr.msk.bf16.mxu1 %vm14819_vm0, %v19198_v61  ;;  %12517 = vmatpush3.bf16.msra.mxu1 %v14424_v37  ;;  %v2376_v37 = vld [vmem:[#allocation3 + $0x4a] sm:$0xff] }
 0x2e2   : > { %12518 = vmatprep.subr.bf16.mxu1 %v19198_v61 }
 0x2e5   : > { %12519 = vmatpush3.bf16.msra.mxu1 %v14425_v54  ;;  %v2375_v54 = vld [vmem:[#allocation3 + $0x42] sm:$0xff] }
 0x2e6   : > { %12520 = vmatprep.subr.bf16.mxu1 %v19198_v61  ;;  %v2388_v6 = vpack.c.bf16 %v2376_v37, %v2375_v54 }
 0x2e7   : > { %12893 = vmatmul.mubr.bf16.vlgmr.msra.gmra.mxu0 %v4080_v58  ;;  %v14434_v58 = vld [vmem:[%s19174_s3 + $0x318] sm:$0xff]  }
 0x2e8   : > { %12485 = vmatmul.mubr.bf16.gmra.mxu1 %v2386_v50  ;;  %12896 = vmatprep.mubr.msk.bf16.mxu0 %vm14819_vm0, %v19198_v61  ;;  %v14435_v50 = vld [vmem:[%s19174_s3 + $0x310] sm:$0xff]  }
 0x2e9   : > { %12488 = vmatprep.mubr.msk.bf16.mxu1 %vm14819_vm0, %v19198_v61  ;;  %12521 = vmatpush3.bf16.msra.mxu1 %v14426_v25  ;;  %v4070_v25 = vld [vmem:[#allocation3 + $0x54] sm:$0xff] }
 0x2ea   : > { %12981 = vmatpush3.bf16.msra.mxu0 %v14428_v41  ;;  %12522 = vmatprep.subr.bf16.mxu1 %v19198_v61  ;;  %v2378_v41 = vld [vmem:[#allocation3 + $0x5a] sm:$0xff] }
 0x2eb   : > { %12982 = vmatprep.subr.bf16.mxu0 %v19198_v61 }
 0x2ed   : > { %12523 = vmatpush3.bf16.msra.mxu1 %v14427_v43  ;;  %v2377_v43 = vld [vmem:[#allocation3 + $0x52] sm:$0xff] }
 0x2ee   : > { %12983 = vmatpush3.bf16.msra.mxu0 %v14429_v38  ;;  %12524 = vmatprep.subr.bf16.mxu1 %v19198_v61  ;;  %v4083_v38 = vpack.c.bf16 %v4070_v25, %v15509_v21  ;;  %v2389_v8 = vpack.c.bf16 %v2378_v41, %v2377_v43  ;;  %v15834_v25 = vld [vmem:[#allocation3 + $0x6c] sm:$0xff] }
 0x2ef   : > { %12984 = vmatprep.subr.bf16.mxu0 %v19198_v61  ;;  %12897 = vmatmul.mubr.bf16.gmra.mxu0 %v4081_v26  ;;  %v14438_v26 = vld [vmem:[%s19174_s3 + $0x300] sm:$0xff]   ;;  %v2381_v41 = vld [vmem:[#allocation3 + $0x72] sm:$0xff] }
 0x2f0   : > { %12489 = vmatmul.mubr.bf16.gmra.mxu1 %v2387_v13  ;;  %12900 = vmatprep.mubr.msk.bf16.mxu0 %vm14819_vm0, %v19198_v61  ;;  %v4072_v13 = vld [vmem:[#allocation3 + $0x64] sm:$0xff] }
 0x2f1   : > { %12492 = vmatprep.mubr.msk.bf16.mxu1 %vm14819_vm0, %v19198_v61  ;;  %12525 = vmatpush3.bf16.msra.mxu1 %v14430_v40  ;;  %v2380_v40 = vld [vmem:[#allocation3 + $0x6a] sm:$0xff] }
 0x2f2   : > { %12985 = vmatpush3.bf16.msra.mxu0 %v14431_v23  ;;  %12526 = vmatprep.subr.bf16.mxu1 %v19198_v61  ;;  %v15822_v23 = vld [vmem:[#allocation3 + $0x5c] sm:$0xff] }
 0x2f3   : > { %12986 = vmatprep.subr.bf16.mxu0 %v19198_v61 }
 0x2f5   : > { %12527 = vmatpush3.bf16.msra.mxu1 %v14433_v57  ;;  %v4084_v57 = vpack.c.bf16 %v4072_v13, %v15822_v23  ;;  %v4076_v13 = vld [vmem:[#allocation3 + $0x84] sm:$0xff] }
 0x2f6   : > { %12987 = vmatpush3.bf16.msra.mxu0 %v14432_v52  ;;  %12564 = vmatprep.subr.bf16.mxu1 %v19198_v61  ;;  %v2379_v52 = vld [vmem:[#allocation3 + $0x62] sm:$0xff] }
 0x2f7   : > { %12988 = vmatprep.subr.bf16.mxu0 %v19198_v61  ;;  %12901 = vmatmul.mubr.bf16.gmra.mxu0 %v4082_v2  ;;  %v2390_v37 = vpack.c.bf16 %v2380_v40, %v2379_v52  ;;  %v2383_v40 = vld [vmem:[#allocation3 + $0x82] sm:$0xff] }
 0x2f8   : > { %12493 = vmatmul.mubr.bf16.gmra.mxu1 %v2388_v6  ;;  %12904 = vmatprep.mubr.msk.bf16.mxu0 %vm14819_vm0, %v19198_v61  ;;  %v4074_v6 = vld [vmem:[#allocation3 + $0x74] sm:$0xff] }
 0x2f9   : > { %12496 = vmatprep.mubr.msk.bf16.mxu1 %vm14819_vm0, %v19198_v61  ;;  %v4085_v43 = vpack.c.bf16 %v4074_v6, %v15834_v25  ;;  %v2392_v6 = vpack.c.bf16 %v2383_v40, %v2383_v40  ;;  %v4077_v40 = vld [vmem:[#allocation3 + $0x8c] sm:$0xff] }
 0x2fa   : > { %12989 = vmatpush3.bf16.msra.mxu0 %v14434_v58  ;;  %v2382_v58 = vld [vmem:[#allocation3 + $0x7a] sm:$0xff] }
 0x2fb   : > { %12990 = vmatprep.subr.bf16.mxu0 %v19198_v61 }
 0x2fe   : > { %12991 = vmatpush3.bf16.msra.mxu0 %v14435_v50 }
 0x2ff   : > { %12992 = vmatprep.subr.bf16.mxu0 %v19198_v61  ;;  %12905 = vmatmul.mubr.bf16.gmra.mxu0 %v4083_v38 }
 0x300   : > { %12497 = vmatmul.mubr.bf16.gmra.mxu1 %v2389_v8  ;;  %12908 = vmatprep.mubr.msk.bf16.mxu0 %vm14819_vm0, %v19198_v61  ;;  %v2391_v8 = vpack.c.bf16 %v2382_v58, %v2381_v41 }
 0x301   : > { %12500 = vmatprep.mubr.msk.bf16.mxu1 %vm14819_vm0, %v19198_v61 }
 0x302   : > { %12993 = vmatpush3.bf16.msra.mxu0 %v14437_v27 }
 0x303   : > { %12994 = vmatprep.subr.bf16.mxu0 %v19198_v61 }
 0x306   : > { %12995 = vmatpush3.bf16.msra.mxu0 %v14438_v26 }
 0x307   : > { %13084 = vmatprep.subr.bf16.mxu0 %v19198_v61  ;;  %12909 = vmatmul.mubr.bf16.gmra.mxu0 %v4084_v57  ;;  %v15826_v54 = vpop.f32.mrf.mxu1  ;;  %v15845_v57 = vld [vmem:[#allocation3 + $0x7c] sm:$0xff] }
 0x308   : > { %12501 = vmatmul.mubr.bf16.gmra.mxu1 %v2390_v37  ;;  %12912 = vmatprep.mubr.msk.bf16.mxu0 %vm14819_vm0, %v19198_v61  ;;  %v4086_v37 = vpack.c.bf16 %v4076_v13, %v15845_v57 }
 0x309   : > { %12504 = vmatprep.mubr.msk.bf16.mxu1 %vm14819_vm0, %v19198_v61  ;;  %v12374_v2 = vpop.f32.mrf.mxu1 }
 0x30b   : > { %v15832_v50 = vpop.f32.mrf.mxu1 }
 0x30d   : > { %v12375_v38 = vpop.f32.mrf.mxu1 }
 0x30f   : > { %12913 = vmatmul.mubr.bf16.gmra.mxu0 %v4085_v43  ;;  %v15837_v27 = vpop.f32.mrf.mxu1 }
 0x310   : > { %12505 = vmatmul.mubr.bf16.gmra.mxu1 %v2391_v8  ;;  %12916 = vmatprep.mubr.msk.bf16.mxu0 %vm14819_vm0, %v19198_v61  ;;  %v4078_v8 = vld [vmem:[#allocation3 + $0x94] sm:$0xff] }
 0x311   : > { %12508 = vmatprep.mubr.msk.bf16.mxu1 %vm14819_vm0, %v19198_v61  ;;  %v12378_v26 = vpop.f32.mrf.mxu1  ;;  %v4087_v31 = vpack.c.bf16 %v4078_v8, %v4077_v40 }
 0x312   : > { %v2580_v26 = vld [vmem:[#allocation3 + $0xb] sm:$0xff] }
 0x313   : > { %v15843_v52 = vpop.f32.mrf.mxu1 }
 0x315   : > { %v12379_v2 = vpop.f32.mrf.mxu1 }
 0x316   : > { %v2579_v2 = vld [vmem:[#allocation3 + $0x3] sm:$0xff] }
 0x317   : > { %v15848_v58 = vpop.f32.mrf.mxu0  ;;  %12917 = vmatmul.mubr.bf16.gmra.mxu0 %v4086_v37  ;;  %v15850_v41 = vpop.f32.mrf.mxu1  ;;  %v14436_v37 = vld [vmem:[%s19174_s3 + $0x138] sm:$0xff]   ;;  %v2596_v12 = vpack.c.bf16 %v2580_v26, %v2579_v2 }
 0x318   : > { %19212 = vst [vmem:[#allocation6_spill] sm:$0xff] %v15848_v58  ;;  %12509 = vmatmul.mubr.bf16.gmra.mxu1 %v2392_v6  ;;  %12920 = vmatprep.mubr.msk.bf16.mxu0 %vm14819_vm0, %v19198_v61  ;;  %v2581_v26 = vld [vmem:[#allocation3 + $0x13] sm:$0xff] }
 0x319   : > { %12528 = vmatprep.mubr.msk.bf16.mxu1 %vm14819_vm0, %v19198_v61  ;;  %v12686_v43 = vpop.f32.mrf.mxu0  ;;  %v12382_v38 = vpop.f32.mrf.mxu1 }
 0x31a   : > { %v14439_v38 = vld [vmem:[%s19174_s3 + $0x130] sm:$0xff]  }
 0x31b   : > { %v15856_v5 = vpop.f32.mrf.mxu0  ;;  %v15858_v13 = vpop.f32.mrf.mxu1 }
 0x31c   : > { %19213 = vst [vmem:[#allocation7_spill] sm:$0xff] %v15856_v5  ;;  %v14795_v5 = vld [vmem:[#allocation3 + $0x53] sm:$0xff] }
 0x31d   : > { %v12687_v6 = vpop.f32.mrf.mxu0  ;;  %v12383_v15 = vpop.f32.mrf.mxu1 }
 0x31e   : > { %v4079_v15 = vld [vmem:[#allocation3 + $0x9c] sm:$0xff] }
 0x31f   : > { %v15863_v44 = vpop.f32.mrf.mxu0  ;;  %12921 = vmatmul.mubr.bf16.gmra.mxu0 %v4087_v31  ;;  %v2582_v31 = vld [vmem:[#allocation3 + $0x1b] sm:$0xff]  ;;  %v4088_v2 = vpack.c.bf16 %v4079_v15, %v4079_v15 }
 0x320   : > { %19214 = vst [vmem:[#allocation8_spill] sm:$0xff] %v15863_v44  ;;  %v15865_v43 = vpop.f32.mrf.mxu1  ;;  %12529 = vmatmul.mubr.bf16.vlgmr.msra.gmra.mxu1 %v2596_v12  ;;  %12924 = vmatprep.mubr.msk.bf16.mxu0 %vm14819_vm0, %v19198_v61  ;;  %v2597_v6 = vpack.c.bf16 %v2582_v31, %v2581_v26  ;;  %v14441_v31 = vld [vmem:[%s19174_s3 + $0x120] sm:$0xff]  }
 0x321   : > { %12565 = vmatpush3.bf16.msra.mxu1 %v14436_v37  ;;  %v12690_v45 = vpop.f32.mrf.mxu0  ;;  %12532 = vmatprep.mubr.msk.bf16.mxu1 %vm14819_vm0, %v19198_v61  ;;  %v4488_v26 = vld [vmem:[#allocation3 + $0x26] sm:$0xff] }
 0x322   : > { %v12386_v0 = vpop.f32.mrf.mxu1  ;;  %12566 = vmatprep.subr.bf16.mxu1 %v19198_v61 }
 0x323   : > { %v15875_v8 = vpop.f32.mrf.mxu0  ;;  %v14440_v0 = vld [vmem:[%s19174_s3 + $0x128] sm:$0xff]  }
 0x324   : > { %19215 = vst [vmem:[#allocation19_spill] sm:$0xff] %v15875_v8  ;;  %v15877_v12 = vpop.f32.mrf.mxu1 }
 0x325   : > { %12567 = vmatpush3.bf16.msra.mxu1 %v14439_v38  ;;  %v12691_v40 = vpop.f32.mrf.mxu0 }
 0x326   : > { %v12387_v37 = vpop.f32.mrf.mxu1  ;;  %12568 = vmatprep.subr.bf16.mxu1 %v19198_v61 }
 0x327   : > { %v15883_v45 = vpop.f32.mrf.mxu0  ;;  %12925 = vmatmul.mubr.bf16.gmra.mxu0 %v4088_v2  ;;  %v4487_v37 = vld [vmem:[#allocation3 + $0x1e] sm:$0xff] }
 0x328   : > { %19216 = vst [vmem:[#allocation20_spill] sm:$0xff] %v15883_v45  ;;  %v15885_v49 = vpop.f32.mrf.mxu1  ;;  %12533 = vmatmul.mubr.bf16.gmra.mxu1 %v2597_v6  ;;  %12996 = vmatprep.mubr.msk.bf16.mxu0 %vm14819_vm0, %v19198_v61  ;;  %v2583_v6 = vld [vmem:[#allocation3 + $0x23] sm:$0xff]  ;;  %v15899_v46 = vpack.c.bf16 %v4488_v26, %v4487_v37  ;;  %v14443_v26 = vld [vmem:[%s19174_s3 + $0x110] sm:$0xff]  }
 0x329   : > { %12536 = vmatprep.mubr.msk.bf16.mxu1 %vm14819_vm0, %v19198_v61  ;;  %v12694_v38 = vpop.f32.mrf.mxu0  ;;  %12569 = vmatpush3.bf16.msra.mxu1 %v14440_v0  ;;  %v14442_v0 = vld [vmem:[%s19174_s3 + $0x118] sm:$0xff]   ;;  %v14445_v37 = vld [vmem:[%s19174_s3 + $0x3b0] sm:$0xff]   ;;  %v14446_v45 = vld [vmem:[%s19174_s3 + $0x108] sm:$0xff]  }
 0x32a   : > { %v12390_v15 = vpop.f32.mrf.mxu1  ;;  %12570 = vmatprep.subr.bf16.mxu1 %v19198_v61  ;;  %v14791_v38 = vld [vmem:[#allocation3 + $0x2b] sm:$0xff] }
 0x32b   : > { %v15895_v40 = vpop.f32.mrf.mxu0  ;;  %v2598_v15 = vpack.c.bf16 %v14791_v38, %v2583_v6  ;;  %v4490_v6 = vld [vmem:[#allocation3 + $0x36] sm:$0xff] }
 0x32c   : > { %19217 = vst [vmem:[#allocation21_spill] sm:$0xff] %v15895_v40  ;;  %v15897_v2 = vpop.f32.mrf.mxu1 }
 0x32d   : > { %v12695_v60 = vpop.f32.mrf.mxu0  ;;  %12571 = vmatpush3.bf16.msra.mxu1 %v14441_v31 }
 0x32e   : > { %v12391_v4 = vpop.f32.mrf.mxu1  ;;  %12572 = vmatprep.subr.bf16.mxu1 %v19198_v61 }
 0x32f   : > { %v15908_v1 = vpop.f32.mrf.mxu0  ;;  %12997 = vmatmul.mubr.bf16.vlgmr.msra.gmra.mxu0 %v15899_v46 }
 0x330   : > { %19218 = vst [vmem:[#allocation22_spill] sm:$0xff] %v15908_v1  ;;  %v15911_v60 = vpop.f32.mrf.mxu1  ;;  %12537 = vmatmul.mubr.bf16.gmra.mxu1 %v2598_v15  ;;  %13000 = vmatprep.mubr.msk.bf16.mxu0 %vm14819_vm0, %v19198_v61  ;;  %v14792_v1 = vld [vmem:[#allocation3 + $0x33] sm:$0xff] }
 0x331   : > { %12540 = vmatprep.mubr.msk.bf16.mxu1 %vm14819_vm0, %v19198_v61  ;;  %v12698_v4 = vpop.f32.mrf.mxu0  ;;  %12573 = vmatpush3.bf16.msra.mxu1 %v14442_v0 }
 0x332   : > { %v12394_v31 = vpop.f32.mrf.mxu1  ;;  %13085 = vmatpush3.bf16.msra.mxu0 %v14444_v51  ;;  %12574 = vmatprep.subr.bf16.mxu1 %v19198_v61  ;;  %v4489_v4 = vld [vmem:[#allocation3 + $0x2e] sm:$0xff]  ;;  %v14793_v51 = vld [vmem:[#allocation3 + $0x3b] sm:$0xff] }
 0x333   : > { %13086 = vmatprep.subr.bf16.mxu0 %v19198_v61  ;;  %v15925_v38 = vpop.f32.mrf.mxu0  ;;  %v15929_v31 = vpack.c.bf16 %v4490_v6, %v4489_v4  ;;  %v2599_v40 = vpack.c.bf16 %v14793_v51, %v14792_v1  ;;  %v14449_v4 = vld [vmem:[%s19174_s3 + $0x100] sm:$0xff]  }
 0x334   : > { %19219 = vst [vmem:[#allocation23_spill] sm:$0xff] %v15925_v38  ;;  %v15927_v15 = vpop.f32.mrf.mxu1  ;;  %v14447_v38 = vld [vmem:[%s19174_s3 + $0x3a8] sm:$0xff]  }
 0x335   : > { %v12699_v0 = vpop.f32.mrf.mxu0  ;;  %12575 = vmatpush3.bf16.msra.mxu1 %v14443_v26 }
 0x336   : > { %v12395_v30 = vpop.f32.mrf.mxu1  ;;  %13087 = vmatpush3.bf16.msra.mxu0 %v14445_v37  ;;  %12576 = vmatprep.subr.bf16.mxu1 %v19198_v61  ;;  %v14448_v37 = vld [vmem:[%s19174_s3 + $0x3a0] sm:$0xff]  }
 0x337   : > { %13088 = vmatprep.subr.bf16.mxu0 %v19198_v61  ;;  %v15939_v6 = vpop.f32.mrf.mxu0  ;;  %13001 = vmatmul.mubr.bf16.gmra.mxu0 %v15929_v31  ;;  %v4492_v0 = vld [vmem:[#allocation3 + $0x46] sm:$0xff] }
 0x338   : > { %19220 = vst [vmem:[#allocation24_spill] sm:$0xff] %v15939_v6  ;;  %v15942_v30 = vpop.f32.mrf.mxu1  ;;  %12541 = vmatmul.mubr.bf16.gmra.mxu1 %v2599_v40  ;;  %13004 = vmatprep.mubr.msk.bf16.mxu0 %vm14819_vm0, %v19198_v61  ;;  %v14794_v6 = vld [vmem:[#allocation3 + $0x43] sm:$0xff] }
 0x339   : > { %12544 = vmatprep.mubr.msk.bf16.mxu1 %vm14819_vm0, %v19198_v61  ;;  %v12702_v1 = vpop.f32.mrf.mxu0  ;;  %12577 = vmatpush3.bf16.msra.mxu1 %v14446_v45  ;;  %v2600_v8 = vpack.c.bf16 %v15521_v62, %v14794_v6 }
 0x33a   : > { %v12398_v26 = vpop.f32.mrf.mxu1  ;;  %13089 = vmatpush3.bf16.msra.mxu0 %v14447_v38  ;;  %12578 = vmatprep.subr.bf16.mxu1 %v19198_v61  ;;  %v4491_v1 = vld [vmem:[#allocation3 + $0x3e] sm:$0xff] }
 0x33b   : > { %13090 = vmatprep.subr.bf16.mxu0 %v19198_v61  ;;  %v15956_v40 = vpop.f32.mrf.mxu0  ;;  %v15960_v38 = vpack.c.bf16 %v4492_v0, %v4491_v1  ;;  %v4494_v1 = vld [vmem:[#allocation3 + $0x56] sm:$0xff] }
 0x33c   : > { %19221 = vst [vmem:[#allocation25_spill] sm:$0xff] %v15956_v40  ;;  %v15958_v51 = vpop.f32.mrf.mxu1 }
 0x33d   : > { %v12703_v45 = vpop.f32.mrf.mxu0  ;;  %12579 = vmatpush3.bf16.msra.mxu1 %v14449_v4  ;;  %v14451_v4 = vld [vmem:[%s19174_s3 + $0x390] sm:$0xff]  }
 0x33e   : > { %v12399_v26 = vpop.f32.mrf.mxu1  ;;  %13091 = vmatpush3.bf16.msra.mxu0 %v14448_v37  ;;  %12616 = vmatprep.subr.bf16.mxu1 %v19198_v61 }
 0x33f   : > { %13092 = vmatprep.subr.bf16.mxu0 %v19198_v61  ;;  %v15968_v40 = vpop.f32.mrf.mxu0  ;;  %13005 = vmatmul.mubr.bf16.gmra.mxu0 %v15960_v38 }
 0x340   : > { %19222 = vst [vmem:[#allocation26_spill] sm:$0xff] %v15968_v40  ;;  %v15971_v0 = vpop.f32.mrf.mxu1  ;;  %12545 = vmatmul.mubr.bf16.gmra.mxu1 %v2600_v8  ;;  %13008 = vmatprep.mubr.msk.bf16.mxu0 %vm14819_vm0, %v19198_v61  ;;  %v4493_v8 = vld [vmem:[#allocation3 + $0x4e] sm:$0xff] }
 0x341   : > { %12548 = vmatprep.mubr.msk.bf16.mxu1 %vm14819_vm0, %v19198_v61  ;;  %v12706_v6 = vpop.f32.mrf.mxu0  ;;  %v15985_v7 = vpack.c.bf16 %v4494_v1, %v4493_v8  ;;  %v14454_v1 = vld [vmem:[%s19174_s3 + $0x380] sm:$0xff]  }
 0x342   : > { %v12402_v37 = vpop.f32.mrf.mxu1  ;;  %13093 = vmatpush3.bf16.msra.mxu0 %v14450_v55  ;;  %v2601_v6 = vpack.c.bf16 %v15546_v63, %v14795_v5  ;;  %v14453_v55 = vld [vmem:[%s19174_s3 + $0x388] sm:$0xff]  }
 0x343   : > { %13094 = vmatprep.subr.bf16.mxu0 %v19198_v61  ;;  %v15981_v45 = vpop.f32.mrf.mxu0  ;;  %v15995_v37 = vld [vmem:[%s19175_s4] ss:$0 sm:$0xff]  ;;  %v4496_v8 = vld [vmem:[#allocation3 + $0x66] sm:$0xff] }
 0x344   : > { %19223 = vst [vmem:[#allocation27_spill] sm:$0xff] %v15981_v45  ;;  %v15983_v26 = vpop.f32.mrf.mxu1 }
 0x345   : > { %v12707_v40 = vpop.f32.mrf.mxu0 }
 0x346   : > { %v12403_v44 = vpop.f32.mrf.mxu1  ;;  %13095 = vmatpush3.bf16.msra.mxu0 %v14451_v4 }
 0x347   : > { %13096 = vmatprep.subr.bf16.mxu0 %v19198_v61  ;;  %v15997_v45 = vpop.f32.mrf.mxu0  ;;  %13009 = vmatmul.mubr.bf16.gmra.mxu0 %v15985_v7 }
 0x348   : > { %19224 = vst [vmem:[#allocation28_spill] sm:$0xff] %v15997_v45  ;;  %v2149_v44 = vpop.f32.mrf.mxu1  ;;  %12549 = vmatmul.mubr.bf16.gmra.mxu1 %v2601_v6  ;;  %13012 = vmatprep.mubr.msk.bf16.mxu0 %vm14819_vm0, %v19198_v61 }
 0x349   : > { %v16003_v5 = vadd.f32 %v15995_v37, %v2149_v44  ;;  %12552 = vmatprep.mubr.msk.bf16.mxu1 %vm14819_vm0, %v19198_v61  ;;  %v12710_v40 = vpop.f32.mrf.mxu0  ;;  %v16013_v44 = vpack.c.bf16 %v4496_v8, %v4495_v56  ;;  %v4497_v8 = vld [vmem:[#allocation3 + $0x6e] sm:$0xff] }
 0x34a   : > { %v12406_v4 = vpop.f32.mrf.mxu1  ;;  %13097 = vmatpush3.bf16.msra.mxu0 %v14453_v55  ;;  %v2602_v40 = vpack.c.bf16 %v15570_v17, %v14796_v24  ;;  %v2086_v55 = vadd.f32 %v15995_v37, %v15826_v54  ;;  %v2089_v54 = vadd.f32 %v15995_v37, %v15832_v50 }
 0x34b   : > { %13098 = vmatprep.subr.bf16.mxu0 %v19198_v61  ;;  %v16011_v6 = vpop.f32.mrf.mxu0 }
 0x34c   : > { %19225 = vst [vmem:[#allocation29_spill] sm:$0xff] %v16011_v6  ;;  %v2152_v45 = vpop.f32.mrf.mxu1 }
 0x34d   : > { %v12711_v29 = vpop.f32.mrf.mxu0 }
 0x34e   : > { %v12407_v58 = vpop.f32.mrf.mxu1  ;;  %13099 = vmatpush3.bf16.msra.mxu0 %v14454_v1 }
 0x34f   : > { %13188 = vmatprep.subr.bf16.mxu0 %v19198_v61  ;;  %v16019_v4 = vpop.f32.mrf.mxu0  ;;  %13013 = vmatmul.mubr.bf16.gmra.mxu0 %v16013_v44  ;;  %v4498_v58 = vld [vmem:[#allocation3 + $0x76] sm:$0xff] }
 0x350   : > { %19226 = vst [vmem:[#allocation30_spill] sm:$0xff] %v16019_v4  ;;  %v2280_v6 = vpop.f32.mrf.mxu1  ;;  %12553 = vmatmul.mubr.bf16.gmra.mxu1 %v2602_v40  ;;  %13016 = vmatprep.mubr.msk.bf16.mxu0 %vm14819_vm0, %v19198_v61  ;;  %v16034_v9 = vpack.c.bf16 %v4498_v58, %v4497_v8  ;;  %v2097_v8 = vadd.f32 %v15995_v37, %v15843_v52 }
 0x351   : > { %v16024_v56 = vadd.f32 %v2280_v6, %v2086_v55  ;;  %12556 = vmatprep.mubr.msk.bf16.mxu1 %vm14819_vm0, %v19198_v61  ;;  %v12714_v24 = vpop.f32.mrf.mxu0  ;;  %v2603_v55 = vpack.c.bf16 %v15602_v14, %v15572_v20 }
 0x352   : > { %v12426_v29 = vpop.f32.mrf.mxu1  ;;  %v2094_v24 = vadd.f32 %v15995_v37, %v15837_v27  ;;  %v4500_v27 = vld [vmem:[#allocation3 + $0x86] sm:$0xff] }
 0x353   : > { %v16030_v45 = vpop.f32.mrf.mxu0 }
 0x354   : > { %19227 = vst [vmem:[#allocation31_spill] sm:$0xff] %v16030_v45  ;;  %v2283_v1 = vpop.f32.mrf.mxu1 }
 0x355   : > { %v16032_v4 = vadd.f32 %v2283_v1, %v2089_v54  ;;  %v12715_v40 = vpop.f32.mrf.mxu0 }
 0x356   : > { %v12427_v6 = vpop.f32.mrf.mxu1 }
 0x357   : > { %v16040_v29 = vpop.f32.mrf.mxu0  ;;  %13017 = vmatmul.mubr.bf16.gmra.mxu0 %v16034_v9 }
 0x358   : > { %19228 = vst [vmem:[#allocation32_spill] sm:$0xff] %v16040_v29  ;;  %v2288_v50 = vpop.f32.mrf.mxu1  ;;  %12557 = vmatmul.mubr.bf16.gmra.mxu1 %v2603_v55  ;;  %13020 = vmatprep.mubr.msk.bf16.mxu0 %vm14819_vm0, %v19198_v61  ;;  %v4499_v29 = vld [vmem:[#allocation3 + $0x7e] sm:$0xff] }
 0x359   : > { %v16045_v54 = vadd.f32 %v2288_v50, %v2094_v24  ;;  %12560 = vmatprep.mubr.msk.bf16.mxu1 %vm14819_vm0, %v19198_v61  ;;  %v12718_v58 = vpop.f32.mrf.mxu0  ;;  %v16053_v42 = vpack.c.bf16 %v4500_v27, %v4499_v29  ;;  %v2604_v24 = vpack.c.bf16 %v15597_v34, %v15597_v34  ;;  %v2102_v50 = vadd.f32 %v15995_v37, %v15850_v41  ;;  %v4502_v41 = vld [vmem:[#allocation3 + $0x96] sm:$0xff]  ;;  %v2792_v27 = vld [vmem:[#allocation3 + $0xc] sm:$0xff] }
 0x35a   : > { %v12430_v1 = vpop.f32.mrf.mxu1 }
 0x35b   : > { %v3407_v40 = vpop.f32.mrf.mxu0 }
 0x35c   : > { %v2291_v6 = vpop.f32.mrf.mxu1 }
 0x35d   : > { %v16051_v45 = vadd.f32 %v2291_v6, %v2097_v8  ;;  %v12719_v55 = vpop.f32.mrf.mxu0  ;;  %v2105_v8 = vadd.f32 %v15995_v37, %v15858_v13  ;;  %v2110_v13 = vadd.f32 %v15995_v37, %v15865_v43  ;;  %v4503_v43 = vld [vmem:[#allocation3 + $0x9e] sm:$0xff] }
 0x35e   : > { %v12431_v39 = vpop.f32.mrf.mxu1  ;;  %v16072_v55 = vld [vmem:[#allocation3 + $0x8e] sm:$0xff] }
 0x35f   : > { %v16059_v58 = vpop.f32.mrf.mxu0  ;;  %13021 = vmatmul.mubr.bf16.gmra.mxu0 %v16053_v42 }
 0x360   : > { %19229 = vst [vmem:[#allocation33_spill] sm:$0xff] %v16059_v58  ;;  %v2296_v52 = vpop.f32.mrf.mxu1  ;;  %12561 = vmatmul.mubr.bf16.gmra.mxu1 %v2604_v24  ;;  %13024 = vmatprep.mubr.msk.bf16.mxu0 %vm14819_vm0, %v19198_v61  ;;  %v2791_v58 = vld [vmem:[#allocation3 + $0x4] sm:$0xff] }
 0x361   : > { %v16064_v1 = vadd.f32 %v2296_v52, %v2102_v50  ;;  %12580 = vmatprep.mubr.msk.bf16.mxu1 %vm14819_vm0, %v19198_v61  ;;  %v12790_v39 = vpop.f32.mrf.mxu0  ;;  %v14452_v50 = vld [vmem:[%s19174_s3 + $0x178] sm:$0xff]   ;;  %v2808_v22 = vpack.c.bf16 %v2792_v27, %v2791_v58 }
 0x362   : > { %v12434_v29 = vpop.f32.mrf.mxu1  ;;  %v4511_v39 = vpack.c.bf16 %v4502_v41, %v16072_v55  ;;  %v14455_v41 = vld [vmem:[%s19174_s3 + $0x170] sm:$0xff]  }
 0x363   : > { %v16070_v40 = vpop.f32.mrf.mxu0 }
 0x364   : > { %19230 = vst [vmem:[#allocation34_spill] sm:$0xff] %v16070_v40  ;;  %v2299_v6 = vpop.f32.mrf.mxu1 }
 0x365   : > { %v16074_v24 = vadd.f32 %v2299_v6, %v2105_v8  ;;  %v12791_v52 = vpop.f32.mrf.mxu0 }
 0x366   : > { %v12435_v29 = vpop.f32.mrf.mxu1 }
 0x367   : > { %v16082_v3 = vpop.f32.mrf.mxu0  ;;  %13025 = vmatmul.mubr.bf16.gmra.mxu0 %v4511_v39  ;;  %v4512_v29 = vpack.c.bf16 %v4503_v43, %v4503_v43 }
 0x368   : > { %v2304_v40 = vpop.f32.mrf.mxu1  ;;  %12581 = vmatmul.mubr.bf16.vlgmr.msra.gmra.mxu1 %v2808_v22  ;;  %13028 = vmatprep.mubr.msk.bf16.mxu0 %vm14819_vm0, %v19198_v61  ;;  %v2113_v22 = vadd.f32 %v15995_v37, %v15877_v12  ;;  %v2118_v12 = vadd.f32 %v15995_v37, %v15885_v49  ;;  %v14457_v49 = vld [vmem:[%s19174_s3 + $0x160] sm:$0xff]  }
 0x369   : > { %v16086_v8 = vadd.f32 %v2304_v40, %v2110_v13  ;;  %12617 = vmatpush3.bf16.msra.mxu1 %v14452_v50  ;;  %v12794_v6 = vpop.f32.mrf.mxu0  ;;  %12584 = vmatprep.mubr.msk.bf16.mxu1 %vm14819_vm0, %v19198_v61  ;;  %v2793_v50 = vld [vmem:[#allocation3 + $0x14] sm:$0xff] }
 0x36a   : > { %v12438_v58 = vpop.f32.mrf.mxu1  ;;  %12618 = vmatprep.subr.bf16.mxu1 %v19198_v61  ;;  %v2809_v6 = vpack.c.bf16 %v15749_v48, %v2793_v50  ;;  %v4912_v50 = vld [vmem:[#allocation3 + $0x28] sm:$0xff] }
 0x36b   : > { %v16096_v27 = vpop.f32.mrf.mxu0  ;;  %v14456_v58 = vld [vmem:[%s19174_s3 + $0x168] sm:$0xff]  }
 0x36c   : > { %19231 = vst [vmem:[#allocation35_spill] sm:$0xff] %v16096_v27  ;;  %v2307_v40 = vpop.f32.mrf.mxu1 }
 0x36d   : > { %v16098_v52 = vadd.f32 %v2307_v40, %v2113_v22  ;;  %12619 = vmatpush3.bf16.msra.mxu1 %v14455_v41  ;;  %v12795_v39 = vpop.f32.mrf.mxu0  ;;  %v2121_v40 = vadd.f32 %v15995_v37, %v15897_v2  ;;  %v14460_v2 = vld [vmem:[%s19174_s3 + $0x438] sm:$0xff]  }
 0x36e   : > { %v12439_v13 = vpop.f32.mrf.mxu1  ;;  %12620 = vmatprep.subr.bf16.mxu1 %v19198_v61 }
 0x36f   : > { %v16107_v27 = vpop.f32.mrf.mxu0  ;;  %13029 = vmatmul.mubr.bf16.gmra.mxu0 %v4512_v29  ;;  %v4911_v13 = vld [vmem:[#allocation3 + $0x20] sm:$0xff] }
 0x370   : > { %v2312_v22 = vpop.f32.mrf.mxu1  ;;  %12585 = vmatmul.mubr.bf16.gmra.mxu1 %v2809_v6  ;;  %13100 = vmatprep.mubr.msk.bf16.mxu0 %vm14819_vm0, %v19198_v61 }
 0x371   : > { %v16111_v41 = vadd.f32 %v2312_v22, %v2118_v12  ;;  %12588 = vmatprep.mubr.msk.bf16.mxu1 %vm14819_vm0, %v19198_v61  ;;  %v12798_v48 = vpop.f32.mrf.mxu0  ;;  %12621 = vmatpush3.bf16.msra.mxu1 %v14456_v58  ;;  %v16125_v22 = vpack.c.bf16 %v4912_v50, %v4911_v13 }
 0x372   : > { %v12442_v43 = vpop.f32.mrf.mxu1  ;;  %12622 = vmatprep.subr.bf16.mxu1 %v19198_v61  ;;  %v14458_v48 = vld [vmem:[%s19174_s3 + $0x158] sm:$0xff]  }
 0x373   : > { %v16121_v39 = vpop.f32.mrf.mxu0  ;;  %v2126_v43 = vadd.f32 %v15995_v37, %v15911_v60 }
 0x374   : > { %v2315_v29 = vpop.f32.mrf.mxu1 }
 0x375   : > { %v16123_v6 = vadd.f32 %v2315_v29, %v2121_v40  ;;  %v12799_v12 = vpop.f32.mrf.mxu0  ;;  %12623 = vmatpush3.bf16.msra.mxu1 %v14457_v49  ;;  %v19233_v49 = vpack.c.bf16 %v15437_v32, %v15435_v10  ;;  %v14461_v10 = vld [vmem:[%s19174_s3 + $0x430] sm:$0xff]   ;;  %v2129_v32 = vadd.f32 %v15995_v37, %v15927_v15  ;;  %v14462_v15 = vld [vmem:[%s19174_s3 + $0x148] sm:$0xff]  }
 0x376   : > { %v12443_v58 = vpop.f32.mrf.mxu1  ;;  %12624 = vmatprep.subr.bf16.mxu1 %v19198_v61  ;;  %v14459_v12 = vld [vmem:[%s19174_s3 + $0x150] sm:$0xff]  }
 0x377   : > { %v16136_v40 = vpop.f32.mrf.mxu0  ;;  %13101 = vmatmul.mubr.bf16.vlgmr.msra.gmra.mxu0 %v16125_v22  ;;  %v4914_v58 = vld [vmem:[#allocation3 + $0x38] sm:$0xff] }
 0x378   : > { %19232 = vst [vmem:[#allocation36_spill] sm:$0xff] %v16136_v40  ;;  %v2320_v50 = vpop.f32.mrf.mxu1  ;;  %12589 = vmatmul.mubr.bf16.gmra.mxu1 %v19233_v49  ;;  %13104 = vmatprep.mubr.msk.bf16.mxu0 %vm14819_vm0, %v19198_v61  ;;  %v14463_v40 = vld [vmem:[%s19174_s3 + $0x428] sm:$0xff]  }
 0x379   : > { %v16144_v29 = vadd.f32 %v2320_v50, %v2126_v43  ;;  %12592 = vmatprep.mubr.msk.bf16.mxu1 %vm14819_vm0, %v19198_v61  ;;  %v12802_v60 = vpop.f32.mrf.mxu0  ;;  %12625 = vmatpush3.bf16.msra.mxu1 %v14458_v48  ;;  %v4913_v50 = vld [vmem:[#allocation3 + $0x30] sm:$0xff] }
 0x37a   : > { %v12446_v13 = vpop.f32.mrf.mxu1  ;;  %13189 = vmatpush3.bf16.msra.mxu0 %v14460_v2  ;;  %12626 = vmatprep.subr.bf16.mxu1 %v19198_v61  ;;  %v16162_v2 = vpack.c.bf16 %v4914_v58, %v4913_v50  ;;  %v14464_v50 = vld [vmem:[%s19174_s3 + $0x420] sm:$0xff]  }
 0x37b   : > { %13190 = vmatprep.subr.bf16.mxu0 %v19198_v61  ;;  %v16158_v43 = vpop.f32.mrf.mxu0 }
 0x37c   : > { %19234 = vst [vmem:[#allocation37_spill] sm:$0xff] %v16158_v43  ;;  %v2323_v48 = vpop.f32.mrf.mxu1  ;;  %v2134_v43 = vadd.f32 %v15995_v37, %v15942_v30 }
 0x37d   : > { %v16160_v49 = vadd.f32 %v2323_v48, %v2129_v32  ;;  %v12803_v60 = vpop.f32.mrf.mxu0  ;;  %12627 = vmatpush3.bf16.msra.mxu1 %v14459_v12 }
 0x37e   : > { %v12447_v13 = vpop.f32.mrf.mxu1  ;;  %13191 = vmatpush3.bf16.msra.mxu0 %v14461_v10  ;;  %12628 = vmatprep.subr.bf16.mxu1 %v19198_v61  ;;  %v19235_v10 = vpack.c.bf16 %v15471_v28, %v15469_v53  ;;  %v14465_v53 = vld [vmem:[%s19174_s3 + $0x140] sm:$0xff]   ;;  %v2137_v28 = vadd.f32 %v15995_v37, %v15958_v51  ;;  %v14466_v51 = vld [vmem:[%s19174_s3 + $0x418] sm:$0xff]  }
 0x37f   : > { %13192 = vmatprep.subr.bf16.mxu0 %v19198_v61  ;;  %v16174_v32 = vpop.f32.mrf.mxu0  ;;  %13105 = vmatmul.mubr.bf16.gmra.mxu0 %v16162_v2 }
 0x380   : > { %v2328_v12 = vpop.f32.mrf.mxu1  ;;  %12593 = vmatmul.mubr.bf16.gmra.mxu1 %v19235_v10  ;;  %13108 = vmatprep.mubr.msk.bf16.mxu0 %vm14819_vm0, %v19198_v61 }
 0x381   : > { %v16182_v58 = vadd.f32 %v2328_v12, %v2134_v43  ;;  %12596 = vmatprep.mubr.msk.bf16.mxu1 %vm14819_vm0, %v19198_v61  ;;  %v12806_v30 = vpop.f32.mrf.mxu0  ;;  %12629 = vmatpush3.bf16.msra.mxu1 %v14462_v15  ;;  %v4916_v43 = vld [vmem:[#allocation3 + $0x48] sm:$0xff] }
 0x382   : > { %v12450_v48 = vpop.f32.mrf.mxu1  ;;  %13193 = vmatpush3.bf16.msra.mxu0 %v14463_v40  ;;  %12630 = vmatprep.subr.bf16.mxu1 %v19198_v61  ;;  %v4915_v40 = vld [vmem:[#allocation3 + $0x40] sm:$0xff] }
 0x383   : > { %13194 = vmatprep.subr.bf16.mxu0 %v19198_v61  ;;  %v16196_v60 = vpop.f32.mrf.mxu0  ;;  %v16200_v10 = vpack.c.bf16 %v4916_v43, %v4915_v40  ;;  %v2142_v48 = vadd.f32 %v15995_v37, %v15971_v0  ;;  %v2145_v40 = vadd.f32 %v15995_v37, %v15983_v26  ;;  %v14469_v26 = vld [vmem:[%s19174_s3 + $0x408] sm:$0xff]  }
 0x384   : > { %19236 = vst [vmem:[#allocation38_spill] sm:$0xff] %v16196_v60  ;;  %v2331_v13 = vpop.f32.mrf.mxu1 }
 0x385   : > { %v16198_v15 = vadd.f32 %v2331_v13, %v2137_v28  ;;  %v12807_v12 = vpop.f32.mrf.mxu0  ;;  %12631 = vmatpush3.bf16.msra.mxu1 %v14465_v53  ;;  %v14467_v13 = vld [vmem:[%s19174_s3 + $0x410] sm:$0xff]  }
 0x386   : > { %v12451_v30 = vpop.f32.mrf.mxu1  ;;  %13195 = vmatpush3.bf16.msra.mxu0 %v14464_v50  ;;  %12720 = vmatprep.subr.bf16.mxu1 %v19198_v61  ;;  %v19238_v50 = vpack.c.bf16 %v15509_v21, %v15507_v35  ;;  %v4918_v35 = vld [vmem:[#allocation3 + $0x58] sm:$0xff] }
 0x387   : > { %13196 = vmatprep.subr.bf16.mxu0 %v19198_v61  ;;  %v16209_v60 = vpop.f32.mrf.mxu0  ;;  %13109 = vmatmul.mubr.bf16.gmra.mxu0 %v16200_v10  ;;  %v4917_v30 = vld [vmem:[#allocation3 + $0x50] sm:$0xff] }
 0x388   : > { %19237 = vst [vmem:[#allocation39_spill] sm:$0xff] %v16209_v60  ;;  %v2336_v28 = vpop.f32.mrf.mxu1  ;;  %12597 = vmatmul.mubr.bf16.gmra.mxu1 %v19238_v50  ;;  %13112 = vmatprep.mubr.msk.bf16.mxu0 %vm14819_vm0, %v19198_v61 }
 0x389   : > { %v16217_v53 = vadd.f32 %v2336_v28, %v2142_v48  ;;  %12600 = vmatprep.mubr.msk.bf16.mxu1 %vm14819_vm0, %v19198_v61  ;;  %v12810_v0 = vpop.f32.mrf.mxu0  ;;  %v2801_v28 = vld [vmem:[#allocation3 + $0x54] sm:$0xff] }
 0x38a   : > { %v12454_v43 = vpop.f32.mrf.mxu1  ;;  %13197 = vmatpush3.bf16.msra.mxu0 %v14466_v51  ;;  %v16231_v0 = vpack.c.bf16 %v4918_v35, %v4917_v30  ;;  %v4920_v30 = vld [vmem:[#allocation3 + $0x68] sm:$0xff] }
 0x38b   : > { %13198 = vmatprep.subr.bf16.mxu0 %v19198_v61  ;;  %v16227_v21 = vpop.f32.mrf.mxu0  ;;  %v2813_v43 = vpack.c.bf16 %v15822_v23, %v2801_v28 }
 0x38c   : > { %19239 = vst [vmem:[#allocation40_spill] sm:$0xff] %v16227_v21  ;;  %v2339_v12 = vpop.f32.mrf.mxu1 }
 0x38d   : > { %v16229_v48 = vadd.f32 %v2339_v12, %v2145_v40  ;;  %v12811_v50 = vpop.f32.mrf.mxu0  ;;  %v14470_v12 = vld [vmem:[%s19174_s3 + $0x400] sm:$0xff]  }
 0x38e   : > { %v12455_v51 = vpop.f32.mrf.mxu1  ;;  %13199 = vmatpush3.bf16.msra.mxu0 %v14467_v13 }
 0x38f   : > { %13200 = vmatprep.subr.bf16.mxu0 %v19198_v61  ;;  %v16238_v37 = vpop.f32.mrf.mxu0  ;;  %13113 = vmatmul.mubr.bf16.gmra.mxu0 %v16231_v0  ;;  %v4919_v51 = vld [vmem:[#allocation3 + $0x60] sm:$0xff] }
 0x390   : > { %19240 = vst [vmem:[#allocation41_spill] sm:$0xff] %v16238_v37  ;;  %v2344_v40 = vpop.f32.mrf.mxu1  ;;  %12601 = vmatmul.mubr.bf16.gmra.mxu1 %v2813_v43  ;;  %13116 = vmatprep.mubr.msk.bf16.mxu0 %vm14819_vm0, %v19198_v61  ;;  %v2803_v43 = vld [vmem:[#allocation3 + $0x64] sm:$0xff] }
 0x391   : > { %v16244_v35 = vadd.f32 %v2344_v40, %v16003_v5  ;;  %12604 = vmatprep.mubr.msk.bf16.mxu1 %vm14819_vm0, %v19198_v61  ;;  %v12814_v23 = vpop.f32.mrf.mxu0  ;;  %v16254_v40 = vpack.c.bf16 %v4920_v30, %v4919_v51 }
 0x392   : > { %v12458_v13 = vpop.f32.mrf.mxu1  ;;  %13201 = vmatpush3.bf16.msra.mxu0 %v14469_v26  ;;  %v2814_v23 = vpack.c.bf16 %v15834_v25, %v2803_v43  ;;  %v4921_v43 = vld [vmem:[#allocation3 + $0x70] sm:$0xff] }
 0x393   : > { %13202 = vmatprep.subr.bf16.mxu0 %v19198_v61  ;;  %v16252_v28 = vpop.f32.mrf.mxu0 }
 0x394   : > { %19241 = vst [vmem:[#allocation42_spill] sm:$0xff] %v16252_v28  ;;  %v2347_v50 = vpop.f32.mrf.mxu1 }
 0x395   : > { %v12815_v5 = vpop.f32.mrf.mxu0 }
 0x396   : > { %v12459_v37 = vpop.f32.mrf.mxu1  ;;  %13203 = vmatpush3.bf16.msra.mxu0 %v14470_v12  ;;  %v4922_v12 = vld [vmem:[#allocation3 + $0x78] sm:$0xff] }
 0x397   : > { %13292 = vmatprep.subr.bf16.mxu0 %v19198_v61  ;;  %v16258_v26 = vpop.f32.mrf.mxu0  ;;  %13117 = vmatmul.mubr.bf16.gmra.mxu0 %v16254_v40  ;;  %v16273_v28 = vpack.c.bf16 %v4922_v12, %v4921_v43  ;;  %v2807_v12 = vld [vmem:[#allocation3 + $0x84] sm:$0xff] }
 0x398   : > { %19242 = vst [vmem:[#allocation43_spill] sm:$0xff] %v16258_v26  ;;  %v2492_v13 = vpop.f32.mrf.mxu1  ;;  %12605 = vmatmul.mubr.bf16.gmra.mxu1 %v2814_v23  ;;  %13120 = vmatprep.mubr.msk.bf16.mxu0 %vm14819_vm0, %v19198_v61  ;;  %v2805_v23 = vld [vmem:[#allocation3 + $0x74] sm:$0xff]  ;;  %v4923_v43 = vld [vmem:[#allocation3 + $0x80] sm:$0xff]  ;;  %v2816_v60 = vpack.c.bf16 %v2807_v12, %v2807_v12 }
 0x399   : > { %v16264_v50 = vadd.f32 %v2492_v13, %v16024_v56  ;;  %12608 = vmatprep.mubr.msk.bf16.mxu1 %vm14819_vm0, %v19198_v61  ;;  %v12818_v37 = vpop.f32.mrf.mxu0  ;;  %v2815_v56 = vpack.c.bf16 %v15845_v57, %v2805_v23 }
 0x39a   : > { %v12478_v25 = vpop.f32.mrf.mxu1 }
 0x39b   : > { %v16268_v30 = vpop.f32.mrf.mxu0 }
 0x39c   : > { %19243 = vst [vmem:[#allocation44_spill] sm:$0xff] %v16268_v30  ;;  %v2495_v51 = vpop.f32.mrf.mxu1 }
 0x39d   : > { %v16271_v5 = vadd.f32 %v2495_v51, %v16032_v4  ;;  %v12819_v26 = vpop.f32.mrf.mxu0 }
 0x39e   : > { %v12479_v21 = vpop.f32.mrf.mxu1 }
 0x39f   : > { %v16276_v13 = vpop.f32.mrf.mxu0  ;;  %13121 = vmatmul.mubr.bf16.gmra.mxu0 %v16273_v28  ;;  %v4924_v21 = vld [vmem:[#allocation3 + $0x88] sm:$0xff] }
 0x3a0   : > { %19244 = vst [vmem:[#allocation45_spill] sm:$0xff] %v16276_v13  ;;  %v2500_v37 = vpop.f32.mrf.mxu1  ;;  %12609 = vmatmul.mubr.bf16.gmra.mxu1 %v2815_v56  ;;  %13124 = vmatprep.mubr.msk.bf16.mxu0 %vm14819_vm0, %v19198_v61  ;;  %v16289_v13 = vpack.c.bf16 %v4924_v21, %v4923_v43  ;;  %v4926_v21 = vld [vmem:[#allocation3 + $0x98] sm:$0xff]  ;;  %v3003_v43 = vld [vmem:[#allocation3 + $0xe] sm:$0xff] }
 0x3a1   : > { %v16282_v25 = vadd.f32 %v2500_v37, %v16045_v54  ;;  %12612 = vmatprep.mubr.msk.bf16.mxu1 %vm14819_vm0, %v19198_v61  ;;  %v12822_v4 = vpop.f32.mrf.mxu0 }
 0x3a2   : > { %v12482_v26 = vpop.f32.mrf.mxu1 }
 0x3a3   : > { %v3831_v57 = vpop.f32.mrf.mxu0 }
 0x3a4   : > { %v2503_v51 = vpop.f32.mrf.mxu1 }
 0x3a5   : > { %v16287_v23 = vadd.f32 %v2503_v51, %v16051_v45  ;;  %v12823_v56 = vpop.f32.mrf.mxu0  ;;  %v16303_v51 = vld [vmem:[#allocation3 + $0x90] sm:$0xff] }
 0x3a6   : > { %v12483_v30 = vpop.f32.mrf.mxu1 }
 0x3a7   : > { %v16291_v54 = vpop.f32.mrf.mxu0  ;;  %13125 = vmatmul.mubr.bf16.gmra.mxu0 %v16289_v13  ;;  %v3004_v30 = vld [vmem:[#allocation3 + $0x16] sm:$0xff] }
 0x3a8   : > { %19245 = vst [vmem:[#allocation46_spill] sm:$0xff] %v16291_v54  ;;  %v2508_v37 = vpop.f32.mrf.mxu1  ;;  %12613 = vmatmul.mubr.bf16.gmra.mxu1 %v2816_v60  ;;  %13128 = vmatprep.mubr.msk.bf16.mxu0 %vm14819_vm0, %v19198_v61 }
 0x3a9   : > { %v16297_v4 = vadd.f32 %v2508_v37, %v16064_v1  ;;  %12632 = vmatprep.mubr.msk.bf16.mxu1 %vm14819_vm0, %v19198_v61  ;;  %v12894_v45 = vpop.f32.mrf.mxu0  ;;  %v14468_v1 = vld [vmem:[%s19174_s3 + $0x1f8] sm:$0xff]   ;;  %v4935_v37 = vpack.c.bf16 %v4926_v21, %v16303_v51 }
 0x3aa   : > { %v12486_v26 = vpop.f32.mrf.mxu1 }
 0x3ab   : > { %v16301_v12 = vpop.f32.mrf.mxu0  ;;  %v3020_v26 = vpack.c.bf16 %v3004_v30, %v3003_v43  ;;  %v4927_v30 = vld [vmem:[#allocation3 + $0xa0] sm:$0xff] }
 0x3ac   : > { %19246 = vst [vmem:[#allocation47_spill] sm:$0xff] %v16301_v12  ;;  %v2511_v57 = vpop.f32.mrf.mxu1 }
 0x3ad   : > { %v16306_v60 = vadd.f32 %v2511_v57, %v16074_v24  ;;  %v12895_v56 = vpop.f32.mrf.mxu0  ;;  %v14471_v57 = vld [vmem:[%s19174_s3 + $0x1f0] sm:$0xff]  }
 0x3ae   : > { %v12487_v45 = vpop.f32.mrf.mxu1 }
 0x3af   : > { %v16312_v54 = vpop.f32.mrf.mxu0  ;;  %13129 = vmatmul.mubr.bf16.gmra.mxu0 %v4935_v37 }
 0x3b0   : > { %v2516_v12 = vpop.f32.mrf.mxu1  ;;  %12633 = vmatmul.mubr.bf16.vlgmr.msra.gmra.mxu1 %v3020_v26  ;;  %13132 = vmatprep.mubr.msk.bf16.mxu0 %vm14819_vm0, %v19198_v61  ;;  %v14472_v26 = vld [vmem:[%s19174_s3 + $0x1e8] sm:$0xff]  }
 0x3b1   : > { %v16317_v24 = vadd.f32 %v2516_v12, %v16086_v8  ;;  %12721 = vmatpush3.bf16.msra.mxu1 %v14468_v1  ;;  %v12898_v56 = vpop.f32.mrf.mxu0  ;;  %12636 = vmatprep.mubr.msk.bf16.mxu1 %vm14819_vm0, %v19198_v61  ;;  %v4936_v12 = vpack.c.bf16 %v4927_v30, %v4927_v30 }
 0x3b2   : > { %v12490_v21 = vpop.f32.mrf.mxu1  ;;  %12722 = vmatprep.subr.bf16.mxu1 %v19198_v61 }
 0x3b3   : > { %v16325_v43 = vpop.f32.mrf.mxu0 }
 0x3b4   : > { %v2519_v37 = vpop.f32.mrf.mxu1 }
 0x3b5   : > { %v16328_v45 = vadd.f32 %v2519_v37, %v16098_v52  ;;  %12723 = vmatpush3.bf16.msra.mxu1 %v14471_v57  ;;  %v12899_v8 = vpop.f32.mrf.mxu0  ;;  %v14473_v37 = vld [vmem:[%s19174_s3 + $0x1e0] sm:$0xff]  }
 0x3b6   : > { %v12491_v1 = vpop.f32.mrf.mxu1  ;;  %12724 = vmatprep.subr.bf16.mxu1 %v19198_v61 }
 0x3b7   : > { %v16334_v56 = vpop.f32.mrf.mxu0  ;;  %13133 = vmatmul.mubr.bf16.gmra.mxu0 %v4936_v12 }
 0x3b8   : > { %v2524_v21 = vpop.f32.mrf.mxu1  ;;  %12637 = vmatmul.mubr.bf16.gmra.mxu1 %v15899_v46  ;;  %13204 = vmatprep.mubr.msk.bf16.mxu0 %vm14819_vm0, %v19198_v61 }
 0x3b9   : > { %v16340_v52 = vadd.f32 %v2524_v21, %v16111_v41  ;;  %12640 = vmatprep.mubr.msk.bf16.mxu1 %vm14819_vm0, %v19198_v61  ;;  %v12902_v57 = vpop.f32.mrf.mxu0  ;;  %12725 = vmatpush3.bf16.msra.mxu1 %v14472_v26  ;;  %v14474_v21 = vld [vmem:[%s19174_s3 + $0x1d8] sm:$0xff]  }
 0x3ba   : > { %v12494_v30 = vpop.f32.mrf.mxu1  ;;  %12726 = vmatprep.subr.bf16.mxu1 %v19198_v61  ;;  %v14476_v26 = vld [vmem:[%s19174_s3 + $0x4b8] sm:$0xff]  }
 0x3bb   : > { %v16348_v8 = vpop.f32.mrf.mxu0  ;;  %v19247_v30 = vpack.c.bf16 %v15452_v33, %v15450_v18  ;;  %v14475_v18 = vld [vmem:[%s19174_s3 + $0x1d0] sm:$0xff]  }
 0x3bc   : > { %v2527_v46 = vpop.f32.mrf.mxu1  ;;  %v14477_v33 = vld [vmem:[%s19174_s3 + $0x4b0] sm:$0xff]  }
 0x3bd   : > { %v16351_v12 = vadd.f32 %v2527_v46, %v16123_v6  ;;  %v12903_v41 = vpop.f32.mrf.mxu0  ;;  %12727 = vmatpush3.bf16.msra.mxu1 %v14473_v37 }
 0x3be   : > { %v12495_v1 = vpop.f32.mrf.mxu1  ;;  %12728 = vmatprep.subr.bf16.mxu1 %v19198_v61 }
 0x3bf   : > { %v16360_v57 = vpop.f32.mrf.mxu0  ;;  %13205 = vmatmul.mubr.bf16.vlgmr.msra.gmra.mxu0 %v19247_v30 }
 0x3c0   : > { %v2532_v6 = vpop.f32.mrf.mxu1  ;;  %12641 = vmatmul.mubr.bf16.gmra.mxu1 %v15929_v31  ;;  %13208 = vmatprep.mubr.msk.bf16.mxu0 %vm14819_vm0, %v19198_v61 }
 0x3c1   : > { %v16369_v37 = vadd.f32 %v2532_v6, %v16144_v29  ;;  %12644 = vmatprep.mubr.msk.bf16.mxu1 %vm14819_vm0, %v19198_v61  ;;  %v12906_v46 = vpop.f32.mrf.mxu0  ;;  %12729 = vmatpush3.bf16.msra.mxu1 %v14474_v21  ;;  %v14479_v6 = vld [vmem:[%s19174_s3 + $0x4a8] sm:$0xff]  }
 0x3c2   : > { %v12498_v41 = vpop.f32.mrf.mxu1  ;;  %13293 = vmatpush3.bf16.msra.mxu0 %v14476_v26  ;;  %12730 = vmatprep.subr.bf16.mxu1 %v19198_v61  ;;  %v14478_v26 = vld [vmem:[%s19174_s3 + $0x1c8] sm:$0xff]  }
 0x3c3   : > { %13294 = vmatprep.subr.bf16.mxu0 %v19198_v61  ;;  %v16381_v31 = vpop.f32.mrf.mxu0 }
 0x3c4   : > { %v2535_v29 = vpop.f32.mrf.mxu1 }
 0x3c5   : > { %v16384_v1 = vadd.f32 %v2535_v29, %v16160_v49  ;;  %v12907_v21 = vpop.f32.mrf.mxu0  ;;  %12731 = vmatpush3.bf16.msra.mxu1 %v14475_v18  ;;  %v19248_v49 = vpack.c.bf16 %v15485_v36, %v15483_v19  ;;  %v14480_v19 = vld [vmem:[%s19174_s3 + $0x4a0] sm:$0xff]  }
 0x3c6   : > { %v12499_v30 = vpop.f32.mrf.mxu1  ;;  %13295 = vmatpush3.bf16.msra.mxu0 %v14477_v33  ;;  %12732 = vmatprep.subr.bf16.mxu1 %v19198_v61  ;;  %v14481_v36 = vld [vmem:[%s19174_s3 + $0x1c0] sm:$0xff]  }
 0x3c7   : > { %13296 = vmatprep.subr.bf16.mxu0 %v19198_v61  ;;  %v16394_v46 = vpop.f32.mrf.mxu0  ;;  %13209 = vmatmul.mubr.bf16.gmra.mxu0 %v19248_v49 }
 0x3c8   : > { %v2540_v41 = vpop.f32.mrf.mxu1  ;;  %12645 = vmatmul.mubr.bf16.gmra.mxu1 %v15960_v38  ;;  %13212 = vmatprep.mubr.msk.bf16.mxu0 %vm14819_vm0, %v19198_v61 }
 0x3c9   : > { %v16403_v18 = vadd.f32 %v2540_v41, %v16182_v58  ;;  %12648 = vmatprep.mubr.msk.bf16.mxu1 %vm14819_vm0, %v19198_v61  ;;  %v12910_v33 = vpop.f32.mrf.mxu0  ;;  %12733 = vmatpush3.bf16.msra.mxu1 %v14478_v26  ;;  %v19249_v41 = vpack.c.bf16 %v15523_v16, %v15521_v62  ;;  %v14483_v62 = vld [vmem:[%s19174_s3 + $0x490] sm:$0xff]  }
 0x3ca   : > { %v12502_v29 = vpop.f32.mrf.mxu1  ;;  %13297 = vmatpush3.bf16.msra.mxu0 %v14479_v6  ;;  %12734 = vmatprep.subr.bf16.mxu1 %v19198_v61  ;;  %v14482_v6 = vld [vmem:[%s19174_s3 + $0x498] sm:$0xff]  }
 0x3cb   : > { %13298 = vmatprep.subr.bf16.mxu0 %v19198_v61  ;;  %v16415_v38 = vpop.f32.mrf.mxu0 }
 0x3cc   : > { %v2543_v58 = vpop.f32.mrf.mxu1 }
 0x3cd   : > { %v16418_v21 = vadd.f32 %v2543_v58, %v16198_v15  ;;  %v12911_v30 = vpop.f32.mrf.mxu0  ;;  %12735 = vmatpush3.bf16.msra.mxu1 %v14481_v36 }
 0x3ce   : > { %v12503_v26 = vpop.f32.mrf.mxu1  ;;  %13299 = vmatpush3.bf16.msra.mxu0 %v14480_v19  ;;  %12824 = vmatprep.subr.bf16.mxu1 %v19198_v61  ;;  %v14485_v30 = vld [vmem:[%s19174_s3 + $0x488] sm:$0xff]  }
 0x3cf   : > { %13300 = vmatprep.subr.bf16.mxu0 %v19198_v61  ;;  %v16425_v49 = vpop.f32.mrf.mxu0  ;;  %13213 = vmatmul.mubr.bf16.gmra.mxu0 %v19249_v41 }
 0x3d0   : > { %v2548_v15 = vpop.f32.mrf.mxu1  ;;  %12649 = vmatmul.mubr.bf16.gmra.mxu1 %v15985_v7  ;;  %13216 = vmatprep.mubr.msk.bf16.mxu0 %vm14819_vm0, %v19198_v61 }
 0x3d1   : > { %v16434_v33 = vadd.f32 %v2548_v15, %v16217_v53  ;;  %12652 = vmatprep.mubr.msk.bf16.mxu1 %vm14819_vm0, %v19198_v61  ;;  %v12914_v29 = vpop.f32.mrf.mxu0 }
 0x3d2   : > { %v12506_v19 = vpop.f32.mrf.mxu1  ;;  %13301 = vmatpush3.bf16.msra.mxu0 %v14482_v6  ;;  %v19250_v6 = vpack.c.bf16 %v15548_v47, %v15546_v63  ;;  %v14486_v63 = vld [vmem:[%s19174_s3 + $0x480] sm:$0xff]  }
 0x3d3   : > { %13302 = vmatprep.subr.bf16.mxu0 %v19198_v61  ;;  %v16442_v16 = vpop.f32.mrf.mxu0 }
 0x3d4   : > { %v2551_v7 = vpop.f32.mrf.mxu1 }
 0x3d5   : > { %v16445_v36 = vadd.f32 %v2551_v7, %v16229_v48  ;;  %v12915_v53 = vpop.f32.mrf.mxu0  ;;  %v19251_v7 = vpack.c.bf16 %v15572_v20, %v15570_v17 }
 0x3d6   : > { %v12507_v58 = vpop.f32.mrf.mxu1  ;;  %13303 = vmatpush3.bf16.msra.mxu0 %v14483_v62 }
 0x3d7   : > { %13304 = vmatprep.subr.bf16.mxu0 %v19198_v61  ;;  %v16451_v26 = vpop.f32.mrf.mxu0  ;;  %13217 = vmatmul.mubr.bf16.gmra.mxu0 %v19250_v6 }
 0x3d8   : > { %v2556_v41 = vpop.f32.mrf.mxu1  ;;  %12653 = vmatmul.mubr.bf16.gmra.mxu1 %v16013_v44  ;;  %13220 = vmatprep.mubr.msk.bf16.mxu0 %vm14819_vm0, %v19198_v61 }
 0x3d9   : > { %v16460_v48 = vadd.f32 %v2556_v41, %v16244_v35  ;;  %12656 = vmatprep.mubr.msk.bf16.mxu1 %vm14819_vm0, %v19198_v61  ;;  %v12918_v15 = vpop.f32.mrf.mxu0 }
 0x3da   : > { %v12510_v29 = vpop.f32.mrf.mxu1  ;;  %13305 = vmatpush3.bf16.msra.mxu0 %v14485_v30 }
 0x3db   : > { %13306 = vmatprep.subr.bf16.mxu0 %v19198_v61  ;;  %v16468_v47 = vpop.f32.mrf.mxu0 }
 0x3dc   : > { %v2559_v44 = vpop.f32.mrf.mxu1 }
 0x3dd   : > { %v12919_v19 = vpop.f32.mrf.mxu0 }
 0x3de   : > { %v12511_v62 = vpop.f32.mrf.mxu1  ;;  %13307 = vmatpush3.bf16.msra.mxu0 %v14486_v63  ;;  %v19252_v63 = vpack.c.bf16 %v15597_v34, %v15602_v14 }
 0x3df   : > { %13396 = vmatprep.subr.bf16.mxu0 %v19198_v61  ;;  %v16471_v35 = vpop.f32.mrf.mxu0  ;;  %13221 = vmatmul.mubr.bf16.gmra.mxu0 %v19251_v7  ;;  %v5348_v62 = vld [vmem:[#allocation3 + $0x93] sm:$0xff] }
 0x3e0   : > { %v2704_v53 = vpop.f32.mrf.mxu1  ;;  %12657 = vmatmul.mubr.bf16.gmra.mxu1 %v16034_v9  ;;  %13224 = vmatprep.mubr.msk.bf16.mxu0 %vm14819_vm0, %v19198_v61 }
 0x3e1   : > { %v16480_v58 = vadd.f32 %v2704_v53, %v16264_v50  ;;  %12660 = vmatprep.mubr.msk.bf16.mxu1 %vm14819_vm0, %v19198_v61  ;;  %v12922_v30 = vpop.f32.mrf.mxu0 }
 0x3e2   : > { %v12530_v6 = vpop.f32.mrf.mxu1  ;;  %v5347_v30 = vld [vmem:[#allocation3 + $0x8b] sm:$0xff] }
 0x3e3   : > { %v16484_v41 = vpop.f32.mrf.mxu0 }
 0x3e4   : > { %v2707_v15 = vpop.f32.mrf.mxu1 }
 0x3e5   : > { %v16487_v17 = vadd.f32 %v2707_v15, %v16271_v5  ;;  %v12923_v20 = vpop.f32.mrf.mxu0  ;;  %v3028_v15 = vpack.c.bf16 %v16072_v55, %v16072_v55 }
 0x3e6   : > { %v12531_v29 = vpop.f32.mrf.mxu1 }
 0x3e7   : > { %v16489_v9 = vpop.f32.mrf.mxu0  ;;  %13225 = vmatmul.mubr.bf16.gmra.mxu0 %v19252_v63 }
 0x3e8   : > { %v2712_v50 = vpop.f32.mrf.mxu1  ;;  %12661 = vmatmul.mubr.bf16.gmra.mxu1 %v16053_v42  ;;  %13228 = vmatprep.mubr.msk.bf16.mxu0 %vm14819_vm0, %v19198_v61  ;;  %v5358_v42 = vpack.c.bf16 %v5348_v62, %v5347_v30  ;;  %v5349_v62 = vld [vmem:[#allocation3 + $0x9b] sm:$0xff] }
 0x3e9   : > { %v16498_v44 = vadd.f32 %v2712_v50, %v16282_v25  ;;  %12664 = vmatprep.mubr.msk.bf16.mxu1 %vm14819_vm0, %v19198_v61  ;;  %v12926_v5 = vpop.f32.mrf.mxu0  ;;  %v5350_v50 = vld [vmem:[#allocation3 + $0xa3] sm:$0xff] }
 0x3ea   : > { %v12534_v19 = vpop.f32.mrf.mxu1  ;;  %v3428_v5 = vld [vmem:[#allocation3 + $0x18] sm:$0xff] }
 0x3eb   : > { %v4255_v7 = vpop.f32.mrf.mxu0 }
 0x3ec   : > { %v2715_v53 = vpop.f32.mrf.mxu1 }
 0x3ed   : > { %v16503_v34 = vadd.f32 %v2715_v53, %v16287_v23  ;;  %v12927_v14 = vpop.f32.mrf.mxu0  ;;  %v3427_v53 = vld [vmem:[#allocation3 + $0x10] sm:$0xff] }
 0x3ee   : > { %v12535_v6 = vpop.f32.mrf.mxu1  ;;  %v5359_v14 = vpack.c.bf16 %v5350_v50, %v5349_v62 }
 0x3ef   : > { %v16507_v25 = vpop.f32.mrf.mxu0  ;;  %13229 = vmatmul.mubr.bf16.gmra.mxu0 %v5358_v42  ;;  %v3444_v6 = vpack.c.bf16 %v3428_v5, %v3427_v53  ;;  %v5351_v5 = vld [vmem:[#allocation3 + $0xab] sm:$0xff] }
 0x3f0   : > { %v2720_v20 = vpop.f32.mrf.mxu1  ;;  %12665 = vmatmul.mubr.bf16.gmra.mxu1 %v3028_v15  ;;  %13232 = vmatprep.mubr.msk.bf16.mxu0 %vm14819_vm0, %v19198_v61 }
 0x3f1   : > { %v16512_v29 = vadd.f32 %v2720_v20, %v16297_v4  ;;  %12736 = vmatprep.mubr.msk.bf16.mxu1 %vm14819_vm0, %v19198_v61  ;;  %v12998_v23 = vpop.f32.mrf.mxu0  ;;  %v14484_v4 = vld [vmem:[%s19174_s3 + $0x278] sm:$0xff]  }
 0x3f2   : > { %v12538_v63 = vpop.f32.mrf.mxu1  ;;  %v14487_v23 = vld [vmem:[%s19174_s3 + $0x270] sm:$0xff]  }
 0x3f3   : > { %v16516_v19 = vpop.f32.mrf.mxu0 }
 0x3f4   : > { %v2723_v55 = vpop.f32.mrf.mxu1 }
 0x3f5   : > { %v16519_v7 = vadd.f32 %v2723_v55, %v16306_v60  ;;  %v12999_v30 = vpop.f32.mrf.mxu0 }
 0x3f6   : > { %v12539_v42 = vpop.f32.mrf.mxu1 }
 0x3f7   : > { %v16524_v15 = vpop.f32.mrf.mxu0  ;;  %13233 = vmatmul.mubr.bf16.gmra.mxu0 %v5359_v14  ;;  %v14488_v14 = vld [vmem:[%s19174_s3 + $0x268] sm:$0xff]  }
 0x3f8   : > { %v2728_v20 = vpop.f32.mrf.mxu1  ;;  %12737 = vmatmul.mubr.bf16.vlgmr.msra.gmra.mxu1 %v3444_v6  ;;  %13236 = vmatprep.mubr.msk.bf16.mxu0 %vm14819_vm0, %v19198_v61 }
 0x3f9   : > { %v16529_v60 = vadd.f32 %v2728_v20, %v16317_v24  ;;  %12825 = vmatpush3.bf16.msra.mxu1 %v14484_v4  ;;  %v13002_v63 = vpop.f32.mrf.mxu0  ;;  %12740 = vmatprep.mubr.msk.bf16.mxu1 %vm14819_vm0, %v19198_v61  ;;  %v5360_v4 = vpack.c.bf16 %v5351_v5, %v5351_v5 }
 0x3fa   : > { %v12542_v50 = vpop.f32.mrf.mxu1  ;;  %12826 = vmatprep.subr.bf16.mxu1 %v19198_v61  ;;  %v14489_v63 = vld [vmem:[%s19174_s3 + $0x260] sm:$0xff]  }
 0x3fb   : > { %v16537_v55 = vpop.f32.mrf.mxu0  ;;  %v5760_v50 = vld [vmem:[#allocation3 + $0x35] sm:$0xff] }
 0x3fc   : > { %19253 = vst [vmem:[#allocation48_spill] sm:$0xff] %v16537_v55  ;;  %v2731_v62 = vpop.f32.mrf.mxu1 }
 0x3fd   : > { %v16540_v53 = vadd.f32 %v2731_v62, %v16328_v45  ;;  %12827 = vmatpush3.bf16.msra.mxu1 %v14487_v23  ;;  %v13003_v24 = vpop.f32.mrf.mxu0  ;;  %v5759_v62 = vld [vmem:[#allocation3 + $0x2d] sm:$0xff] }
 0x3fe   : > { %v12543_v30 = vpop.f32.mrf.mxu1  ;;  %12828 = vmatprep.subr.bf16.mxu1 %v19198_v61 }
 0x3ff   : > { %v16546_v42 = vpop.f32.mrf.mxu0  ;;  %13237 = vmatmul.mubr.bf16.gmra.mxu0 %v5360_v4  ;;  %v16565_v4 = vpack.c.bf16 %v5760_v50, %v5759_v62  ;;  %v5762_v62 = vld [vmem:[#allocation3 + $0x45] sm:$0xff] }
 0x400   : > { %19254 = vst [vmem:[#allocation49_spill] sm:$0xff] %v16546_v42  ;;  %v2736_v6 = vpop.f32.mrf.mxu1  ;;  %12741 = vmatmul.mubr.bf16.gmra.mxu1 %v16125_v22  ;;  %13308 = vmatprep.mubr.msk.bf16.mxu0 %vm14819_vm0, %v19198_v61 }
 0x401   : > { %v16552_v45 = vadd.f32 %v2736_v6, %v16340_v52  ;;  %12744 = vmatprep.mubr.msk.bf16.mxu1 %vm14819_vm0, %v19198_v61  ;;  %v13006_v20 = vpop.f32.mrf.mxu0  ;;  %12829 = vmatpush3.bf16.msra.mxu1 %v14488_v14  ;;  %v14490_v14 = vld [vmem:[%s19174_s3 + $0x258] sm:$0xff]  }
 0x402   : > { %v12546_v23 = vpop.f32.mrf.mxu1  ;;  %12830 = vmatprep.subr.bf16.mxu1 %v19198_v61  ;;  %v14492_v6 = vld [vmem:[%s19174_s3 + $0x538] sm:$0xff]  }
 0x403   : > { %v16560_v22 = vpop.f32.mrf.mxu0 }
 0x404   : > { %19255 = vst [vmem:[#allocation50_spill] sm:$0xff] %v16560_v22  ;;  %v2739_v5 = vpop.f32.mrf.mxu1 }
 0x405   : > { %v16563_v52 = vadd.f32 %v2739_v5, %v16351_v12  ;;  %v13007_v24 = vpop.f32.mrf.mxu0  ;;  %12831 = vmatpush3.bf16.msra.mxu1 %v14489_v63  ;;  %v14491_v5 = vld [vmem:[%s19174_s3 + $0x250] sm:$0xff]  }
 0x406   : > { %v12547_v30 = vpop.f32.mrf.mxu1  ;;  %12832 = vmatprep.subr.bf16.mxu1 %v19198_v61 }
 0x407   : > { %v16574_v20 = vpop.f32.mrf.mxu0  ;;  %13309 = vmatmul.mubr.bf16.vlgmr.msra.gmra.mxu0 %v16565_v4  ;;  %v5761_v30 = vld [vmem:[#allocation3 + $0x3d] sm:$0xff] }
 0x408   : > { %19256 = vst [vmem:[#allocation51_spill] sm:$0xff] %v16574_v20  ;;  %v2744_v12 = vpop.f32.mrf.mxu1  ;;  %12745 = vmatmul.mubr.bf16.gmra.mxu1 %v16162_v2  ;;  %13312 = vmatprep.mubr.msk.bf16.mxu0 %vm14819_vm0, %v19198_v61  ;;  %v14493_v2 = vld [vmem:[%s19174_s3 + $0x530] sm:$0xff]   ;;  %v14495_v20 = vld [vmem:[%s19174_s3 + $0x528] sm:$0xff]  }
 0x409   : > { %v16581_v23 = vadd.f32 %v2744_v12, %v16369_v37  ;;  %12748 = vmatprep.mubr.msk.bf16.mxu1 %vm14819_vm0, %v19198_v61  ;;  %v13010_v63 = vpop.f32.mrf.mxu0  ;;  %12833 = vmatpush3.bf16.msra.mxu1 %v14490_v14 }
 0x40a   : > { %v12550_v50 = vpop.f32.mrf.mxu1  ;;  %13397 = vmatpush3.bf16.msra.mxu0 %v14492_v6  ;;  %12834 = vmatprep.subr.bf16.mxu1 %v19198_v61  ;;  %v16598_v63 = vpack.c.bf16 %v5762_v62, %v5761_v30  ;;  %v14496_v30 = vld [vmem:[%s19174_s3 + $0x520] sm:$0xff]  }
 0x40b   : > { %13398 = vmatprep.subr.bf16.mxu0 %v19198_v61  ;;  %v16593_v37 = vpop.f32.mrf.mxu0  ;;  %v14494_v50 = vld [vmem:[%s19174_s3 + $0x248] sm:$0xff]  }
 0x40c   : > { %19257 = vst [vmem:[#allocation52_spill] sm:$0xff] %v16593_v37  ;;  %v2747_v24 = vpop.f32.mrf.mxu1 }
 0x40d   : > { %v16596_v14 = vadd.f32 %v2747_v24, %v16384_v1  ;;  %v13011_v12 = vpop.f32.mrf.mxu0  ;;  %12835 = vmatpush3.bf16.msra.mxu1 %v14491_v5 }
 0x40e   : > { %v12551_v6 = vpop.f32.mrf.mxu1  ;;  %13399 = vmatpush3.bf16.msra.mxu0 %v14493_v2  ;;  %12836 = vmatprep.subr.bf16.mxu1 %v19198_v61  ;;  %v5764_v12 = vld [vmem:[#allocation3 + $0x55] sm:$0xff] }
 0x40f   : > { %13400 = vmatprep.subr.bf16.mxu0 %v19198_v61  ;;  %v16608_v1 = vpop.f32.mrf.mxu0  ;;  %13313 = vmatmul.mubr.bf16.gmra.mxu0 %v16598_v63 }
 0x410   : > { %19258 = vst [vmem:[#allocation53_spill] sm:$0xff] %v16608_v1  ;;  %v2752_v62 = vpop.f32.mrf.mxu1  ;;  %12749 = vmatmul.mubr.bf16.gmra.mxu1 %v16200_v10  ;;  %13316 = vmatprep.mubr.msk.bf16.mxu0 %vm14819_vm0, %v19198_v61  ;;  %v14497_v10 = vld [vmem:[%s19174_s3 + $0x240] sm:$0xff]   ;;  %v14498_v1 = vld [vmem:[%s19174_s3 + $0x518] sm:$0xff]  }
 0x411   : > { %v16615_v5 = vadd.f32 %v2752_v62, %v16403_v18  ;;  %12752 = vmatprep.mubr.msk.bf16.mxu1 %vm14819_vm0, %v19198_v61  ;;  %v13014_v2 = vpop.f32.mrf.mxu0  ;;  %12837 = vmatpush3.bf16.msra.mxu1 %v14494_v50  ;;  %v5763_v62 = vld [vmem:[#allocation3 + $0x4d] sm:$0xff] }
 0x412   : > { %v12554_v24 = vpop.f32.mrf.mxu1  ;;  %13401 = vmatpush3.bf16.msra.mxu0 %v14495_v20  ;;  %12838 = vmatprep.subr.bf16.mxu1 %v19198_v61  ;;  %v16632_v2 = vpack.c.bf16 %v5764_v12, %v5763_v62  ;;  %v5766_v62 = vld [vmem:[#allocation3 + $0x65] sm:$0xff] }
 0x413   : > { %13402 = vmatprep.subr.bf16.mxu0 %v19198_v61  ;;  %v16627_v18 = vpop.f32.mrf.mxu0 }
 0x414   : > { %19259 = vst [vmem:[#allocation54_spill] sm:$0xff] %v16627_v18  ;;  %v2755_v6 = vpop.f32.mrf.mxu1 }
 0x415   : > { %v16630_v50 = vadd.f32 %v2755_v6, %v16418_v21  ;;  %v13015_v20 = vpop.f32.mrf.mxu0  ;;  %12839 = vmatpush3.bf16.msra.mxu1 %v14497_v10  ;;  %v14499_v6 = vld [vmem:[%s19174_s3 + $0x510] sm:$0xff]  }
 0x416   : > { %v12555_v24 = vpop.f32.mrf.mxu1  ;;  %13403 = vmatpush3.bf16.msra.mxu0 %v14496_v30  ;;  %12928 = vmatprep.subr.bf16.mxu1 %v19198_v61 }
 0x417   : > { %13404 = vmatprep.subr.bf16.mxu0 %v19198_v61  ;;  %v16639_v18 = vpop.f32.mrf.mxu0  ;;  %13317 = vmatmul.mubr.bf16.gmra.mxu0 %v16632_v2  ;;  %v5765_v24 = vld [vmem:[#allocation3 + $0x5d] sm:$0xff] }
 0x418   : > { %19260 = vst [vmem:[#allocation55_spill] sm:$0xff] %v16639_v18  ;;  %v2760_v21 = vpop.f32.mrf.mxu1  ;;  %12753 = vmatmul.mubr.bf16.gmra.mxu1 %v16231_v0  ;;  %13320 = vmatprep.mubr.msk.bf16.mxu0 %vm14819_vm0, %v19198_v61  ;;  %v16659_v18 = vpack.c.bf16 %v5766_v62, %v5765_v24  ;;  %v5768_v24 = vld [vmem:[#allocation3 + $0x75] sm:$0xff] }
 0x419   : > { %v16646_v30 = vadd.f32 %v2760_v21, %v16434_v33  ;;  %12756 = vmatprep.mubr.msk.bf16.mxu1 %vm14819_vm0, %v19198_v61  ;;  %v13018_v10 = vpop.f32.mrf.mxu0 }
 0x41a   : > { %v12558_v12 = vpop.f32.mrf.mxu1  ;;  %13405 = vmatpush3.bf16.msra.mxu0 %v14498_v1  ;;  %v14501_v1 = vld [vmem:[%s19174_s3 + $0x508] sm:$0xff]  }
 0x41b   : > { %13406 = vmatprep.subr.bf16.mxu0 %v19198_v61  ;;  %v16654_v0 = vpop.f32.mrf.mxu0 }
 0x41c   : > { %19261 = vst [vmem:[#allocation56_spill] sm:$0xff] %v16654_v0  ;;  %v2763_v20 = vpop.f32.mrf.mxu1 }
 0x41d   : > { %v16657_v33 = vadd.f32 %v2763_v20, %v16445_v36  ;;  %v13019_v21 = vpop.f32.mrf.mxu0  ;;  %v14502_v20 = vld [vmem:[%s19174_s3 + $0x500] sm:$0xff]  }
 0x41e   : > { %v12559_v10 = vpop.f32.mrf.mxu1  ;;  %13407 = vmatpush3.bf16.msra.mxu0 %v14499_v6 }
 0x41f   : > { %13408 = vmatprep.subr.bf16.mxu0 %v19198_v61  ;;  %v16665_v12 = vpop.f32.mrf.mxu0  ;;  %13321 = vmatmul.mubr.bf16.gmra.mxu0 %v16659_v18  ;;  %v5767_v10 = vld [vmem:[#allocation3 + $0x6d] sm:$0xff] }
 0x420   : > { %19262 = vst [vmem:[#allocation57_spill] sm:$0xff] %v16665_v12  ;;  %v2768_v0 = vpop.f32.mrf.mxu1  ;;  %12757 = vmatmul.mubr.bf16.gmra.mxu1 %v16254_v40  ;;  %13324 = vmatprep.mubr.msk.bf16.mxu0 %vm14819_vm0, %v19198_v61 }
 0x421   : > { %v16672_v36 = vadd.f32 %v2768_v0, %v16460_v48  ;;  %12760 = vmatprep.mubr.msk.bf16.mxu1 %vm14819_vm0, %v19198_v61  ;;  %v13022_v6 = vpop.f32.mrf.mxu0  ;;  %v16682_v48 = vpack.c.bf16 %v5768_v24, %v5767_v10  ;;  %v5770_v24 = vld [vmem:[#allocation3 + $0x85] sm:$0xff] }
 0x422   : > { %v12562_v62 = vpop.f32.mrf.mxu1  ;;  %13409 = vmatpush3.bf16.msra.mxu0 %v14501_v1 }
 0x423   : > { %13410 = vmatprep.subr.bf16.mxu0 %v19198_v61  ;;  %v16680_v40 = vpop.f32.mrf.mxu0 }
 0x424   : > { %19263 = vst [vmem:[#allocation58_spill] sm:$0xff] %v16680_v40  ;;  %v2771_v21 = vpop.f32.mrf.mxu1 }
 0x425   : > { %v13023_v12 = vpop.f32.mrf.mxu0 }
 0x426   : > { %v12563_v0 = vpop.f32.mrf.mxu1  ;;  %13411 = vmatpush3.bf16.msra.mxu0 %v14502_v20 }
 0x427   : > { %13500 = vmatprep.subr.bf16.mxu0 %v19198_v61  ;;  %v16685_v6 = vpop.f32.mrf.mxu0  ;;  %13325 = vmatmul.mubr.bf16.gmra.mxu0 %v16682_v48  ;;  %v5769_v0 = vld [vmem:[#allocation3 + $0x7d] sm:$0xff] }
 0x428   : > { %19264 = vst [vmem:[#allocation59_spill] sm:$0xff] %v16685_v6  ;;  %v2916_v1 = vpop.f32.mrf.mxu1  ;;  %12761 = vmatmul.mubr.bf16.gmra.mxu1 %v16273_v28  ;;  %13328 = vmatprep.mubr.msk.bf16.mxu0 %vm14819_vm0, %v19198_v61  ;;  %v16701_v40 = vpack.c.bf16 %v5770_v24, %v5769_v0 }
 0x429   : > { %v16692_v62 = vadd.f32 %v2916_v1, %v16480_v58  ;;  %12764 = vmatprep.mubr.msk.bf16.mxu1 %vm14819_vm0, %v19198_v61  ;;  %v13026_v12 = vpop.f32.mrf.mxu0 }
 0x42a   : > { %v12582_v20 = vpop.f32.mrf.mxu1 }
 0x42b   : > { %v16696_v21 = vpop.f32.mrf.mxu0  ;;  %v5772_v20 = vld [vmem:[#allocation3 + $0x95] sm:$0xff] }
 0x42c   : > { %19265 = vst [vmem:[#allocation60_spill] sm:$0xff] %v16696_v21  ;;  %v2919_v10 = vpop.f32.mrf.mxu1 }
 0x42d   : > { %v16699_v6 = vadd.f32 %v2919_v10, %v16487_v17  ;;  %v13027_v28 = vpop.f32.mrf.mxu0  ;;  %v5771_v10 = vld [vmem:[#allocation3 + $0x8d] sm:$0xff] }
 0x42e   : > { %v12583_v37 = vpop.f32.mrf.mxu1 }
 0x42f   : > { %v16703_v22 = vpop.f32.mrf.mxu0  ;;  %13329 = vmatmul.mubr.bf16.gmra.mxu0 %v16701_v40 }
 0x430   : > { %19266 = vst [vmem:[#allocation61_spill] sm:$0xff] %v16703_v22  ;;  %v2924_v58 = vpop.f32.mrf.mxu1  ;;  %12765 = vmatmul.mubr.bf16.gmra.mxu1 %v16289_v13  ;;  %13332 = vmatprep.mubr.msk.bf16.mxu0 %vm14819_vm0, %v19198_v61  ;;  %v16717_v13 = vpack.c.bf16 %v5772_v20, %v5771_v10  ;;  %v5774_v20 = vld [vmem:[#allocation3 + $0xa5] sm:$0xff]  ;;  %v5773_v10 = vld [vmem:[#allocation3 + $0x9d] sm:$0xff] }
 0x431   : > { %v16710_v1 = vadd.f32 %v2924_v58, %v16498_v44  ;;  %12768 = vmatprep.mubr.msk.bf16.mxu1 %vm14819_vm0, %v19198_v61  ;;  %v13030_v17 = vpop.f32.mrf.mxu0  ;;  %v3452_v44 = vpack.c.bf16 %v16303_v51, %v16303_v51 }
 0x432   : > { %v12586_v12 = vpop.f32.mrf.mxu1 }
 0x433   : > { %v4679_v37 = vpop.f32.mrf.mxu0 }
 0x434   : > { %v2927_v24 = vpop.f32.mrf.mxu1  ;;  %v3852_v37 = vld [vmem:[#allocation3 + $0x1a] sm:$0xff] }
 0x435   : > { %v16715_v0 = vadd.f32 %v2927_v24, %v16503_v34  ;;  %v13031_v28 = vpop.f32.mrf.mxu0 }
 0x436   : > { %v12587_v22 = vpop.f32.mrf.mxu1 }
 0x437   : > { %v16721_v58 = vpop.f32.mrf.mxu0  ;;  %13333 = vmatmul.mubr.bf16.gmra.mxu0 %v16717_v13 }
 0x438   : > { %19267 = vst [vmem:[#allocation62_spill] sm:$0xff] %v16721_v58  ;;  %v2932_v17 = vpop.f32.mrf.mxu1  ;;  %12769 = vmatmul.mubr.bf16.gmra.mxu1 %v3452_v44  ;;  %13336 = vmatprep.mubr.msk.bf16.mxu0 %vm14819_vm0, %v19198_v61  ;;  %v3851_v44 = vld [vmem:[#allocation3 + $0x12] sm:$0xff]  ;;  %v5783_v58 = vpack.c.bf16 %v5774_v20, %v5773_v10  ;;  %v3853_v10 = vld [vmem:[#allocation3 + $0x22] sm:$0xff] }
 0x439   : > { %v16727_v12 = vadd.f32 %v2932_v17, %v16512_v29  ;;  %12840 = vmatprep.mubr.msk.bf16.mxu1 %vm14819_vm0, %v19198_v61  ;;  %v13102_v34 = vpop.f32.mrf.mxu0  ;;  %v14500_v29 = vld [vmem:[%s19174_s3 + $0x2f8] sm:$0xff]   ;;  %v3868_v42 = vpack.c.bf16 %v3852_v37, %v3851_v44 }
 0x43a   : > { %v12590_v22 = vpop.f32.mrf.mxu1 }
 0x43b   : > { %v16731_v51 = vpop.f32.mrf.mxu0 }
 0x43c   : > { %19268 = vst [vmem:[#allocation63_spill] sm:$0xff] %v16731_v51  ;;  %v2935_v24 = vpop.f32.mrf.mxu1 }
 0x43d   : > { %v16734_v28 = vadd.f32 %v2935_v24, %v16519_v7  ;;  %v13103_v17 = vpop.f32.mrf.mxu0  ;;  %v14503_v24 = vld [vmem:[%s19174_s3 + $0x2f0] sm:$0xff]  }
 0x43e   : > { %v12591_v21 = vpop.f32.mrf.mxu1 }
 0x43f   : > { %v16739_v34 = vpop.f32.mrf.mxu0  ;;  %13337 = vmatmul.mubr.bf16.gmra.mxu0 %v5783_v58  ;;  %v5775_v21 = vld [vmem:[#allocation3 + $0xad] sm:$0xff] }
 0x440   : > { %19269 = vst [vmem:[#allocation64_spill] sm:$0xff] %v16739_v34  ;;  %v2940_v22 = vpop.f32.mrf.mxu1  ;;  %12841 = vmatmul.mubr.bf16.vlgmr.msra.gmra.mxu1 %v3868_v42  ;;  %13340 = vmatprep.mubr.msk.bf16.mxu0 %vm14819_vm0, %v19198_v61  ;;  %v3854_v42 = vld [vmem:[#allocation3 + $0x2a] sm:$0xff] }
 0x441   : > { %v16744_v7 = vadd.f32 %v2940_v22, %v16529_v60  ;;  %12929 = vmatpush3.bf16.msra.mxu1 %v14500_v29  ;;  %v13106_v17 = vpop.f32.mrf.mxu0  ;;  %12844 = vmatprep.mubr.msk.bf16.mxu1 %vm14819_vm0, %v19198_v61  ;;  %v5784_v29 = vpack.c.bf16 %v5775_v21, %v5775_v21 }
 0x442   : > { %v12594_v20 = vpop.f32.mrf.mxu1  ;;  %12930 = vmatprep.subr.bf16.mxu1 %v19198_v61  ;;  %v3869_v17 = vpack.c.bf16 %v3854_v42, %v3853_v10  ;;  %v14505_v42 = vld [vmem:[%s19174_s3 + $0x2e0] sm:$0xff]  }
 0x443   : > { %v16752_v58 = vpop.f32.mrf.mxu0  ;;  %v14504_v20 = vld [vmem:[%s19174_s3 + $0x2e8] sm:$0xff]  }
 0x444   : > { %19270 = vst [vmem:[#allocation65_spill] sm:$0xff] %v16752_v58  ;;  %v2943_v37 = vpop.f32.mrf.mxu1 }
 0x445   : > { %v16755_v60 = vadd.f32 %v2943_v37, %v16540_v53  ;;  %12931 = vmatpush3.bf16.msra.mxu1 %v14503_v24  ;;  %v13107_v44 = vpop.f32.mrf.mxu0  ;;  %v6184_v37 = vld [vmem:[#allocation3 + $0x40] sm:$0xff] }
 0x446   : > { %v12595_v22 = vpop.f32.mrf.mxu1  ;;  %12932 = vmatprep.subr.bf16.mxu1 %v19198_v61 }
 0x447   : > { %v16761_v34 = vpop.f32.mrf.mxu0  ;;  %13341 = vmatmul.mubr.bf16.gmra.mxu0 %v5784_v29  ;;  %v6183_v29 = vld [vmem:[#allocation3 + $0x38] sm:$0xff] }
 0x448   : > { %19271 = vst [vmem:[#allocation66_spill] sm:$0xff] %v16761_v34  ;;  %v2948_v58 = vpop.f32.mrf.mxu1  ;;  %12845 = vmatmul.mubr.bf16.gmra.mxu1 %v3869_v17  ;;  %13412 = vmatprep.mubr.msk.bf16.mxu0 %vm14819_vm0, %v19198_v61  ;;  %v6200_v17 = vpack.c.bf16 %v6184_v37, %v6183_v29  ;;  %v14506_v34 = vld [vmem:[%s19174_s3 + $0x2d8] sm:$0xff]   ;;  %v14507_v29 = vld [vmem:[%s19174_s3 + $0x2d0] sm:$0xff]  }
 0x449   : > { %v16766_v53 = vadd.f32 %v2948_v58, %v16552_v45  ;;  %12848 = vmatprep.mubr.msk.bf16.mxu1 %vm14819_vm0, %v19198_v61  ;;  %v13110_v24 = vpop.f32.mrf.mxu0  ;;  %12933 = vmatpush3.bf16.msra.mxu1 %v14504_v20  ;;  %v3855_v58 = vld [vmem:[#allocation3 + $0x32] sm:$0xff] }
 0x44a   : > { %v12598_v21 = vpop.f32.mrf.mxu1  ;;  %12934 = vmatprep.subr.bf16.mxu1 %v19198_v61 }
 0x44b   : > { %v16774_v10 = vpop.f32.mrf.mxu0  ;;  %v14797_v21 = vld [vmem:[#allocation3 + $0x3a] sm:$0xff] }
 0x44c   : > { %19272 = vst [vmem:[#allocation67_spill] sm:$0xff] %v16774_v10  ;;  %v2951_v44 = vpop.f32.mrf.mxu1  ;;  %v3870_v20 = vpack.c.bf16 %v14797_v21, %v3855_v58  ;;  %v14508_v10 = vld [vmem:[%s19174_s3 + $0x5b8] sm:$0xff]   ;;  %v14509_v58 = vld [vmem:[%s19174_s3 + $0x5b0] sm:$0xff]  }
 0x44d   : > { %v16777_v45 = vadd.f32 %v2951_v44, %v16563_v52  ;;  %v13111_v22 = vpop.f32.mrf.mxu0  ;;  %12935 = vmatpush3.bf16.msra.mxu1 %v14505_v42 }
 0x44e   : > { %v12599_v24 = vpop.f32.mrf.mxu1  ;;  %12936 = vmatprep.subr.bf16.mxu1 %v19198_v61  ;;  %v6186_v22 = vld [vmem:[#allocation3 + $0x50] sm:$0xff] }
 0x44f   : > { %v16786_v51 = vpop.f32.mrf.mxu0  ;;  %13413 = vmatmul.mubr.bf16.vlgmr.msra.gmra.mxu0 %v6200_v17  ;;  %v6185_v24 = vld [vmem:[#allocation3 + $0x48] sm:$0xff] }
 0x450   : > { %19273 = vst [vmem:[#allocation68_spill] sm:$0xff] %v16786_v51  ;;  %v2956_v52 = vpop.f32.mrf.mxu1  ;;  %12849 = vmatmul.mubr.bf16.gmra.mxu1 %v3870_v20  ;;  %13416 = vmatprep.mubr.msk.bf16.mxu0 %vm14819_vm0, %v19198_v61  ;;  %v6201_v20 = vpack.c.bf16 %v6186_v22, %v6185_v24  ;;  %v14510_v51 = vld [vmem:[%s19174_s3 + $0x2c8] sm:$0xff]   ;;  %v14512_v24 = vld [vmem:[%s19174_s3 + $0x5a0] sm:$0xff]  }
 0x451   : > { %v16791_v42 = vadd.f32 %v2956_v52, %v16581_v23  ;;  %12852 = vmatprep.mubr.msk.bf16.mxu1 %vm14819_vm0, %v19198_v61  ;;  %v13114_v37 = vpop.f32.mrf.mxu0  ;;  %12937 = vmatpush3.bf16.msra.mxu1 %v14506_v34 }
 0x452   : > { %v12602_v44 = vpop.f32.mrf.mxu1  ;;  %13501 = vmatpush3.bf16.msra.mxu0 %v14508_v10  ;;  %12938 = vmatprep.subr.bf16.mxu1 %v19198_v61  ;;  %v14798_v10 = vld [vmem:[#allocation3 + $0x42] sm:$0xff]  ;;  %v14799_v37 = vld [vmem:[#allocation3 + $0x4a] sm:$0xff] }
 0x453   : > { %13502 = vmatprep.subr.bf16.mxu0 %v19198_v61  ;;  %v16803_v23 = vpop.f32.mrf.mxu0  ;;  %v3871_v44 = vpack.c.bf16 %v14799_v37, %v14798_v10  ;;  %v6187_v10 = vld [vmem:[#allocation3 + $0x58] sm:$0xff] }
 0x454   : > { %19274 = vst [vmem:[#allocation69_spill] sm:$0xff] %v16803_v23  ;;  %v2959_v17 = vpop.f32.mrf.mxu1  ;;  %v14511_v23 = vld [vmem:[%s19174_s3 + $0x5a8] sm:$0xff]  }
 0x455   : > { %v16806_v34 = vadd.f32 %v2959_v17, %v16596_v14  ;;  %v13115_v21 = vpop.f32.mrf.mxu0  ;;  %12939 = vmatpush3.bf16.msra.mxu1 %v14507_v29 }
 0x456   : > { %v12603_v52 = vpop.f32.mrf.mxu1  ;;  %13503 = vmatpush3.bf16.msra.mxu0 %v14509_v58  ;;  %12940 = vmatprep.subr.bf16.mxu1 %v19198_v61  ;;  %v14513_v21 = vld [vmem:[%s19174_s3 + $0x2c0] sm:$0xff]  }
 0x457   : > { %13504 = vmatprep.subr.bf16.mxu0 %v19198_v61  ;;  %v16816_v14 = vpop.f32.mrf.mxu0  ;;  %13417 = vmatmul.mubr.bf16.gmra.mxu0 %v6201_v20  ;;  %v6188_v20 = vld [vmem:[#allocation3 + $0x60] sm:$0xff] }
 0x458   : > { %19275 = vst [vmem:[#allocation70_spill] sm:$0xff] %v16816_v14  ;;  %v2964_v22 = vpop.f32.mrf.mxu1  ;;  %12853 = vmatmul.mubr.bf16.gmra.mxu1 %v3871_v44  ;;  %13420 = vmatprep.mubr.msk.bf16.mxu0 %vm14819_vm0, %v19198_v61  ;;  %v6202_v37 = vpack.c.bf16 %v6188_v20, %v6187_v10  ;;  %v14514_v14 = vld [vmem:[%s19174_s3 + $0x598] sm:$0xff]   ;;  %v6190_v10 = vld [vmem:[#allocation3 + $0x70] sm:$0xff] }
 0x459   : > { %v16821_v29 = vadd.f32 %v2964_v22, %v16615_v5  ;;  %12856 = vmatprep.mubr.msk.bf16.mxu1 %vm14819_vm0, %v19198_v61  ;;  %v13118_v58 = vpop.f32.mrf.mxu0  ;;  %12941 = vmatpush3.bf16.msra.mxu1 %v14510_v51  ;;  %v14800_v22 = vld [vmem:[#allocation3 + $0x52] sm:$0xff] }
 0x45a   : > { %v12606_v17 = vpop.f32.mrf.mxu1  ;;  %13505 = vmatpush3.bf16.msra.mxu0 %v14511_v23  ;;  %12942 = vmatprep.subr.bf16.mxu1 %v19198_v61  ;;  %v14801_v58 = vld [vmem:[#allocation3 + $0x5a] sm:$0xff] }
 0x45b   : > { %13506 = vmatprep.subr.bf16.mxu0 %v19198_v61  ;;  %v16833_v5 = vpop.f32.mrf.mxu0  ;;  %v3872_v17 = vpack.c.bf16 %v14801_v58, %v14800_v22 }
 0x45c   : > { %19276 = vst [vmem:[#allocation71_spill] sm:$0xff] %v16833_v5  ;;  %v2967_v52 = vpop.f32.mrf.mxu1 }
 0x45d   : > { %v16836_v51 = vadd.f32 %v2967_v52, %v16630_v50  ;;  %v13119_v23 = vpop.f32.mrf.mxu0  ;;  %12943 = vmatpush3.bf16.msra.mxu1 %v14513_v21  ;;  %v14515_v52 = vld [vmem:[%s19174_s3 + $0x590] sm:$0xff]  }
 0x45e   : > { %v12607_v44 = vpop.f32.mrf.mxu1  ;;  %13507 = vmatpush3.bf16.msra.mxu0 %v14512_v24  ;;  %13032 = vmatprep.subr.bf16.mxu1 %v19198_v61 }
 0x45f   : > { %13508 = vmatprep.subr.bf16.mxu0 %v19198_v61  ;;  %v16843_v5 = vpop.f32.mrf.mxu0  ;;  %13421 = vmatmul.mubr.bf16.gmra.mxu0 %v6202_v37  ;;  %v6189_v44 = vld [vmem:[#allocation3 + $0x68] sm:$0xff] }
 0x460   : > { %19277 = vst [vmem:[#allocation72_spill] sm:$0xff] %v16843_v5  ;;  %v2972_v50 = vpop.f32.mrf.mxu1  ;;  %12857 = vmatmul.mubr.bf16.gmra.mxu1 %v3872_v17  ;;  %13424 = vmatprep.mubr.msk.bf16.mxu0 %vm14819_vm0, %v19198_v61  ;;  %v6203_v58 = vpack.c.bf16 %v6190_v10, %v6189_v44  ;;  %v6192_v44 = vld [vmem:[#allocation3 + $0x80] sm:$0xff] }
 0x461   : > { %v16848_v20 = vadd.f32 %v2972_v50, %v16646_v30  ;;  %12860 = vmatprep.mubr.msk.bf16.mxu1 %vm14819_vm0, %v19198_v61  ;;  %v13122_v24 = vpop.f32.mrf.mxu0  ;;  %v14802_v50 = vld [vmem:[#allocation3 + $0x62] sm:$0xff] }
 0x462   : > { %v12610_v21 = vpop.f32.mrf.mxu1  ;;  %13509 = vmatpush3.bf16.msra.mxu0 %v14514_v14  ;;  %v14803_v24 = vld [vmem:[#allocation3 + $0x6a] sm:$0xff] }
 0x463   : > { %13510 = vmatprep.subr.bf16.mxu0 %v19198_v61  ;;  %v16856_v23 = vpop.f32.mrf.mxu0  ;;  %v3873_v14 = vpack.c.bf16 %v14803_v24, %v14802_v50  ;;  %v14517_v21 = vld [vmem:[%s19174_s3 + $0x588] sm:$0xff]   ;;  %v14804_v24 = vld [vmem:[#allocation3 + $0x72] sm:$0xff] }
 0x464   : > { %19278 = vst [vmem:[#allocation73_spill] sm:$0xff] %v16856_v23  ;;  %v2975_v37 = vpop.f32.mrf.mxu1 }
 0x465   : > { %v16859_v30 = vadd.f32 %v2975_v37, %v16657_v33  ;;  %v13123_v22 = vpop.f32.mrf.mxu0  ;;  %v14518_v37 = vld [vmem:[%s19174_s3 + $0x580] sm:$0xff]  }
 0x466   : > { %v12611_v17 = vpop.f32.mrf.mxu1  ;;  %13511 = vmatpush3.bf16.msra.mxu0 %v14515_v52 }
 0x467   : > { %13512 = vmatprep.subr.bf16.mxu0 %v19198_v61  ;;  %v16865_v5 = vpop.f32.mrf.mxu0  ;;  %13425 = vmatmul.mubr.bf16.gmra.mxu0 %v6203_v58  ;;  %v6191_v17 = vld [vmem:[#allocation3 + $0x78] sm:$0xff] }
 0x468   : > { %19279 = vst [vmem:[#allocation74_spill] sm:$0xff] %v16865_v5  ;;  %v2980_v23 = vpop.f32.mrf.mxu1  ;;  %12861 = vmatmul.mubr.bf16.gmra.mxu1 %v3873_v14  ;;  %13428 = vmatprep.mubr.msk.bf16.mxu0 %vm14819_vm0, %v19198_v61  ;;  %v14805_v14 = vld [vmem:[#allocation3 + $0x7a] sm:$0xff] }
 0x469   : > { %v16870_v33 = vadd.f32 %v2980_v23, %v16672_v36  ;;  %12864 = vmatprep.mubr.msk.bf16.mxu1 %vm14819_vm0, %v19198_v61  ;;  %v13126_v52 = vpop.f32.mrf.mxu0  ;;  %v6204_v36 = vpack.c.bf16 %v6192_v44, %v6191_v17  ;;  %v3874_v5 = vpack.c.bf16 %v14805_v14, %v14804_v24  ;;  %v6194_v17 = vld [vmem:[#allocation3 + $0x90] sm:$0xff] }
 0x46a   : > { %v12614_v10 = vpop.f32.mrf.mxu1  ;;  %13513 = vmatpush3.bf16.msra.mxu0 %v14517_v21 }
 0x46b   : > { %13514 = vmatprep.subr.bf16.mxu0 %v19198_v61  ;;  %v16878_v22 = vpop.f32.mrf.mxu0 }
 0x46c   : > { %19280 = vst [vmem:[#allocation75_spill] sm:$0xff] %v16878_v22  ;;  %v2983_v58 = vpop.f32.mrf.mxu1  ;;  %v14807_v22 = vld [vmem:[#allocation3 + $0x8a] sm:$0xff] }
 0x46d   : > { %v13127_v50 = vpop.f32.mrf.mxu0 }
 0x46e   : > { %v12615_v23 = vpop.f32.mrf.mxu1  ;;  %13515 = vmatpush3.bf16.msra.mxu0 %v14518_v37 }
 0x46f   : > { %13604 = vmatprep.subr.bf16.mxu0 %v19198_v61  ;;  %v16881_v21 = vpop.f32.mrf.mxu0  ;;  %13429 = vmatmul.mubr.bf16.gmra.mxu0 %v6204_v36  ;;  %v6193_v23 = vld [vmem:[#allocation3 + $0x88] sm:$0xff] }
 0x470   : > { %19281 = vst [vmem:[#allocation76_spill] sm:$0xff] %v16881_v21  ;;  %v3128_v52 = vpop.f32.mrf.mxu1  ;;  %12865 = vmatmul.mubr.bf16.gmra.mxu1 %v3874_v5  ;;  %13432 = vmatprep.mubr.msk.bf16.mxu0 %vm14819_vm0, %v19198_v61  ;;  %v6205_v24 = vpack.c.bf16 %v6194_v17, %v6193_v23  ;;  %v14806_v21 = vld [vmem:[#allocation3 + $0x82] sm:$0xff] }
 0x471   : > { %v16886_v10 = vadd.f32 %v3128_v52, %v16692_v62  ;;  %12868 = vmatprep.mubr.msk.bf16.mxu1 %vm14819_vm0, %v19198_v61  ;;  %v13130_v44 = vpop.f32.mrf.mxu0  ;;  %v3875_v62 = vpack.c.bf16 %v14807_v22, %v14806_v21  ;;  %v6196_v17 = vld [vmem:[#allocation3 + $0xa0] sm:$0xff]  ;;  %v6195_v22 = vld [vmem:[#allocation3 + $0x98] sm:$0xff] }
 0x472   : > { %v12634_v58 = vpop.f32.mrf.mxu1 }
 0x473   : > { %v16890_v37 = vpop.f32.mrf.mxu0 }
 0x474   : > { %19282 = vst [vmem:[#allocation77_spill] sm:$0xff] %v16890_v37  ;;  %v3131_v50 = vpop.f32.mrf.mxu1 }
 0x475   : > { %v16893_v36 = vadd.f32 %v3131_v50, %v16699_v6  ;;  %v13131_v5 = vpop.f32.mrf.mxu0 }
 0x476   : > { %v12635_v14 = vpop.f32.mrf.mxu1 }
 0x477   : > { %v16895_v52 = vpop.f32.mrf.mxu0  ;;  %13433 = vmatmul.mubr.bf16.gmra.mxu0 %v6205_v24  ;;  %v6206_v24 = vpack.c.bf16 %v6196_v17, %v6195_v22  ;;  %v4276_v17 = vld [vmem:[#allocation3 + $0x25] sm:$0xff] }
 0x478   : > { %19283 = vst [vmem:[#allocation78_spill] sm:$0xff] %v16895_v52  ;;  %v3136_v55 = vpop.f32.mrf.mxu1  ;;  %12869 = vmatmul.mubr.bf16.gmra.mxu1 %v3875_v62  ;;  %13436 = vmatprep.mubr.msk.bf16.mxu0 %vm14819_vm0, %v19198_v61  ;;  %v14808_v62 = vld [vmem:[#allocation3 + $0x92] sm:$0xff]  ;;  %v6197_v22 = vld [vmem:[#allocation3 + $0xa8] sm:$0xff] }
 0x479   : > { %v16900_v44 = vadd.f32 %v3136_v55, %v16710_v1  ;;  %12872 = vmatprep.mubr.msk.bf16.mxu1 %vm14819_vm0, %v19198_v61  ;;  %v13134_v6 = vpop.f32.mrf.mxu0  ;;  %v3876_v52 = vpack.c.bf16 %v14808_v62, %v14808_v62 }
 0x47a   : > { %v12638_v58 = vpop.f32.mrf.mxu1 }
 0x47b   : > { %v5103_v50 = vpop.f32.mrf.mxu0  ;;  %v6198_v58 = vld [vmem:[#allocation3 + $0xb0] sm:$0xff] }
 0x47c   : > { %v3139_v23 = vpop.f32.mrf.mxu1 }
 0x47d   : > { %v16905_v21 = vadd.f32 %v3139_v23, %v16715_v0  ;;  %v13135_v5 = vpop.f32.mrf.mxu0 }
 0x47e   : > { %v12639_v14 = vpop.f32.mrf.mxu1 }
 0x47f   : > { %v16907_v37 = vpop.f32.mrf.mxu0  ;;  %13437 = vmatmul.mubr.bf16.gmra.mxu0 %v6206_v24  ;;  %v6207_v14 = vpack.c.bf16 %v6198_v58, %v6197_v22 }
 0x480   : > { %v3144_v55 = vpop.f32.mrf.mxu1  ;;  %12873 = vmatmul.mubr.bf16.gmra.mxu1 %v3876_v52  ;;  %13440 = vmatprep.mubr.msk.bf16.mxu0 %vm14819_vm0, %v19198_v61  ;;  %v4275_v52 = vld [vmem:[#allocation3 + $0x1d] sm:$0xff] }
 0x481   : > { %v16912_v1 = vadd.f32 %v3144_v55, %v16727_v12  ;;  %12944 = vmatprep.mubr.msk.bf16.mxu1 %vm14819_vm0, %v19198_v61  ;;  %v13206_v0 = vpop.f32.mrf.mxu0  ;;  %v14516_v12 = vld [vmem:[%s19174_s3 + $0x378] sm:$0xff]   ;;  %v4292_v55 = vpack.c.bf16 %v4276_v17, %v4275_v52 }
 0x482   : > { %v12642_v6 = vpop.f32.mrf.mxu1  ;;  %v6199_v17 = vld [vmem:[#allocation3 + $0xb8] sm:$0xff] }
 0x483   : > { %v16916_v50 = vpop.f32.mrf.mxu0 }
 0x484   : > { %v3147_v23 = vpop.f32.mrf.mxu1 }
 0x485   : > { %v16919_v5 = vadd.f32 %v3147_v23, %v16734_v28  ;;  %v13207_v24 = vpop.f32.mrf.mxu0  ;;  %v14519_v23 = vld [vmem:[%s19174_s3 + $0x370] sm:$0xff]  }
 0x486   : > { %v12643_v62 = vpop.f32.mrf.mxu1 }
 0x487   : > { %v16924_v0 = vpop.f32.mrf.mxu0  ;;  %13441 = vmatmul.mubr.bf16.gmra.mxu0 %v6207_v14 }
 0x488   : > { %19284 = vst [vmem:[#allocation79_spill] sm:$0xff] %v16924_v0  ;;  %v3152_v6 = vpop.f32.mrf.mxu1  ;;  %12945 = vmatmul.mubr.bf16.vlgmr.msra.gmra.mxu1 %v4292_v55  ;;  %13444 = vmatprep.mubr.msk.bf16.mxu0 %vm14819_vm0, %v19198_v61  ;;  %v14520_v55 = vld [vmem:[%s19174_s3 + $0x368] sm:$0xff]  }
 0x489   : > { %v16929_v28 = vadd.f32 %v3152_v6, %v16744_v7  ;;  %13033 = vmatpush3.bf16.msra.mxu1 %v14516_v12  ;;  %v13210_v24 = vpop.f32.mrf.mxu0  ;;  %12948 = vmatprep.mubr.msk.bf16.mxu1 %vm14819_vm0, %v19198_v61  ;;  %v6208_v12 = vpack.c.bf16 %v6199_v17, %v6199_v17  ;;  %v14521_v17 = vld [vmem:[%s19174_s3 + $0x360] sm:$0xff]  }
 0x48a   : > { %v12646_v58 = vpop.f32.mrf.mxu1  ;;  %13034 = vmatprep.subr.bf16.mxu1 %v19198_v61 }
 0x48b   : > { %v16937_v22 = vpop.f32.mrf.mxu0 }
 0x48c   : > { %19285 = vst [vmem:[#allocation80_spill] sm:$0xff] %v16937_v22  ;;  %v3155_v52 = vpop.f32.mrf.mxu1 }
 0x48d   : > { %v16940_v14 = vadd.f32 %v3155_v52, %v16755_v60  ;;  %13035 = vmatpush3.bf16.msra.mxu1 %v14519_v23  ;;  %v13211_v7 = vpop.f32.mrf.mxu0 }
 0x48e   : > { %v12647_v62 = vpop.f32.mrf.mxu1  ;;  %13036 = vmatprep.subr.bf16.mxu1 %v19198_v61 }
 0x48f   : > { %v16946_v6 = vpop.f32.mrf.mxu0  ;;  %13445 = vmatmul.mubr.bf16.gmra.mxu0 %v6208_v12  ;;  %v14522_v62 = vld [vmem:[%s19174_s3 + $0x358] sm:$0xff]  }
 0x490   : > { %19286 = vst [vmem:[#allocation81_spill] sm:$0xff] %v16946_v6  ;;  %v3160_v24 = vpop.f32.mrf.mxu1  ;;  %12949 = vmatmul.mubr.bf16.gmra.mxu1 %v16565_v4  ;;  %13516 = vmatprep.mubr.msk.bf16.mxu0 %vm14819_vm0, %v19198_v61 }
 0x491   : > { %v16952_v60 = vadd.f32 %v3160_v24, %v16766_v53  ;;  %12952 = vmatprep.mubr.msk.bf16.mxu1 %vm14819_vm0, %v19198_v61  ;;  %v13214_v23 = vpop.f32.mrf.mxu0  ;;  %13037 = vmatpush3.bf16.msra.mxu1 %v14520_v55  ;;  %v14524_v55 = vld [vmem:[%s19174_s3 + $0x638] sm:$0xff]  }
 0x492   : > { %v12650_v58 = vpop.f32.mrf.mxu1  ;;  %13038 = vmatprep.subr.bf16.mxu1 %v19198_v61  ;;  %v19289_v23 = vpack.c.bf16 %v15497_v59, %v15495_v11  ;;  %v14523_v11 = vld [vmem:[%s19174_s3 + $0x350] sm:$0xff]  }
 0x493   : > { %v16960_v52 = vpop.f32.mrf.mxu0  ;;  %v14525_v59 = vld [vmem:[%s19174_s3 + $0x630] sm:$0xff]  }
 0x494   : > { %19287 = vst [vmem:[#allocation82_spill] sm:$0xff] %v16960_v52  ;;  %v3163_v4 = vpop.f32.mrf.mxu1  ;;  %v19339_v52 = vld [vmem:[#allocation30_spill] sm:$0xff] }
 0x495   : > { %v16963_v7 = vadd.f32 %v3163_v4, %v16777_v45  ;;  %v13215_v53 = vpop.f32.mrf.mxu0  ;;  %13039 = vmatpush3.bf16.msra.mxu1 %v14521_v17 }
 0x496   : > { %v12651_v12 = vpop.f32.mrf.mxu1  ;;  %13040 = vmatprep.subr.bf16.mxu1 %v19198_v61 }
 0x497   : > { %v16972_v24 = vpop.f32.mrf.mxu0  ;;  %13517 = vmatmul.mubr.bf16.vlgmr.msra.gmra.mxu0 %v19289_v23  ;;  %v14527_v23 = vld [vmem:[%s19174_s3 + $0x628] sm:$0xff]  }
 0x498   : > { %19288 = vst [vmem:[#allocation83_spill] sm:$0xff] %v16972_v24  ;;  %v3168_v45 = vpop.f32.mrf.mxu1  ;;  %12953 = vmatmul.mubr.bf16.gmra.mxu1 %v16598_v63  ;;  %13520 = vmatprep.mubr.msk.bf16.mxu0 %vm14819_vm0, %v19198_v61 }
 0x499   : > { %v16981_v58 = vadd.f32 %v3168_v45, %v16791_v42  ;;  %12956 = vmatprep.mubr.msk.bf16.mxu1 %vm14819_vm0, %v19198_v61  ;;  %v13218_v17 = vpop.f32.mrf.mxu0  ;;  %13041 = vmatpush3.bf16.msra.mxu1 %v14522_v62 }
 0x49a   : > { %v12654_v4 = vpop.f32.mrf.mxu1  ;;  %13605 = vmatpush3.bf16.msra.mxu0 %v14524_v55  ;;  %13042 = vmatprep.subr.bf16.mxu1 %v19198_v61  ;;  %v14526_v55 = vld [vmem:[%s19174_s3 + $0x348] sm:$0xff]  }
 0x49b   : > { %13606 = vmatprep.subr.bf16.mxu0 %v19198_v61  ;;  %v16993_v63 = vpop.f32.mrf.mxu0  ;;  %v19293_v17 = vld [vmem:[#allocation9_spill] sm:$0xff] }
 0x49c   : > { %19290 = vst [vmem:[#allocation84_spill] sm:$0xff] %v16993_v63  ;;  %v3171_v42 = vpop.f32.mrf.mxu1 }
 0x49d   : > { %v16996_v53 = vadd.f32 %v3171_v42, %v16806_v34  ;;  %v13219_v12 = vpop.f32.mrf.mxu0  ;;  %13043 = vmatpush3.bf16.msra.mxu1 %v14523_v11  ;;  %v19292_v34 = vld [vmem:[#allocation10_spill] sm:$0xff] }
 0x49e   : > { %v12655_v62 = vpop.f32.mrf.mxu1  ;;  %13607 = vmatpush3.bf16.msra.mxu0 %v14525_v59  ;;  %13044 = vmatprep.subr.bf16.mxu1 %v19198_v61  ;;  %v19294_v4 = vpack.c.bf16 %v19292_v34, %v19293_v17 }
 0x49f   : > { %13608 = vmatprep.subr.bf16.mxu0 %v19198_v61  ;;  %v17006_v45 = vpop.f32.mrf.mxu0  ;;  %v14528_v62 = vld [vmem:[%s19174_s3 + $0x620] sm:$0xff]  }
 0x4a0   : > { %19291 = vst [vmem:[#allocation85_spill] sm:$0xff] %v17006_v45  ;;  %13521 = vmatmul.mubr.bf16.gmra.mxu0 %v19294_v4  ;;  %v3176_v11 = vpop.f32.mrf.mxu1  ;;  %12957 = vmatmul.mubr.bf16.gmra.mxu1 %v16632_v2  ;;  %v14529_v2 = vld [vmem:[%s19174_s3 + $0x340] sm:$0xff]   ;;  %v14530_v4 = vld [vmem:[%s19174_s3 + $0x618] sm:$0xff]  }
 0x4a1   : > { %13524 = vmatprep.mubr.msk.bf16.mxu0 %vm14819_vm0, %v19198_v61  ;;  %v17015_v59 = vadd.f32 %v3176_v11, %v16821_v29  ;;  %12960 = vmatprep.mubr.msk.bf16.mxu1 %vm14819_vm0, %v19198_v61  ;;  %v13222_v42 = vpop.f32.mrf.mxu0 }
 0x4a2   : > { %v12658_v12 = vpop.f32.mrf.mxu1  ;;  %13045 = vmatpush3.bf16.msra.mxu1 %v14526_v55  ;;  %13609 = vmatpush3.bf16.msra.mxu0 %v14527_v23  ;;  %v19297_v42 = vld [vmem:[#allocation12_spill] sm:$0xff] }
 0x4a3   : > { %13610 = vmatprep.subr.bf16.mxu0 %v19198_v61  ;;  %13046 = vmatprep.subr.bf16.mxu1 %v19198_v61  ;;  %v17027_v29 = vpop.f32.mrf.mxu0  ;;  %v19298_v12 = vld [vmem:[#allocation11_spill] sm:$0xff] }
 0x4a4   : > { %19295 = vst [vmem:[#allocation10_spill] sm:$0xff] %v17027_v29  ;;  %v3179_v34 = vpop.f32.mrf.mxu1  ;;  %v19299_v29 = vpack.c.bf16 %v19297_v42, %v19298_v12  ;;  %v14533_v12 = vld [vmem:[%s19174_s3 + $0x608] sm:$0xff]  }
 0x4a5   : > { %v17030_v17 = vadd.f32 %v3179_v34, %v16836_v51  ;;  %v13223_v55 = vpop.f32.mrf.mxu0 }
 0x4a6   : > { %v12659_v23 = vpop.f32.mrf.mxu1  ;;  %13611 = vmatpush3.bf16.msra.mxu0 %v14528_v62  ;;  %13047 = vmatpush3.bf16.msra.mxu1 %v14529_v2  ;;  %v14531_v55 = vld [vmem:[%s19174_s3 + $0x610] sm:$0xff]  }
 0x4a7   : > { %13612 = vmatprep.subr.bf16.mxu0 %v19198_v61  ;;  %13136 = vmatprep.subr.bf16.mxu1 %v19198_v61  ;;  %v17037_v11 = vpop.f32.mrf.mxu0 }
 0x4a8   : > { %19296 = vst [vmem:[#allocation9_spill] sm:$0xff] %v17037_v11  ;;  %13525 = vmatmul.mubr.bf16.gmra.mxu0 %v19299_v29  ;;  %v3184_v51 = vpop.f32.mrf.mxu1  ;;  %12961 = vmatmul.mubr.bf16.gmra.mxu1 %v16659_v18  ;;  %v19316_v11 = vld [vmem:[#allocation17_spill] sm:$0xff] }
 0x4a9   : > { %13528 = vmatprep.mubr.msk.bf16.mxu0 %vm14819_vm0, %v19198_v61  ;;  %v17046_v62 = vadd.f32 %v3184_v51, %v16848_v20  ;;  %12964 = vmatprep.mubr.msk.bf16.mxu1 %vm14819_vm0, %v19198_v61  ;;  %v13226_v2 = vpop.f32.mrf.mxu0  ;;  %v19302_v51 = vld [vmem:[#allocation14_spill] sm:$0xff] }
 0x4aa   : > { %v12662_v34 = vpop.f32.mrf.mxu1  ;;  %13613 = vmatpush3.bf16.msra.mxu0 %v14530_v4  ;;  %v19303_v2 = vld [vmem:[#allocation13_spill] sm:$0xff] }
 0x4ab   : > { %13614 = vmatprep.subr.bf16.mxu0 %v19198_v61  ;;  %v17054_v29 = vpop.f32.mrf.mxu0  ;;  %v19304_v34 = vpack.c.bf16 %v19302_v51, %v19303_v2  ;;  %v3424_v6 = vadd.f32 %v19339_v52, %v17046_v62  ;;  %v19341_v52 = vld [vmem:[#allocation31_spill] sm:$0xff] }
 0x4ac   : > { %19300 = vst [vmem:[#allocation12_spill] sm:$0xff] %v17054_v29  ;;  %v3187_v18 = vpop.f32.mrf.mxu1 }
 0x4ad   : > { %v17057_v23 = vadd.f32 %v3187_v18, %v16859_v30  ;;  %v13227_v20 = vpop.f32.mrf.mxu0 }
 0x4ae   : > { %v12663_v42 = vpop.f32.mrf.mxu1  ;;  %13615 = vmatpush3.bf16.msra.mxu0 %v14531_v55  ;;  %v14534_v20 = vld [vmem:[%s19174_s3 + $0x600] sm:$0xff]  }
 0x4af   : > { %13616 = vmatprep.subr.bf16.mxu0 %v19198_v61  ;;  %v17063_v4 = vpop.f32.mrf.mxu0  ;;  %v3425_v62 = vadd.f32 %v19341_v52, %v17057_v23 }
 0x4b0   : > { %19301 = vst [vmem:[#allocation11_spill] sm:$0xff] %v17063_v4  ;;  %13529 = vmatmul.mubr.bf16.gmra.mxu0 %v19304_v34  ;;  %v3192_v29 = vpop.f32.mrf.mxu1  ;;  %12965 = vmatmul.mubr.bf16.gmra.mxu1 %v16682_v48 }
 0x4b1   : > { %13532 = vmatprep.mubr.msk.bf16.mxu0 %vm14819_vm0, %v19198_v61  ;;  %v17072_v30 = vadd.f32 %v3192_v29, %v16870_v33  ;;  %12968 = vmatprep.mubr.msk.bf16.mxu1 %vm14819_vm0, %v19198_v61  ;;  %v13230_v55 = vpop.f32.mrf.mxu0  ;;  %v19306_v33 = vld [vmem:[#allocation6_spill] sm:$0xff] }
 0x4b2   : > { %v12666_v18 = vpop.f32.mrf.mxu1  ;;  %13617 = vmatpush3.bf16.msra.mxu0 %v14533_v12  ;;  %v3410_v29 = vadd.f32 %v19306_v33, %v16886_v10  ;;  %v19308_v12 = vld [vmem:[#allocation16_spill] sm:$0xff]  ;;  %v19309_v55 = vld [vmem:[#allocation15_spill] sm:$0xff] }
 0x4b3   : > { %13618 = vmatprep.subr.bf16.mxu0 %v19198_v61  ;;  %v17080_v42 = vpop.f32.mrf.mxu0  ;;  %v19310_v18 = vpack.c.bf16 %v19308_v12, %v19309_v55 }
 0x4b4   : > { %19305 = vst [vmem:[#allocation14_spill] sm:$0xff] %v17080_v42  ;;  %v3195_v48 = vpop.f32.mrf.mxu1 }
 0x4b5   : > { %v13231_v51 = vpop.f32.mrf.mxu0 }
 0x4b6   : > { %v12667_v2 = vpop.f32.mrf.mxu1  ;;  %13619 = vmatpush3.bf16.msra.mxu0 %v14534_v20  ;;  %v19311_v51 = vld [vmem:[#allocation7_spill] sm:$0xff] }
 0x4b7   : > { %13716 = vmatprep.subr.bf16.mxu0 %v19198_v61  ;;  %v17085_v34 = vpop.f32.mrf.mxu0  ;;  %v3411_v2 = vadd.f32 %v19311_v51, %v16893_v36 }
 0x4b8   : > { %19307 = vst [vmem:[#allocation13_spill] sm:$0xff] %v17085_v34  ;;  %13533 = vmatmul.mubr.bf16.gmra.mxu0 %v19310_v18  ;;  %v3552_v4 = vpop.f32.mrf.mxu1  ;;  %12969 = vmatmul.mubr.bf16.gmra.mxu1 %v16701_v40  ;;  %v19313_v34 = vld [vmem:[#allocation8_spill] sm:$0xff] }
 0x4b9   : > { %13536 = vmatprep.mubr.msk.bf16.mxu0 %vm14819_vm0, %v19198_v61  ;;  %v17093_v48 = vadd.f32 %v3552_v4, %v3410_v29  ;;  %12972 = vmatprep.mubr.msk.bf16.mxu1 %vm14819_vm0, %v19198_v61  ;;  %v13234_v10 = vpop.f32.mrf.mxu0  ;;  %v3412_v42 = vadd.f32 %v19313_v34, %v16900_v44  ;;  %v19315_v29 = vld [vmem:[#allocation18_spill] sm:$0xff]  ;;  %v6620_v44 = vld [vmem:[#allocation3 + $0xa2] sm:$0xff]  ;;  %v19318_v34 = vld [vmem:[#allocation19_spill] sm:$0xff] }
 0x4ba   : > { %v12738_v20 = vpop.f32.mrf.mxu1  ;;  %v19317_v45 = vpack.c.bf16 %v19315_v29, %v19316_v11 }
 0x4bb   : > { %v17099_v33 = vpop.f32.mrf.mxu0 }
 0x4bc   : > { %19312 = vst [vmem:[#allocation6_spill] sm:$0xff] %v17099_v33  ;;  %v3555_v12 = vpop.f32.mrf.mxu1 }
 0x4bd   : > { %v17101_v55 = vadd.f32 %v3555_v12, %v3411_v2  ;;  %v13235_v18 = vpop.f32.mrf.mxu0  ;;  %v3413_v2 = vadd.f32 %v19318_v34, %v16905_v21  ;;  %v4291_v12 = vld [vmem:[#allocation3 + $0x9d] sm:$0xff] }
 0x4be   : > { %v12739_v40 = vpop.f32.mrf.mxu1  ;;  %v6619_v18 = vld [vmem:[#allocation3 + $0x9a] sm:$0xff] }
 0x4bf   : > { %v17105_v4 = vpop.f32.mrf.mxu0  ;;  %v17121_v29 = vpack.c.bf16 %v6620_v44, %v6619_v18  ;;  %v17138_v18 = vld [vmem:[#allocation3 + $0xaa] sm:$0xff] }
 0x4c0   : > { %19314 = vst [vmem:[#allocation16_spill] sm:$0xff] %v17105_v4  ;;  %13537 = vmatmul.mubr.bf16.gmra.mxu0 %v19317_v45  ;;  %v3560_v10 = vpop.f32.mrf.mxu1  ;;  %12973 = vmatmul.mubr.bf16.gmra.mxu1 %v16717_v13  ;;  %v19319_v4 = vld [vmem:[#allocation20_spill] sm:$0xff] }
 0x4c1   : > { %13540 = vmatprep.mubr.msk.bf16.mxu0 %vm14819_vm0, %v19198_v61  ;;  %v17113_v36 = vadd.f32 %v3560_v10, %v3412_v42  ;;  %12976 = vmatprep.mubr.msk.bf16.mxu1 %vm14819_vm0, %v19198_v61  ;;  %v13238_v20 = vpop.f32.mrf.mxu0  ;;  %v4300_v10 = vpack.c.bf16 %v4291_v12, %v4291_v12  ;;  %v3414_v33 = vadd.f32 %v19319_v4, %v16912_v1  ;;  %v19321_v12 = vld [vmem:[#allocation21_spill] sm:$0xff] }
 0x4c2   : > { %v12742_v51 = vpop.f32.mrf.mxu1  ;;  %v3415_v1 = vadd.f32 %v19321_v12, %v16919_v5  ;;  %v4700_v4 = vld [vmem:[#allocation3 + $0x27] sm:$0xff]  ;;  %v19323_v5 = vld [vmem:[#allocation22_spill] sm:$0xff] }
 0x4c3   : > { %v5527_v11 = vpop.f32.mrf.mxu0  ;;  %v3416_v12 = vadd.f32 %v19323_v5, %v16929_v28  ;;  %v6623_v28 = vld [vmem:[#allocation3 + $0xba] sm:$0xff] }
 0x4c4   : > { %v3563_v45 = vpop.f32.mrf.mxu1 }
 0x4c5   : > { %v17119_v40 = vadd.f32 %v3563_v45, %v3413_v2  ;;  %v13239_v13 = vpop.f32.mrf.mxu0  ;;  %v6622_v2 = vld [vmem:[#allocation3 + $0xb2] sm:$0xff] }
 0x4c6   : > { %v12743_v42 = vpop.f32.mrf.mxu1 }
 0x4c7   : > { %v17125_v20 = vpop.f32.mrf.mxu0  ;;  %v4699_v42 = vld [vmem:[#allocation3 + $0x1f] sm:$0xff] }
 0x4c8   : > { %19320 = vst [vmem:[#allocation15_spill] sm:$0xff] %v17125_v20  ;;  %13541 = vmatmul.mubr.bf16.gmra.mxu0 %v17121_v29  ;;  %v3568_v51 = vpop.f32.mrf.mxu1  ;;  %12977 = vmatmul.mubr.bf16.gmra.mxu1 %v4300_v10 }
 0x4c9   : > { %13544 = vmatprep.mubr.msk.bf16.mxu0 %vm14819_vm0, %v19198_v61  ;;  %v17130_v21 = vadd.f32 %v3568_v51, %v3414_v33  ;;  %13048 = vmatprep.mubr.msk.bf16.mxu1 %vm14819_vm0, %v19198_v61  ;;  %v13310_v44 = vpop.f32.mrf.mxu0  ;;  %v14532_v33 = vld [vmem:[%s19174_s3 + $0x3f8] sm:$0xff]   ;;  %v6631_v51 = vpack.c.bf16 %v6622_v2, %v17138_v18  ;;  %v14535_v2 = vld [vmem:[%s19174_s3 + $0x3f0] sm:$0xff]  }
 0x4ca   : > { %v12746_v34 = vpop.f32.mrf.mxu1 }
 0x4cb   : > { %v17136_v11 = vpop.f32.mrf.mxu0  ;;  %v4716_v34 = vpack.c.bf16 %v4700_v4, %v4699_v42  ;;  %v19325_v42 = vld [vmem:[#allocation23_spill] sm:$0xff] }
 0x4cc   : > { %19322 = vst [vmem:[#allocation7_spill] sm:$0xff] %v17136_v11  ;;  %v3571_v45 = vpop.f32.mrf.mxu1 }
 0x4cd   : > { %v17140_v13 = vadd.f32 %v3571_v45, %v3415_v1  ;;  %v13311_v10 = vpop.f32.mrf.mxu0 }
 0x4ce   : > { %v12747_v44 = vpop.f32.mrf.mxu1  ;;  %v3417_v10 = vadd.f32 %v19325_v42, %v16940_v14  ;;  %v19327_v14 = vld [vmem:[#allocation24_spill] sm:$0xff] }
 0x4cf   : > { %v17148_v20 = vpop.f32.mrf.mxu0  ;;  %v3418_v42 = vadd.f32 %v19327_v14, %v16952_v60  ;;  %v14537_v60 = vld [vmem:[%s19174_s3 + $0x3e0] sm:$0xff]  }
 0x4d0   : > { %19324 = vst [vmem:[#allocation8_spill] sm:$0xff] %v17148_v20  ;;  %13545 = vmatmul.mubr.bf16.gmra.mxu0 %v6631_v51  ;;  %v3576_v11 = vpop.f32.mrf.mxu1  ;;  %13049 = vmatmul.mubr.bf16.vlgmr.msra.gmra.mxu1 %v4716_v34  ;;  %v4702_v51 = vld [vmem:[#allocation3 + $0x37] sm:$0xff]  ;;  %v4701_v34 = vld [vmem:[#allocation3 + $0x2f] sm:$0xff] }
 0x4d1   : > { %13548 = vmatprep.mubr.msk.bf16.mxu0 %vm14819_vm0, %v19198_v61  ;;  %v17152_v1 = vadd.f32 %v3576_v11, %v3416_v12  ;;  %13137 = vmatpush3.bf16.msra.mxu1 %v14532_v33  ;;  %v13314_v45 = vpop.f32.mrf.mxu0  ;;  %v6632_v12 = vpack.c.bf16 %v6623_v28, %v6623_v28  ;;  %v14536_v20 = vld [vmem:[%s19174_s3 + $0x3e8] sm:$0xff]   ;;  %v7031_v14 = vld [vmem:[#allocation3 + $0x3c] sm:$0xff] }
 0x4d2   : > { %v12750_v4 = vpop.f32.mrf.mxu1  ;;  %13052 = vmatprep.mubr.msk.bf16.mxu1 %vm14819_vm0, %v19198_v61  ;;  %13138 = vmatprep.subr.bf16.mxu1 %v19198_v61 }
 0x4d3   : > { %v17162_v44 = vpop.f32.mrf.mxu0  ;;  %v4717_v4 = vpack.c.bf16 %v4702_v51, %v4701_v34  ;;  %v19329_v34 = vld [vmem:[#allocation25_spill] sm:$0xff] }
 0x4d4   : > { %19326 = vst [vmem:[#allocation18_spill] sm:$0xff] %v17162_v44  ;;  %v3579_v11 = vpop.f32.mrf.mxu1 }
 0x4d5   : > { %v17164_v33 = vadd.f32 %v3579_v11, %v3417_v10  ;;  %13139 = vmatpush3.bf16.msra.mxu1 %v14535_v2  ;;  %v13315_v5 = vpop.f32.mrf.mxu0  ;;  %v7032_v11 = vld [vmem:[#allocation3 + $0x44] sm:$0xff] }
 0x4d6   : > { %v12751_v45 = vpop.f32.mrf.mxu1  ;;  %13140 = vmatprep.subr.bf16.mxu1 %v19198_v61  ;;  %v3419_v5 = vadd.f32 %v19329_v34, %v16963_v7  ;;  %v14538_v7 = vld [vmem:[%s19174_s3 + $0x3d8] sm:$0xff]   ;;  %v19331_v34 = vld [vmem:[#allocation26_spill] sm:$0xff] }
 0x4d7   : > { %v17172_v63 = vpop.f32.mrf.mxu0  ;;  %v3420_v44 = vadd.f32 %v19331_v34, %v16981_v58  ;;  %v14539_v58 = vld [vmem:[%s19174_s3 + $0x3d0] sm:$0xff]  }
 0x4d8   : > { %19328 = vst [vmem:[#allocation17_spill] sm:$0xff] %v17172_v63  ;;  %13549 = vmatmul.mubr.bf16.gmra.mxu0 %v6632_v12  ;;  %v3584_v10 = vpop.f32.mrf.mxu1  ;;  %13053 = vmatmul.mubr.bf16.gmra.mxu1 %v4717_v4  ;;  %v4704_v12 = vld [vmem:[#allocation3 + $0x47] sm:$0xff] }
 0x4d9   : > { %13620 = vmatprep.mubr.msk.bf16.mxu0 %vm14819_vm0, %v19198_v61  ;;  %v17176_v2 = vadd.f32 %v3584_v10, %v3418_v42  ;;  %13056 = vmatprep.mubr.msk.bf16.mxu1 %vm14819_vm0, %v19198_v61  ;;  %v13318_v28 = vpop.f32.mrf.mxu0  ;;  %v4703_v10 = vld [vmem:[#allocation3 + $0x3f] sm:$0xff] }
 0x4da   : > { %v12754_v51 = vpop.f32.mrf.mxu1  ;;  %13141 = vmatpush3.bf16.msra.mxu1 %v14536_v20  ;;  %v17190_v20 = vpack.c.bf16 %v7032_v11, %v7031_v14  ;;  %v4718_v63 = vpack.c.bf16 %v4704_v12, %v4703_v10  ;;  %v19333_v14 = vld [vmem:[#allocation27_spill] sm:$0xff] }
 0x4db   : > { %13142 = vmatprep.subr.bf16.mxu1 %v19198_v61  ;;  %v17186_v45 = vpop.f32.mrf.mxu0  ;;  %v3421_v10 = vadd.f32 %v19333_v14, %v16996_v53  ;;  %v14540_v53 = vld [vmem:[%s19174_s3 + $0x3c8] sm:$0xff]   ;;  %v19335_v14 = vld [vmem:[#allocation28_spill] sm:$0xff] }
 0x4dc   : > { %19330 = vst [vmem:[#allocation19_spill] sm:$0xff] %v17186_v45  ;;  %v3587_v4 = vpop.f32.mrf.mxu1  ;;  %v3422_v24 = vadd.f32 %v19335_v14, %v17015_v59  ;;  %v14541_v59 = vld [vmem:[%s19174_s3 + $0x3c0] sm:$0xff]  }
 0x4dd   : > { %v17188_v42 = vadd.f32 %v3587_v4, %v3419_v5  ;;  %v13319_v28 = vpop.f32.mrf.mxu0  ;;  %v7034_v4 = vld [vmem:[#allocation3 + $0x54] sm:$0xff] }
 0x4de   : > { %v12755_v51 = vpop.f32.mrf.mxu1  ;;  %13143 = vmatpush3.bf16.msra.mxu1 %v14537_v60 }
 0x4df   : > { %13144 = vmatprep.subr.bf16.mxu1 %v19198_v61  ;;  %v17198_v45 = vpop.f32.mrf.mxu0  ;;  %v7033_v51 = vld [vmem:[#allocation3 + $0x4c] sm:$0xff] }
 0x4e0   : > { %19332 = vst [vmem:[#allocation20_spill] sm:$0xff] %v17198_v45  ;;  %13621 = vmatmul.mubr.bf16.vlgmr.msra.gmra.mxu0 %v17190_v20  ;;  %v3592_v5 = vpop.f32.mrf.mxu1  ;;  %13057 = vmatmul.mubr.bf16.gmra.mxu1 %v4718_v63  ;;  %v4706_v63 = vld [vmem:[#allocation3 + $0x57] sm:$0xff] }
 0x4e1   : > { %13624 = vmatprep.mubr.msk.bf16.mxu0 %vm14819_vm0, %v19198_v61  ;;  %v17203_v11 = vadd.f32 %v3592_v5, %v3420_v44  ;;  %13060 = vmatprep.mubr.msk.bf16.mxu1 %vm14819_vm0, %v19198_v61  ;;  %v13322_v60 = vpop.f32.mrf.mxu0  ;;  %v4705_v5 = vld [vmem:[#allocation3 + $0x4f] sm:$0xff] }
 0x4e2   : > { %v12758_v12 = vpop.f32.mrf.mxu1  ;;  %13145 = vmatpush3.bf16.msra.mxu1 %v14538_v7  ;;  %v17217_v7 = vpack.c.bf16 %v7034_v4, %v7033_v51  ;;  %v4719_v45 = vpack.c.bf16 %v4706_v63, %v4705_v5  ;;  %v19337_v51 = vld [vmem:[#allocation29_spill] sm:$0xff] }
 0x4e3   : > { %13146 = vmatprep.subr.bf16.mxu1 %v19198_v61  ;;  %v17213_v28 = vpop.f32.mrf.mxu0  ;;  %v3423_v5 = vadd.f32 %v19337_v51, %v17030_v17 }
 0x4e4   : > { %19334 = vst [vmem:[#allocation21_spill] sm:$0xff] %v17213_v28  ;;  %v3595_v44 = vpop.f32.mrf.mxu1 }
 0x4e5   : > { %v17215_v34 = vadd.f32 %v3595_v44, %v3421_v10  ;;  %v13323_v60 = vpop.f32.mrf.mxu0  ;;  %v7036_v44 = vld [vmem:[#allocation3 + $0x64] sm:$0xff] }
 0x4e6   : > { %v12759_v12 = vpop.f32.mrf.mxu1  ;;  %13147 = vmatpush3.bf16.msra.mxu1 %v14539_v58 }
 0x4e7   : > { %13148 = vmatprep.subr.bf16.mxu1 %v19198_v61  ;;  %v17225_v28 = vpop.f32.mrf.mxu0  ;;  %v7035_v12 = vld [vmem:[#allocation3 + $0x5c] sm:$0xff] }
 0x4e8   : > { %19336 = vst [vmem:[#allocation22_spill] sm:$0xff] %v17225_v28  ;;  %13625 = vmatmul.mubr.bf16.gmra.mxu0 %v17217_v7  ;;  %v3600_v10 = vpop.f32.mrf.mxu1  ;;  %13061 = vmatmul.mubr.bf16.gmra.mxu1 %v4719_v45  ;;  %v4708_v45 = vld [vmem:[#allocation3 + $0x67] sm:$0xff] }
 0x4e9   : > { %13628 = vmatprep.mubr.msk.bf16.mxu0 %vm14819_vm0, %v19198_v61  ;;  %v17230_v4 = vadd.f32 %v3600_v10, %v3422_v24  ;;  %13064 = vmatprep.mubr.msk.bf16.mxu1 %vm14819_vm0, %v19198_v61  ;;  %v13326_v58 = vpop.f32.mrf.mxu0  ;;  %v4707_v10 = vld [vmem:[#allocation3 + $0x5f] sm:$0xff] }
 0x4ea   : > { %v12762_v63 = vpop.f32.mrf.mxu1  ;;  %13149 = vmatpush3.bf16.msra.mxu1 %v14540_v53  ;;  %v17244_v53 = vpack.c.bf16 %v7036_v44, %v7035_v12  ;;  %v4720_v28 = vpack.c.bf16 %v4708_v45, %v4707_v10  ;;  %v7038_v45 = vld [vmem:[#allocation3 + $0x74] sm:$0xff] }
 0x4eb   : > { %13150 = vmatprep.subr.bf16.mxu1 %v19198_v61  ;;  %v17240_v60 = vpop.f32.mrf.mxu0 }
 0x4ec   : > { %19338 = vst [vmem:[#allocation23_spill] sm:$0xff] %v17240_v60  ;;  %v3603_v24 = vpop.f32.mrf.mxu1 }
 0x4ed   : > { %v17242_v14 = vadd.f32 %v3603_v24, %v3423_v5  ;;  %v13327_v58 = vpop.f32.mrf.mxu0  ;;  %v4710_v24 = vld [vmem:[#allocation3 + $0x77] sm:$0xff] }
 0x4ee   : > { %v12763_v63 = vpop.f32.mrf.mxu1  ;;  %13151 = vmatpush3.bf16.msra.mxu1 %v14541_v59  ;;  %v7037_v58 = vld [vmem:[#allocation3 + $0x6c] sm:$0xff] }
 0x4ef   : > { %13240 = vmatprep.subr.bf16.mxu1 %v19198_v61  ;;  %v17249_v17 = vpop.f32.mrf.mxu0  ;;  %v4709_v63 = vld [vmem:[#allocation3 + $0x6f] sm:$0xff] }
 0x4f0   : > { %19340 = vst [vmem:[#allocation24_spill] sm:$0xff] %v17249_v17  ;;  %13629 = vmatmul.mubr.bf16.gmra.mxu0 %v17244_v53  ;;  %v3608_v51 = vpop.f32.mrf.mxu1  ;;  %13065 = vmatmul.mubr.bf16.gmra.mxu1 %v4720_v28  ;;  %v4721_v60 = vpack.c.bf16 %v4710_v24, %v4709_v63  ;;  %v4712_v24 = vld [vmem:[#allocation3 + $0x87] sm:$0xff]  ;;  %v4711_v63 = vld [vmem:[#allocation3 + $0x7f] sm:$0xff] }
 0x4f1   : > { %13632 = vmatprep.mubr.msk.bf16.mxu0 %vm14819_vm0, %v19198_v61  ;;  %v17254_v5 = vadd.f32 %v3608_v51, %v3424_v6  ;;  %13068 = vmatprep.mubr.msk.bf16.mxu1 %vm14819_vm0, %v19198_v61  ;;  %v13330_v59 = vpop.f32.mrf.mxu0  ;;  %v17264_v6 = vpack.c.bf16 %v7038_v45, %v7037_v58  ;;  %v7039_v58 = vld [vmem:[#allocation3 + $0x7c] sm:$0xff] }
 0x4f2   : > { %v12766_v44 = vpop.f32.mrf.mxu1  ;;  %v19343_v59 = vld [vmem:[#allocation32_spill] sm:$0xff] }
 0x4f3   : > { %v17260_v12 = vpop.f32.mrf.mxu0  ;;  %v3426_v44 = vadd.f32 %v19343_v59, %v17072_v30 }
 0x4f4   : > { %19342 = vst [vmem:[#allocation25_spill] sm:$0xff] %v17260_v12  ;;  %v3611_v10 = vpop.f32.mrf.mxu1 }
 0x4f5   : > { %v17262_v28 = vadd.f32 %v3611_v10, %v3425_v62  ;;  %v13331_v17 = vpop.f32.mrf.mxu0  ;;  %v7040_v62 = vld [vmem:[#allocation3 + $0x84] sm:$0xff] }
 0x4f6   : > { %v12767_v51 = vpop.f32.mrf.mxu1  ;;  %v17279_v59 = vpack.c.bf16 %v7040_v62, %v7039_v58  ;;  %v19348_v58 = vld [vmem:[#allocation34_spill] sm:$0xff] }
 0x4f7   : > { %v17268_v22 = vpop.f32.mrf.mxu0 }
 0x4f8   : > { %19344 = vst [vmem:[#allocation26_spill] sm:$0xff] %v17268_v22  ;;  %13633 = vmatmul.mubr.bf16.gmra.mxu0 %v17264_v6  ;;  %v3616_v23 = vpop.f32.mrf.mxu1  ;;  %13069 = vmatmul.mubr.bf16.gmra.mxu1 %v4721_v60  ;;  %v4722_v22 = vpack.c.bf16 %v4712_v24, %v4711_v63  ;;  %v7042_v24 = vld [vmem:[#allocation3 + $0x94] sm:$0xff] }
 0x4f9   : > { %13636 = vmatprep.mubr.msk.bf16.mxu0 %vm14819_vm0, %v19198_v61  ;;  %v17273_v52 = vadd.f32 %v3616_v23, %v3426_v44  ;;  %13072 = vmatprep.mubr.msk.bf16.mxu1 %vm14819_vm0, %v19198_v61  ;;  %v13334_v17 = vpop.f32.mrf.mxu0  ;;  %v19346_v44 = vld [vmem:[#allocation33_spill] sm:$0xff]  ;;  %v4714_v63 = vld [vmem:[#allocation3 + $0x97] sm:$0xff] }
 0x4fa   : > { %v12770_v45 = vpop.f32.mrf.mxu1  ;;  %v3834_v23 = vadd.f32 %v19346_v44, %v17093_v48  ;;  %v3835_v48 = vadd.f32 %v19348_v58, %v17101_v55  ;;  %v7041_v44 = vld [vmem:[#allocation3 + $0x8c] sm:$0xff] }
 0x4fb   : > { %v17277_v10 = vpop.f32.mrf.mxu0 }
 0x4fc   : > { %19345 = vst [vmem:[#allocation27_spill] sm:$0xff] %v17277_v10  ;;  %v3619_v30 = vpop.f32.mrf.mxu1 }
 0x4fd   : > { %v13335_v51 = vpop.f32.mrf.mxu0 }
 0x4fe   : > { %v12771_v60 = vpop.f32.mrf.mxu1 }
 0x4ff   : > { %v17283_v12 = vpop.f32.mrf.mxu0 }
 0x500   : > { %19347 = vst [vmem:[#allocation28_spill] sm:$0xff] %v17283_v12  ;;  %13637 = vmatmul.mubr.bf16.gmra.mxu0 %v17279_v59  ;;  %v3976_v17 = vpop.f32.mrf.mxu1  ;;  %13073 = vmatmul.mubr.bf16.gmra.mxu1 %v4722_v22  ;;  %v4713_v12 = vld [vmem:[#allocation3 + $0x8f] sm:$0xff] }
 0x501   : > { %13640 = vmatprep.mubr.msk.bf16.mxu0 %vm14819_vm0, %v19198_v61  ;;  %v17288_v45 = vadd.f32 %v3976_v17, %v3834_v23  ;;  %13076 = vmatprep.mubr.msk.bf16.mxu1 %vm14819_vm0, %v19198_v61  ;;  %v13338_v62 = vpop.f32.mrf.mxu0  ;;  %v17298_v23 = vpack.c.bf16 %v7042_v24, %v7041_v44  ;;  %v4723_v0 = vpack.c.bf16 %v4714_v63, %v4713_v12  ;;  %v7044_v12 = vld [vmem:[#allocation3 + $0xa4] sm:$0xff]  ;;  %v7043_v44 = vld [vmem:[#allocation3 + $0x9c] sm:$0xff] }
 0x502   : > { %v12842_v30 = vpop.f32.mrf.mxu1  ;;  %v3836_v62 = vadd.f32 %v16082_v3, %v17113_v36  ;;  %v4715_v36 = vld [vmem:[#allocation3 + $0x9f] sm:$0xff] }
 0x503   : > { %v17294_v51 = vpop.f32.mrf.mxu0 }
 0x504   : > { %19349 = vst [vmem:[#allocation29_spill] sm:$0xff] %v17294_v51  ;;  %v3979_v60 = vpop.f32.mrf.mxu1  ;;  %v3838_v51 = vadd.f32 %v16107_v27, %v17130_v21  ;;  %v3839_v27 = vadd.f32 %v16121_v39, %v17140_v13  ;;  %v5124_v21 = vld [vmem:[#allocation3 + $0x32] sm:$0xff]  ;;  %v19353_v39 = vld [vmem:[#allocation36_spill] sm:$0xff] }
 0x505   : > { %v17296_v22 = vadd.f32 %v3979_v60, %v3835_v48  ;;  %v13339_v10 = vpop.f32.mrf.mxu0  ;;  %v19351_v48 = vld [vmem:[#allocation35_spill] sm:$0xff]  ;;  %v3840_v13 = vadd.f32 %v19353_v39, %v17152_v1  ;;  %v14544_v39 = vld [vmem:[%s19174_s3 + $0x468] sm:$0xff]  }
 0x506   : > { %v12843_v17 = vpop.f32.mrf.mxu1  ;;  %v3837_v3 = vadd.f32 %v19351_v48, %v17119_v40  ;;  %v7047_v1 = vld [vmem:[#allocation3 + $0xbc] sm:$0xff] }
 0x507   : > { %v17302_v30 = vpop.f32.mrf.mxu0 }
 0x508   : > { %19350 = vst [vmem:[#allocation30_spill] sm:$0xff] %v17302_v30  ;;  %13641 = vmatmul.mubr.bf16.gmra.mxu0 %v17298_v23  ;;  %v3984_v55 = vpop.f32.mrf.mxu1  ;;  %13077 = vmatmul.mubr.bf16.gmra.mxu1 %v4723_v0  ;;  %v17315_v30 = vpack.c.bf16 %v7044_v12, %v7043_v44 }
 0x509   : > { %13644 = vmatprep.mubr.msk.bf16.mxu0 %vm14819_vm0, %v19198_v61  ;;  %v17307_v58 = vadd.f32 %v3984_v55, %v3836_v62  ;;  %13080 = vmatprep.mubr.msk.bf16.mxu1 %vm14819_vm0, %v19198_v61  ;;  %v13342_v10 = vpop.f32.mrf.mxu0  ;;  %v4724_v55 = vpack.c.bf16 %v4715_v36, %v4715_v36 }
 0x50a   : > { %v12846_v24 = vpop.f32.mrf.mxu1 }
 0x50b   : > { %v5951_v63 = vpop.f32.mrf.mxu0 }
 0x50c   : > { %v3987_v60 = vpop.f32.mrf.mxu1 }
 0x50d   : > { %v17313_v17 = vadd.f32 %v3987_v60, %v3837_v3  ;;  %v13343_v0 = vpop.f32.mrf.mxu0  ;;  %v7046_v3 = vld [vmem:[#allocation3 + $0xb4] sm:$0xff]  ;;  %v17332_v60 = vld [vmem:[#allocation3 + $0xac] sm:$0xff] }
 0x50e   : > { %v12847_v62 = vpop.f32.mrf.mxu1  ;;  %v5123_v0 = vld [vmem:[#allocation3 + $0x2a] sm:$0xff] }
 0x50f   : > { %v17319_v10 = vpop.f32.mrf.mxu0 }
 0x510   : > { %13645 = vmatmul.mubr.bf16.gmra.mxu0 %v17315_v30  ;;  %v3992_v24 = vpop.f32.mrf.mxu1  ;;  %13081 = vmatmul.mubr.bf16.gmra.mxu1 %v4724_v55  ;;  %v7055_v55 = vpack.c.bf16 %v7046_v3, %v17332_v60  ;;  %v14543_v3 = vld [vmem:[%s19174_s3 + $0x470] sm:$0xff]  }
 0x511   : > { %13648 = vmatprep.mubr.msk.bf16.mxu0 %vm14819_vm0, %v19198_v61  ;;  %v17324_v40 = vadd.f32 %v3992_v24, %v3838_v51  ;;  %13152 = vmatprep.mubr.msk.bf16.mxu1 %vm14819_vm0, %v19198_v61  ;;  %v13414_v12 = vpop.f32.mrf.mxu0  ;;  %v14542_v51 = vld [vmem:[%s19174_s3 + $0x478] sm:$0xff]  }
 0x512   : > { %v12850_v48 = vpop.f32.mrf.mxu1  ;;  %v5140_v12 = vpack.c.bf16 %v5124_v21, %v5123_v0  ;;  %v19355_v0 = vld [vmem:[#allocation37_spill] sm:$0xff] }
 0x513   : > { %v17330_v36 = vpop.f32.mrf.mxu0 }
 0x514   : > { %19352 = vst [vmem:[#allocation31_spill] sm:$0xff] %v17330_v36  ;;  %v3995_v63 = vpop.f32.mrf.mxu1 }
 0x515   : > { %v17334_v44 = vadd.f32 %v3995_v63, %v3839_v27  ;;  %v13415_v62 = vpop.f32.mrf.mxu0 }
 0x516   : > { %v12851_v24 = vpop.f32.mrf.mxu1  ;;  %v3841_v62 = vadd.f32 %v19355_v0, %v17164_v33  ;;  %v3842_v33 = vadd.f32 %v16174_v32, %v17176_v2  ;;  %v19358_v32 = vld [vmem:[#allocation38_spill] sm:$0xff] }
 0x517   : > { %v17342_v48 = vpop.f32.mrf.mxu0  ;;  %v3843_v2 = vadd.f32 %v19358_v32, %v17188_v42 }
 0x518   : > { %19354 = vst [vmem:[#allocation32_spill] sm:$0xff] %v17342_v48  ;;  %13649 = vmatmul.mubr.bf16.gmra.mxu0 %v7055_v55  ;;  %v4000_v36 = vpop.f32.mrf.mxu1  ;;  %13153 = vmatmul.mubr.bf16.vlgmr.msra.gmra.mxu1 %v5140_v12  ;;  %v5126_v55 = vld [vmem:[#allocation3 + $0x42] sm:$0xff]  ;;  %v5125_v12 = vld [vmem:[#allocation3 + $0x3a] sm:$0xff] }
 0x519   : > { %13652 = vmatprep.mubr.msk.bf16.mxu0 %vm14819_vm0, %v19198_v61  ;;  %v17346_v27 = vadd.f32 %v4000_v36, %v3840_v13  ;;  %13241 = vmatpush3.bf16.msra.mxu1 %v14542_v51  ;;  %v13418_v63 = vpop.f32.mrf.mxu0  ;;  %v5141_v48 = vpack.c.bf16 %v5126_v55, %v5125_v12 }
 0x51a   : > { %v12854_v21 = vpop.f32.mrf.mxu1  ;;  %13156 = vmatprep.mubr.msk.bf16.mxu1 %vm14819_vm0, %v19198_v61  ;;  %13242 = vmatprep.subr.bf16.mxu1 %v19198_v61  ;;  %v7056_v63 = vpack.c.bf16 %v7047_v1, %v7047_v1 }
 0x51b   : > { %v17356_v24 = vpop.f32.mrf.mxu0 }
 0x51c   : > { %19356 = vst [vmem:[#allocation33_spill] sm:$0xff] %v17356_v24  ;;  %v4003_v36 = vpop.f32.mrf.mxu1 }
 0x51d   : > { %v17358_v51 = vadd.f32 %v4003_v36, %v3841_v62  ;;  %13243 = vmatpush3.bf16.msra.mxu1 %v14543_v3  ;;  %v13419_v13 = vpop.f32.mrf.mxu0  ;;  %v14545_v3 = vld [vmem:[%s19174_s3 + $0x460] sm:$0xff]  }
 0x51e   : > { %v12855_v21 = vpop.f32.mrf.mxu1  ;;  %13244 = vmatprep.subr.bf16.mxu1 %v19198_v61 }
 0x51f   : > { %v17366_v0 = vpop.f32.mrf.mxu0  ;;  %v14546_v21 = vld [vmem:[%s19174_s3 + $0x458] sm:$0xff]  }
 0x520   : > { %19357 = vst [vmem:[#allocation34_spill] sm:$0xff] %v17366_v0  ;;  %13653 = vmatmul.mubr.bf16.gmra.mxu0 %v7056_v63  ;;  %v4008_v62 = vpop.f32.mrf.mxu1  ;;  %13157 = vmatmul.mubr.bf16.gmra.mxu1 %v5141_v48  ;;  %v5128_v48 = vld [vmem:[#allocation3 + $0x52] sm:$0xff] }
 0x521   : > { %v17368_v36 = vadd.f32 %v4008_v62, %v3842_v33  ;;  %13160 = vmatprep.mubr.msk.bf16.mxu1 %vm14819_vm0, %v19198_v61  ;;  %13245 = vmatpush3.bf16.msra.mxu1 %v14544_v39  ;;  %v13422_v1 = vpop.f32.mrf.mxu0  ;;  %v5127_v39 = vld [vmem:[#allocation3 + $0x4a] sm:$0xff] }
 0x522   : > { %v12858_v55 = vpop.f32.mrf.mxu1  ;;  %13246 = vmatprep.subr.bf16.mxu1 %v19198_v61  ;;  %13732 = vmatprep.mubr.msk.bf16.mxu0 %vm14819_vm0, %v19198_v61  ;;  %v5142_v1 = vpack.c.bf16 %v5128_v48, %v5127_v39 }
 0x523   : > { %v17380_v12 = vpop.f32.mrf.mxu0  ;;  %v19360_v55 = vld [vmem:[#allocation39_spill] sm:$0xff] }
 0x524   : > { %19359 = vst [vmem:[#allocation35_spill] sm:$0xff] %v17380_v12  ;;  %v4011_v13 = vpop.f32.mrf.mxu1  ;;  %v3844_v42 = vadd.f32 %v19360_v55, %v17203_v11  ;;  %v19362_v11 = vld [vmem:[#allocation40_spill] sm:$0xff] }
 0x525   : > { %v17382_v63 = vadd.f32 %v4011_v13, %v3843_v2  ;;  %13247 = vmatpush3.bf16.msra.mxu1 %v14545_v3  ;;  %v13423_v33 = vpop.f32.mrf.mxu0  ;;  %v14547_v3 = vld [vmem:[%s19174_s3 + $0x450] sm:$0xff]   ;;  %v3845_v39 = vadd.f32 %v19362_v11, %v17215_v34  ;;  %v5129_v55 = vld [vmem:[#allocation3 + $0x5a] sm:$0xff] }
 0x526   : > { %v12859_v62 = vpop.f32.mrf.mxu1  ;;  %13248 = vmatprep.subr.bf16.mxu1 %v19198_v61  ;;  %v5130_v33 = vld [vmem:[#allocation3 + $0x62] sm:$0xff] }
 0x527   : > { %v17390_v32 = vpop.f32.mrf.mxu0 }
 0x528   : > { %19361 = vst [vmem:[#allocation36_spill] sm:$0xff] %v17390_v32  ;;  %v4016_v12 = vpop.f32.mrf.mxu1  ;;  %13161 = vmatmul.mubr.bf16.gmra.mxu1 %v5142_v1  ;;  %v19364_v32 = vld [vmem:[#allocation41_spill] sm:$0xff] }
 0x529   : > { %v17392_v2 = vadd.f32 %v4016_v12, %v3844_v42  ;;  %13164 = vmatprep.mubr.msk.bf16.mxu1 %vm14819_vm0, %v19198_v61  ;;  %13249 = vmatpush3.bf16.msra.mxu1 %v14546_v21  ;;  %v13426_v48 = vpop.f32.mrf.mxu0  ;;  %v14548_v21 = vld [vmem:[%s19174_s3 + $0x448] sm:$0xff]   ;;  %v3846_v34 = vadd.f32 %v19364_v32, %v17230_v4  ;;  %v19366_v4 = vld [vmem:[#allocation42_spill] sm:$0xff] }
 0x52a   : > { %v12862_v13 = vpop.f32.mrf.mxu1  ;;  %13250 = vmatprep.subr.bf16.mxu1 %v19198_v61  ;;  %v3847_v32 = vadd.f32 %v19366_v4, %v17242_v14 }
 0x52b   : > { %v17402_v62 = vpop.f32.mrf.mxu0  ;;  %v5143_v13 = vpack.c.bf16 %v5130_v33, %v5129_v55  ;;  %v5132_v55 = vld [vmem:[#allocation3 + $0x72] sm:$0xff] }
 0x52c   : > { %19363 = vst [vmem:[#allocation37_spill] sm:$0xff] %v17402_v62  ;;  %v4019_v12 = vpop.f32.mrf.mxu1 }
 0x52d   : > { %v17404_v1 = vadd.f32 %v4019_v12, %v3845_v39  ;;  %13251 = vmatpush3.bf16.msra.mxu1 %v14547_v3  ;;  %v13427_v42 = vpop.f32.mrf.mxu0  ;;  %v14549_v3 = vld [vmem:[%s19174_s3 + $0x440] sm:$0xff]  }
 0x52e   : > { %v12863_v48 = vpop.f32.mrf.mxu1  ;;  %13252 = vmatprep.subr.bf16.mxu1 %v19198_v61 }
 0x52f   : > { %v17412_v11 = vpop.f32.mrf.mxu0 }
 0x530   : > { %19365 = vst [vmem:[#allocation38_spill] sm:$0xff] %v17412_v11  ;;  %v4024_v62 = vpop.f32.mrf.mxu1  ;;  %13165 = vmatmul.mubr.bf16.gmra.mxu1 %v5143_v13  ;;  %v5131_v13 = vld [vmem:[#allocation3 + $0x6a] sm:$0xff] }
 0x531   : > { %v17414_v39 = vadd.f32 %v4024_v62, %v3846_v34  ;;  %13168 = vmatprep.mubr.msk.bf16.mxu1 %vm14819_vm0, %v19198_v61  ;;  %13253 = vmatpush3.bf16.msra.mxu1 %v14548_v21  ;;  %v13430_v33 = vpop.f32.mrf.mxu0  ;;  %v5144_v11 = vpack.c.bf16 %v5132_v55, %v5131_v13  ;;  %v5134_v55 = vld [vmem:[#allocation3 + $0x82] sm:$0xff] }
 0x532   : > { %v12866_v12 = vpop.f32.mrf.mxu1  ;;  %13254 = vmatprep.subr.bf16.mxu1 %v19198_v61  ;;  %v19368_v33 = vld [vmem:[#allocation43_spill] sm:$0xff] }
 0x533   : > { %v17424_v42 = vpop.f32.mrf.mxu0  ;;  %v3848_v12 = vadd.f32 %v19368_v33, %v17254_v5  ;;  %v5133_v5 = vld [vmem:[#allocation3 + $0x7a] sm:$0xff] }
 0x534   : > { %19367 = vst [vmem:[#allocation39_spill] sm:$0xff] %v17424_v42  ;;  %v4027_v62 = vpop.f32.mrf.mxu1 }
 0x535   : > { %v17426_v48 = vadd.f32 %v4027_v62, %v3847_v32  ;;  %13255 = vmatpush3.bf16.msra.mxu1 %v14549_v3  ;;  %v13431_v21 = vpop.f32.mrf.mxu0  ;;  %v19370_v3 = vld [vmem:[#allocation44_spill] sm:$0xff] }
 0x536   : > { %v12867_v34 = vpop.f32.mrf.mxu1  ;;  %13344 = vmatprep.subr.bf16.mxu1 %v19198_v61  ;;  %v3849_v62 = vadd.f32 %v19370_v3, %v17262_v28 }
 0x537   : > { %v17431_v0 = vpop.f32.mrf.mxu0 }
 0x538   : > { %19369 = vst [vmem:[#allocation40_spill] sm:$0xff] %v17431_v0  ;;  %v4032_v24 = vpop.f32.mrf.mxu1  ;;  %13169 = vmatmul.mubr.bf16.gmra.mxu1 %v5144_v11  ;;  %v5145_v11 = vpack.c.bf16 %v5134_v55, %v5133_v5 }
 0x539   : > { %v17433_v14 = vadd.f32 %v4032_v24, %v3848_v12  ;;  %13172 = vmatprep.mubr.msk.bf16.mxu1 %vm14819_vm0, %v19198_v61  ;;  %v13434_v4 = vpop.f32.mrf.mxu0  ;;  %v19372_v24 = vld [vmem:[#allocation45_spill] sm:$0xff] }
 0x53a   : > { %v12870_v32 = vpop.f32.mrf.mxu1  ;;  %v3850_v12 = vadd.f32 %v19372_v24, %v17273_v52  ;;  %v19374_v52 = vld [vmem:[#allocation46_spill] sm:$0xff] }
 0x53b   : > { %v17439_v13 = vpop.f32.mrf.mxu0  ;;  %v4258_v24 = vadd.f32 %v19374_v52, %v17288_v45 }
 0x53c   : > { %19371 = vst [vmem:[#allocation41_spill] sm:$0xff] %v17439_v13  ;;  %v4035_v21 = vpop.f32.mrf.mxu1 }
 0x53d   : > { %v17441_v34 = vadd.f32 %v4035_v21, %v3849_v62  ;;  %v13435_v33 = vpop.f32.mrf.mxu0  ;;  %v5136_v62 = vld [vmem:[#allocation3 + $0x92] sm:$0xff] }
 0x53e   : > { %v12871_v0 = vpop.f32.mrf.mxu1 }
 0x53f   : > { %v17445_v42 = vpop.f32.mrf.mxu0  ;;  %v5135_v0 = vld [vmem:[#allocation3 + $0x8a] sm:$0xff] }
 0x540   : > { %19373 = vst [vmem:[#allocation42_spill] sm:$0xff] %v17445_v42  ;;  %v4040_v4 = vpop.f32.mrf.mxu1  ;;  %13173 = vmatmul.mubr.bf16.gmra.mxu1 %v5145_v11  ;;  %v5146_v13 = vpack.c.bf16 %v5136_v62, %v5135_v0 }
 0x541   : > { %v17447_v32 = vadd.f32 %v4040_v4, %v3850_v12  ;;  %13176 = vmatprep.mubr.msk.bf16.mxu1 %vm14819_vm0, %v19198_v61  ;;  %v13438_v28 = vpop.f32.mrf.mxu0 }
 0x542   : > { %v12874_v3 = vpop.f32.mrf.mxu1 }
 0x543   : > { %v17451_v21 = vpop.f32.mrf.mxu0  ;;  %v19375_v3 = vld [vmem:[#allocation47_spill] sm:$0xff] }
 0x544   : > { %v4043_v33 = vpop.f32.mrf.mxu1 }
 0x545   : > { %v13439_v55 = vpop.f32.mrf.mxu0  ;;  %v4259_v33 = vadd.f32 %v19375_v3, %v17296_v22 }
 0x546   : > { %v12875_v5 = vpop.f32.mrf.mxu1 }
 0x547   : > { %v17455_v42 = vpop.f32.mrf.mxu0 }
 0x548   : > { %v4400_v11 = vpop.f32.mrf.mxu1  ;;  %13177 = vmatmul.mubr.bf16.gmra.mxu1 %v5146_v13  ;;  %v4260_v13 = vadd.f32 %v16312_v54, %v17307_v58 }
 0x549   : > { %v17457_v12 = vadd.f32 %v4400_v11, %v4258_v24  ;;  %13180 = vmatprep.mubr.msk.bf16.mxu1 %vm14819_vm0, %v19198_v61  ;;  %v13442_v4 = vpop.f32.mrf.mxu0 }
 0x54a   : > { %v12946_v28 = vpop.f32.mrf.mxu1 }
 0x54b   : > { %v17463_v55 = vpop.f32.mrf.mxu0  ;;  %v4261_v28 = vadd.f32 %v16325_v43, %v17313_v17 }
 0x54c   : > { %v4403_v62 = vpop.f32.mrf.mxu1 }
 0x54d   : > { %v17465_v0 = vadd.f32 %v4403_v62, %v4259_v33  ;;  %v13443_v45 = vpop.f32.mrf.mxu0 }
 0x54e   : > { %v12947_v5 = vpop.f32.mrf.mxu1  ;;  %v5148_v45 = vpack.c.bf16 %v17138_v18, %v17138_v18 }
 0x54f   : > { %v17469_v52 = vpop.f32.mrf.mxu0 }
 0x550   : > { %v4408_v24 = vpop.f32.mrf.mxu1  ;;  %13181 = vmatmul.mubr.bf16.gmra.mxu1 %v17121_v29  ;;  %v4262_v29 = vadd.f32 %v16334_v56, %v17324_v40  ;;  %v5547_v56 = vld [vmem:[#allocation3 + $0x2c] sm:$0xff]  ;;  %v14550_v40 = vld [vmem:[%s19174_s3 + $0x4f8] sm:$0xff]  }
 0x551   : > { %v17472_v11 = vadd.f32 %v4408_v24, %v4260_v13  ;;  %13184 = vmatprep.mubr.msk.bf16.mxu1 %vm14819_vm0, %v19198_v61  ;;  %v13446_v22 = vpop.f32.mrf.mxu0 }
 0x552   : > { %v12950_v4 = vpop.f32.mrf.mxu1  ;;  %v4263_v22 = vadd.f32 %v16348_v8, %v17334_v44 }
 0x553   : > { %v6375_v3 = vpop.f32.mrf.mxu0  ;;  %v5548_v4 = vld [vmem:[#allocation3 + $0x34] sm:$0xff] }
 0x554   : > { %v4411_v33 = vpop.f32.mrf.mxu1 }
 0x555   : > { %v17478_v62 = vadd.f32 %v4411_v33, %v4261_v28  ;;  %v13447_v54 = vpop.f32.mrf.mxu0 }
 0x556   : > { %v12951_v58 = vpop.f32.mrf.mxu1 }
 0x557   : > { %v17484_v5 = vpop.f32.mrf.mxu0  ;;  %v5564_v58 = vpack.c.bf16 %v5548_v4, %v5547_v56 }
 0x558   : > { %v4416_v13 = vpop.f32.mrf.mxu1  ;;  %13185 = vmatmul.mubr.bf16.gmra.mxu1 %v5148_v45  ;;  %v4264_v45 = vadd.f32 %v16360_v57, %v17346_v27  ;;  %v4265_v57 = vadd.f32 %v16381_v31, %v17358_v51 }
 0x559   : > { %v17486_v24 = vadd.f32 %v4416_v13, %v4262_v29  ;;  %13256 = vmatprep.mubr.msk.bf16.mxu1 %vm14819_vm0, %v19198_v61  ;;  %v13518_v43 = vpop.f32.mrf.mxu0  ;;  %v14551_v13 = vld [vmem:[%s19174_s3 + $0x4f0] sm:$0xff]  }
 0x55a   : > { %v12954_v17 = vpop.f32.mrf.mxu1 }
 0x55b   : > { %v17492_v28 = vpop.f32.mrf.mxu0 }
 0x55c   : > { %v4419_v18 = vpop.f32.mrf.mxu1 }
 0x55d   : > { %v17494_v3 = vadd.f32 %v4419_v18, %v4263_v22  ;;  %v13519_v33 = vpop.f32.mrf.mxu0  ;;  %v14552_v18 = vld [vmem:[%s19174_s3 + $0x4e8] sm:$0xff]  }
 0x55e   : > { %v12955_v54 = vpop.f32.mrf.mxu1  ;;  %v4266_v33 = vadd.f32 %v16394_v46, %v17368_v36  ;;  %v4267_v46 = vadd.f32 %v16415_v38, %v17382_v63 }
 0x560   : > { %v17501_v29 = vpop.f32.mrf.mxu0  ;;  %v4424_v8 = vpop.f32.mrf.mxu1  ;;  %13257 = vmatmul.mubr.bf16.vlgmr.msra.gmra.mxu1 %v5564_v58  ;;  %v14553_v58 = vld [vmem:[%s19174_s3 + $0x4e0] sm:$0xff]  }
 0x561   : > { %v17503_v44 = vadd.f32 %v4424_v8, %v4264_v45  ;;  %13345 = vmatpush3.bf16.msra.mxu1 %v14550_v40  ;;  %13260 = vmatprep.mubr.msk.bf16.mxu1 %vm14819_vm0, %v19198_v61 }
 0x562   : > { %v13522_v43 = vpop.f32.mrf.mxu0  ;;  %v12958_v17 = vpop.f32.mrf.mxu1  ;;  %13346 = vmatprep.subr.bf16.mxu1 %v19198_v61 }
 0x563   : > { %v14554_v43 = vld [vmem:[%s19174_s3 + $0x4d8] sm:$0xff]  }
 0x564   : > { %v17513_v27 = vpop.f32.mrf.mxu0  ;;  %v4427_v22 = vpop.f32.mrf.mxu1 }
 0x565   : > { %v17515_v4 = vadd.f32 %v4427_v22, %v4265_v57  ;;  %13347 = vmatpush3.bf16.msra.mxu1 %v14551_v13  ;;  %v4268_v22 = vadd.f32 %v16425_v49, %v17392_v2  ;;  %v4269_v49 = vadd.f32 %v16442_v16, %v17404_v1 }
 0x566   : > { %v13523_v56 = vpop.f32.mrf.mxu0  ;;  %v12959_v40 = vpop.f32.mrf.mxu1  ;;  %13348 = vmatprep.subr.bf16.mxu1 %v19198_v61 }
 0x567   : > { %v14555_v56 = vld [vmem:[%s19174_s3 + $0x4d0] sm:$0xff]  }
 0x568   : > { %v17523_v54 = vpop.f32.mrf.mxu0  ;;  %v4432_v31 = vpop.f32.mrf.mxu1  ;;  %13261 = vmatmul.mubr.bf16.gmra.mxu1 %v17190_v20 }
 0x569   : > { %v17526_v51 = vadd.f32 %v4432_v31, %v4266_v33  ;;  %13264 = vmatprep.mubr.msk.bf16.mxu1 %vm14819_vm0, %v19198_v61  ;;  %13349 = vmatpush3.bf16.msra.mxu1 %v14552_v18 }
 0x56a   : > { %v13526_v45 = vpop.f32.mrf.mxu0  ;;  %v12962_v8 = vpop.f32.mrf.mxu1  ;;  %13350 = vmatprep.subr.bf16.mxu1 %v19198_v61 }
 0x56c   : > { %v17536_v36 = vpop.f32.mrf.mxu0  ;;  %v4435_v20 = vpop.f32.mrf.mxu1 }
 0x56d   : > { %v17538_v13 = vadd.f32 %v4435_v20, %v4267_v46  ;;  %13351 = vmatpush3.bf16.msra.mxu1 %v14553_v58  ;;  %v14556_v58 = vld [vmem:[%s19174_s3 + $0x4c8] sm:$0xff]   ;;  %v4270_v46 = vadd.f32 %v16451_v26, %v17414_v39  ;;  %v4271_v26 = vadd.f32 %v16468_v47, %v17426_v48 }
 0x56e   : > { %v13527_v17 = vpop.f32.mrf.mxu0  ;;  %v12963_v57 = vpop.f32.mrf.mxu1  ;;  %13352 = vmatprep.subr.bf16.mxu1 %v19198_v61 }
 0x570   : > { %v17546_v18 = vpop.f32.mrf.mxu0  ;;  %v4440_v38 = vpop.f32.mrf.mxu1  ;;  %13265 = vmatmul.mubr.bf16.gmra.mxu1 %v17217_v7 }
 0x571   : > { %v17549_v63 = vadd.f32 %v4440_v38, %v4268_v22  ;;  %13268 = vmatprep.mubr.msk.bf16.mxu1 %vm14819_vm0, %v19198_v61  ;;  %13353 = vmatpush3.bf16.msra.mxu1 %v14554_v43  ;;  %v14557_v43 = vld [vmem:[%s19174_s3 + $0x4c0] sm:$0xff]  }
 0x572   : > { %v13530_v40 = vpop.f32.mrf.mxu0  ;;  %v12966_v33 = vpop.f32.mrf.mxu1  ;;  %13354 = vmatprep.subr.bf16.mxu1 %v19198_v61 }
 0x573   : > { %v4272_v40 = vadd.f32 %v16471_v35, %v17433_v14 }
 0x574   : > { %v17559_v2 = vpop.f32.mrf.mxu0  ;;  %v4443_v7 = vpop.f32.mrf.mxu1 }
 0x575   : > { %v17561_v31 = vadd.f32 %v4443_v7, %v4269_v49  ;;  %13355 = vmatpush3.bf16.msra.mxu1 %v14555_v56 }
 0x576   : > { %v13531_v45 = vpop.f32.mrf.mxu0  ;;  %v12967_v8 = vpop.f32.mrf.mxu1  ;;  %13356 = vmatprep.subr.bf16.mxu1 %v19198_v61 }
 0x578   : > { %v17569_v20 = vpop.f32.mrf.mxu0  ;;  %v4448_v16 = vpop.f32.mrf.mxu1  ;;  %13269 = vmatmul.mubr.bf16.gmra.mxu1 %v17244_v53 }
 0x579   : > { %v17572_v1 = vadd.f32 %v4448_v16, %v4270_v46  ;;  %13272 = vmatprep.mubr.msk.bf16.mxu1 %vm14819_vm0, %v19198_v61  ;;  %13357 = vmatpush3.bf16.msra.mxu1 %v14556_v58  ;;  %v4273_v58 = vadd.f32 %v16484_v41, %v17441_v34 }
 0x57a   : > { %v13534_v17 = vpop.f32.mrf.mxu0  ;;  %v12970_v57 = vpop.f32.mrf.mxu1  ;;  %13358 = vmatprep.subr.bf16.mxu1 %v19198_v61 }
 0x57c   : > { %v17582_v39 = vpop.f32.mrf.mxu0  ;;  %v4451_v53 = vpop.f32.mrf.mxu1 }
 0x57d   : > { %v17584_v22 = vadd.f32 %v4451_v53, %v4271_v26  ;;  %13359 = vmatpush3.bf16.msra.mxu1 %v14557_v43 }
 0x57e   : > { %v13535_v38 = vpop.f32.mrf.mxu0  ;;  %v12971_v56 = vpop.f32.mrf.mxu1  ;;  %13448 = vmatprep.subr.bf16.mxu1 %v19198_v61 }
 0x580   : > { %v17589_v33 = vpop.f32.mrf.mxu0  ;;  %v4456_v49 = vpop.f32.mrf.mxu1  ;;  %13273 = vmatmul.mubr.bf16.gmra.mxu1 %v17264_v6  ;;  %v4274_v6 = vadd.f32 %v16489_v9, %v17447_v32  ;;  %v4682_v9 = vadd.f32 %v16507_v25, %v17457_v12 }
 0x581   : > { %v17592_v7 = vadd.f32 %v4456_v49, %v4272_v40  ;;  %13276 = vmatprep.mubr.msk.bf16.mxu1 %vm14819_vm0, %v19198_v61 }
 0x582   : > { %v13538_v47 = vpop.f32.mrf.mxu0  ;;  %v12974_v48 = vpop.f32.mrf.mxu1 }
 0x583   : > { %v4683_v47 = vadd.f32 %v16516_v19, %v17465_v0 }
 0x584   : > { %v17598_v45 = vpop.f32.mrf.mxu0  ;;  %v4459_v8 = vpop.f32.mrf.mxu1 }
 0x585   : > { %v17600_v46 = vadd.f32 %v4459_v8, %v4273_v58 }
 0x586   : > { %v13539_v35 = vpop.f32.mrf.mxu0  ;;  %v12975_v14 = vpop.f32.mrf.mxu1 }
 0x588   : > { %v17604_v16 = vpop.f32.mrf.mxu0  ;;  %v4464_v43 = vpop.f32.mrf.mxu1  ;;  %13277 = vmatmul.mubr.bf16.gmra.mxu1 %v17279_v59 }
 0x589   : > { %v17607_v17 = vadd.f32 %v4464_v43, %v4274_v6  ;;  %13280 = vmatprep.mubr.msk.bf16.mxu1 %vm14819_vm0, %v19198_v61  ;;  %v19380_v43 = vld [vmem:[#allocation48_spill] sm:$0xff] }
 0x58a   : > { %v13542_v41 = vpop.f32.mrf.mxu0  ;;  %v12978_v34 = vpop.f32.mrf.mxu1 }
 0x58b   : > { %v4685_v41 = vadd.f32 %v19380_v43, %v17478_v62 }
 0x58c   : > { %v17611_v57 = vpop.f32.mrf.mxu0  ;;  %v4467_v26 = vpop.f32.mrf.mxu1 }
 0x58d   : > { %19376 = vst [vmem:[#allocation43_spill] sm:$0xff] %v17611_v57 }
 0x58e   : > { %v13543_v53 = vpop.f32.mrf.mxu0  ;;  %v12979_v38 = vpop.f32.mrf.mxu1 }
 0x58f   : > { %v5572_v38 = vpack.c.bf16 %v17332_v60, %v17332_v60 }
 0x590   : > { %v17615_v32 = vpop.f32.mrf.mxu0  ;;  %v4824_v56 = vpop.f32.mrf.mxu1  ;;  %13281 = vmatmul.mubr.bf16.gmra.mxu1 %v17298_v23  ;;  %v4684_v23 = vadd.f32 %v16524_v15, %v17472_v11 }
 0x591   : > { %19377 = vst [vmem:[#allocation44_spill] sm:$0xff] %v17615_v32  ;;  %v17618_v59 = vadd.f32 %v4824_v56, %v4682_v9  ;;  %13284 = vmatprep.mubr.msk.bf16.mxu1 %vm14819_vm0, %v19198_v61 }
 0x592   : > { %v13546_v40 = vpop.f32.mrf.mxu0  ;;  %v13050_v49 = vpop.f32.mrf.mxu1 }
 0x594   : > { %v17624_v48 = vpop.f32.mrf.mxu0  ;;  %v4827_v58 = vpop.f32.mrf.mxu1 }
 0x595   : > { %19378 = vst [vmem:[#allocation45_spill] sm:$0xff] %v17624_v48  ;;  %v17626_v8 = vadd.f32 %v4827_v58, %v4683_v47  ;;  %v19382_v58 = vld [vmem:[#allocation50_spill] sm:$0xff] }
 0x596   : > { %v13547_v25 = vpop.f32.mrf.mxu0  ;;  %v13051_v12 = vpop.f32.mrf.mxu1 }
 0x597   : > { %v4687_v25 = vadd.f32 %v19382_v58, %v17494_v3  ;;  %v5972_v12 = vld [vmem:[#allocation3 + $0x36] sm:$0xff] }
 0x598   : > { %v17630_v35 = vpop.f32.mrf.mxu0  ;;  %v4832_v14 = vpop.f32.mrf.mxu1  ;;  %13285 = vmatmul.mubr.bf16.gmra.mxu1 %v17315_v30  ;;  %v19381_v30 = vld [vmem:[#allocation49_spill] sm:$0xff] }
 0x599   : > { %19379 = vst [vmem:[#allocation46_spill] sm:$0xff] %v17630_v35  ;;  %v17633_v6 = vadd.f32 %v4832_v14, %v4684_v23  ;;  %13288 = vmatprep.mubr.msk.bf16.mxu1 %vm14819_vm0, %v19198_v61  ;;  %v4686_v9 = vadd.f32 %v19381_v30, %v17486_v24  ;;  %v5971_v24 = vld [vmem:[#allocation3 + $0x2e] sm:$0xff] }
 0x59a   : > { %v13550_v19 = vpop.f32.mrf.mxu0  ;;  %v13054_v0 = vpop.f32.mrf.mxu1 }
 0x59b   : > { %v14558_v19 = vld [vmem:[%s19174_s3 + $0x578] sm:$0xff]  }
 0x59c   : > { %v6799_v34 = vpop.f32.mrf.mxu0  ;;  %v4835_v26 = vpop.f32.mrf.mxu1 }
 0x59d   : > { %v17639_v53 = vadd.f32 %v4835_v26, %v4685_v41  ;;  %v5988_v41 = vpack.c.bf16 %v5972_v12, %v5971_v24  ;;  %v19383_v34 = vld [vmem:[#allocation51_spill] sm:$0xff] }
 0x59e   : > { %v13551_v15 = vpop.f32.mrf.mxu0  ;;  %v13055_v11 = vpop.f32.mrf.mxu1  ;;  %v4688_v26 = vadd.f32 %v19383_v34, %v17503_v44  ;;  %v19384_v44 = vld [vmem:[#allocation52_spill] sm:$0xff] }
 0x59f   : > { %v5973_v12 = vld [vmem:[#allocation3 + $0x3e] sm:$0xff] }
 0x5a0   : > { %v17645_v56 = vpop.f32.mrf.mxu0  ;;  %v4840_v40 = vpop.f32.mrf.mxu1  ;;  %13289 = vmatmul.mubr.bf16.gmra.mxu1 %v5572_v38  ;;  %v14559_v38 = vld [vmem:[%s19174_s3 + $0x570] sm:$0xff]  }
 0x5a1   : > { %v17647_v49 = vadd.f32 %v4840_v40, %v4686_v9  ;;  %13360 = vmatprep.mubr.msk.bf16.mxu1 %vm14819_vm0, %v19198_v61  ;;  %v4689_v40 = vadd.f32 %v19384_v44, %v17515_v4  ;;  %v5976_v44 = vld [vmem:[#allocation3 + $0x56] sm:$0xff] }
 0x5a2   : > { %v13622_v62 = vpop.f32.mrf.mxu0  ;;  %v13058_v47 = vpop.f32.mrf.mxu1 }
 0x5a3   : > { %v5974_v62 = vld [vmem:[#allocation3 + $0x46] sm:$0xff] }
 0x5a4   : > { %v17653_v23 = vpop.f32.mrf.mxu0  ;;  %v4843_v60 = vpop.f32.mrf.mxu1 }
 0x5a5   : > { %v17655_v14 = vadd.f32 %v4843_v60, %v4687_v25  ;;  %v14560_v60 = vld [vmem:[%s19174_s3 + $0x568] sm:$0xff]  }
 0x5a6   : > { %v13623_v0 = vpop.f32.mrf.mxu0  ;;  %v13059_v43 = vpop.f32.mrf.mxu1 }
 0x5a7   : > { %v5989_v0 = vpack.c.bf16 %v5974_v62, %v5973_v12  ;;  %v19385_v43 = vld [vmem:[#allocation53_spill] sm:$0xff] }
 0x5a8   : > { %v17662_v15 = vpop.f32.mrf.mxu0  ;;  %v4848_v3 = vpop.f32.mrf.mxu1  ;;  %13361 = vmatmul.mubr.bf16.vlgmr.msra.gmra.mxu1 %v5988_v41  ;;  %v4690_v4 = vadd.f32 %v19385_v43, %v17526_v51  ;;  %v19386_v51 = vld [vmem:[#allocation54_spill] sm:$0xff]  ;;  %v19387_v43 = vld [vmem:[#allocation55_spill] sm:$0xff] }
 0x5a9   : > { %v17664_v11 = vadd.f32 %v4848_v3, %v4688_v26  ;;  %13449 = vmatpush3.bf16.msra.mxu1 %v14558_v19  ;;  %13364 = vmatprep.mubr.msk.bf16.mxu1 %vm14819_vm0, %v19198_v61  ;;  %v14561_v3 = vld [vmem:[%s19174_s3 + $0x560] sm:$0xff]   ;;  %v5975_v12 = vld [vmem:[#allocation3 + $0x4e] sm:$0xff] }
 0x5aa   : > { %v13626_v30 = vpop.f32.mrf.mxu0  ;;  %v13062_v9 = vpop.f32.mrf.mxu1  ;;  %13450 = vmatprep.subr.bf16.mxu1 %v19198_v61 }
 0x5ab   : > { %v4691_v9 = vadd.f32 %v19386_v51, %v17538_v13  ;;  %v4692_v13 = vadd.f32 %v19387_v43, %v17549_v63  ;;  %v19388_v63 = vld [vmem:[#allocation56_spill] sm:$0xff] }
 0x5ac   : > { %v17674_v47 = vpop.f32.mrf.mxu0  ;;  %v4851_v58 = vpop.f32.mrf.mxu1 }
 0x5ad   : > { %v17676_v25 = vadd.f32 %v4851_v58, %v4689_v40  ;;  %13451 = vmatpush3.bf16.msra.mxu1 %v14559_v38 }
 0x5ae   : > { %v13627_v24 = vpop.f32.mrf.mxu0  ;;  %v13063_v19 = vpop.f32.mrf.mxu1  ;;  %13452 = vmatprep.subr.bf16.mxu1 %v19198_v61 }
 0x5b0   : > { %v17684_v41 = vpop.f32.mrf.mxu0  ;;  %v4856_v34 = vpop.f32.mrf.mxu1  ;;  %13365 = vmatmul.mubr.bf16.gmra.mxu1 %v5989_v0  ;;  %v5990_v0 = vpack.c.bf16 %v5976_v44, %v5975_v12  ;;  %v5978_v44 = vld [vmem:[#allocation3 + $0x66] sm:$0xff] }
 0x5b1   : > { %v17686_v26 = vadd.f32 %v4856_v34, %v4690_v4  ;;  %13368 = vmatprep.mubr.msk.bf16.mxu1 %vm14819_vm0, %v19198_v61  ;;  %13453 = vmatpush3.bf16.msra.mxu1 %v14560_v60  ;;  %v14562_v60 = vld [vmem:[%s19174_s3 + $0x558] sm:$0xff]  }
 0x5b2   : > { %v13630_v38 = vpop.f32.mrf.mxu0  ;;  %v13066_v30 = vpop.f32.mrf.mxu1  ;;  %13454 = vmatprep.subr.bf16.mxu1 %v19198_v61 }
 0x5b4   : > { %v17696_v40 = vpop.f32.mrf.mxu0  ;;  %v4859_v62 = vpop.f32.mrf.mxu1 }
 0x5b5   : > { %v17698_v58 = vadd.f32 %v4859_v62, %v4691_v9  ;;  %13455 = vmatpush3.bf16.msra.mxu1 %v14561_v3  ;;  %v14563_v3 = vld [vmem:[%s19174_s3 + $0x550] sm:$0xff]   ;;  %v4693_v9 = vadd.f32 %v19388_v63, %v17561_v31 }
 0x5b6   : > { %v13631_v24 = vpop.f32.mrf.mxu0  ;;  %v13067_v19 = vpop.f32.mrf.mxu1  ;;  %13456 = vmatprep.subr.bf16.mxu1 %v19198_v61 }
 0x5b7   : > { %v5977_v19 = vld [vmem:[#allocation3 + $0x5e] sm:$0xff] }
 0x5b8   : > { %v17706_v4 = vpop.f32.mrf.mxu0  ;;  %v4864_v34 = vpop.f32.mrf.mxu1  ;;  %13369 = vmatmul.mubr.bf16.gmra.mxu1 %v5990_v0 }
 0x5b9   : > { %v17708_v38 = vadd.f32 %v4864_v34, %v4692_v13  ;;  %13372 = vmatprep.mubr.msk.bf16.mxu1 %vm14819_vm0, %v19198_v61  ;;  %13457 = vmatpush3.bf16.msra.mxu1 %v14562_v60  ;;  %v14564_v60 = vld [vmem:[%s19174_s3 + $0x548] sm:$0xff]   ;;  %v5991_v13 = vpack.c.bf16 %v5978_v44, %v5977_v19  ;;  %v5980_v19 = vld [vmem:[#allocation3 + $0x76] sm:$0xff] }
 0x5ba   : > { %v13634_v30 = vpop.f32.mrf.mxu0  ;;  %v13070_v51 = vpop.f32.mrf.mxu1  ;;  %13458 = vmatprep.subr.bf16.mxu1 %v19198_v61  ;;  %v19389_v34 = vld [vmem:[#allocation57_spill] sm:$0xff] }
 0x5bb   : > { %v4694_v31 = vadd.f32 %v19389_v34, %v17572_v1  ;;  %v19390_v1 = vld [vmem:[#allocation58_spill] sm:$0xff] }
 0x5bc   : > { %v17718_v62 = vpop.f32.mrf.mxu0  ;;  %v4867_v12 = vpop.f32.mrf.mxu1  ;;  %v5979_v34 = vld [vmem:[#allocation3 + $0x6e] sm:$0xff] }
 0x5bd   : > { %v17720_v24 = vadd.f32 %v4867_v12, %v4693_v9  ;;  %13459 = vmatpush3.bf16.msra.mxu1 %v14563_v3  ;;  %v14565_v3 = vld [vmem:[%s19174_s3 + $0x540] sm:$0xff]   ;;  %v4695_v12 = vadd.f32 %v19390_v1, %v17584_v22 }
 0x5be   : > { %v13635_v0 = vpop.f32.mrf.mxu0  ;;  %v13071_v43 = vpop.f32.mrf.mxu1  ;;  %13460 = vmatprep.subr.bf16.mxu1 %v19198_v61 }
 0x5c0   : > { %v17728_v30 = vpop.f32.mrf.mxu0  ;;  %v4872_v51 = vpop.f32.mrf.mxu1  ;;  %13373 = vmatmul.mubr.bf16.gmra.mxu1 %v5991_v13 }
 0x5c1   : > { %v17730_v63 = vadd.f32 %v4872_v51, %v4694_v31  ;;  %13376 = vmatprep.mubr.msk.bf16.mxu1 %vm14819_vm0, %v19198_v61  ;;  %13461 = vmatpush3.bf16.msra.mxu1 %v14564_v60  ;;  %v5992_v51 = vpack.c.bf16 %v5980_v19, %v5979_v34  ;;  %v5982_v19 = vld [vmem:[#allocation3 + $0x86] sm:$0xff] }
 0x5c2   : > { %v13638_v9 = vpop.f32.mrf.mxu0  ;;  %v13074_v44 = vpop.f32.mrf.mxu1  ;;  %13462 = vmatprep.subr.bf16.mxu1 %v19198_v61 }
 0x5c3   : > { %v19391_v9 = vld [vmem:[#allocation59_spill] sm:$0xff] }
 0x5c4   : > { %v17740_v0 = vpop.f32.mrf.mxu0  ;;  %v4875_v43 = vpop.f32.mrf.mxu1  ;;  %v4696_v44 = vadd.f32 %v19391_v9, %v17592_v7  ;;  %v5981_v7 = vld [vmem:[#allocation3 + $0x7e] sm:$0xff] }
 0x5c5   : > { %v17742_v13 = vadd.f32 %v4875_v43, %v4695_v12  ;;  %13463 = vmatpush3.bf16.msra.mxu1 %v14565_v3  ;;  %v19392_v3 = vld [vmem:[#allocation60_spill] sm:$0xff] }
 0x5c6   : > { %v13639_v60 = vpop.f32.mrf.mxu0  ;;  %v13075_v31 = vpop.f32.mrf.mxu1  ;;  %13552 = vmatprep.subr.bf16.mxu1 %v19198_v61  ;;  %v4697_v43 = vadd.f32 %v19392_v3, %v17600_v46 }
 0x5c8   : > { %v17747_v35 = vpop.f32.mrf.mxu0  ;;  %v4880_v48 = vpop.f32.mrf.mxu1  ;;  %13377 = vmatmul.mubr.bf16.gmra.mxu1 %v5992_v51  ;;  %v5993_v51 = vpack.c.bf16 %v5982_v19, %v5981_v7 }
 0x5c9   : > { %v17749_v22 = vadd.f32 %v4880_v48, %v4696_v44  ;;  %13380 = vmatprep.mubr.msk.bf16.mxu1 %vm14819_vm0, %v19198_v61  ;;  %v19394_v48 = vld [vmem:[#allocation61_spill] sm:$0xff] }
 0x5ca   : > { %v13642_v1 = vpop.f32.mrf.mxu0  ;;  %v13078_v12 = vpop.f32.mrf.mxu1  ;;  %v4698_v44 = vadd.f32 %v19394_v48, %v17607_v17  ;;  %v19397_v17 = vld [vmem:[#allocation62_spill] sm:$0xff] }
 0x5cb   : > { %v5106_v48 = vadd.f32 %v19397_v17, %v17618_v59  ;;  %v5985_v59 = vld [vmem:[#allocation3 + $0x9e] sm:$0xff] }
 0x5cc   : > { %v17755_v34 = vpop.f32.mrf.mxu0  ;;  %v4883_v60 = vpop.f32.mrf.mxu1 }
 0x5cd   : > { %19393 = vst [vmem:[#allocation47_spill] sm:$0xff] %v17755_v34  ;;  %v17757_v31 = vadd.f32 %v4883_v60, %v4697_v43  ;;  %v5984_v43 = vld [vmem:[#allocation3 + $0x96] sm:$0xff] }
 0x5ce   : > { %v13643_v9 = vpop.f32.mrf.mxu0  ;;  %v13079_v32 = vpop.f32.mrf.mxu1 }
 0x5cf   : > { %v5983_v32 = vld [vmem:[#allocation3 + $0x8e] sm:$0xff] }
 0x5d0   : > { %v17761_v57 = vpop.f32.mrf.mxu0  ;;  %v4888_v1 = vpop.f32.mrf.mxu1  ;;  %13381 = vmatmul.mubr.bf16.gmra.mxu1 %v5993_v51  ;;  %v5994_v34 = vpack.c.bf16 %v5984_v43, %v5983_v32 }
 0x5d1   : > { %19395 = vst [vmem:[#allocation48_spill] sm:$0xff] %v17761_v57  ;;  %v17763_v12 = vadd.f32 %v4888_v1, %v4698_v44  ;;  %13384 = vmatprep.mubr.msk.bf16.mxu1 %vm14819_vm0, %v19198_v61 }
 0x5d2   : > { %v13646_v46 = vpop.f32.mrf.mxu0  ;;  %v13082_v3 = vpop.f32.mrf.mxu1 }
 0x5d3   : > { %v19399_v3 = vld [vmem:[#allocation63_spill] sm:$0xff] }
 0x5d4   : > { %v17767_v60 = vpop.f32.mrf.mxu0  ;;  %v4891_v9 = vpop.f32.mrf.mxu1 }
 0x5d5   : > { %19396 = vst [vmem:[#allocation49_spill] sm:$0xff] %v17767_v60  ;;  %v5107_v9 = vadd.f32 %v19399_v3, %v17626_v8 }
 0x5d6   : > { %v13647_v19 = vpop.f32.mrf.mxu0  ;;  %v13083_v7 = vpop.f32.mrf.mxu1 }
 0x5d7   : > { %v5986_v19 = vld [vmem:[#allocation3 + $0xa6] sm:$0xff] }
 0x5d8   : > { %v17771_v57 = vpop.f32.mrf.mxu0  ;;  %v5248_v51 = vpop.f32.mrf.mxu1  ;;  %13385 = vmatmul.mubr.bf16.gmra.mxu1 %v5994_v34  ;;  %v5995_v34 = vpack.c.bf16 %v5986_v19, %v5985_v59 }
 0x5d9   : > { %19398 = vst [vmem:[#allocation50_spill] sm:$0xff] %v17771_v57  ;;  %v17773_v44 = vadd.f32 %v5248_v51, %v5106_v48  ;;  %13388 = vmatprep.mubr.msk.bf16.mxu1 %vm14819_vm0, %v19198_v61  ;;  %v19401_v48 = vld [vmem:[#allocation64_spill] sm:$0xff] }
 0x5da   : > { %v13650_v1 = vpop.f32.mrf.mxu0  ;;  %v13154_v46 = vpop.f32.mrf.mxu1  ;;  %v5108_v51 = vadd.f32 %v19401_v48, %v17633_v6 }
 0x5dc   : > { %v17779_v7 = vpop.f32.mrf.mxu0  ;;  %v5251_v43 = vpop.f32.mrf.mxu1 }
 0x5dd   : > { %19400 = vst [vmem:[#allocation51_spill] sm:$0xff] %v17779_v7  ;;  %v17781_v32 = vadd.f32 %v5251_v43, %v5107_v9  ;;  %v19403_v9 = vld [vmem:[#allocation65_spill] sm:$0xff] }
 0x5de   : > { %v13651_v17 = vpop.f32.mrf.mxu0  ;;  %v13155_v57 = vpop.f32.mrf.mxu1  ;;  %v5109_v43 = vadd.f32 %v19403_v9, %v17639_v53  ;;  %v19405_v53 = vld [vmem:[#allocation67_spill] sm:$0xff]  ;;  %v6396_v9 = vld [vmem:[#allocation3 + $0x41] sm:$0xff] }
 0x5df   : > { %v5987_v17 = vld [vmem:[#allocation3 + $0xae] sm:$0xff] }
 0x5e0   : > { %v17785_v60 = vpop.f32.mrf.mxu0  ;;  %v5256_v1 = vpop.f32.mrf.mxu1  ;;  %13389 = vmatmul.mubr.bf16.gmra.mxu1 %v5995_v34  ;;  %v19404_v34 = vld [vmem:[#allocation66_spill] sm:$0xff] }
 0x5e1   : > { %19402 = vst [vmem:[#allocation52_spill] sm:$0xff] %v17785_v60  ;;  %v17787_v46 = vadd.f32 %v5256_v1, %v5108_v51  ;;  %13392 = vmatprep.mubr.msk.bf16.mxu1 %vm14819_vm0, %v19198_v61  ;;  %v5996_v60 = vpack.c.bf16 %v5987_v17, %v5987_v17  ;;  %v5110_v51 = vadd.f32 %v19404_v34, %v17647_v49  ;;  %v14566_v49 = vld [vmem:[%s19174_s3 + $0x5f8] sm:$0xff]  }
 0x5e2   : > { %v13654_v8 = vpop.f32.mrf.mxu0  ;;  %v13158_v3 = vpop.f32.mrf.mxu1 }
 0x5e3   : > { %v5111_v3 = vadd.f32 %v19405_v53, %v17655_v14  ;;  %v14567_v14 = vld [vmem:[%s19174_s3 + $0x5f0] sm:$0xff]  }
 0x5e4   : > { %v7223_v57 = vpop.f32.mrf.mxu0  ;;  %v5259_v19 = vpop.f32.mrf.mxu1 }
 0x5e5   : > { %v17793_v59 = vadd.f32 %v5259_v19, %v5109_v43  ;;  %v6395_v19 = vld [vmem:[#allocation3 + $0x39] sm:$0xff] }
 0x5e6   : > { %v13655_v6 = vpop.f32.mrf.mxu0  ;;  %v13159_v48 = vpop.f32.mrf.mxu1 }
 0x5e7   : > { %v19406_v6 = vld [vmem:[#allocation68_spill] sm:$0xff] }
 0x5e8   : > { %v5264_v1 = vpop.f32.mrf.mxu1  ;;  %13393 = vmatmul.mubr.bf16.gmra.mxu1 %v5996_v60  ;;  %v6412_v60 = vpack.c.bf16 %v6396_v9, %v6395_v19  ;;  %v5112_v48 = vadd.f32 %v19406_v6, %v17664_v11  ;;  %v14568_v19 = vld [vmem:[%s19174_s3 + $0x5e8] sm:$0xff]  }
 0x5e9   : > { %v17797_v7 = vadd.f32 %v5264_v1, %v5110_v51  ;;  %13464 = vmatprep.mubr.msk.bf16.mxu1 %vm14819_vm0, %v19198_v61 }
 0x5ea   : > { %v13162_v8 = vpop.f32.mrf.mxu1 }
 0x5eb   : > { %v19407_v8 = vld [vmem:[#allocation69_spill] sm:$0xff] }
 0x5ec   : > { %v5267_v43 = vpop.f32.mrf.mxu1  ;;  %v5113_v53 = vadd.f32 %v19407_v8, %v17676_v25 }
 0x5ed   : > { %v17803_v57 = vadd.f32 %v5267_v43, %v5111_v3  ;;  %v6398_v3 = vld [vmem:[#allocation3 + $0x51] sm:$0xff]  ;;  %v6397_v43 = vld [vmem:[#allocation3 + $0x49] sm:$0xff] }
 0x5ee   : > { %v13163_v17 = vpop.f32.mrf.mxu1 }
 0x5ef   : > { %v6413_v17 = vpack.c.bf16 %v6398_v3, %v6397_v43  ;;  %v14570_v43 = vld [vmem:[%s19174_s3 + $0x5d8] sm:$0xff]  }
 0x5f0   : > { %v5272_v34 = vpop.f32.mrf.mxu1  ;;  %13465 = vmatmul.mubr.bf16.vlgmr.msra.gmra.mxu1 %v6412_v60  ;;  %v19408_v60 = vld [vmem:[#allocation70_spill] sm:$0xff] }
 0x5f1   : > { %v17810_v51 = vadd.f32 %v5272_v34, %v5112_v48  ;;  %13553 = vmatpush3.bf16.msra.mxu1 %v14566_v49  ;;  %13468 = vmatprep.mubr.msk.bf16.mxu1 %vm14819_vm0, %v19198_v61  ;;  %v5114_v6 = vadd.f32 %v19408_v60, %v17686_v26  ;;  %v14569_v34 = vld [vmem:[%s19174_s3 + $0x5e0] sm:$0xff]  }
 0x5f2   : > { %v13166_v1 = vpop.f32.mrf.mxu1  ;;  %13554 = vmatprep.subr.bf16.mxu1 %v19198_v61 }
 0x5f3   : > { %v19409_v1 = vld [vmem:[#allocation71_spill] sm:$0xff] }
 0x5f4   : > { %v5275_v11 = vpop.f32.mrf.mxu1  ;;  %v5115_v8 = vadd.f32 %v19409_v1, %v17698_v58 }
 0x5f5   : > { %v17820_v9 = vadd.f32 %v5275_v11, %v5113_v53  ;;  %13555 = vmatpush3.bf16.msra.mxu1 %v14567_v14  ;;  %v6400_v53 = vld [vmem:[#allocation3 + $0x61] sm:$0xff]  ;;  %v6399_v11 = vld [vmem:[#allocation3 + $0x59] sm:$0xff] }
 0x5f6   : > { %v13167_v49 = vpop.f32.mrf.mxu1  ;;  %13556 = vmatprep.subr.bf16.mxu1 %v19198_v61 }
 0x5f7   : > { %v6414_v49 = vpack.c.bf16 %v6400_v53, %v6399_v11  ;;  %v14572_v11 = vld [vmem:[%s19174_s3 + $0x5c8] sm:$0xff]  }
 0x5f8   : > { %v5280_v48 = vpop.f32.mrf.mxu1  ;;  %13469 = vmatmul.mubr.bf16.gmra.mxu1 %v6413_v17  ;;  %v19410_v17 = vld [vmem:[#allocation72_spill] sm:$0xff] }
 0x5f9   : > { %v17828_v25 = vadd.f32 %v5280_v48, %v5114_v6  ;;  %13472 = vmatprep.mubr.msk.bf16.mxu1 %vm14819_vm0, %v19198_v61  ;;  %13557 = vmatpush3.bf16.msra.mxu1 %v14568_v19  ;;  %v5116_v60 = vadd.f32 %v19410_v17, %v17708_v38  ;;  %v14571_v48 = vld [vmem:[%s19174_s3 + $0x5d0] sm:$0xff]  }
 0x5fa   : > { %v13170_v14 = vpop.f32.mrf.mxu1  ;;  %13558 = vmatprep.subr.bf16.mxu1 %v19198_v61 }
 0x5fb   : > { %v19411_v14 = vld [vmem:[#allocation73_spill] sm:$0xff] }
 0x5fc   : > { %v5283_v26 = vpop.f32.mrf.mxu1  ;;  %v5117_v1 = vadd.f32 %v19411_v14, %v17720_v24 }
 0x5fd   : > { %v17838_v3 = vadd.f32 %v5283_v26, %v5115_v8  ;;  %13559 = vmatpush3.bf16.msra.mxu1 %v14569_v34  ;;  %v6402_v8 = vld [vmem:[#allocation3 + $0x71] sm:$0xff]  ;;  %v6401_v26 = vld [vmem:[#allocation3 + $0x69] sm:$0xff] }
 0x5fe   : > { %v13171_v19 = vpop.f32.mrf.mxu1  ;;  %13560 = vmatprep.subr.bf16.mxu1 %v19198_v61 }
 0x5ff   : > { %v6415_v19 = vpack.c.bf16 %v6402_v8, %v6401_v26 }
 0x600   : > { %v5288_v6 = vpop.f32.mrf.mxu1  ;;  %13473 = vmatmul.mubr.bf16.gmra.mxu1 %v6414_v49  ;;  %v19412_v49 = vld [vmem:[#allocation74_spill] sm:$0xff] }
 0x601   : > { %v17846_v58 = vadd.f32 %v5288_v6, %v5116_v60  ;;  %13476 = vmatprep.mubr.msk.bf16.mxu1 %vm14819_vm0, %v19198_v61  ;;  %13561 = vmatpush3.bf16.msra.mxu1 %v14570_v43  ;;  %v5118_v17 = vadd.f32 %v19412_v49, %v17730_v63  ;;  %v14573_v6 = vld [vmem:[%s19174_s3 + $0x5c0] sm:$0xff]  }
 0x602   : > { %v13174_v34 = vpop.f32.mrf.mxu1  ;;  %13562 = vmatprep.subr.bf16.mxu1 %v19198_v61 }
 0x603   : > { %v19413_v34 = vld [vmem:[#allocation75_spill] sm:$0xff] }
 0x604   : > { %v5291_v38 = vpop.f32.mrf.mxu1  ;;  %v5119_v14 = vadd.f32 %v19413_v34, %v17742_v13  ;;  %v6406_v34 = vld [vmem:[#allocation3 + $0x91] sm:$0xff] }
 0x605   : > { %v17856_v53 = vadd.f32 %v5291_v38, %v5117_v1  ;;  %13563 = vmatpush3.bf16.msra.mxu1 %v14571_v48  ;;  %v6404_v1 = vld [vmem:[#allocation3 + $0x81] sm:$0xff]  ;;  %v6403_v38 = vld [vmem:[#allocation3 + $0x79] sm:$0xff] }
 0x606   : > { %v13175_v43 = vpop.f32.mrf.mxu1  ;;  %13564 = vmatprep.subr.bf16.mxu1 %v19198_v61 }
 0x607   : > { %v6416_v43 = vpack.c.bf16 %v6404_v1, %v6403_v38  ;;  %v6405_v1 = vld [vmem:[#allocation3 + $0x89] sm:$0xff] }
 0x608   : > { %v5296_v60 = vpop.f32.mrf.mxu1  ;;  %13477 = vmatmul.mubr.bf16.gmra.mxu1 %v6415_v19  ;;  %v6417_v38 = vpack.c.bf16 %v6406_v34, %v6405_v1 }
 0x609   : > { %v17864_v24 = vadd.f32 %v5296_v60, %v5118_v17  ;;  %13480 = vmatprep.mubr.msk.bf16.mxu1 %vm14819_vm0, %v19198_v61  ;;  %13565 = vmatpush3.bf16.msra.mxu1 %v14572_v11  ;;  %v19414_v11 = vld [vmem:[#allocation76_spill] sm:$0xff]  ;;  %v19415_v60 = vld [vmem:[#allocation77_spill] sm:$0xff] }
 0x60a   : > { %v13178_v48 = vpop.f32.mrf.mxu1  ;;  %13566 = vmatprep.subr.bf16.mxu1 %v19198_v61  ;;  %v5120_v19 = vadd.f32 %v19414_v11, %v17749_v22  ;;  %v19416_v22 = vld [vmem:[#allocation78_spill] sm:$0xff] }
 0x60b   : > { %v5121_v48 = vadd.f32 %v19415_v60, %v17757_v31 }
 0x60c   : > { %v5299_v63 = vpop.f32.mrf.mxu1 }
 0x60d   : > { %v17874_v8 = vadd.f32 %v5299_v63, %v5119_v14  ;;  %13567 = vmatpush3.bf16.msra.mxu1 %v14573_v6 }
 0x60e   : > { %v13179_v26 = vpop.f32.mrf.mxu1  ;;  %13656 = vmatprep.subr.bf16.mxu1 %v19198_v61 }
 0x60f   : > { %v5122_v26 = vadd.f32 %v19416_v22, %v17763_v12 }
 0x610   : > { %v5304_v49 = vpop.f32.mrf.mxu1  ;;  %13481 = vmatmul.mubr.bf16.gmra.mxu1 %v6416_v43 }
 0x611   : > { %v17879_v17 = vadd.f32 %v5304_v49, %v5120_v19  ;;  %13484 = vmatprep.mubr.msk.bf16.mxu1 %vm14819_vm0, %v19198_v61  ;;  %v6408_v49 = vld [vmem:[#allocation3 + $0xa1] sm:$0xff] }
 0x612   : > { %v13182_v13 = vpop.f32.mrf.mxu1 }
 0x613   : > { %v6407_v13 = vld [vmem:[#allocation3 + $0x99] sm:$0xff] }
 0x614   : > { %v5307_v6 = vpop.f32.mrf.mxu1 }
 0x615   : > { %v17885_v14 = vadd.f32 %v5307_v6, %v5121_v48  ;;  %v6418_v48 = vpack.c.bf16 %v6408_v49, %v6407_v13  ;;  %v5530_v6 = vadd.f32 %v16907_v37, %v17773_v44  ;;  %v19417_v37 = vld [vmem:[#allocation79_spill] sm:$0xff] }
 0x616   : > { %v13183_v63 = vpop.f32.mrf.mxu1  ;;  %v5532_v44 = vadd.f32 %v19417_v37, %v17787_v46  ;;  %v6820_v37 = vld [vmem:[#allocation3 + $0x43] sm:$0xff] }
 0x617   : > { %v5531_v63 = vadd.f32 %v16916_v50, %v17781_v32  ;;  %v19418_v50 = vld [vmem:[#allocation80_spill] sm:$0xff] }
 0x618   : > { %v5312_v43 = vpop.f32.mrf.mxu1  ;;  %13485 = vmatmul.mubr.bf16.gmra.mxu1 %v6417_v38  ;;  %v6410_v38 = vld [vmem:[#allocation3 + $0xb1] sm:$0xff]  ;;  %v5533_v32 = vadd.f32 %v19418_v50, %v17793_v59 }
 0x619   : > { %v17889_v11 = vadd.f32 %v5312_v43, %v5122_v26  ;;  %13488 = vmatprep.mubr.msk.bf16.mxu1 %vm14819_vm0, %v19198_v61  ;;  %v6409_v43 = vld [vmem:[#allocation3 + $0xa9] sm:$0xff] }
 0x61a   : > { %v13186_v19 = vpop.f32.mrf.mxu1  ;;  %v6419_v49 = vpack.c.bf16 %v6410_v38, %v6409_v43  ;;  %v19419_v38 = vld [vmem:[#allocation81_spill] sm:$0xff] }
 0x61b   : > { %v5534_v46 = vadd.f32 %v19419_v38, %v17797_v7  ;;  %v19421_v7 = vld [vmem:[#allocation83_spill] sm:$0xff] }
 0x61c   : > { %v5315_v31 = vpop.f32.mrf.mxu1 }
 0x61e   : > { %v13187_v60 = vpop.f32.mrf.mxu1 }
 0x620   : > { %v5672_v34 = vpop.f32.mrf.mxu1  ;;  %13489 = vmatmul.mubr.bf16.gmra.mxu1 %v6418_v48  ;;  %v6411_v48 = vld [vmem:[#allocation3 + $0xb9] sm:$0xff] }
 0x621   : > { %v17895_v1 = vadd.f32 %v5672_v34, %v5530_v6  ;;  %13492 = vmatprep.mubr.msk.bf16.mxu1 %vm14819_vm0, %v19198_v61 }
 0x622   : > { %v13258_v12 = vpop.f32.mrf.mxu1 }
 0x624   : > { %v5675_v22 = vpop.f32.mrf.mxu1 }
 0x625   : > { %v17901_v26 = vadd.f32 %v5675_v22, %v5531_v63  ;;  %v6420_v63 = vpack.c.bf16 %v6411_v48, %v6411_v48  ;;  %v5536_v48 = vadd.f32 %v19421_v7, %v17810_v51  ;;  %v19423_v51 = vld [vmem:[#allocation85_spill] sm:$0xff] }
 0x626   : > { %v13259_v19 = vpop.f32.mrf.mxu1 }
 0x628   : > { %v5680_v31 = vpop.f32.mrf.mxu1  ;;  %13493 = vmatmul.mubr.bf16.gmra.mxu1 %v6419_v49  ;;  %v19420_v49 = vld [vmem:[#allocation82_spill] sm:$0xff] }
 0x629   : > { %v17905_v13 = vadd.f32 %v5680_v31, %v5532_v44  ;;  %13496 = vmatprep.mubr.msk.bf16.mxu1 %vm14819_vm0, %v19198_v61  ;;  %v5535_v59 = vadd.f32 %v19420_v49, %v17803_v57  ;;  %v19422_v57 = vld [vmem:[#allocation84_spill] sm:$0xff]  ;;  %v6821_v49 = vld [vmem:[#allocation3 + $0x4b] sm:$0xff] }
 0x62a   : > { %v13262_v60 = vpop.f32.mrf.mxu1  ;;  %v5537_v38 = vadd.f32 %v19422_v57, %v17820_v9  ;;  %v19424_v9 = vld [vmem:[#allocation10_spill] sm:$0xff]  ;;  %v6823_v57 = vld [vmem:[#allocation3 + $0x5b] sm:$0xff] }
 0x62b   : > { %v6819_v60 = vld [vmem:[#allocation3 + $0x3b] sm:$0xff]  ;;  %v5539_v7 = vadd.f32 %v19424_v9, %v17838_v3  ;;  %v6825_v9 = vld [vmem:[#allocation3 + $0x6b] sm:$0xff] }
 0x62c   : > { %v5683_v6 = vpop.f32.mrf.mxu1  ;;  %v19426_v3 = vld [vmem:[#allocation12_spill] sm:$0xff] }
 0x62d   : > { %v17911_v34 = vadd.f32 %v5683_v6, %v5533_v32  ;;  %v6836_v32 = vpack.c.bf16 %v6820_v37, %v6819_v60 }
 0x62e   : > { %v13263_v12 = vpop.f32.mrf.mxu1 }
 0x630   : > { %v5688_v22 = vpop.f32.mrf.mxu1  ;;  %13497 = vmatmul.mubr.bf16.gmra.mxu1 %v6420_v63 }
 0x631   : > { %v17915_v43 = vadd.f32 %v5688_v22, %v5534_v46  ;;  %13568 = vmatprep.mubr.msk.bf16.mxu1 %vm14819_vm0, %v19198_v61  ;;  %v6822_v46 = vld [vmem:[#allocation3 + $0x53] sm:$0xff] }
 0x632   : > { %v13266_v19 = vpop.f32.mrf.mxu1  ;;  %v6837_v37 = vpack.c.bf16 %v6822_v46, %v6821_v49 }
 0x634   : > { %v5691_v44 = vpop.f32.mrf.mxu1 }
 0x635   : > { %v17921_v31 = vadd.f32 %v5691_v44, %v5535_v59  ;;  %v5538_v44 = vadd.f32 %v19423_v51, %v17828_v25  ;;  %v19425_v25 = vld [vmem:[#allocation9_spill] sm:$0xff]  ;;  %v5541_v51 = vadd.f32 %v19426_v3, %v17856_v53  ;;  %v19428_v53 = vld [vmem:[#allocation14_spill] sm:$0xff]  ;;  %v6827_v3 = vld [vmem:[#allocation3 + $0x7b] sm:$0xff] }
 0x636   : > { %v13267_v50 = vpop.f32.mrf.mxu1 }
 0x638   : > { %v5696_v6 = vpop.f32.mrf.mxu1  ;;  %13569 = vmatmul.mubr.bf16.vlgmr.msra.gmra.mxu1 %v6836_v32 }
 0x639   : > { %v17925_v12 = vadd.f32 %v5696_v6, %v5536_v48  ;;  %13572 = vmatprep.mubr.msk.bf16.mxu1 %vm14819_vm0, %v19198_v61  ;;  %v6824_v48 = vld [vmem:[#allocation3 + $0x63] sm:$0xff] }
 0x63a   : > { %v13270_v63 = vpop.f32.mrf.mxu1  ;;  %v6838_v46 = vpack.c.bf16 %v6824_v48, %v6823_v57 }
 0x63c   : > { %v5699_v22 = vpop.f32.mrf.mxu1 }
 0x63d   : > { %v17931_v19 = vadd.f32 %v5699_v22, %v5537_v38  ;;  %v5540_v22 = vadd.f32 %v19425_v25, %v17846_v58  ;;  %v19427_v58 = vld [vmem:[#allocation11_spill] sm:$0xff]  ;;  %v5543_v25 = vadd.f32 %v19428_v53, %v17874_v8 }
 0x63e   : > { %v13271_v59 = vpop.f32.mrf.mxu1 }
 0x640   : > { %v5704_v60 = vpop.f32.mrf.mxu1  ;;  %13573 = vmatmul.mubr.bf16.gmra.mxu1 %v6837_v37 }
 0x641   : > { %v17935_v50 = vadd.f32 %v5704_v60, %v5538_v44  ;;  %13576 = vmatprep.mubr.msk.bf16.mxu1 %vm14819_vm0, %v19198_v61  ;;  %v6826_v44 = vld [vmem:[#allocation3 + $0x73] sm:$0xff] }
 0x642   : > { %v13274_v32 = vpop.f32.mrf.mxu1  ;;  %v6839_v48 = vpack.c.bf16 %v6826_v44, %v6825_v9 }
 0x644   : > { %v5707_v6 = vpop.f32.mrf.mxu1 }
 0x645   : > { %v17941_v63 = vadd.f32 %v5707_v6, %v5539_v7  ;;  %v5542_v6 = vadd.f32 %v19427_v58, %v17864_v24  ;;  %v14574_v24 = vld [vmem:[%s19176_s5 + $0x38] sm:$0xff]   ;;  %v19430_v58 = vld [vmem:[#allocation6_spill] sm:$0xff] }
 0x646   : > { %v13275_v38 = vpop.f32.mrf.mxu1  ;;  %13657 = vmatpush3.bf16.msra.mxu1 %v14574_v24 }
 0x647   : > { %13658 = vmatprep.subr.bf16.mxu1 %v19198_v61 }
 0x648   : > { %v5712_v49 = vpop.f32.mrf.mxu1  ;;  %13577 = vmatmul.mubr.bf16.gmra.mxu1 %v6838_v46 }
 0x649   : > { %v17945_v59 = vadd.f32 %v5712_v49, %v5540_v22  ;;  %13580 = vmatprep.mubr.msk.bf16.mxu1 %vm14819_vm0, %v19198_v61  ;;  %v6828_v22 = vld [vmem:[#allocation3 + $0x83] sm:$0xff] }
 0x64a   : > { %v13278_v37 = vpop.f32.mrf.mxu1  ;;  %v6840_v44 = vpack.c.bf16 %v6828_v22, %v6827_v3  ;;  %v19431_v3 = vld [vmem:[#allocation16_spill] sm:$0xff] }
 0x64b   : > { %v5546_v24 = vadd.f32 %v19431_v3, %v17889_v11  ;;  %v14576_v11 = vld [vmem:[%s19176_s5 + $0x28] sm:$0xff]   ;;  %v6834_v3 = vld [vmem:[#allocation3 + $0xb3] sm:$0xff] }
 0x64c   : > { %v5715_v60 = vpop.f32.mrf.mxu1 }
 0x64d   : > { %v17951_v32 = vadd.f32 %v5715_v60, %v5541_v51  ;;  %v19429_v60 = vld [vmem:[#allocation13_spill] sm:$0xff] }
 0x64e   : > { %v13279_v7 = vpop.f32.mrf.mxu1  ;;  %v5544_v9 = vadd.f32 %v19429_v60, %v17879_v17  ;;  %v6832_v60 = vld [vmem:[#allocation3 + $0xa3] sm:$0xff] }
 0x650   : > { %v5720_v57 = vpop.f32.mrf.mxu1  ;;  %13581 = vmatmul.mubr.bf16.gmra.mxu1 %v6839_v48 }
 0x651   : > { %v17955_v38 = vadd.f32 %v5720_v57, %v5542_v6  ;;  %13584 = vmatprep.mubr.msk.bf16.mxu1 %vm14819_vm0, %v19198_v61  ;;  %v5545_v6 = vadd.f32 %v19430_v58, %v17885_v14  ;;  %v6830_v57 = vld [vmem:[#allocation3 + $0x93] sm:$0xff] }
 0x652   : > { %v13282_v46 = vpop.f32.mrf.mxu1 }
 0x654   : > { %v5723_v49 = vpop.f32.mrf.mxu1 }
 0x655   : > { %v17961_v37 = vadd.f32 %v5723_v49, %v5543_v25  ;;  %v6829_v25 = vld [vmem:[#allocation3 + $0x8b] sm:$0xff] }
 0x656   : > { %v13283_v51 = vpop.f32.mrf.mxu1  ;;  %v6841_v22 = vpack.c.bf16 %v6830_v57, %v6829_v25  ;;  %v14575_v49 = vld [vmem:[%s19176_s5 + $0x30] sm:$0xff]  }
 0x657   : > { %13659 = vmatpush3.bf16.msra.mxu1 %v14575_v49 }
 0x658   : > { %v5728_v7 = vpop.f32.mrf.mxu1  ;;  %13585 = vmatmul.mubr.bf16.gmra.mxu1 %v6840_v44  ;;  %13660 = vmatprep.subr.bf16.mxu1 %v19198_v61 }
 0x659   : > { %v17969_v8 = vadd.f32 %v5728_v7, %v5544_v9  ;;  %13588 = vmatprep.mubr.msk.bf16.mxu1 %vm14819_vm0, %v19198_v61  ;;  %v6831_v7 = vld [vmem:[#allocation3 + $0x9b] sm:$0xff] }
 0x65a   : > { %v13286_v48 = vpop.f32.mrf.mxu1  ;;  %v6842_v58 = vpack.c.bf16 %v6832_v60, %v6831_v7 }
 0x65b   : > { %13661 = vmatpush3.bf16.msra.mxu1 %v14576_v11 }
 0x65c   : > { %v5731_v46 = vpop.f32.mrf.mxu1  ;;  %13662 = vmatprep.subr.bf16.mxu1 %v19198_v61 }
 0x65d   : > { %v17975_v53 = vadd.f32 %v5731_v46, %v5545_v6  ;;  %v19432_v6 = vld [vmem:[#allocation15_spill] sm:$0xff] }
 0x65e   : > { %v13287_v17 = vpop.f32.mrf.mxu1  ;;  %v5954_v57 = vadd.f32 %v19432_v6, %v17895_v1  ;;  %v19435_v6 = vld [vmem:[#allocation18_spill] sm:$0xff] }
 0x660   : > { %v5736_v51 = vpop.f32.mrf.mxu1  ;;  %13589 = vmatmul.mubr.bf16.gmra.mxu1 %v6841_v22  ;;  %v19433_v22 = vld [vmem:[#allocation7_spill] sm:$0xff] }
 0x661   : > { %v17982_v44 = vadd.f32 %v5736_v51, %v5546_v24  ;;  %13592 = vmatprep.mubr.msk.bf16.mxu1 %vm14819_vm0, %v19198_v61  ;;  %v5955_v49 = vadd.f32 %v19433_v22, %v17901_v26  ;;  %v14577_v26 = vld [vmem:[%s19176_s5 + $0x20] sm:$0xff]  }
 0x662   : > { %v13290_v14 = vpop.f32.mrf.mxu1  ;;  %13663 = vmatpush3.bf16.msra.mxu1 %v14577_v26 }
 0x663   : > { %v6833_v14 = vld [vmem:[#allocation3 + $0xab] sm:$0xff]  ;;  %13664 = vmatprep.subr.bf16.mxu1 %v19198_v61 }
 0x664   : > { %v5739_v9 = vpop.f32.mrf.mxu1  ;;  %v6843_v60 = vpack.c.bf16 %v6834_v3, %v6833_v14  ;;  %v19436_v3 = vld [vmem:[#allocation17_spill] sm:$0xff] }
 0x665   : > { %v19434_v9 = vld [vmem:[#allocation8_spill] sm:$0xff] }
 0x666   : > { %v13291_v48 = vpop.f32.mrf.mxu1  ;;  %v5956_v7 = vadd.f32 %v19434_v9, %v17905_v13 }
 0x668   : > { %v6096_v46 = vpop.f32.mrf.mxu1  ;;  %13593 = vmatmul.mubr.bf16.gmra.mxu1 %v6842_v58 }
 0x669   : > { %v17992_v25 = vadd.f32 %v6096_v46, %v5954_v57  ;;  %13596 = vmatprep.mubr.msk.bf16.mxu1 %vm14819_vm0, %v19198_v61  ;;  %v5957_v57 = vadd.f32 %v19435_v6, %v17911_v34  ;;  %v6835_v46 = vld [vmem:[#allocation3 + $0xbb] sm:$0xff] }
 0x66a   : > { %v13362_v17 = vpop.f32.mrf.mxu1 }
 0x66c   : > { %v6099_v24 = vpop.f32.mrf.mxu1 }
 0x66d   : > { %v17999_v51 = vadd.f32 %v6099_v24, %v5955_v49  ;;  %v6844_v49 = vpack.c.bf16 %v6835_v46, %v6835_v46  ;;  %v5958_v24 = vadd.f32 %v19436_v3, %v17915_v43  ;;  %v14578_v43 = vld [vmem:[%s19176_s5 + $0x18] sm:$0xff]  }
 0x66e   : > { %v13363_v1 = vpop.f32.mrf.mxu1  ;;  %13665 = vmatpush3.bf16.msra.mxu1 %v14578_v43 }
 0x66f   : > { %13666 = vmatprep.subr.bf16.mxu1 %v19198_v61 }
 0x670   : > { %v6104_v48 = vpop.f32.mrf.mxu1  ;;  %13597 = vmatmul.mubr.bf16.gmra.mxu1 %v6843_v60  ;;  %v19437_v60 = vld [vmem:[#allocation19_spill] sm:$0xff] }
 0x671   : > { %v18003_v58 = vadd.f32 %v6104_v48, %v5956_v7  ;;  %13600 = vmatprep.mubr.msk.bf16.mxu1 %vm14819_vm0, %v19198_v61  ;;  %v5959_v9 = vadd.f32 %v19437_v60, %v17921_v31  ;;  %v19439_v31 = vld [vmem:[#allocation21_spill] sm:$0xff] }
 0x672   : > { %v13366_v11 = vpop.f32.mrf.mxu1 }
 0x673   : > { %v19438_v11 = vld [vmem:[#allocation20_spill] sm:$0xff] }
 0x674   : > { %v6107_v17 = vpop.f32.mrf.mxu1  ;;  %v5960_v6 = vadd.f32 %v19438_v11, %v17925_v12  ;;  %v19440_v12 = vld [vmem:[#allocation22_spill] sm:$0xff]  ;;  %v14579_v11 = vld [vmem:[%s19176_s5 + $0xf8] sm:$0xff]  }
 0x675   : > { %v18013_v13 = vadd.f32 %v6107_v17, %v5957_v57  ;;  %13717 = vmatpush3.bf16.msra.mxu0 %v14579_v11 }
 0x676   : > { %v13367_v22 = vpop.f32.mrf.mxu1  ;;  %13718 = vmatprep.subr.bf16.mxu0 %v19198_v61 }
 0x677   : > { %v5961_v22 = vadd.f32 %v19439_v31, %v17931_v19 }
 0x678   : > { %v6112_v14 = vpop.f32.mrf.mxu1  ;;  %13601 = vmatmul.mubr.bf16.gmra.mxu1 %v6844_v49 }
 0x679   : > { %v18017_v1 = vadd.f32 %v6112_v14, %v5958_v24  ;;  %13672 = vmatprep.mubr.msk.bf16.mxu1 %vm14819_vm0, %v19198_v61  ;;  %v5962_v14 = vadd.f32 %v19440_v12, %v17935_v50  ;;  %v19442_v50 = vld [vmem:[#allocation24_spill] sm:$0xff]  ;;  %v14581_v12 = vld [vmem:[%s19176_s5 + $0x10] sm:$0xff]  }
 0x67a   : > { %v13370_v34 = vpop.f32.mrf.mxu1  ;;  %13667 = vmatpush3.bf16.msra.mxu1 %v14581_v12 }
 0x67b   : > { %13668 = vmatprep.subr.bf16.mxu1 %v19198_v61 }
 0x67c   : > { %v6115_v7 = vpop.f32.mrf.mxu1 }
 0x67d   : > { %v18023_v48 = vadd.f32 %v6115_v7, %v5959_v9  ;;  %v19441_v7 = vld [vmem:[#allocation23_spill] sm:$0xff] }
 0x67e   : > { %v13371_v26 = vpop.f32.mrf.mxu1 }
 0x67f   : > { %v5963_v26 = vadd.f32 %v19441_v7, %v17941_v63  ;;  %v19443_v63 = vld [vmem:[#allocation25_spill] sm:$0xff] }
 0x680   : > { %v6120_v57 = vpop.f32.mrf.mxu1  ;;  %v14582_v7 = vld [vmem:[%s19176_s5 + $0xe8] sm:$0xff]  }
 0x681   : > { %v18030_v46 = vadd.f32 %v6120_v57, %v5960_v6  ;;  %v5964_v57 = vadd.f32 %v19442_v50, %v17945_v59 }
 0x682   : > { %v13374_v17 = vpop.f32.mrf.mxu1 }
 0x684   : > { %v6123_v49 = vpop.f32.mrf.mxu1 }
 0x685   : > { %v18035_v3 = vadd.f32 %v6123_v49, %v5961_v22  ;;  %v5965_v49 = vadd.f32 %v19443_v63, %v17951_v32  ;;  %v19444_v32 = vld [vmem:[#allocation26_spill] sm:$0xff] }
 0x686   : > { %v13375_v24 = vpop.f32.mrf.mxu1 }
 0x687   : > { %v14580_v24 = vld [vmem:[%s19176_s5 + $0xf0] sm:$0xff]  }
 0x688   : > { %v6128_v34 = vpop.f32.mrf.mxu1  ;;  %13719 = vmatpush3.bf16.msra.mxu0 %v14580_v24  ;;  %v14585_v24 = vld [vmem:[%s19176_s5 + $0xd8] sm:$0xff]  }
 0x689   : > { %v18039_v60 = vadd.f32 %v6128_v34, %v5962_v14  ;;  %13720 = vmatprep.subr.bf16.mxu0 %v19198_v61 }
 0x68a   : > { %v13378_v9 = vpop.f32.mrf.mxu1 }
 0x68b   : > { %v5966_v9 = vadd.f32 %v19444_v32, %v17955_v38  ;;  %v14584_v38 = vld [vmem:[%s19176_s5 + $0x8] sm:$0xff]  }
 0x68c   : > { %v6131_v6 = vpop.f32.mrf.mxu1  ;;  %13721 = vmatpush3.bf16.msra.mxu0 %v14582_v7  ;;  %13669 = vmatpush3.bf16.msra.mxu1 %v14584_v38  ;;  %v19447_v32 = vld [vmem:[#allocation29_spill] sm:$0xff]  ;;  %v14586_v7 = vld [vmem:[%s19176_s5 + $0xd0] sm:$0xff]  }
 0x68d   : > { %v18046_v19 = vadd.f32 %v6131_v6, %v5963_v26  ;;  %13722 = vmatprep.subr.bf16.mxu0 %v19198_v61  ;;  %13670 = vmatprep.subr.bf16.mxu1 %v19198_v61 }
 0x68e   : > { %v13379_v43 = vpop.f32.mrf.mxu1 }
 0x68f   : > { %v19445_v43 = vld [vmem:[#allocation27_spill] sm:$0xff] }
 0x690   : > { %v6136_v17 = vpop.f32.mrf.mxu1  ;;  %v5967_v50 = vadd.f32 %v19445_v43, %v17961_v37  ;;  %v19446_v37 = vld [vmem:[#allocation28_spill] sm:$0xff]  ;;  %v19448_v43 = vld [vmem:[#allocation30_spill] sm:$0xff] }
 0x691   : > { %v18051_v31 = vadd.f32 %v6136_v17, %v5964_v57  ;;  %v14583_v57 = vld [vmem:[%s19176_s5 + $0xe0] sm:$0xff]  }
 0x692   : > { %v13382_v22 = vpop.f32.mrf.mxu1  ;;  %13723 = vmatpush3.bf16.msra.mxu0 %v14583_v57  ;;  %v14587_v57 = vld [vmem:[%s19176_s5] sm:$0xff]  }
 0x693   : > { %13724 = vmatprep.subr.bf16.mxu0 %v19198_v61  ;;  %13671 = vmatpush3.bf16.msra.mxu1 %v14587_v57 }
 0x694   : > { %v6139_v14 = vpop.f32.mrf.mxu1  ;;  %13676 = vmatprep.subr.bf16.mxu1 %v19198_v61 }
 0x695   : > { %v18061_v34 = vadd.f32 %v6139_v14, %v5965_v49  ;;  %v5968_v49 = vadd.f32 %v19446_v37, %v17969_v8 }
 0x696   : > { %v13383_v59 = vpop.f32.mrf.mxu1  ;;  %13725 = vmatpush3.bf16.msra.mxu0 %v14585_v24  ;;  %v6378_v24 = vadd.f32 %v17319_v10, %v17992_v25  ;;  %v19451_v10 = vld [vmem:[#allocation33_spill] sm:$0xff] }
 0x697   : > { %13726 = vmatprep.subr.bf16.mxu0 %v19198_v61  ;;  %v6381_v25 = vadd.f32 %v19451_v10, %v18013_v13  ;;  %v19454_v13 = vld [vmem:[#allocation36_spill] sm:$0xff] }
 0x698   : > { %v6144_v26 = vpop.f32.mrf.mxu1 }
 0x699   : > { %v18070_v11 = vadd.f32 %v6144_v26, %v5966_v9  ;;  %v5969_v9 = vadd.f32 %v19447_v32, %v17975_v53  ;;  %v14588_v53 = vld [vmem:[%s19176_s5 + $0xc8] sm:$0xff]  }
 0x69a   : > { %v13386_v6 = vpop.f32.mrf.mxu1  ;;  %13727 = vmatpush3.bf16.msra.mxu0 %v14586_v7 }
 0x69b   : > { %13728 = vmatprep.subr.bf16.mxu0 %v19198_v61 }
 0x69c   : > { %v6147_v17 = vpop.f32.mrf.mxu1 }
 0x69d   : > { %v18081_v22 = vadd.f32 %v6147_v17, %v5967_v50  ;;  %v5970_v50 = vadd.f32 %v19448_v43, %v17982_v44  ;;  %v14589_v44 = vld [vmem:[%s19176_s5 + $0xc0] sm:$0xff]  }
 0x69e   : > { %v13387_v63 = vpop.f32.mrf.mxu1  ;;  %13729 = vmatpush3.bf16.msra.mxu0 %v14588_v53 }
 0x69f   : > { %13730 = vmatprep.subr.bf16.mxu0 %v19198_v61 }
 0x6a0   : > { %v6152_v12 = vpop.f32.mrf.mxu1 }
 0x6a1   : > { %v18090_v14 = vadd.f32 %v6152_v12, %v5968_v49 }
 0x6a2   : > { %v13390_v59 = vpop.f32.mrf.mxu1  ;;  %13731 = vmatpush3.bf16.msra.mxu0 %v14589_v44 }
 0x6a3   : > { %13756 = vmatprep.subr.bf16.mxu0 %v19198_v61 }
 0x6a4   : > { %v6155_v26 = vpop.f32.mrf.mxu1 }
 0x6a5   : > { %v18098_v8 = vadd.f32 %v6155_v26, %v5969_v9  ;;  %v19449_v9 = vld [vmem:[#allocation31_spill] sm:$0xff] }
 0x6a6   : > { %v13391_v6 = vpop.f32.mrf.mxu1  ;;  %v6379_v7 = vadd.f32 %v19449_v9, %v17999_v51  ;;  %v19452_v51 = vld [vmem:[#allocation34_spill] sm:$0xff] }
 0x6a8   : > { %v6160_v38 = vpop.f32.mrf.mxu1 }
 0x6a9   : > { %v18109_v17 = vadd.f32 %v6160_v38, %v5970_v50  ;;  %v19450_v50 = vld [vmem:[#allocation32_spill] sm:$0xff] }
 0x6aa   : > { %v13394_v63 = vpop.f32.mrf.mxu1  ;;  %v6380_v57 = vadd.f32 %v19450_v50, %v18003_v58  ;;  %v19453_v58 = vld [vmem:[#allocation35_spill] sm:$0xff] }
 0x6ac   : > { %v6163_v37 = vpop.f32.mrf.mxu1 }
 0x6ae   : > { %v13395_v49 = vpop.f32.mrf.mxu1 }
 0x6b0   : > { %v6520_v12 = vpop.f32.mrf.mxu1 }
 0x6b1   : > { %v18119_v59 = vadd.f32 %v6520_v12, %v6378_v24  ;;  %v6382_v24 = vadd.f32 %v19452_v51, %v18017_v1  ;;  %v19455_v1 = vld [vmem:[#allocation37_spill] sm:$0xff] }
 0x6b2   : > { %v13466_v32 = vpop.f32.mrf.mxu1 }
 0x6b4   : > { %v6523_v26 = vpop.f32.mrf.mxu1 }
 0x6b5   : > { %v18123_v6 = vadd.f32 %v6523_v26, %v6379_v7  ;;  %v6383_v7 = vadd.f32 %v19453_v58, %v18023_v48  ;;  %v19456_v48 = vld [vmem:[#allocation38_spill] sm:$0xff] }
 0x6b6   : > { %v13467_v43 = vpop.f32.mrf.mxu1 }
 0x6b8   : > { %v6528_v53 = vpop.f32.mrf.mxu1 }
 0x6b9   : > { %v18127_v38 = vadd.f32 %v6528_v53, %v6380_v57  ;;  %v6384_v57 = vadd.f32 %v19454_v13, %v18030_v46  ;;  %v19457_v46 = vld [vmem:[#allocation39_spill] sm:$0xff] }
 0x6ba   : > { %v13470_v63 = vpop.f32.mrf.mxu1 }
 0x6bc   : > { %v6531_v44 = vpop.f32.mrf.mxu1 }
 0x6bd   : > { %v18131_v37 = vadd.f32 %v6531_v44, %v6381_v25  ;;  %v6385_v25 = vadd.f32 %v19455_v1, %v18035_v3  ;;  %v19458_v3 = vld [vmem:[#allocation40_spill] sm:$0xff] }
 0x6be   : > { %v13471_v49 = vpop.f32.mrf.mxu1 }
 0x6c0   : > { %v6536_v12 = vpop.f32.mrf.mxu1 }
 0x6c1   : > { %v18135_v32 = vadd.f32 %v6536_v12, %v6382_v24  ;;  %v6386_v24 = vadd.f32 %v19456_v48, %v18039_v60  ;;  %v19459_v60 = vld [vmem:[#allocation41_spill] sm:$0xff] }
 0x6c2   : > { %v13474_v9 = vpop.f32.mrf.mxu1 }
 0x6c4   : > { %v6539_v26 = vpop.f32.mrf.mxu1 }
 0x6c5   : > { %v18139_v43 = vadd.f32 %v6539_v26, %v6383_v7  ;;  %v6387_v7 = vadd.f32 %v19457_v46, %v18046_v19  ;;  %v19460_v19 = vld [vmem:[#allocation42_spill] sm:$0xff] }
 0x6c6   : > { %v13475_v50 = vpop.f32.mrf.mxu1 }
 0x6c8   : > { %v6544_v53 = vpop.f32.mrf.mxu1 }
 0x6c9   : > { %v18143_v63 = vadd.f32 %v6544_v53, %v6384_v57  ;;  %v6388_v57 = vadd.f32 %v19458_v3, %v18051_v31  ;;  %v6391_v31 = vadd.f32 %v17451_v21, %v18081_v22  ;;  %v6394_v21 = vadd.f32 %v17469_v52, %v18109_v17 }
 0x6ca   : > { %v13478_v10 = vpop.f32.mrf.mxu1 }
 0x6cc   : > { %v6547_v44 = vpop.f32.mrf.mxu1 }
 0x6cd   : > { %v18147_v49 = vadd.f32 %v6547_v44, %v6385_v25  ;;  %v6389_v25 = vadd.f32 %v19459_v60, %v18061_v34  ;;  %v6392_v34 = vadd.f32 %v17455_v42, %v18090_v14  ;;  %v6802_v14 = vadd.f32 %v17484_v5, %v18119_v59 }
 0x6ce   : > { %v13479_v51 = vpop.f32.mrf.mxu1 }
 0x6d0   : > { %v6552_v12 = vpop.f32.mrf.mxu1 }
 0x6d1   : > { %v18151_v9 = vadd.f32 %v6552_v12, %v6386_v24  ;;  %v6390_v24 = vadd.f32 %v19460_v19, %v18070_v11  ;;  %v6393_v11 = vadd.f32 %v17463_v55, %v18098_v8  ;;  %v6803_v8 = vadd.f32 %v17492_v28, %v18123_v6 }
 0x6d2   : > { %v13482_v58 = vpop.f32.mrf.mxu1  ;;  %v6805_v28 = vadd.f32 %v17513_v27, %v18131_v37  ;;  %v6807_v27 = vadd.f32 %v17536_v36, %v18139_v43 }
 0x6d4   : > { %v6555_v26 = vpop.f32.mrf.mxu1 }
 0x6d5   : > { %v18155_v50 = vadd.f32 %v6555_v26, %v6387_v7 }
 0x6d6   : > { %v13483_v13 = vpop.f32.mrf.mxu1 }
 0x6d8   : > { %v6560_v53 = vpop.f32.mrf.mxu1 }
 0x6d9   : > { %v18159_v10 = vadd.f32 %v6560_v53, %v6388_v57 }
 0x6da   : > { %v13486_v1 = vpop.f32.mrf.mxu1 }
 0x6dc   : > { %v6563_v44 = vpop.f32.mrf.mxu1 }
 0x6dd   : > { %v18163_v51 = vadd.f32 %v6563_v44, %v6389_v25 }
 0x6de   : > { %v13487_v48 = vpop.f32.mrf.mxu1 }
 0x6e0   : > { %v6568_v12 = vpop.f32.mrf.mxu1 }
 0x6e1   : > { %v18167_v58 = vadd.f32 %v6568_v12, %v6390_v24 }
 0x6e2   : > { %v13490_v46 = vpop.f32.mrf.mxu1 }
 0x6e4   : > { %v6571_v7 = vpop.f32.mrf.mxu1 }
 0x6e5   : > { %v18171_v26 = vadd.f32 %v6571_v7, %v6391_v31 }
 0x6e6   : > { %v13491_v13 = vpop.f32.mrf.mxu1 }
 0x6e8   : > { %v6576_v3 = vpop.f32.mrf.mxu1 }
 0x6e9   : > { %v18175_v57 = vadd.f32 %v6576_v3, %v6392_v34  ;;  %v6804_v34 = vadd.f32 %v17501_v29, %v18127_v38  ;;  %v6806_v29 = vadd.f32 %v17523_v54, %v18135_v32 }
 0x6ea   : > { %v13494_v53 = vpop.f32.mrf.mxu1 }
 0x6ec   : > { %v6579_v1 = vpop.f32.mrf.mxu1 }
 0x6ed   : > { %v18179_v60 = vadd.f32 %v6579_v1, %v6393_v11 }
 0x6ee   : > { %v13495_v25 = vpop.f32.mrf.mxu1 }
 0x6f0   : > { %v6584_v22 = vpop.f32.mrf.mxu1 }
 0x6f1   : > { %v18183_v44 = vadd.f32 %v6584_v22, %v6394_v21 }
 0x6f2   : > { %v13498_v48 = vpop.f32.mrf.mxu1 }
 0x6f4   : > { %v6587_v19 = vpop.f32.mrf.mxu1 }
 0x6f6   : > { %v13499_v42 = vpop.f32.mrf.mxu1 }
 0x6f8   : > { %v6944_v24 = vpop.f32.mrf.mxu1 }
 0x6f9   : > { %v7014_v12 = vadd.f32 %v6944_v24, %v6802_v14 }
 0x6fa   : > { %v13570_v46 = vpop.f32.mrf.mxu1 }
 0x6fb   : > { %v7226_v55 = vadd.f32 %v17645_v56, %v7014_v12 }
 0x6fc   : > { %v6947_v31 = vpop.f32.mrf.mxu1 }
 0x6fd   : > { %v7243_v7 = vmax.f32 %v7226_v55, 0.0  ;;  %v7015_v52 = vadd.f32 %v6947_v31, %v6803_v8 }
 0x6fe   : > { %v13571_v17 = vpop.f32.mrf.mxu1 }
 0x6ff   : > { %7260 = vst [vmem:[#allocation4] sm:$0xff] %v7243_v7  ;;  %v7227_v13 = vadd.f32 %v17653_v23, %v7015_v52 }
 0x700   : > { %v6952_v3 = vpop.f32.mrf.mxu1 }
 0x701   : > { %v7244_v5 = vmax.f32 %v7227_v13, 0.0  ;;  %v7016_v59 = vadd.f32 %v6952_v3, %v6804_v34 }
 0x702   : > { %v13574_v53 = vpop.f32.mrf.mxu1 }
 0x703   : > { %7261 = vst [vmem:[#allocation4 + $0x8] sm:$0xff] %v7244_v5  ;;  %v7228_v56 = vadd.f32 %v17662_v15, %v7016_v59 }
 0x704   : > { %v6955_v6 = vpop.f32.mrf.mxu1 }
 0x705   : > { %v7245_v11 = vmax.f32 %v7228_v56, 0.0  ;;  %v7017_v1 = vadd.f32 %v6955_v6, %v6805_v28 }
 0x706   : > { %v13575_v25 = vpop.f32.mrf.mxu1 }
 0x707   : > { %7262 = vst [vmem:[#allocation4 + $0x10] sm:$0xff] %v7245_v11  ;;  %v7229_v23 = vadd.f32 %v17674_v47, %v7017_v1 }
 0x708   : > { %v6960_v38 = vpop.f32.mrf.mxu1 }
 0x709   : > { %v7246_v21 = vmax.f32 %v7229_v23, 0.0  ;;  %v7018_v22 = vadd.f32 %v6960_v38, %v6806_v29  ;;  %v14590_v23 = vld [vmem:[%s19176_s5 + $0x78] sm:$0xff]  }
 0x70a   : > { %v13578_v48 = vpop.f32.mrf.mxu1  ;;  %v7293_v37 = vld [vmem:[#allocation4 + $0x1] sm:$0xff] }
 0x70b   : > { %7263 = vst [vmem:[#allocation4 + $0x18] sm:$0xff] %v7246_v21  ;;  %v18200_v15 = vadd.f32 %v17684_v41, %v7018_v22  ;;  %v7309_v54 = vmax.f32 %v7243_v7, %v7293_v37  ;;  %v6808_v41 = vadd.f32 %v17546_v18, %v18143_v63  ;;  %v14591_v48 = vld [vmem:[%s19176_s5 + $0x178] sm:$0xff]  }
 0x70c   : > { %v6963_v19 = vpop.f32.mrf.mxu1 }
 0x70d   : > { %v7247_v42 = vmax.f32 %v18200_v15, 0.0  ;;  %v7019_v14 = vadd.f32 %v6963_v19, %v6807_v27 }
 0x70e   : > { %v7325_v47 = vld [vmem:[#allocation4 + $0xe] sm:$0xff]  ;;  %v13579_v12 = vpop.f32.mrf.mxu1 }
 0x70f   : > { %v7341_v24 = vld [vmem:[#allocation4 + $0xf] sm:$0xff]  ;;  %7264 = vst [vmem:[#allocation4 + $0x20] sm:$0xff] %v7247_v42  ;;  %v7231_v46 = vadd.f32 %v17696_v40, %v7019_v14  ;;  %v6809_v40 = vadd.f32 %v17559_v2, %v18147_v49 }
 0x710   : > { %v7357_v32 = vmax.f32 %v7325_v47, %v7341_v24  ;;  %v7294_v55 = vld [vmem:[#allocation4 + $0x9] sm:$0xff]  ;;  %v6968_v8 = vpop.f32.mrf.mxu1 }
 0x711   : > { %v7248_v36 = vmax.f32 %v7231_v46, 0.0  ;;  %v7020_v43 = vadd.f32 %v6968_v8, %v6808_v41  ;;  %v7310_v34 = vmax.f32 %v7244_v5, %v7294_v55  ;;  %v6810_v5 = vadd.f32 %v17569_v20, %v18151_v9  ;;  %v14592_v46 = vld [vmem:[%s19176_s5 + $0x70] sm:$0xff]  }
 0x712   : > { %v7373_v31 = vmax.f32 %v7309_v54, %v7357_v32  ;;  %v7326_v52 = vld [vmem:[#allocation4 + $0x16] sm:$0xff]  ;;  %v13582_v13 = vpop.f32.mrf.mxu1  ;;  %v6811_v20 = vadd.f32 %v17582_v39, %v18155_v50  ;;  %v6812_v39 = vadd.f32 %v17589_v33, %v18159_v10  ;;  %v14593_v41 = vld [vmem:[%s19176_s5 + $0x170] sm:$0xff]   ;;  %v6813_v8 = vadd.f32 %v17598_v45, %v18163_v51 }
 0x713   : > { %v7342_v17 = vld [vmem:[#allocation4 + $0x17] sm:$0xff]  ;;  %7265 = vst [vmem:[#allocation4 + $0x28] sm:$0xff] %v7248_v36  ;;  %v7232_v7 = vadd.f32 %v17706_v4, %v7020_v43  ;;  %v14594_v36 = vld [vmem:[%s19176_s5 + $0x68] sm:$0xff]  }
 0x714   : > { %7389 = vst [vmem:[#allocation5] sm:$0xff] %v7373_v31  ;;  %v7358_v3 = vmax.f32 %v7326_v52, %v7342_v17  ;;  %v6971_v59 = vpop.f32.mrf.mxu1  ;;  %v14595_v43 = vld [vmem:[%s19176_s5 + $0x168] sm:$0xff]   ;;  %v6814_v17 = vadd.f32 %v17604_v16, %v18167_v58  ;;  %v19461_v13 = vld [vmem:[#allocation47_spill] sm:$0xff] }
 0x715   : > { %v7249_v18 = vmax.f32 %v7232_v7, 0.0  ;;  %v7021_v63 = vadd.f32 %v6971_v59, %v6809_v40  ;;  %v14597_v7 = vld [vmem:[%s19176_s5 + $0x160] sm:$0xff]  }
 0x716   : > { %v7374_v53 = vmax.f32 %v7310_v34, %v7358_v3  ;;  %v13583_v56 = vpop.f32.mrf.mxu1  ;;  %v7296_v6 = vld [vmem:[#allocation4 + $0x19] sm:$0xff] }
 0x717   : > { %7266 = vst [vmem:[#allocation4 + $0x30] sm:$0xff] %v7249_v18  ;;  %v18212_v28 = vadd.f32 %v17718_v62, %v7021_v63  ;;  %v7312_v29 = vmax.f32 %v7246_v21, %v7296_v6  ;;  %v14596_v3 = vld [vmem:[%s19176_s5 + $0x60] sm:$0xff]   ;;  %v19462_v56 = vld [vmem:[#allocation43_spill] sm:$0xff] }
 0x718   : > { %7390 = vst [vmem:[#allocation5 + $0x8] sm:$0xff] %v7374_v53  ;;  %v6976_v11 = vpop.f32.mrf.mxu1 }
 0x719   : > { %v7250_v4 = vmax.f32 %v18212_v28, 0.0  ;;  %v7022_v1 = vadd.f32 %v6976_v11, %v6810_v5  ;;  %v6815_v5 = vadd.f32 %v19462_v56, %v18171_v26 }
 0x71a   : > { %v7328_v25 = vld [vmem:[#allocation4 + $0x26] sm:$0xff]  ;;  %v13586_v49 = vpop.f32.mrf.mxu1 }
 0x71b   : > { %v7344_v2 = vld [vmem:[#allocation4 + $0x27] sm:$0xff]  ;;  %7267 = vst [vmem:[#allocation4 + $0x38] sm:$0xff] %v7250_v4  ;;  %v18223_v62 = vadd.f32 %v17728_v30, %v7022_v1  ;;  %v19463_v1 = vld [vmem:[#allocation48_spill] sm:$0xff]  ;;  %v14599_v49 = vld [vmem:[%s19176_s5 + $0x158] sm:$0xff]  }
 0x71c   : > { %v7360_v38 = vmax.f32 %v7328_v25, %v7344_v2  ;;  %v7406_v9 = vld [vmem:[#allocation5] sm:$0x1]  ;;  %v7729_v22 = vld [vmem:[#allocation5 + $0x6] sm:$0x1]  ;;  %v6979_v27 = vpop.f32.mrf.mxu1  ;;  %v14598_v2 = vld [vmem:[%s19176_s5 + $0x58] sm:$0xff]  }
 0x71d   : > { %v7297_v15 = vld [vmem:[#allocation4 + $0x21] sm:$0xff]  ;;  %v7407_v37 = vpack.c.bf16 %v7406_v9, %v7406_v9  ;;  %v7730_v21 = vpack.c.bf16 %v7729_v22, %v7729_v22  ;;  %v7251_v14 = vmax.f32 %v18223_v62, 0.0  ;;  %v7023_v47 = vadd.f32 %v6979_v27, %v6811_v20  ;;  %v19464_v22 = vld [vmem:[#allocation44_spill] sm:$0xff] }
 0x71e   : > { %v7376_v19 = vmax.f32 %v7312_v29, %v7360_v38  ;;  %v7329_v24 = vld [vmem:[#allocation4 + $0x2e] sm:$0xff]  ;;  %v13587_v12 = vpop.f32.mrf.mxu1  ;;  %v7313_v50 = vmax.f32 %v7247_v42, %v7297_v15 }
 0x71f   : > { %v7345_v30 = vld [vmem:[#allocation4 + $0x2f] sm:$0xff]  ;;  %13673 = vmatmul.mubr.bf16.vlgmr.msra.gmra.mxu1 %v7407_v37  ;;  %13733 = vmatmul.mubr.bf16.vlgmr.msra.gmra.mxu0 %v7730_v21  ;;  %7268 = vst [vmem:[#allocation4 + $0x40] sm:$0xff] %v7251_v14  ;;  %v7235_v32 = vadd.f32 %v17740_v0, %v7023_v47  ;;  %v19465_v37 = vld [vmem:[#allocation49_spill] sm:$0xff] }
 0x720   : > { %7392 = vst [vmem:[#allocation5 + $0x18] sm:$0xff] %v7376_v19  ;;  %v7361_v54 = vmax.f32 %v7329_v24, %v7345_v30  ;;  %13677 = vmatpush3.bf16.msra.mxu1 %v14590_v23  ;;  %13757 = vmatpush3.bf16.msra.mxu0 %v14591_v48  ;;  %v6984_v55 = vpop.f32.mrf.mxu1  ;;  %v6816_v48 = vadd.f32 %v19464_v22, %v18175_v57  ;;  %v14600_v19 = vld [vmem:[%s19176_s5 + $0x50] sm:$0xff]   ;;  %v19466_v12 = vld [vmem:[#allocation45_spill] sm:$0xff] }
 0x721   : > { %13678 = vmatprep.subr.bf16.mxu1 %v19198_v61  ;;  %13758 = vmatprep.subr.bf16.mxu0 %v19198_v61  ;;  %v7252_v10 = vmax.f32 %v7235_v32, 0.0  ;;  %v7024_v42 = vadd.f32 %v6984_v55, %v6812_v39  ;;  %v14601_v47 = vld [vmem:[%s19176_s5 + $0x150] sm:$0xff]   ;;  %v6817_v39 = vadd.f32 %v19466_v12, %v18179_v60  ;;  %v14602_v32 = vld [vmem:[%s19176_s5 + $0x48] sm:$0xff]   ;;  %v14615_v12 = vld [vmem:[%s19176_s5 + $0x1d8] sm:$0xff]  }
 0x722   : > { %v7377_v33 = vmax.f32 %v7313_v50, %v7361_v54  ;;  %13692 = vmatprep.mubr.msk.bf16.mxu1 %vm14819_vm0, %v19198_v61  ;;  %13772 = vmatprep.mubr.msk.bf16.mxu0 %vm14819_vm0, %v19198_v61  ;;  %v13590_v0 = vpop.f32.mrf.mxu1  ;;  %v19467_v50 = vld [vmem:[#allocation50_spill] sm:$0xff] }
 0x723   : > { %7269 = vst [vmem:[#allocation4 + $0x48] sm:$0xff] %v7252_v10  ;;  %v18251_v31 = vadd.f32 %v17747_v35, %v7024_v42 }
 0x724   : > { %7393 = vst [vmem:[#allocation5 + $0x20] sm:$0xff] %v7377_v33  ;;  %13679 = vmatpush3.bf16.msra.mxu1 %v14592_v46  ;;  %13759 = vmatpush3.bf16.msra.mxu0 %v14593_v41  ;;  %v6987_v52 = vpop.f32.mrf.mxu1  ;;  %v14603_v46 = vld [vmem:[%s19176_s5 + $0x148] sm:$0xff]  }
 0x725   : > { %13680 = vmatprep.subr.bf16.mxu1 %v19198_v61  ;;  %13760 = vmatprep.subr.bf16.mxu0 %v19198_v61  ;;  %v7253_v45 = vmax.f32 %v18251_v31, 0.0  ;;  %v7025_v51 = vadd.f32 %v6987_v52, %v6813_v8  ;;  %v19468_v8 = vld [vmem:[#allocation46_spill] sm:$0xff] }
 0x726   : > { %v13591_v35 = vpop.f32.mrf.mxu1  ;;  %v7300_v40 = vld [vmem:[#allocation4 + $0x39] sm:$0xff] }
 0x727   : > { %7270 = vst [vmem:[#allocation4 + $0x50] sm:$0xff] %v7253_v45  ;;  %v18267_v34 = vadd.f32 %v19461_v13, %v7025_v51  ;;  %v7316_v6 = vmax.f32 %v7250_v4, %v7300_v40  ;;  %v19469_v51 = vld [vmem:[#allocation51_spill] sm:$0xff]  ;;  %v14605_v13 = vld [vmem:[%s19176_s5 + $0x140] sm:$0xff]   ;;  %v7513_v40 = vld [vmem:[#allocation5 + $0x2] sm:$0x1] }
 0x728   : > { %13681 = vmatpush3.bf16.msra.mxu1 %v14594_v36  ;;  %13761 = vmatpush3.bf16.msra.mxu0 %v14595_v43  ;;  %v6992_v59 = vpop.f32.mrf.mxu1  ;;  %v6818_v36 = vadd.f32 %v19468_v8, %v18183_v44  ;;  %v14624_v8 = vld [vmem:[%s19176_s5 + $0x130] sm:$0xff]  }
 0x729   : > { %13682 = vmatprep.subr.bf16.mxu1 %v19198_v61  ;;  %13762 = vmatprep.subr.bf16.mxu0 %v19198_v61  ;;  %v7254_v16 = vmax.f32 %v18267_v34, 0.0  ;;  %v7026_v58 = vadd.f32 %v6992_v59, %v6814_v17  ;;  %v14604_v17 = vld [vmem:[%s19176_s5 + $0x40] sm:$0xff]   ;;  %v7945_v59 = vld [vmem:[#allocation5 + $0x1c] sm:$0x1] }
 0x72a   : > { %v7332_v53 = vld [vmem:[#allocation4 + $0x46] sm:$0xff]  ;;  %v13594_v63 = vpop.f32.mrf.mxu1  ;;  %v7946_v34 = vpack.c.bf16 %v7945_v59, %v7945_v59  ;;  %v7837_v59 = vld [vmem:[#allocation5 + $0x8] sm:$0x1] }
 0x72b   : > { %v7348_v18 = vld [vmem:[#allocation4 + $0x47] sm:$0xff]  ;;  %7271 = vst [vmem:[#allocation4 + $0x58] sm:$0xff] %v7254_v16  ;;  %v7238_v25 = vadd.f32 %v19463_v1, %v7026_v58  ;;  %v14607_v1 = vld [vmem:[%s19176_s5 + $0x1f8] sm:$0xff]  }
 0x72c   : > { %v7364_v11 = vmax.f32 %v7332_v53, %v7348_v18  ;;  %13683 = vmatpush3.bf16.msra.mxu1 %v14596_v3  ;;  %13763 = vmatpush3.bf16.msra.mxu0 %v14597_v7  ;;  %v7301_v26 = vld [vmem:[#allocation4 + $0x41] sm:$0xff]  ;;  %v6995_v23 = vpop.f32.mrf.mxu1 }
 0x72d   : > { %13684 = vmatprep.subr.bf16.mxu1 %v19198_v61  ;;  %13764 = vmatprep.subr.bf16.mxu0 %v19198_v61  ;;  %v7255_v4 = vmax.f32 %v7238_v25, 0.0  ;;  %v7027_v29 = vadd.f32 %v6995_v23, %v6815_v5  ;;  %v7317_v15 = vmax.f32 %v7251_v14, %v7301_v26  ;;  %v19470_v5 = vld [vmem:[#allocation52_spill] sm:$0xff]  ;;  %v14608_v23 = vld [vmem:[%s19176_s5 + $0xb0] sm:$0xff]  }
 0x72e   : > { %v7380_v28 = vmax.f32 %v7316_v6, %v7364_v11  ;;  %v7333_v38 = vld [vmem:[#allocation4 + $0x4e] sm:$0xff]  ;;  %v13595_v9 = vpop.f32.mrf.mxu1 }
 0x72f   : > { %v7349_v20 = vld [vmem:[#allocation4 + $0x4f] sm:$0xff]  ;;  %7272 = vst [vmem:[#allocation4 + $0x60] sm:$0xff] %v7255_v4  ;;  %v7239_v21 = vadd.f32 %v19465_v37, %v7027_v29  ;;  %v14610_v4 = vld [vmem:[%s19176_s5 + $0xa8] sm:$0xff]  }
 0x730   : > { %7396 = vst [vmem:[#allocation5 + $0x38] sm:$0xff] %v7380_v28  ;;  %v7365_v27 = vmax.f32 %v7333_v38, %v7349_v20  ;;  %13685 = vmatpush3.bf16.msra.mxu1 %v14598_v2  ;;  %13765 = vmatpush3.bf16.msra.mxu0 %v14599_v49  ;;  %v7000_v24 = vpop.f32.mrf.mxu1  ;;  %v14606_v11 = vld [vmem:[%s19176_s5 + $0xb8] sm:$0xff]   ;;  %v7514_v2 = vpack.c.bf16 %v7513_v40, %v7513_v40  ;;  %v14609_v28 = vld [vmem:[%s19176_s5 + $0x1f0] sm:$0xff]   ;;  %v14611_v29 = vld [vmem:[%s19176_s5 + $0x1e8] sm:$0xff]  }
 0x731   : > { %13686 = vmatprep.subr.bf16.mxu1 %v19198_v61  ;;  %13766 = vmatprep.subr.bf16.mxu0 %v19198_v61  ;;  %v7256_v62 = vmax.f32 %v7239_v21, 0.0  ;;  %v7028_v14 = vadd.f32 %v7000_v24, %v6816_v48  ;;  %v14637_v40 = vld [vmem:[%s19176_s5 + $0x240] sm:$0xff]  }
 0x732   : > { %v7381_v57 = vmax.f32 %v7317_v15, %v7365_v27  ;;  %v13598_v30 = vpop.f32.mrf.mxu1  ;;  %v7303_v41 = vld [vmem:[#allocation4 + $0x51] sm:$0xff] }
 0x733   : > { %7273 = vst [vmem:[#allocation4 + $0x68] sm:$0xff] %v7256_v62  ;;  %v18309_v54 = vadd.f32 %v19467_v50, %v7028_v14  ;;  %v7319_v43 = vmax.f32 %v7253_v45, %v7303_v41  ;;  %v14614_v30 = vld [vmem:[%s19176_s5 + $0x98] sm:$0xff]   ;;  %v14617_v50 = vld [vmem:[%s19176_s5 + $0x1d0] sm:$0xff]   ;;  %v14621_v41 = vld [vmem:[%s19176_s5 + $0x1c0] sm:$0xff]  }
 0x734   : > { %7397 = vst [vmem:[#allocation5 + $0x40] sm:$0xff] %v7381_v57  ;;  %13687 = vmatpush3.bf16.msra.mxu1 %v14600_v19  ;;  %13767 = vmatpush3.bf16.msra.mxu0 %v14601_v47  ;;  %v7003_v55 = vpop.f32.mrf.mxu1  ;;  %v14612_v19 = vld [vmem:[%s19176_s5 + $0xa0] sm:$0xff]  }
 0x735   : > { %13688 = vmatprep.subr.bf16.mxu1 %v19198_v61  ;;  %13768 = vmatprep.subr.bf16.mxu0 %v19198_v61  ;;  %v7257_v60 = vmax.f32 %v18309_v54, 0.0  ;;  %v7029_v33 = vadd.f32 %v7003_v55, %v6817_v39  ;;  %v14613_v47 = vld [vmem:[%s19176_s5 + $0x1e0] sm:$0xff]   ;;  %v14616_v39 = vld [vmem:[%s19176_s5 + $0x90] sm:$0xff]   ;;  %v14618_v54 = vld [vmem:[%s19176_s5 + $0x88] sm:$0xff]  }
 0x736   : > { %v7335_v10 = vld [vmem:[#allocation4 + $0x5e] sm:$0xff]  ;;  %v13599_v0 = vpop.f32.mrf.mxu1  ;;  %v7621_v55 = vld [vmem:[#allocation5 + $0x4] sm:$0x1] }
 0x737   : > { %v7351_v42 = vld [vmem:[#allocation4 + $0x5f] sm:$0xff]  ;;  %7274 = vst [vmem:[#allocation4 + $0x70] sm:$0xff] %v7257_v60  ;;  %v7241_v35 = vadd.f32 %v19469_v51, %v7029_v33  ;;  %v14622_v33 = vld [vmem:[%s19176_s5 + $0x138] sm:$0xff]  }
 0x738   : > { %v7367_v52 = vmax.f32 %v7335_v10, %v7351_v42  ;;  %13689 = vmatpush3.bf16.msra.mxu1 %v14602_v32  ;;  %13769 = vmatpush3.bf16.msra.mxu0 %v14603_v46  ;;  %v7304_v44 = vld [vmem:[#allocation4 + $0x59] sm:$0xff]  ;;  %v7008_v3 = vpop.f32.mrf.mxu1  ;;  %v14623_v10 = vld [vmem:[%s19176_s5 + $0x278] sm:$0xff]   ;;  %v7622_v42 = vpack.c.bf16 %v7621_v55, %v7621_v55 }
 0x739   : > { %13690 = vmatprep.subr.bf16.mxu1 %v19198_v61  ;;  %13770 = vmatprep.subr.bf16.mxu0 %v19198_v61  ;;  %v7258_v45 = vmax.f32 %v7241_v35, 0.0  ;;  %v7030_v7 = vadd.f32 %v7008_v3, %v6818_v36  ;;  %v7320_v63 = vmax.f32 %v7254_v16, %v7304_v44  ;;  %v14619_v32 = vld [vmem:[%s19176_s5 + $0x1c8] sm:$0xff]   ;;  %v14620_v46 = vld [vmem:[%s19176_s5 + $0x80] sm:$0xff]   ;;  %v14625_v36 = vld [vmem:[%s19176_s5 + $0x270] sm:$0xff]  }
 0x73a   : > { %v7383_v31 = vmax.f32 %v7319_v43, %v7367_v52  ;;  %v7336_v58 = vld [vmem:[#allocation4 + $0x66] sm:$0xff]  ;;  %v13602_v18 = vpop.f32.mrf.mxu1  ;;  %v14628_v51 = vld [vmem:[%s19176_s5 + $0x120] sm:$0xff]   ;;  %v14671_v55 = vld [vmem:[%s19176_s5 + $0x3f8] sm:$0xff]  }
 0x73b   : > { %v7352_v53 = vld [vmem:[#allocation4 + $0x67] sm:$0xff]  ;;  %7275 = vst [vmem:[#allocation4 + $0x78] sm:$0xff] %v7258_v45  ;;  %v7242_v6 = vadd.f32 %v19470_v5, %v7030_v7  ;;  %v14629_v35 = vld [vmem:[%s19176_s5 + $0x260] sm:$0xff]   ;;  %v14639_v18 = vld [vmem:[%s19176_s5 + $0x2f8] sm:$0xff]  }
 0x73c   : > { %7399 = vst [vmem:[#allocation5 + $0x50] sm:$0xff] %v7383_v31  ;;  %v7368_v56 = vmax.f32 %v7336_v58, %v7352_v53  ;;  %13691 = vmatpush3.bf16.msra.mxu1 %v14604_v17  ;;  %13771 = vmatpush3.bf16.msra.mxu0 %v14605_v13  ;;  %v7011_v25 = vpop.f32.mrf.mxu1  ;;  %v14626_v43 = vld [vmem:[%s19176_s5 + $0x128] sm:$0xff]   ;;  %v14630_v17 = vld [vmem:[%s19176_s5 + $0x118] sm:$0xff]   ;;  %v14632_v44 = vld [vmem:[%s19176_s5 + $0x110] sm:$0xff]  }
 0x73d   : > { %13696 = vmatprep.subr.bf16.mxu1 %v19198_v61  ;;  %13796 = vmatprep.subr.bf16.mxu0 %v19198_v61  ;;  %v7259_v49 = vmax.f32 %v7242_v6, 0.0  ;;  %v14627_v52 = vld [vmem:[%s19176_s5 + $0x268] sm:$0xff]   ;;  %v14631_v13 = vld [vmem:[%s19176_s5 + $0x258] sm:$0xff]   ;;  %v14633_v3 = vld [vmem:[%s19176_s5 + $0x250] sm:$0xff]  }
 0x73e   : > { %v7384_v16 = vmax.f32 %v7320_v63, %v7368_v56  ;;  %v13603_v26 = vpop.f32.mrf.mxu1  ;;  %v14634_v31 = vld [vmem:[%s19176_s5 + $0x108] sm:$0xff]   ;;  %v14636_v7 = vld [vmem:[%s19176_s5 + $0x100] sm:$0xff]   ;;  %v8377_v58 = vld [vmem:[#allocation5 + $0x24] sm:$0x1]  ;;  %v7838_v63 = vpack.c.bf16 %v7837_v59, %v7837_v59 }
 0x73f   : > { %13693 = vmatmul.mubr.bf16.vlgmr.msra.gmra.mxu1 %v7514_v2  ;;  %13773 = vmatmul.mubr.bf16.vlgmr.msra.gmra.mxu0 %v7946_v34  ;;  %7276 = vst [vmem:[#allocation4 + $0x80] sm:$0xff] %v7259_v49  ;;  %v14635_v45 = vld [vmem:[%s19176_s5 + $0x248] sm:$0xff]   ;;  %v14638_v53 = vld [vmem:[%s19176_s5 + $0x1b8] sm:$0xff]   ;;  %v8378_v56 = vpack.c.bf16 %v8377_v58, %v8377_v58  ;;  %v14640_v5 = vld [vmem:[%s19176_s5 + $0x1b0] sm:$0xff]  }
 0x740   : > { %7400 = vst [vmem:[#allocation5 + $0x58] sm:$0xff] %v7384_v16  ;;  %13697 = vmatpush3.bf16.msra.mxu1 %v14606_v11  ;;  %13797 = vmatpush3.bf16.msra.mxu0 %v14607_v1  ;;  %v14641_v6 = vld [vmem:[%s19176_s5 + $0x2f0] sm:$0xff]   ;;  %v14642_v11 = vld [vmem:[%s19176_s5 + $0x1a8] sm:$0xff]   ;;  %v14644_v25 = vld [vmem:[%s19176_s5 + $0x1a0] sm:$0xff]  }
 0x741   : > { %13698 = vmatprep.subr.bf16.mxu1 %v19198_v61  ;;  %13798 = vmatprep.subr.bf16.mxu0 %v19198_v61  ;;  %v14643_v1 = vld [vmem:[%s19176_s5 + $0x2e8] sm:$0xff]   ;;  %v14645_v2 = vld [vmem:[%s19176_s5 + $0x2e0] sm:$0xff]   ;;  %v14646_v34 = vld [vmem:[%s19176_s5 + $0x198] sm:$0xff]  }
 0x742   : > { %13712 = vmatprep.mubr.msk.bf16.mxu1 %vm14819_vm0, %v19198_v61  ;;  %13812 = vmatprep.mubr.msk.bf16.mxu0 %vm14819_vm0, %v19198_v61  ;;  %v7307_v38 = vld [vmem:[#allocation4 + $0x71] sm:$0xff]  ;;  %v7308_v9 = vld [vmem:[#allocation4 + $0x79] sm:$0x1]  ;;  %v14648_v49 = vld [vmem:[%s19176_s5 + $0x190] sm:$0xff]  }
 0x743   : > { %v7292_v20 = vld [vmem:[#allocation4 + $0x78] sm:$0x1]  ;;  %v7323_v27 = vmax.f32 %v7257_v60, %v7307_v38  ;;  %v8161_v60 = vld [vmem:[#allocation5 + $0x20] sm:$0x1]  ;;  %v14647_v16 = vld [vmem:[%s19176_s5 + $0x2d8] sm:$0xff]  }
 0x744   : > { %13699 = vmatpush3.bf16.msra.mxu1 %v14608_v23  ;;  %13799 = vmatpush3.bf16.msra.mxu0 %v14609_v28  ;;  %v7324_v24 = vmax.f32 %v7292_v20, %v7308_v9  ;;  %v8162_v0 = vpack.c.bf16 %v8161_v60, %v8161_v60  ;;  %v14649_v26 = vld [vmem:[%s19176_s5 + $0x2d0] sm:$0xff]   ;;  %v14650_v23 = vld [vmem:[%s19176_s5 + $0x188] sm:$0xff]   ;;  %v14654_v9 = vld [vmem:[%s19176_s5 + $0x238] sm:$0xff]  }
 0x745   : > { %13700 = vmatprep.subr.bf16.mxu1 %v19198_v61  ;;  %13800 = vmatprep.subr.bf16.mxu0 %v19198_v61  ;;  %v14651_v28 = vld [vmem:[%s19176_s5 + $0x2c8] sm:$0xff]   ;;  %v14687_v59 = vld [vmem:[%s19176_s5 + $0x478] sm:$0xff]  }
 0x746   : > { %v7339_v22 = vld [vmem:[#allocation4 + $0x7e] sm:$0xff]  ;;  %v7340_v48 = vld [vmem:[#allocation4 + $0x86] sm:$0x1]  ;;  %v7356_v37 = vld [vmem:[#allocation4 + $0x87] sm:$0x1] }
 0x747   : > { %v7355_v15 = vld [vmem:[#allocation4 + $0x7f] sm:$0xff]  ;;  %v7372_v57 = vmax.f32 %v7340_v48, %v7356_v37  ;;  %v14657_v37 = vld [vmem:[%s19176_s5 + $0x370] sm:$0xff]  }
 0x748   : > { %v7371_v21 = vmax.f32 %v7339_v22, %v7355_v15  ;;  %13701 = vmatpush3.bf16.msra.mxu1 %v14610_v4  ;;  %13801 = vmatpush3.bf16.msra.mxu0 %v14611_v29  ;;  %v14652_v4 = vld [vmem:[%s19176_s5 + $0x180] sm:$0xff]   ;;  %v8053_v38 = vld [vmem:[#allocation5 + $0x1e] sm:$0x1]  ;;  %v8593_v20 = vld [vmem:[#allocation5 + $0x3a] sm:$0x1] }
 0x749   : > { %13702 = vmatprep.subr.bf16.mxu1 %v19198_v61  ;;  %13802 = vmatprep.subr.bf16.mxu0 %v19198_v61  ;;  %v7388_v14 = vmax.f32 %v7324_v24, %v7372_v57  ;;  %v14653_v29 = vld [vmem:[%s19176_s5 + $0x2c0] sm:$0xff]   ;;  %v14655_v22 = vld [vmem:[%s19176_s5 + $0x378] sm:$0xff]   ;;  %v8054_v48 = vpack.c.bf16 %v8053_v38, %v8053_v38  ;;  %v8594_v15 = vpack.c.bf16 %v8593_v20, %v8593_v20  ;;  %v14697_v38 = vld [vmem:[%s19176_s5 + $0x450] sm:$0xff]  }
 0x74a   : > { %v7387_v62 = vmax.f32 %v7323_v27, %v7371_v21  ;;  %v14656_v27 = vld [vmem:[%s19176_s5 + $0x230] sm:$0xff]   ;;  %v14658_v21 = vld [vmem:[%s19176_s5 + $0x228] sm:$0xff]   ;;  %v14661_v24 = vld [vmem:[%s19176_s5 + $0x360] sm:$0xff]  }
 0x74b   : > { %7404 = vst [vmem:[#allocation5 + $0x78] sm:$0x1] %v7388_v14  ;;  %v14662_v57 = vld [vmem:[%s19176_s5 + $0x218] sm:$0xff]   ;;  %v14664_v14 = vld [vmem:[%s19176_s5 + $0x210] sm:$0xff]   ;;  %v14698_v20 = vld [vmem:[%s19176_s5 + $0x308] sm:$0xff]  }
 0x74c   : > { %7403 = vst [vmem:[#allocation5 + $0x70] sm:$0xff] %v7387_v62  ;;  %13703 = vmatpush3.bf16.msra.mxu1 %v14612_v19  ;;  %13803 = vmatpush3.bf16.msra.mxu0 %v14613_v47  ;;  %v14659_v19 = vld [vmem:[%s19176_s5 + $0x368] sm:$0xff]   ;;  %v14660_v47 = vld [vmem:[%s19176_s5 + $0x220] sm:$0xff]   ;;  %v14663_v62 = vld [vmem:[%s19176_s5 + $0x358] sm:$0xff]  }
 0x74d   : > { %13704 = vmatprep.subr.bf16.mxu1 %v19198_v61  ;;  %13804 = vmatprep.subr.bf16.mxu0 %v19198_v61 }
 0x750   : > { %13705 = vmatpush3.bf16.msra.mxu1 %v14614_v30  ;;  %13805 = vmatpush3.bf16.msra.mxu0 %v14615_v12  ;;  %v14665_v30 = vld [vmem:[%s19176_s5 + $0x350] sm:$0xff]   ;;  %v14666_v12 = vld [vmem:[%s19176_s5 + $0x208] sm:$0xff]  }
 0x751   : > { %13706 = vmatprep.subr.bf16.mxu1 %v19198_v61  ;;  %13806 = vmatprep.subr.bf16.mxu0 %v19198_v61 }
 0x754   : > { %13707 = vmatpush3.bf16.msra.mxu1 %v14616_v39  ;;  %13807 = vmatpush3.bf16.msra.mxu0 %v14617_v50  ;;  %v14667_v39 = vld [vmem:[%s19176_s5 + $0x348] sm:$0xff]   ;;  %v14668_v50 = vld [vmem:[%s19176_s5 + $0x200] sm:$0xff]  }
 0x755   : > { %13708 = vmatprep.subr.bf16.mxu1 %v19198_v61  ;;  %13808 = vmatprep.subr.bf16.mxu0 %v19198_v61 }
 0x758   : > { %13709 = vmatpush3.bf16.msra.mxu1 %v14618_v54  ;;  %13809 = vmatpush3.bf16.msra.mxu0 %v14619_v32  ;;  %v14669_v54 = vld [vmem:[%s19176_s5 + $0x340] sm:$0xff]   ;;  %v8269_v32 = vld [vmem:[#allocation5 + $0x22] sm:$0x1] }
 0x759   : > { %13710 = vmatprep.subr.bf16.mxu1 %v19198_v61  ;;  %13810 = vmatprep.subr.bf16.mxu0 %v19198_v61  ;;  %v8270_v60 = vpack.c.bf16 %v8269_v32, %v8269_v32 }
 0x75c   : > { %13711 = vmatpush3.bf16.msra.mxu1 %v14620_v46  ;;  %13811 = vmatpush3.bf16.msra.mxu0 %v14621_v41  ;;  %v8809_v46 = vld [vmem:[#allocation5 + $0x3e] sm:$0x1]  ;;  %v14670_v41 = vld [vmem:[%s19176_s5 + $0x2b8] sm:$0xff]  }
 0x75d   : > { %13736 = vmatprep.subr.bf16.mxu1 %v19198_v61  ;;  %13836 = vmatprep.subr.bf16.mxu0 %v19198_v61 }
 0x75f   : > { %13713 = vmatmul.mubr.bf16.vlgmr.msra.gmra.mxu1 %v7622_v42  ;;  %13813 = vmatmul.mubr.bf16.vlgmr.msra.gmra.mxu0 %v8162_v0  ;;  %v14673_v42 = vld [vmem:[%s19176_s5 + $0x3f0] sm:$0xff]   ;;  %v14674_v0 = vld [vmem:[%s19176_s5 + $0x2a8] sm:$0xff]  }
 0x760   : > { %13737 = vmatpush3.bf16.msra.mxu1 %v14622_v33  ;;  %13837 = vmatpush3.bf16.msra.mxu0 %v14623_v10  ;;  %v8810_v33 = vpack.c.bf16 %v8809_v46, %v8809_v46  ;;  %v14672_v10 = vld [vmem:[%s19176_s5 + $0x2b0] sm:$0xff]  }
 0x761   : > { %13738 = vmatprep.subr.bf16.mxu1 %v19198_v61  ;;  %13838 = vmatprep.subr.bf16.mxu0 %v19198_v61 }
 0x762   : > { %13752 = vmatprep.mubr.msk.bf16.mxu1 %vm14819_vm0, %v19198_v61  ;;  %13852 = vmatprep.mubr.msk.bf16.mxu0 %vm14819_vm0, %v19198_v61 }
 0x764   : > { %13739 = vmatpush3.bf16.msra.mxu1 %v14624_v8  ;;  %13839 = vmatpush3.bf16.msra.mxu0 %v14625_v36  ;;  %v14675_v8 = vld [vmem:[%s19176_s5 + $0x3e8] sm:$0xff]   ;;  %v14676_v36 = vld [vmem:[%s19176_s5 + $0x2a0] sm:$0xff]  }
 0x765   : > { %13740 = vmatprep.subr.bf16.mxu1 %v19198_v61  ;;  %13840 = vmatprep.subr.bf16.mxu0 %v19198_v61 }
 0x768   : > { %13741 = vmatpush3.bf16.msra.mxu1 %v14626_v43  ;;  %13841 = vmatpush3.bf16.msra.mxu0 %v14627_v52  ;;  %v14677_v43 = vld [vmem:[%s19176_s5 + $0x3e0] sm:$0xff]   ;;  %v14678_v52 = vld [vmem:[%s19176_s5 + $0x298] sm:$0xff]  }
 0x769   : > { %13742 = vmatprep.subr.bf16.mxu1 %v19198_v61  ;;  %13842 = vmatprep.subr.bf16.mxu0 %v19198_v61 }
 0x76c   : > { %13743 = vmatpush3.bf16.msra.mxu1 %v14628_v51  ;;  %13843 = vmatpush3.bf16.msra.mxu0 %v14629_v35  ;;  %v14679_v51 = vld [vmem:[%s19176_s5 + $0x3d8] sm:$0xff]   ;;  %v14680_v35 = vld [vmem:[%s19176_s5 + $0x290] sm:$0xff]  }
 0x76d   : > { %13744 = vmatprep.subr.bf16.mxu1 %v19198_v61  ;;  %13844 = vmatprep.subr.bf16.mxu0 %v19198_v61 }
 0x770   : > { %13745 = vmatpush3.bf16.msra.mxu1 %v14630_v17  ;;  %13845 = vmatpush3.bf16.msra.mxu0 %v14631_v13  ;;  %v14681_v17 = vld [vmem:[%s19176_s5 + $0x3d0] sm:$0xff]   ;;  %v14682_v13 = vld [vmem:[%s19176_s5 + $0x288] sm:$0xff]  }
 0x771   : > { %13746 = vmatprep.subr.bf16.mxu1 %v19198_v61  ;;  %13846 = vmatprep.subr.bf16.mxu0 %v19198_v61 }
 0x774   : > { %13747 = vmatpush3.bf16.msra.mxu1 %v14632_v44  ;;  %13847 = vmatpush3.bf16.msra.mxu0 %v14633_v3  ;;  %v14683_v44 = vld [vmem:[%s19176_s5 + $0x3c8] sm:$0xff]   ;;  %v14684_v3 = vld [vmem:[%s19176_s5 + $0x280] sm:$0xff]  }
 0x775   : > { %13748 = vmatprep.subr.bf16.mxu1 %v19198_v61  ;;  %13848 = vmatprep.subr.bf16.mxu0 %v19198_v61 }
 0x778   : > { %13749 = vmatpush3.bf16.msra.mxu1 %v14634_v31  ;;  %13849 = vmatpush3.bf16.msra.mxu0 %v14635_v45  ;;  %v14685_v31 = vld [vmem:[%s19176_s5 + $0x3c0] sm:$0xff]   ;;  %v8485_v45 = vld [vmem:[#allocation5 + $0x38] sm:$0x1] }
 0x779   : > { %13750 = vmatprep.subr.bf16.mxu1 %v19198_v61  ;;  %13850 = vmatprep.subr.bf16.mxu0 %v19198_v61  ;;  %v8486_v58 = vpack.c.bf16 %v8485_v45, %v8485_v45 }
 0x77c   : > { %13751 = vmatpush3.bf16.msra.mxu1 %v14636_v7  ;;  %13851 = vmatpush3.bf16.msra.mxu0 %v14637_v40  ;;  %v9025_v7 = vld [vmem:[#allocation5 + $0x54] sm:$0x1]  ;;  %v14686_v40 = vld [vmem:[%s19176_s5 + $0x338] sm:$0xff]  }
 0x77d   : > { %13776 = vmatprep.subr.bf16.mxu1 %v19198_v61  ;;  %13876 = vmatprep.subr.bf16.mxu0 %v19198_v61 }
 0x77f   : > { %13753 = vmatmul.mubr.bf16.vlgmr.msra.gmra.mxu1 %v7838_v63  ;;  %13853 = vmatmul.mubr.bf16.vlgmr.msra.gmra.mxu0 %v8378_v56  ;;  %v14688_v56 = vld [vmem:[%s19176_s5 + $0x330] sm:$0xff]  }
 0x780   : > { %13777 = vmatpush3.bf16.msra.mxu1 %v14638_v53  ;;  %13877 = vmatpush3.bf16.msra.mxu0 %v14639_v18  ;;  %v9026_v53 = vpack.c.bf16 %v9025_v7, %v9025_v7 }
 0x781   : > { %13778 = vmatprep.subr.bf16.mxu1 %v19198_v61  ;;  %13878 = vmatprep.subr.bf16.mxu0 %v19198_v61 }
 0x782   : > { %13792 = vmatprep.mubr.msk.bf16.mxu1 %vm14819_vm0, %v19198_v61  ;;  %13892 = vmatprep.mubr.msk.bf16.mxu0 %vm14819_vm0, %v19198_v61 }
 0x784   : > { %13779 = vmatpush3.bf16.msra.mxu1 %v14640_v5  ;;  %13879 = vmatpush3.bf16.msra.mxu0 %v14641_v6  ;;  %v14689_v5 = vld [vmem:[%s19176_s5 + $0x470] sm:$0xff]  }
 0x785   : > { %13780 = vmatprep.subr.bf16.mxu1 %v19198_v61  ;;  %13880 = vmatprep.subr.bf16.mxu0 %v19198_v61 }
 0x788   : > { %13781 = vmatpush3.bf16.msra.mxu1 %v14642_v11  ;;  %13881 = vmatpush3.bf16.msra.mxu0 %v14643_v1 }
 0x789   : > { %13782 = vmatprep.subr.bf16.mxu1 %v19198_v61  ;;  %13882 = vmatprep.subr.bf16.mxu0 %v19198_v61 }
 0x78c   : > { %13783 = vmatpush3.bf16.msra.mxu1 %v14644_v25  ;;  %13883 = vmatpush3.bf16.msra.mxu0 %v14645_v2  ;;  %v14690_v2 = vld [vmem:[%s19176_s5 + $0x328] sm:$0xff]  }
 0x78d   : > { %13784 = vmatprep.subr.bf16.mxu1 %v19198_v61  ;;  %13884 = vmatprep.subr.bf16.mxu0 %v19198_v61 }
 0x790   : > { %13785 = vmatpush3.bf16.msra.mxu1 %v14646_v34  ;;  %13885 = vmatpush3.bf16.msra.mxu0 %v14647_v16  ;;  %v14691_v34 = vld [vmem:[%s19176_s5 + $0x468] sm:$0xff]  }
 0x791   : > { %13786 = vmatprep.subr.bf16.mxu1 %v19198_v61  ;;  %13886 = vmatprep.subr.bf16.mxu0 %v19198_v61 }
 0x794   : > { %13787 = vmatpush3.bf16.msra.mxu1 %v14648_v49  ;;  %13887 = vmatpush3.bf16.msra.mxu0 %v14649_v26  ;;  %v14692_v26 = vld [vmem:[%s19176_s5 + $0x320] sm:$0xff]  }
 0x795   : > { %13788 = vmatprep.subr.bf16.mxu1 %v19198_v61  ;;  %13888 = vmatprep.subr.bf16.mxu0 %v19198_v61 }
 0x798   : > { %13789 = vmatpush3.bf16.msra.mxu1 %v14650_v23  ;;  %13889 = vmatpush3.bf16.msra.mxu0 %v14651_v28  ;;  %v14693_v23 = vld [vmem:[%s19176_s5 + $0x460] sm:$0xff]   ;;  %v14694_v28 = vld [vmem:[%s19176_s5 + $0x318] sm:$0xff]  }
 0x799   : > { %13790 = vmatprep.subr.bf16.mxu1 %v19198_v61  ;;  %13890 = vmatprep.subr.bf16.mxu0 %v19198_v61 }
 0x79c   : > { %13791 = vmatpush3.bf16.msra.mxu1 %v14652_v4  ;;  %13891 = vmatpush3.bf16.msra.mxu0 %v14653_v29  ;;  %v14695_v4 = vld [vmem:[%s19176_s5 + $0x458] sm:$0xff]   ;;  %v14696_v29 = vld [vmem:[%s19176_s5 + $0x310] sm:$0xff]  }
 0x79d   : > { %13816 = vmatprep.subr.bf16.mxu1 %v19198_v61  ;;  %13916 = vmatprep.subr.bf16.mxu0 %v19198_v61 }
 0x79f   : > { %13793 = vmatmul.mubr.bf16.vlgmr.msra.gmra.mxu1 %v8054_v48  ;;  %13893 = vmatmul.mubr.bf16.vlgmr.msra.gmra.mxu0 %v8594_v15  ;;  %v14701_v48 = vld [vmem:[%s19176_s5 + $0x440] sm:$0xff]   ;;  %v8701_v15 = vld [vmem:[#allocation5 + $0x3c] sm:$0x1] }
 0x7a0   : > { %13817 = vmatpush3.bf16.msra.mxu1 %v14654_v9  ;;  %13917 = vmatpush3.bf16.msra.mxu0 %v14655_v22  ;;  %v14699_v9 = vld [vmem:[%s19176_s5 + $0x448] sm:$0xff]   ;;  %v14700_v22 = vld [vmem:[%s19176_s5 + $0x300] sm:$0xff]  }
 0x7a1   : > { %13818 = vmatprep.subr.bf16.mxu1 %v19198_v61  ;;  %13918 = vmatprep.subr.bf16.mxu0 %v19198_v61 }
 0x7a2   : > { %13832 = vmatprep.mubr.msk.bf16.mxu1 %vm14819_vm0, %v19198_v61  ;;  %13932 = vmatprep.mubr.msk.bf16.mxu0 %vm14819_vm0, %v19198_v61 }
 0x7a4   : > { %13819 = vmatpush3.bf16.msra.mxu1 %v14656_v27  ;;  %13919 = vmatpush3.bf16.msra.mxu0 %v14657_v37  ;;  %v9241_v27 = vld [vmem:[#allocation5 + $0x58] sm:$0x1]  ;;  %v7405_v37 = vld [vmem:[%s19177_s6] sm:$0x1] }
 0x7a5   : > { %13820 = vmatprep.subr.bf16.mxu1 %v19198_v61  ;;  %13920 = vmatprep.subr.bf16.mxu0 %v19198_v61 }
 0x7a8   : > { %13821 = vmatpush3.bf16.msra.mxu1 %v14658_v21  ;;  %13921 = vmatpush3.bf16.msra.mxu0 %v14659_v19  ;;  %v14702_v21 = vld [vmem:[%s19176_s5 + $0x3b8] sm:$0xff]  }
 0x7a9   : > { %13822 = vmatprep.subr.bf16.mxu1 %v19198_v61  ;;  %13922 = vmatprep.subr.bf16.mxu0 %v19198_v61  ;;  %v14703_v19 = vld [vmem:[%s19176_s5 + $0x4f8] sm:$0xff]  }
 0x7ac   : > { %13823 = vmatpush3.bf16.msra.mxu1 %v14660_v47  ;;  %13923 = vmatpush3.bf16.msra.mxu0 %v14661_v24  ;;  %v8702_v47 = vpack.c.bf16 %v8701_v15, %v8701_v15  ;;  %v9242_v24 = vpack.c.bf16 %v9241_v27, %v9241_v27  ;;  %v14734_v15 = vld [vmem:[%s19176_s5 + $0x4b8] sm:$0xff]  }
 0x7ad   : > { %13824 = vmatprep.subr.bf16.mxu1 %v19198_v61  ;;  %13924 = vmatprep.subr.bf16.mxu0 %v19198_v61  ;;  %v14735_v27 = vld [vmem:[%s19176_s5 + $0x5f8] sm:$0xff]  }
 0x7b0   : > { %13825 = vmatpush3.bf16.msra.mxu1 %v14662_v57  ;;  %13925 = vmatpush3.bf16.msra.mxu0 %v14663_v62 }
 0x7b1   : > { %13826 = vmatprep.subr.bf16.mxu1 %v19198_v61  ;;  %13926 = vmatprep.subr.bf16.mxu0 %v19198_v61 }
 0x7b4   : > { %13827 = vmatpush3.bf16.msra.mxu1 %v14664_v14  ;;  %13927 = vmatpush3.bf16.msra.mxu0 %v14665_v30 }
 0x7b5   : > { %13828 = vmatprep.subr.bf16.mxu1 %v19198_v61  ;;  %13928 = vmatprep.subr.bf16.mxu0 %v19198_v61 }
 0x7b8   : > { %13829 = vmatpush3.bf16.msra.mxu1 %v14666_v12  ;;  %13929 = vmatpush3.bf16.msra.mxu0 %v14667_v39  ;;  %v14704_v12 = vld [vmem:[%s19176_s5 + $0x3b0] sm:$0xff]  }
 0x7b9   : > { %13830 = vmatprep.subr.bf16.mxu1 %v19198_v61  ;;  %13930 = vmatprep.subr.bf16.mxu0 %v19198_v61  ;;  %v14705_v39 = vld [vmem:[%s19176_s5 + $0x4f0] sm:$0xff]  }
 0x7bc   : > { %13831 = vmatpush3.bf16.msra.mxu1 %v14668_v50  ;;  %13931 = vmatpush3.bf16.msra.mxu0 %v14669_v54 }
 0x7bd   : > { %13856 = vmatprep.subr.bf16.mxu1 %v19198_v61  ;;  %13956 = vmatprep.subr.bf16.mxu0 %v19198_v61 }
 0x7bf   : > { %13833 = vmatmul.mubr.bf16.vlgmr.msra.gmra.mxu1 %v8270_v60  ;;  %13933 = vmatmul.mubr.bf16.vlgmr.msra.gmra.mxu0 %v8810_v33 }
 0x7c0   : > { %13857 = vmatpush3.bf16.msra.mxu1 %v14670_v41  ;;  %13957 = vmatpush3.bf16.msra.mxu0 %v14671_v55  ;;  %v14706_v41 = vld [vmem:[%s19176_s5 + $0x3a8] sm:$0xff]  }
 0x7c1   : > { %13858 = vmatprep.subr.bf16.mxu1 %v19198_v61  ;;  %13958 = vmatprep.subr.bf16.mxu0 %v19198_v61  ;;  %v14707_v55 = vld [vmem:[%s19176_s5 + $0x4e8] sm:$0xff]  }
 0x7c2   : > { %13872 = vmatprep.mubr.msk.bf16.mxu1 %vm14819_vm0, %v19198_v61  ;;  %13972 = vmatprep.mubr.msk.bf16.mxu0 %vm14819_vm0, %v19198_v61 }
 0x7c4   : > { %13859 = vmatpush3.bf16.msra.mxu1 %v14672_v10  ;;  %13959 = vmatpush3.bf16.msra.mxu0 %v14673_v42  ;;  %v14708_v10 = vld [vmem:[%s19176_s5 + $0x3a0] sm:$0xff]  }
 0x7c5   : > { %13860 = vmatprep.subr.bf16.mxu1 %v19198_v61  ;;  %13960 = vmatprep.subr.bf16.mxu0 %v19198_v61  ;;  %v14709_v42 = vld [vmem:[%s19176_s5 + $0x4e0] sm:$0xff]  }
 0x7c8   : > { %13861 = vmatpush3.bf16.msra.mxu1 %v14674_v0  ;;  %13961 = vmatpush3.bf16.msra.mxu0 %v14675_v8  ;;  %v14710_v0 = vld [vmem:[%s19176_s5 + $0x398] sm:$0xff]  }
 0x7c9   : > { %13862 = vmatprep.subr.bf16.mxu1 %v19198_v61  ;;  %13962 = vmatprep.subr.bf16.mxu0 %v19198_v61  ;;  %v14711_v8 = vld [vmem:[%s19176_s5 + $0x4d8] sm:$0xff]  }
 0x7cc   : > { %13863 = vmatpush3.bf16.msra.mxu1 %v14676_v36  ;;  %13963 = vmatpush3.bf16.msra.mxu0 %v14677_v43  ;;  %v14712_v36 = vld [vmem:[%s19176_s5 + $0x390] sm:$0xff]  }
 0x7cd   : > { %13864 = vmatprep.subr.bf16.mxu1 %v19198_v61  ;;  %13964 = vmatprep.subr.bf16.mxu0 %v19198_v61  ;;  %v14713_v43 = vld [vmem:[%s19176_s5 + $0x4d0] sm:$0xff]  }
 0x7d0   : > { %13865 = vmatpush3.bf16.msra.mxu1 %v14678_v52  ;;  %13965 = vmatpush3.bf16.msra.mxu0 %v14679_v51  ;;  %v14714_v52 = vld [vmem:[%s19176_s5 + $0x388] sm:$0xff]  }
 0x7d1   : > { %13866 = vmatprep.subr.bf16.mxu1 %v19198_v61  ;;  %13966 = vmatprep.subr.bf16.mxu0 %v19198_v61  ;;  %v14715_v51 = vld [vmem:[%s19176_s5 + $0x4c8] sm:$0xff]  }
 0x7d4   : > { %13867 = vmatpush3.bf16.msra.mxu1 %v14680_v35  ;;  %13967 = vmatpush3.bf16.msra.mxu0 %v14681_v17  ;;  %v14716_v35 = vld [vmem:[%s19176_s5 + $0x380] sm:$0xff]  }
 0x7d5   : > { %13868 = vmatprep.subr.bf16.mxu1 %v19198_v61  ;;  %13968 = vmatprep.subr.bf16.mxu0 %v19198_v61  ;;  %v14717_v17 = vld [vmem:[%s19176_s5 + $0x4c0] sm:$0xff]  }
 0x7d8   : > { %13869 = vmatpush3.bf16.msra.mxu1 %v14682_v13  ;;  %13969 = vmatpush3.bf16.msra.mxu0 %v14683_v44  ;;  %v8917_v13 = vld [vmem:[#allocation5 + $0x40] sm:$0x1]  ;;  %v9457_v44 = vld [vmem:[#allocation5 + $0x5c] sm:$0x1] }
 0x7d9   : > { %13870 = vmatprep.subr.bf16.mxu1 %v19198_v61  ;;  %13970 = vmatprep.subr.bf16.mxu0 %v19198_v61  ;;  %v8918_v45 = vpack.c.bf16 %v8917_v13, %v8917_v13  ;;  %v9458_v7 = vpack.c.bf16 %v9457_v44, %v9457_v44 }
 0x7dc   : > { %13871 = vmatpush3.bf16.msra.mxu1 %v14684_v3  ;;  %13971 = vmatpush3.bf16.msra.mxu0 %v14685_v31  ;;  %v14718_v3 = vld [vmem:[%s19176_s5 + $0x438] sm:$0xff]  }
 0x7dd   : > { %13896 = vmatprep.subr.bf16.mxu1 %v19198_v61  ;;  %13996 = vmatprep.subr.bf16.mxu0 %v19198_v61  ;;  %v14719_v31 = vld [vmem:[%s19176_s5 + $0x578] sm:$0xff]  }
 0x7df   : > { %13873 = vmatmul.mubr.bf16.vlgmr.msra.gmra.mxu1 %v8486_v58  ;;  %13973 = vmatmul.mubr.bf16.vlgmr.msra.gmra.mxu0 %v9026_v53  ;;  %v18688_v18 = vpop.f32.mrf.mxu1  ;;  %v18690_v63 = vpop.f32.mrf.mxu0  ;;  %v14720_v53 = vld [vmem:[%s19176_s5 + $0x430] sm:$0xff]  }
 0x7e0   : > { %13897 = vmatpush3.bf16.msra.mxu1 %v14686_v40  ;;  %13997 = vmatpush3.bf16.msra.mxu0 %v14687_v59  ;;  %v7512_v57 = vadd.f32 %v18688_v18, %v7405_v37  ;;  %v14721_v18 = vld [vmem:[%s19176_s5 + $0x570] sm:$0xff]  }
 0x7e1   : > { %v13674_v6 = vpop.f32.mrf.mxu1  ;;  %v13734_v11 = vpop.f32.mrf.mxu0  ;;  %13898 = vmatprep.subr.bf16.mxu1 %v19198_v61  ;;  %13998 = vmatprep.subr.bf16.mxu0 %v19198_v61 }
 0x7e2   : > { %13912 = vmatprep.mubr.msk.bf16.mxu1 %vm14819_vm0, %v19198_v61  ;;  %14012 = vmatprep.mubr.msk.bf16.mxu0 %vm14819_vm0, %v19198_v61 }
 0x7e3   : > { %v7509_v1 = vpop.f32.mrf.mxu1  ;;  %v7833_v25 = vpop.f32.mrf.mxu0 }
 0x7e4   : > { %13899 = vmatpush3.bf16.msra.mxu1 %v14688_v56  ;;  %13999 = vmatpush3.bf16.msra.mxu0 %v14689_v5  ;;  %v14722_v1 = vld [vmem:[%s19176_s5 + $0x428] sm:$0xff]  }
 0x7e5   : > { %v13675_v16 = vpop.f32.mrf.mxu1  ;;  %v13735_v49 = vpop.f32.mrf.mxu0  ;;  %13900 = vmatprep.subr.bf16.mxu1 %v19198_v61  ;;  %14000 = vmatprep.subr.bf16.mxu0 %v19198_v61  ;;  %v14723_v25 = vld [vmem:[%s19176_s5 + $0x568] sm:$0xff]  }
 0x7e6   : > { %v14724_v16 = vld [vmem:[%s19176_s5 + $0x420] sm:$0xff]  }
 0x7e7   : > { %v14725_v49 = vld [vmem:[%s19176_s5 + $0x560] sm:$0xff]  }
 0x7e8   : > { %13901 = vmatpush3.bf16.msra.mxu1 %v14690_v2  ;;  %14001 = vmatpush3.bf16.msra.mxu0 %v14691_v34 }
 0x7e9   : > { %13902 = vmatprep.subr.bf16.mxu1 %v19198_v61  ;;  %14002 = vmatprep.subr.bf16.mxu0 %v19198_v61 }
 0x7ec   : > { %13903 = vmatpush3.bf16.msra.mxu1 %v14692_v26  ;;  %14003 = vmatpush3.bf16.msra.mxu0 %v14693_v23  ;;  %v14726_v26 = vld [vmem:[%s19176_s5 + $0x418] sm:$0xff]  }
 0x7ed   : > { %13904 = vmatprep.subr.bf16.mxu1 %v19198_v61  ;;  %14004 = vmatprep.subr.bf16.mxu0 %v19198_v61  ;;  %v14727_v23 = vld [vmem:[%s19176_s5 + $0x558] sm:$0xff]  }
 0x7f0   : > { %13905 = vmatpush3.bf16.msra.mxu1 %v14694_v28  ;;  %14005 = vmatpush3.bf16.msra.mxu0 %v14695_v4  ;;  %v14728_v28 = vld [vmem:[%s19176_s5 + $0x410] sm:$0xff]  }
 0x7f1   : > { %13906 = vmatprep.subr.bf16.mxu1 %v19198_v61  ;;  %14006 = vmatprep.subr.bf16.mxu0 %v19198_v61  ;;  %v14729_v4 = vld [vmem:[%s19176_s5 + $0x550] sm:$0xff]  }
 0x7f4   : > { %13907 = vmatpush3.bf16.msra.mxu1 %v14696_v29  ;;  %14007 = vmatpush3.bf16.msra.mxu0 %v14697_v38  ;;  %v14730_v29 = vld [vmem:[%s19176_s5 + $0x408] sm:$0xff]  }
 0x7f5   : > { %13908 = vmatprep.subr.bf16.mxu1 %v19198_v61  ;;  %14008 = vmatprep.subr.bf16.mxu0 %v19198_v61  ;;  %v14731_v38 = vld [vmem:[%s19176_s5 + $0x548] sm:$0xff]  }
 0x7f8   : > { %13909 = vmatpush3.bf16.msra.mxu1 %v14698_v20  ;;  %14009 = vmatpush3.bf16.msra.mxu0 %v14699_v9  ;;  %v14732_v20 = vld [vmem:[%s19176_s5 + $0x400] sm:$0xff]  }
 0x7f9   : > { %13910 = vmatprep.subr.bf16.mxu1 %v19198_v61  ;;  %14010 = vmatprep.subr.bf16.mxu0 %v19198_v61  ;;  %v14733_v9 = vld [vmem:[%s19176_s5 + $0x540] sm:$0xff]  }
 0x7fc   : > { %13911 = vmatpush3.bf16.msra.mxu1 %v14700_v22  ;;  %14011 = vmatpush3.bf16.msra.mxu0 %v14701_v48  ;;  %v9133_v22 = vld [vmem:[#allocation5 + $0x56] sm:$0x1]  ;;  %v9673_v48 = vld [vmem:[#allocation5 + $0x72] sm:$0x1] }
 0x7fd   : > { %13936 = vmatprep.subr.bf16.mxu1 %v19198_v61  ;;  %14036 = vmatprep.subr.bf16.mxu0 %v19198_v61  ;;  %v9134_v37 = vpack.c.bf16 %v9133_v22, %v9133_v22 }
 0x7ff   : > { %v7614_v62 = vpop.f32.mrf.mxu1  ;;  %v18764_v14 = vpop.f32.mrf.mxu0  ;;  %13913 = vmatmul.mubr.bf16.vlgmr.msra.gmra.mxu1 %v8702_v47  ;;  %14013 = vmatmul.mubr.bf16.vlgmr.msra.gmra.mxu0 %v9242_v24 }
 0x800   : > { %v18766_v30 = vadd.f32 %v7614_v62, %v7512_v57  ;;  %13937 = vmatpush3.bf16.msra.mxu1 %v14702_v21  ;;  %14037 = vmatpush3.bf16.msra.mxu0 %v14703_v19  ;;  %v9674_v21 = vpack.c.bf16 %v9673_v48, %v9673_v48  ;;  %v14736_v62 = vld [vmem:[%s19176_s5 + $0x4b0] sm:$0xff]  }
 0x801   : > { %v13694_v50 = vpop.f32.mrf.mxu1  ;;  %v13774_v54 = vpop.f32.mrf.mxu0  ;;  %13938 = vmatprep.subr.bf16.mxu1 %v19198_v61  ;;  %14038 = vmatprep.subr.bf16.mxu0 %v19198_v61 }
 0x802   : > { %13952 = vmatprep.mubr.msk.bf16.mxu1 %vm14819_vm0, %v19198_v61  ;;  %14052 = vmatprep.mubr.msk.bf16.mxu0 %vm14819_vm0, %v19198_v61  ;;  %v14738_v54 = vld [vmem:[%s19176_s5 + $0x4a8] sm:$0xff]  }
 0x803   : > { %v7617_v32 = vpop.f32.mrf.mxu1  ;;  %v8049_v46 = vpop.f32.mrf.mxu0 }
 0x804   : > { %13939 = vmatpush3.bf16.msra.mxu1 %v14704_v12  ;;  %14039 = vmatpush3.bf16.msra.mxu0 %v14705_v39  ;;  %v14739_v32 = vld [vmem:[%s19176_s5 + $0x5e8] sm:$0xff]  }
 0x805   : > { %v13695_v60 = vpop.f32.mrf.mxu1  ;;  %v13775_v33 = vpop.f32.mrf.mxu0  ;;  %13940 = vmatprep.subr.bf16.mxu1 %v19198_v61  ;;  %14040 = vmatprep.subr.bf16.mxu0 %v19198_v61 }
 0x806   : > { %v14741_v60 = vld [vmem:[%s19176_s5 + $0x5e0] sm:$0xff]   ;;  %v14742_v33 = vld [vmem:[%s19176_s5 + $0x498] sm:$0xff]  }
 0x808   : > { %13941 = vmatpush3.bf16.msra.mxu1 %v14706_v41  ;;  %14041 = vmatpush3.bf16.msra.mxu0 %v14707_v55  ;;  %v14740_v55 = vld [vmem:[%s19176_s5 + $0x4a0] sm:$0xff]  }
 0x809   : > { %13942 = vmatprep.subr.bf16.mxu1 %v19198_v61  ;;  %14042 = vmatprep.subr.bf16.mxu0 %v19198_v61 }
 0x80c   : > { %13943 = vmatpush3.bf16.msra.mxu1 %v14708_v10  ;;  %14043 = vmatpush3.bf16.msra.mxu0 %v14709_v42  ;;  %v14743_v10 = vld [vmem:[%s19176_s5 + $0x5d8] sm:$0xff]   ;;  %v14744_v42 = vld [vmem:[%s19176_s5 + $0x490] sm:$0xff]  }
 0x80d   : > { %13944 = vmatprep.subr.bf16.mxu1 %v19198_v61  ;;  %14044 = vmatprep.subr.bf16.mxu0 %v19198_v61 }
 0x810   : > { %13945 = vmatpush3.bf16.msra.mxu1 %v14710_v0  ;;  %14045 = vmatpush3.bf16.msra.mxu0 %v14711_v8  ;;  %v14745_v0 = vld [vmem:[%s19176_s5 + $0x5d0] sm:$0xff]   ;;  %v14746_v8 = vld [vmem:[%s19176_s5 + $0x488] sm:$0xff]  }
 0x811   : > { %13946 = vmatprep.subr.bf16.mxu1 %v19198_v61  ;;  %14046 = vmatprep.subr.bf16.mxu0 %v19198_v61 }
 0x814   : > { %13947 = vmatpush3.bf16.msra.mxu1 %v14712_v36  ;;  %14047 = vmatpush3.bf16.msra.mxu0 %v14713_v43  ;;  %v14747_v36 = vld [vmem:[%s19176_s5 + $0x5c8] sm:$0xff]   ;;  %v14748_v43 = vld [vmem:[%s19176_s5 + $0x480] sm:$0xff]  }
 0x815   : > { %13948 = vmatprep.subr.bf16.mxu1 %v19198_v61  ;;  %14048 = vmatprep.subr.bf16.mxu0 %v19198_v61 }
 0x818   : > { %13949 = vmatpush3.bf16.msra.mxu1 %v14714_v52  ;;  %14049 = vmatpush3.bf16.msra.mxu0 %v14715_v51  ;;  %v14749_v52 = vld [vmem:[%s19176_s5 + $0x5c0] sm:$0xff]   ;;  %v9349_v51 = vld [vmem:[#allocation5 + $0x5a] sm:$0x1] }
 0x819   : > { %13950 = vmatprep.subr.bf16.mxu1 %v19198_v61  ;;  %14050 = vmatprep.subr.bf16.mxu0 %v19198_v61  ;;  %v9350_v13 = vpack.c.bf16 %v9349_v51, %v9349_v51 }
 0x81c   : > { %13951 = vmatpush3.bf16.msra.mxu1 %v14716_v35  ;;  %14051 = vmatpush3.bf16.msra.mxu0 %v14717_v17  ;;  %v9889_v35 = vld [vmem:[#allocation5 + $0x76] sm:$0x1]  ;;  %v14750_v17 = vld [vmem:[%s19176_s5 + $0x538] sm:$0xff]  }
 0x81d   : > { %13976 = vmatprep.subr.bf16.mxu1 %v19198_v61  ;;  %14076 = vmatprep.subr.bf16.mxu0 %v19198_v61  ;;  %v9890_v44 = vpack.c.bf16 %v9889_v35, %v9889_v35 }
 0x81f   : > { %v7722_v40 = vpop.f32.mrf.mxu1  ;;  %v18836_v59 = vpop.f32.mrf.mxu0  ;;  %13953 = vmatmul.mubr.bf16.vlgmr.msra.gmra.mxu1 %v8918_v45  ;;  %14053 = vmatmul.mubr.bf16.vlgmr.msra.gmra.mxu0 %v9458_v7 }
 0x820   : > { %v7728_v58 = vadd.f32 %v7722_v40, %v18766_v30  ;;  %13977 = vmatpush3.bf16.msra.mxu1 %v14718_v3  ;;  %14077 = vmatpush3.bf16.msra.mxu0 %v14719_v31  ;;  %v14737_v30 = vld [vmem:[%s19176_s5 + $0x5f0] sm:$0xff]  }
 0x821   : > { %v13714_v56 = vpop.f32.mrf.mxu1  ;;  %v13814_v5 = vpop.f32.mrf.mxu0  ;;  %13978 = vmatprep.subr.bf16.mxu1 %v19198_v61  ;;  %14078 = vmatprep.subr.bf16.mxu0 %v19198_v61  ;;  %v14751_v40 = vld [vmem:[%s19176_s5 + $0x530] sm:$0xff]  }
 0x822   : > { %13992 = vmatprep.mubr.msk.bf16.mxu1 %vm14819_vm0, %v19198_v61  ;;  %14092 = vmatprep.mubr.msk.bf16.mxu0 %vm14819_vm0, %v19198_v61  ;;  %v7836_v19 = vadd.f32 %v18690_v63, %v7728_v58  ;;  %v14752_v56 = vld [vmem:[%s19176_s5 + $0x528] sm:$0xff]  }
 0x823   : > { %v7725_v6 = vpop.f32.mrf.mxu1  ;;  %v8265_v11 = vpop.f32.mrf.mxu0 }
 0x824   : > { %13979 = vmatpush3.bf16.msra.mxu1 %v14720_v53  ;;  %14079 = vmatpush3.bf16.msra.mxu0 %v14721_v18  ;;  %v14753_v11 = vld [vmem:[%s19176_s5 + $0x520] sm:$0xff]  }
 0x825   : > { %v13715_v2 = vpop.f32.mrf.mxu1  ;;  %v13815_v34 = vpop.f32.mrf.mxu0  ;;  %13980 = vmatprep.subr.bf16.mxu1 %v19198_v61  ;;  %14080 = vmatprep.subr.bf16.mxu0 %v19198_v61 }
 0x826   : > { %v14756_v2 = vld [vmem:[%s19176_s5 + $0x508] sm:$0xff]   ;;  %v14757_v34 = vld [vmem:[%s19176_s5 + $0x500] sm:$0xff]  }
 0x828   : > { %13981 = vmatpush3.bf16.msra.mxu1 %v14722_v1  ;;  %14081 = vmatpush3.bf16.msra.mxu0 %v14723_v25  ;;  %v14754_v1 = vld [vmem:[%s19176_s5 + $0x518] sm:$0xff]   ;;  %v14755_v25 = vld [vmem:[%s19176_s5 + $0x510] sm:$0xff]  }
 0x829   : > { %13982 = vmatprep.subr.bf16.mxu1 %v19198_v61  ;;  %14082 = vmatprep.subr.bf16.mxu0 %v19198_v61 }
 0x82c   : > { %13983 = vmatpush3.bf16.msra.mxu1 %v14724_v16  ;;  %14083 = vmatpush3.bf16.msra.mxu0 %v14725_v49  ;;  %v9565_v16 = vld [vmem:[#allocation5 + $0x70] sm:$0x1]  ;;  %v14758_v49 = vld [vmem:[%s19176_s5 + $0x5b8] sm:$0xff]  }
 0x82d   : > { %13984 = vmatprep.subr.bf16.mxu1 %v19198_v61  ;;  %14084 = vmatprep.subr.bf16.mxu0 %v19198_v61 }
 0x830   : > { %13985 = vmatpush3.bf16.msra.mxu1 %v14726_v26  ;;  %14085 = vmatpush3.bf16.msra.mxu0 %v14727_v23  ;;  %v9566_v26 = vpack.c.bf16 %v9565_v16, %v9565_v16  ;;  %v14775_v16 = vld [vmem:[%s19178_s7 + $0x30] sm:$0xff]  }
 0x831   : > { %13986 = vmatprep.subr.bf16.mxu1 %v19198_v61  ;;  %14086 = vmatprep.subr.bf16.mxu0 %v19198_v61 }
 0x834   : > { %13987 = vmatpush3.bf16.msra.mxu1 %v14728_v28  ;;  %14087 = vmatpush3.bf16.msra.mxu0 %v14729_v4 }
 0x835   : > { %13988 = vmatprep.subr.bf16.mxu1 %v19198_v61  ;;  %14088 = vmatprep.subr.bf16.mxu0 %v19198_v61 }
 0x838   : > { %13989 = vmatpush3.bf16.msra.mxu1 %v14730_v29  ;;  %14089 = vmatpush3.bf16.msra.mxu0 %v14731_v38  ;;  %v14759_v38 = vld [vmem:[%s19176_s5 + $0x5b0] sm:$0xff]  }
 0x839   : > { %13990 = vmatprep.subr.bf16.mxu1 %v19198_v61  ;;  %14090 = vmatprep.subr.bf16.mxu0 %v19198_v61 }
 0x83c   : > { %13991 = vmatpush3.bf16.msra.mxu1 %v14732_v20  ;;  %14091 = vmatpush3.bf16.msra.mxu0 %v14733_v9 }
 0x83d   : > { %14016 = vmatprep.subr.bf16.mxu1 %v19198_v61  ;;  %14116 = vmatprep.subr.bf16.mxu0 %v19198_v61 }
 0x83f   : > { %v7938_v47 = vpop.f32.mrf.mxu1  ;;  %v18908_v24 = vpop.f32.mrf.mxu0  ;;  %13993 = vmatmul.mubr.bf16.vlgmr.msra.gmra.mxu1 %v9134_v37  ;;  %14093 = vmatmul.mubr.bf16.vlgmr.msra.gmra.mxu0 %v9674_v21  ;;  %v14761_v37 = vld [vmem:[%s19176_s5 + $0x5a0] sm:$0xff]   ;;  %v14762_v21 = vld [vmem:[%s19176_s5 + $0x598] sm:$0xff]  }
 0x840   : > { %v7944_v57 = vadd.f32 %v7938_v47, %v7836_v19  ;;  %14017 = vmatpush3.bf16.msra.mxu1 %v14734_v15  ;;  %14117 = vmatpush3.bf16.msra.mxu0 %v14735_v27  ;;  %v14763_v19 = vld [vmem:[%s19176_s5 + $0x590] sm:$0xff]   ;;  %v14764_v47 = vld [vmem:[%s19176_s5 + $0x588] sm:$0xff]  }
 0x841   : > { %v13754_v12 = vpop.f32.mrf.mxu1  ;;  %v13854_v39 = vpop.f32.mrf.mxu0  ;;  %14018 = vmatprep.subr.bf16.mxu1 %v19198_v61  ;;  %14118 = vmatprep.subr.bf16.mxu0 %v19198_v61 }
 0x842   : > { %14032 = vmatprep.mubr.msk.bf16.mxu1 %vm14819_vm0, %v19198_v61  ;;  %14132 = vmatprep.mubr.msk.bf16.mxu0 %vm14819_vm0, %v19198_v61  ;;  %v8052_v3 = vadd.f32 %v18764_v14, %v7944_v57  ;;  %v14765_v57 = vld [vmem:[%s19176_s5 + $0x580] sm:$0xff]  }
 0x843   : > { %v7941_v63 = vpop.f32.mrf.mxu1  ;;  %v8481_v50 = vpop.f32.mrf.mxu0 }
 0x844   : > { %14019 = vmatpush3.bf16.msra.mxu1 %v14736_v62  ;;  %14119 = vmatpush3.bf16.msra.mxu0 %v14737_v30  ;;  %v9781_v62 = vld [vmem:[#allocation5 + $0x74] sm:$0x1]  ;;  %v14766_v30 = vld [vmem:[%s19176_s5 + $0x638] sm:$0xff]  }
 0x845   : > { %v13755_v46 = vpop.f32.mrf.mxu1  ;;  %v13855_v41 = vpop.f32.mrf.mxu0  ;;  %14020 = vmatprep.subr.bf16.mxu1 %v19198_v61  ;;  %14120 = vmatprep.subr.bf16.mxu0 %v19198_v61  ;;  %v9782_v12 = vpack.c.bf16 %v9781_v62, %v9781_v62  ;;  %v14785_v62 = vld [vmem:[%s19180_s9 + $0x20] sm:$0xff]  }
 0x848   : > { %14021 = vmatpush3.bf16.msra.mxu1 %v14738_v54  ;;  %14121 = vmatpush3.bf16.msra.mxu0 %v14739_v32  ;;  %v14767_v32 = vld [vmem:[%s19176_s5 + $0x630] sm:$0xff]  }
 0x849   : > { %14022 = vmatprep.subr.bf16.mxu1 %v19198_v61  ;;  %14122 = vmatprep.subr.bf16.mxu0 %v19198_v61 }
 0x84c   : > { %14023 = vmatpush3.bf16.msra.mxu1 %v14740_v55  ;;  %14123 = vmatpush3.bf16.msra.mxu0 %v14741_v60 }
 0x84d   : > { %14024 = vmatprep.subr.bf16.mxu1 %v19198_v61  ;;  %14124 = vmatprep.subr.bf16.mxu0 %v19198_v61 }
 0x850   : > { %14025 = vmatpush3.bf16.msra.mxu1 %v14742_v33  ;;  %14125 = vmatpush3.bf16.msra.mxu0 %v14743_v10 }
 0x851   : > { %14026 = vmatprep.subr.bf16.mxu1 %v19198_v61  ;;  %14126 = vmatprep.subr.bf16.mxu0 %v19198_v61 }
 0x854   : > { %14027 = vmatpush3.bf16.msra.mxu1 %v14744_v42  ;;  %14127 = vmatpush3.bf16.msra.mxu0 %v14745_v0  ;;  %v14769_v42 = vld [vmem:[%s19176_s5 + $0x620] sm:$0xff]   ;;  %v14770_v0 = vld [vmem:[%s19176_s5 + $0x618] sm:$0xff]  }
 0x855   : > { %14028 = vmatprep.subr.bf16.mxu1 %v19198_v61  ;;  %14128 = vmatprep.subr.bf16.mxu0 %v19198_v61 }
 0x858   : > { %14029 = vmatpush3.bf16.msra.mxu1 %v14746_v8  ;;  %14129 = vmatpush3.bf16.msra.mxu0 %v14747_v36  ;;  %v14771_v8 = vld [vmem:[%s19176_s5 + $0x610] sm:$0xff]   ;;  %v14772_v36 = vld [vmem:[%s19176_s5 + $0x608] sm:$0xff]  }
 0x859   : > { %14030 = vmatprep.subr.bf16.mxu1 %v19198_v61  ;;  %14130 = vmatprep.subr.bf16.mxu0 %v19198_v61 }
 0x85c   : > { %14031 = vmatpush3.bf16.msra.mxu1 %v14748_v43  ;;  %14131 = vmatpush3.bf16.msra.mxu0 %v14749_v52  ;;  %v14773_v43 = vld [vmem:[%s19176_s5 + $0x600] sm:$0xff]   ;;  %v9997_v52 = vld [vmem:[#allocation5 + $0x78] sm:$0x1] }
 0x85d   : > { %14056 = vmatprep.subr.bf16.mxu1 %v19198_v61  ;;  %14156 = vmatprep.subr.bf16.mxu0 %v19198_v61  ;;  %v9998_v51 = vpack.c.bf16 %v9997_v52, %v9997_v52 }
 0x85f   : > { %v8154_v31 = vpop.f32.mrf.mxu1  ;;  %v18976_v45 = vpop.f32.mrf.mxu0  ;;  %14033 = vmatmul.mubr.bf16.vlgmr.msra.gmra.mxu1 %v9350_v13  ;;  %14133 = vmatmul.mubr.bf16.vlgmr.msra.gmra.mxu0 %v9890_v44 }
 0x860   : > { %v8160_v7 = vadd.f32 %v8154_v31, %v8052_v3  ;;  %14057 = vmatpush3.bf16.msra.mxu1 %v14750_v17  ;;  %14072 = vmatprep.mubr.msk.bf16.mxu1 %vm14819_vm0, %v19198_v61 }
 0x861   : > { %v13794_v58 = vpop.f32.mrf.mxu1  ;;  %v13894_v53 = vpop.f32.mrf.mxu0  ;;  %14058 = vmatprep.subr.bf16.mxu1 %v19198_v61  ;;  %14172 = vmatprep.mubr.msk.bf16.mxu0 %vm14819_vm0, %v19198_v61 }
 0x862   : > { %v8268_v23 = vadd.f32 %v18836_v59, %v8160_v7  ;;  %v14760_v59 = vld [vmem:[%s19176_s5 + $0x5a8] sm:$0xff]  }
 0x863   : > { %v8157_v14 = vpop.f32.mrf.mxu1  ;;  %v8697_v18 = vpop.f32.mrf.mxu0 }
 0x864   : > { %14059 = vmatpush3.bf16.msra.mxu1 %v14751_v40 }
 0x865   : > { %v13795_v5 = vpop.f32.mrf.mxu1  ;;  %v13895_v6 = vpop.f32.mrf.mxu0  ;;  %14060 = vmatprep.subr.bf16.mxu1 %v19198_v61 }
 0x868   : > { %14061 = vmatpush3.bf16.msra.mxu1 %v14752_v56 }
 0x869   : > { %14062 = vmatprep.subr.bf16.mxu1 %v19198_v61 }
 0x86c   : > { %14063 = vmatpush3.bf16.msra.mxu1 %v14753_v11 }
 0x86d   : > { %14064 = vmatprep.subr.bf16.mxu1 %v19198_v61 }
 0x870   : > { %14065 = vmatpush3.bf16.msra.mxu1 %v14754_v1 }
 0x871   : > { %14066 = vmatprep.subr.bf16.mxu1 %v19198_v61 }
 0x874   : > { %14067 = vmatpush3.bf16.msra.mxu1 %v14755_v25 }
 0x875   : > { %14068 = vmatprep.subr.bf16.mxu1 %v19198_v61 }
 0x878   : > { %14069 = vmatpush3.bf16.msra.mxu1 %v14756_v2 }
 0x879   : > { %14070 = vmatprep.subr.bf16.mxu1 %v19198_v61 }
 0x87c   : > { %14071 = vmatpush3.bf16.msra.mxu1 %v14757_v34  ;;  %v14774_v34 = vld [vmem:[%s19178_s7 + $0x38] sm:$0xff]  }
 0x87d   : > { %14096 = vmatprep.subr.bf16.mxu1 %v19198_v61  ;;  %14157 = vmatpush3.bf16.msra.mxu0 %v14774_v34 }
 0x87e   : > { %14158 = vmatprep.subr.bf16.mxu0 %v19198_v61 }
 0x87f   : > { %v8370_v28 = vpop.f32.mrf.mxu1  ;;  %v19015_v4 = vpop.f32.mrf.mxu0  ;;  %14073 = vmatmul.mubr.bf16.vlgmr.msra.gmra.mxu1 %v9566_v26  ;;  %v14777_v26 = vld [vmem:[%s19178_s7 + $0x20] sm:$0xff]  }
 0x880   : > { %v8376_v29 = vadd.f32 %v8370_v28, %v8268_v23  ;;  %14097 = vmatpush3.bf16.msra.mxu1 %v14758_v49  ;;  %14112 = vmatprep.mubr.msk.bf16.mxu1 %vm14819_vm0, %v19198_v61  ;;  %v14776_v49 = vld [vmem:[%s19178_s7 + $0x28] sm:$0xff]   ;;  %v14778_v23 = vld [vmem:[%s19178_s7 + $0x18] sm:$0xff]   ;;  %v14779_v28 = vld [vmem:[%s19178_s7 + $0x10] sm:$0xff]  }
 0x881   : > { %v13834_v20 = vpop.f32.mrf.mxu1  ;;  %v13934_v9 = vpop.f32.mrf.mxu0  ;;  %14098 = vmatprep.subr.bf16.mxu1 %v19198_v61  ;;  %14159 = vmatpush3.bf16.msra.mxu0 %v14775_v16  ;;  %v10319_v16 = vlaneseq }
 0x882   : > { %v8484_v39 = vadd.f32 %v18908_v24, %v8376_v29  ;;  %v14768_v24 = vld [vmem:[%s19176_s5 + $0x628] sm:$0xff]   ;;  %14160 = vmatprep.subr.bf16.mxu0 %v19198_v61 }
 0x883   : > { %v8373_v22 = vpop.f32.mrf.mxu1  ;;  %v8913_v48 = vpop.f32.mrf.mxu0 }
 0x884   : > { %14099 = vmatpush3.bf16.msra.mxu1 %v14759_v38 }
 0x885   : > { %v13835_v15 = vpop.f32.mrf.mxu1  ;;  %v13935_v27 = vpop.f32.mrf.mxu0  ;;  %14100 = vmatprep.subr.bf16.mxu1 %v19198_v61  ;;  %14161 = vmatpush3.bf16.msra.mxu0 %v14776_v49  ;;  %v10320_v49 = vshrl.u32 %v10319_v16, 7 }
 0x886   : > { %14162 = vmatprep.subr.bf16.mxu0 %v19198_v61  ;;  %v14780_v15 = vld [vmem:[%s19178_s7 + $0x8] sm:$0xff]  }
 0x888   : > { %14101 = vmatpush3.bf16.msra.mxu1 %v14760_v59 }
 0x889   : > { %14102 = vmatprep.subr.bf16.mxu1 %v19198_v61  ;;  %14163 = vmatpush3.bf16.msra.mxu0 %v14777_v26  ;;  %v10230_v26 = vld [vmem:[%s19181_s10] sm:$0x1] }
 0x88a   : > { %14164 = vmatprep.subr.bf16.mxu0 %v19198_v61 }
 0x88c   : > { %14103 = vmatpush3.bf16.msra.mxu1 %v14761_v37 }
 0x88d   : > { %14104 = vmatprep.subr.bf16.mxu1 %v19198_v61  ;;  %14165 = vmatpush3.bf16.msra.mxu0 %v14778_v23 }
 0x88e   : > { %14166 = vmatprep.subr.bf16.mxu0 %v19198_v61 }
 0x890   : > { %14105 = vmatpush3.bf16.msra.mxu1 %v14762_v21  ;;  %v14781_v21 = vld [vmem:[%s19178_s7] sm:$0xff]  }
 0x891   : > { %14106 = vmatprep.subr.bf16.mxu1 %v19198_v61  ;;  %14167 = vmatpush3.bf16.msra.mxu0 %v14779_v28 }
 0x892   : > { %14168 = vmatprep.subr.bf16.mxu0 %v19198_v61 }
 0x894   : > { %14107 = vmatpush3.bf16.msra.mxu1 %v14763_v19  ;;  %v14782_v19 = vld [vmem:[%s19180_s9 + $0x38] sm:$0xff]  }
 0x895   : > { %14108 = vmatprep.subr.bf16.mxu1 %v19198_v61  ;;  %14169 = vmatpush3.bf16.msra.mxu0 %v14780_v15 }
 0x896   : > { %14170 = vmatprep.subr.bf16.mxu0 %v19198_v61 }
 0x898   : > { %14109 = vmatpush3.bf16.msra.mxu1 %v14764_v47  ;;  %v14783_v47 = vld [vmem:[%s19180_s9 + $0x30] sm:$0xff]  }
 0x899   : > { %14110 = vmatprep.subr.bf16.mxu1 %v19198_v61  ;;  %14171 = vmatpush3.bf16.msra.mxu0 %v14781_v21 }
 0x89c   : > { %14111 = vmatpush3.bf16.msra.mxu1 %v14765_v57  ;;  %v14784_v57 = vld [vmem:[%s19180_s9 + $0x28] sm:$0xff]  }
 0x89d   : > { %14136 = vmatprep.subr.bf16.mxu1 %v19198_v61 }
 0x89f   : > { %v8586_v63 = vpop.f32.mrf.mxu1  ;;  %v19052_v50 = vpop.f32.mrf.mxu0  ;;  %14113 = vmatmul.mubr.bf16.vlgmr.msra.gmra.mxu1 %v9782_v12  ;;  %v14787_v12 = vld [vmem:[%s19180_s9 + $0x10] sm:$0xff]  }
 0x8a0   : > { %v8592_v54 = vadd.f32 %v8586_v63, %v8484_v39  ;;  %14137 = vmatpush3.bf16.msra.mxu1 %v14766_v30  ;;  %14152 = vmatprep.mubr.msk.bf16.mxu1 %vm14819_vm0, %v19198_v61  ;;  %v14786_v30 = vld [vmem:[%s19180_s9 + $0x18] sm:$0xff]  }
 0x8a1   : > { %v13874_v46 = vpop.f32.mrf.mxu1  ;;  %v13974_v41 = vpop.f32.mrf.mxu0  ;;  %14138 = vmatprep.subr.bf16.mxu1 %v19198_v61 }
 0x8a2   : > { %v8700_v35 = vadd.f32 %v18976_v45, %v8592_v54 }
 0x8a3   : > { %v8589_v55 = vpop.f32.mrf.mxu1  ;;  %v9129_v60 = vpop.f32.mrf.mxu0 }
 0x8a4   : > { %14139 = vmatpush3.bf16.msra.mxu1 %v14767_v32 }
 0x8a5   : > { %v13875_v33 = vpop.f32.mrf.mxu1  ;;  %v13975_v10 = vpop.f32.mrf.mxu0  ;;  %14140 = vmatprep.subr.bf16.mxu1 %v19198_v61 }
 0x8a8   : > { %14141 = vmatpush3.bf16.msra.mxu1 %v14768_v24 }
 0x8a9   : > { %14142 = vmatprep.subr.bf16.mxu1 %v19198_v61 }
 0x8ac   : > { %14143 = vmatpush3.bf16.msra.mxu1 %v14769_v42 }
 0x8ad   : > { %14144 = vmatprep.subr.bf16.mxu1 %v19198_v61 }
 0x8b0   : > { %14145 = vmatpush3.bf16.msra.mxu1 %v14770_v0 }
 0x8b1   : > { %14146 = vmatprep.subr.bf16.mxu1 %v19198_v61 }
 0x8b4   : > { %14147 = vmatpush3.bf16.msra.mxu1 %v14771_v8 }
 0x8b5   : > { %14148 = vmatprep.subr.bf16.mxu1 %v19198_v61 }
 0x8b8   : > { %14149 = vmatpush3.bf16.msra.mxu1 %v14772_v36 }
 0x8b9   : > { %14150 = vmatprep.subr.bf16.mxu1 %v19198_v61 }
 0x8bc   : > { %14151 = vmatpush3.bf16.msra.mxu1 %v14773_v43 }
 0x8bd   : > { %14176 = vmatprep.subr.bf16.mxu1 %v19198_v61 }
 0x8bf   : > { %v8802_v17 = vpop.f32.mrf.mxu1  ;;  %v19086_v13 = vpop.f32.mrf.mxu0  ;;  %14153 = vmatmul.mubr.bf16.vlgmr.msra.gmra.mxu1 %v9998_v51 }
 0x8c0   : > { %v8808_v44 = vadd.f32 %v8802_v17, %v8700_v35  ;;  %14192 = vmatprep.mubr.msk.bf16.mxu1 %vm14819_vm0, %v19198_v61  ;;  %14177 = vmatpush3.bf16.msra.mxu1 %v14782_v19 }
 0x8c1   : > { %v13914_v3 = vpop.f32.mrf.mxu1  ;;  %v14014_v31 = vpop.f32.mrf.mxu0  ;;  %14178 = vmatprep.subr.bf16.mxu1 %v19198_v61 }
 0x8c2   : > { %v8916_v14 = vadd.f32 %v19015_v4, %v8808_v44 }
 0x8c3   : > { %v8805_v7 = vpop.f32.mrf.mxu1  ;;  %v9345_v40 = vpop.f32.mrf.mxu0 }
 0x8c4   : > { %14179 = vmatpush3.bf16.msra.mxu1 %v14783_v47 }
 0x8c5   : > { %v13915_v58 = vpop.f32.mrf.mxu1  ;;  %v14015_v53 = vpop.f32.mrf.mxu0  ;;  %14180 = vmatprep.subr.bf16.mxu1 %v19198_v61 }
 0x8c8   : > { %14181 = vmatpush3.bf16.msra.mxu1 %v14784_v57 }
 0x8c9   : > { %14182 = vmatprep.subr.bf16.mxu1 %v19198_v61 }
 0x8cc   : > { %14183 = vmatpush3.bf16.msra.mxu1 %v14785_v62 }
 0x8cd   : > { %14184 = vmatprep.subr.bf16.mxu1 %v19198_v61 }
 0x8d0   : > { %14185 = vmatpush3.bf16.msra.mxu1 %v14786_v30 }
 0x8d1   : > { %14186 = vmatprep.subr.bf16.mxu1 %v19198_v61 }
 0x8d4   : > { %14187 = vmatpush3.bf16.msra.mxu1 %v14787_v12 }
 0x8d5   : > { %14188 = vmatprep.subr.bf16.mxu1 %v19198_v61 }
 0x8df   : > { %v9018_v18 = vpop.f32.mrf.mxu1  ;;  %v19091_v56 = vpop.f32.mrf.mxu0 }
 0x8e0   : > { %v9024_v45 = vadd.f32 %v9018_v18, %v8916_v14  ;;  %v14788_v18 = vld [vmem:[%s19180_s9 + $0x8] sm:$0xff]  }
 0x8e1   : > { %v13954_v5 = vpop.f32.mrf.mxu1  ;;  %v14054_v6 = vpop.f32.mrf.mxu0  ;;  %14189 = vmatpush3.bf16.msra.mxu1 %v14788_v18 }
 0x8e2   : > { %v9132_v4 = vadd.f32 %v19052_v50, %v9024_v45  ;;  %14190 = vmatprep.subr.bf16.mxu1 %v19198_v61  ;;  %v10123_v45 = vld [vmem:[%s19179_s8] sm:$0x1]  ;;  %v10321_v61 = vsub.s32 0, %v10320_v49 }
 0x8e3   : > { %v9021_v11 = vpop.f32.mrf.mxu1  ;;  %v9561_v1 = vpop.f32.mrf.mxu0 }
 0x8e5   : > { %v13955_v25 = vpop.f32.mrf.mxu1  ;;  %v14055_v2 = vpop.f32.mrf.mxu0 }
 0x8ff   : > { %v9234_v29 = vpop.f32.mrf.mxu1  ;;  %v9774_v38 = vpop.f32.mrf.mxu0 }
 0x900   : > { %v9240_v20 = vadd.f32 %v9234_v29, %v9132_v4 }
 0x901   : > { %v13994_v9 = vpop.f32.mrf.mxu1  ;;  %v14094_v22 = vpop.f32.mrf.mxu0 }
 0x902   : > { %v9348_v39 = vadd.f32 %v19086_v13, %v9240_v20 }
 0x903   : > { %v9237_v48 = vpop.f32.mrf.mxu1  ;;  %v9777_v59 = vpop.f32.mrf.mxu0 }
 0x905   : > { %v13995_v27 = vpop.f32.mrf.mxu1  ;;  %v14095_v37 = vpop.f32.mrf.mxu0 }
 0x91f   : > { %v9450_v63 = vpop.f32.mrf.mxu1  ;;  %v9990_v50 = vpop.f32.mrf.mxu0 }
 0x920   : > { %v9456_v54 = vadd.f32 %v9450_v63, %v9348_v39 }
 0x921   : > { %v14034_v32 = vpop.f32.mrf.mxu1  ;;  %v14134_v46 = vpop.f32.mrf.mxu0 }
 0x922   : > { %v9564_v51 = vadd.f32 %v19091_v56, %v9456_v54  ;;  %v14789_v56 = vld [vmem:[%s19180_s9] sm:$0xff]  }
 0x923   : > { %v9453_v41 = vpop.f32.mrf.mxu1  ;;  %v9993_v55 = vpop.f32.mrf.mxu0  ;;  %14191 = vmatpush3.bf16.msra.mxu1 %v14789_v56 }
 0x925   : > { %v14035_v60 = vpop.f32.mrf.mxu1  ;;  %v14135_v24 = vpop.f32.mrf.mxu0 }
 0x93f   : > { %v9666_v33 = vpop.f32.mrf.mxu1 }
 0x940   : > { %v9672_v35 = vadd.f32 %v9666_v33, %v9564_v51 }
 0x941   : > { %v14074_v10 = vpop.f32.mrf.mxu1 }
 0x942   : > { %v9780_v17 = vadd.f32 %v9774_v38, %v9672_v35 }
 0x943   : > { %v9669_v42 = vpop.f32.mrf.mxu1 }
 0x945   : > { %v14075_v0 = vpop.f32.mrf.mxu1 }
 0x95f   : > { %v9882_v8 = vpop.f32.mrf.mxu1 }
 0x960   : > { %v9888_v13 = vadd.f32 %v9882_v8, %v9780_v17 }
 0x961   : > { %v14114_v36 = vpop.f32.mrf.mxu1 }
 0x962   : > { %v9996_v44 = vadd.f32 %v9990_v50, %v9888_v13 }
 0x963   : > { %v9885_v43 = vpop.f32.mrf.mxu1 }
 0x965   : > { %v14115_v52 = vpop.f32.mrf.mxu1 }
 0x97f   : > { %v10098_v3 = vpop.f32.mrf.mxu1 }
 0x980   : > { %v10104_v31 = vadd.f32 %v10098_v3, %v9996_v44 }
 0x981   : > { %v14154_v7 = vpop.f32.mrf.mxu1 }
 0x982   : > { %v10105_v40 = vmax.f32 %v10104_v31, 0.0 }
 0x983   : > { %v10101_v58 = vpop.f32.mrf.mxu1 }
 0x984   : > { %v10106_v53 = vpack.c.bf16 %v10105_v40, %v10105_v40 }
 0x985   : > { %v14155_v14 = vpop.f32.mrf.mxu1 }
 0x986   : > { %14173 = vmatmul.mubr.bf16.vlgmr.msra.gmra.mxu0 %v10106_v53 }
 0xa46   : > { %v10206_v5 = vpop.f32.mrf.mxu0 }
 0xa47   : > { %v10207_v6 = vadd.f32 %v10206_v5, %v10123_v45 }
 0xa48   : > { %v14174_v11 = vpop.f32.mrf.mxu0 }
 0xa49   : > { %v10212_v1 = vmax.f32 %v10207_v6, 0.0 }
 0xa4a   : > { %v10209_v25 = vpop.f32.mrf.mxu0 }
 0xa4b   : > { %v10213_v2 = vpack.c.bf16 %v10212_v1, %v10212_v1 }
 0xa4c   : > { %v14175_v34 = vpop.f32.mrf.mxu0 }
 0xa4d   : > { %14193 = vmatmul.mubr.bf16.vlgmr.msra.gmra.mxu1 %v10213_v2 }
 0xb0d   : > { %v10313_v23 = vpop.f32.mrf.mxu1 }
 0xb0e   : > { %v10314_v28 = vadd.f32 %v10313_v23, %v10230_v26 }
 0xb0f   : > { %v14194_v4 = vpop.f32.mrf.mxu1 }
 0xb10   : > { %v10322_v29 = vrot.slane %v10314_v28, %v10321_v61 }
 0xb11   : > { %v10316_v38 = vpop.f32.mrf.mxu1 }
 0xb12   : > { %10323 = vst [vmem:[%s384_s21] sm:$0xff] %v10322_v29 }
 0xb13   : > { %v14195_v20 = vpop.f32.mrf.mxu1 }
 0xb14 PF: > { %s21_s17 = sadd.s32 1, %s14815_s17  }
 0xb15   : > { %p18_p4 = scmp.ge.s32.totalorder %s21_s17, 4  }
 0xb17   :  { %20 = sbr.rel (!%p18_p4) target bundleno = 1 (0x1), region = 142 }

</bundles_post_ra>
